<compile_context>
chip_gen: v6e
topology: v6e:2x2x1
jax: 0.10.0
libtpu: 0.0.40
codegen_flags: <defaults>
</compile_context>

<pallas_src>
import jax
import jax.numpy as jnp
from jax.experimental import pallas as pl
from jax.experimental.pallas import tpu as pltpu

CPAD = 128                         # lane-dense padded Cout for the conv GEMMs
CONV_DTYPE = jnp.bfloat16          # conv patches / weights / activations
FC1_WEIGHT_DTYPE = jnp.bfloat16    # set to jnp.float32 for bit-faithful fc1 math


# -----------------------------------------------------------------------------
# Kernel 1: fused conv-as-GEMM + bias + ReLU + 2x2 max-pool.
#   a_ref : (4, tmp, K) bf16 -- 4 = pooling-window position, tmp pooled pixels
#   w_ref : (K, 128)    bf16 -- conv weight, Cout zero-padded to 128 (lane dense)
#   b_ref : (1, 128)    f32
#   o_ref : (tmp, 128)  bf16 -- pooled, lane-dense output tile
# -----------------------------------------------------------------------------
def _conv_bias_relu_pool_kernel(a_ref, w_ref, b_ref, o_ref):
    four, tmp, K = a_ref.shape
    a = a_ref[...].reshape(four * tmp, K)            # tile-aligned (tmp % 16 == 0)
    y = jnp.dot(a, w_ref[...], preferred_element_type=jnp.float32)  # (4*tmp, 128)
    y = y.reshape(four, tmp, CPAD)
    m = jnp.max(y, axis=0)                           # 2x2 max-pool over positions
    # bias commutes with the max and ReLU is monotonic -> apply both once here.
    o_ref[...] = jnp.maximum(m + b_ref[...], 0.0).astype(o_ref.dtype)


def conv_bias_relu_pool(patches, w, b, *, tile_rows):
    """patches (4, Mp, K) bf16, w (K, 128) bf16, b (1, 128) f32 -> (Mp, 128) bf16."""
    _, Mp, K = patches.shape
    tmp = min(tile_rows, Mp)                         # fixed tile, not batch-scaled
    assert Mp % tmp == 0 and tmp % 16 == 0
    return pl.pallas_call(
        _conv_bias_relu_pool_kernel,
        out_shape=jax.ShapeDtypeStruct((Mp, CPAD), CONV_DTYPE),
        grid_spec=pltpu.PrefetchScalarGridSpec(
            num_scalar_prefetch=0,
            grid=(Mp // tmp,),
            in_specs=[
                pl.BlockSpec((4, tmp, K), lambda i: (0, i, 0)),
                pl.BlockSpec((K, CPAD), lambda i: (0, 0)),
                pl.BlockSpec((1, CPAD), lambda i: (0, 0)),
            ],
            out_specs=pl.BlockSpec((tmp, CPAD), lambda i: (i, 0)),
        ),
        compiler_params=pltpu.CompilerParams(
            dimension_semantics=("parallel",),        # multiple blocks -> both v7x TCs
        ),
    )(patches, w, b)


# -----------------------------------------------------------------------------
# Kernel 2: fused fc1 (+ReLU) + fc2, K-blocked so the bf16 fc1 weight streams
# through the pipeline (its HBM read overlaps the dots) instead of one
# monolithic un-overlapped 4 MiB transfer.  fc2 is lane-dense (padded to 128).
#   x_ref  : (M, tk)    bf16      w1_ref : (tk, 128) bf16
#   b1_ref : (1, 128)   f32       w2_ref : (128, 128) f32 (zero-padded)
#   b2_ref : (1, 128)   f32       o_ref  : (M, 128)  f32
#   acc_ref: (M, 128)   f32 scratch (resident across the K grid)
# -----------------------------------------------------------------------------
def _fc_fused_kernel(x_ref, w1_ref, b1_ref, w2_ref, b2_ref, o_ref, acc_ref):
    k = pl.program_id(0)

    @pl.when(k == 0)
    def _():
        acc_ref[...] = jnp.zeros_like(acc_ref)

    acc_ref[...] += jnp.dot(x_ref[...], w1_ref[...],
                            preferred_element_type=jnp.float32)

    @pl.when(k == pl.num_programs(0) - 1)
    def _():
        h = jnp.maximum(acc_ref[...] + b1_ref[...], 0.0)     # fc1 bias + ReLU
        o_ref[...] = (jnp.dot(h, w2_ref[...], preferred_element_type=jnp.float32)
                      + b2_ref[...]).astype(o_ref.dtype)     # fc2 (tiny)


def fc_fused(x, w1, b1, w2, b2, *, tk=2048):
    M, K = x.shape
    H = w1.shape[1]
    O = w2.shape[1]
    assert K % tk == 0
    return pl.pallas_call(
        _fc_fused_kernel,
        out_shape=jax.ShapeDtypeStruct((M, O), jnp.float32),
        grid_spec=pltpu.PrefetchScalarGridSpec(
            num_scalar_prefetch=0,
            grid=(K // tk,),                          # stream 2048-row weight slabs
            in_specs=[
                pl.BlockSpec((M, tk), lambda k: (0, k)),
                pl.BlockSpec((tk, H), lambda k: (k, 0)),
                pl.BlockSpec((1, H), lambda k: (0, 0)),
                pl.BlockSpec((H, O), lambda k: (0, 0)),
                pl.BlockSpec((1, O), lambda k: (0, 0)),
            ],
            out_specs=pl.BlockSpec((M, O), lambda k: (0, 0)),
            scratch_shapes=[pltpu.VMEM((M, H), jnp.float32)],
        ),
        compiler_params=pltpu.CompilerParams(
            dimension_semantics=("arbitrary",),       # K is a reduction axis
        ),
    )(x, w1, b1, w2, b2)


# -----------------------------------------------------------------------------
# XLA glue: 3x3/pad-1 im2col with rows grouped by pooling-window position.
# Returns (4, N*Ho*Wo, 9*C) bf16; leading index = py*2 + px, rows ordered
# (n, yo, xo) so the conv kernel's pooled output is the NHWC flattening of the
# pooled map.
# -----------------------------------------------------------------------------
def _im2col_pool_layout(x_nhwc):
    N, H, W, C = x_nhwc.shape
    Ho, Wo = H // 2, W // 2
    xp = jnp.pad(x_nhwc, ((0, 0), (1, 1), (1, 1), (0, 0)))
    cols = [xp[:, dy:dy + H, dx:dx + W, :] for dy in range(3) for dx in range(3)]
    patches = jnp.concatenate(cols, axis=-1)              # (N,H,W,9C), feature order (dy,dx,ci)
    patches = patches.reshape(N, Ho, 2, Wo, 2, 9 * C)     # (n, yo, py, xo, px, f)
    patches = patches.transpose(2, 4, 0, 1, 3, 5)         # (py, px, n, yo, xo, f)
    return patches.reshape(4, N * Ho * Wo, 9 * C).astype(CONV_DTYPE)


def init_params():
    key = jax.random.PRNGKey(42)
    ks = jax.random.split(key, 8)
    # PyTorch-shaped parameters (Conv2d: (Cout, Cin, kH, kW); Linear: (out, in)).
    w1 = jax.random.normal(ks[0], (32, 3, 3, 3), jnp.float32) * 0.05
    b1 = jax.random.normal(ks[1], (32,), jnp.float32) * 0.05
    w2 = jax.random.normal(ks[2], (64, 32, 3, 3), jnp.float32) * 0.05
    b2 = jax.random.normal(ks[3], (64,), jnp.float32) * 0.05
    wf1 = jax.random.normal(ks[4], (128, 64 * 16 * 16), jnp.float32) * 0.01
    bf1 = jax.random.normal(ks[5], (128,), jnp.float32) * 0.01
    wf2 = jax.random.normal(ks[6], (2, 128), jnp.float32) * 0.05
    bf2 = jax.random.normal(ks[7], (2,), jnp.float32) * 0.05

    def conv_gemm_weight(w):
        # (Cout, Cin, 3, 3) -> (9*Cin, CPAD) bf16; row order (dy, dx, ci) matches
        # the im2col feature order; Cout zero-padded to 128 for lane-dense stores.
        cout, cin = w.shape[0], w.shape[1]
        wg = jnp.transpose(w, (2, 3, 1, 0)).reshape(9 * cin, cout)
        return jnp.pad(wg, ((0, 0), (0, CPAD - cout))).astype(CONV_DTYPE)

    def pad_bias(b):
        return jnp.pad(b, (0, CPAD - b.shape[0])).reshape(1, CPAD)

    # fc1 weight rows are permuted from PyTorch's (c, y, x) feature order to the
    # (y, x, c) order produced by flattening the NHWC pooled feature map.
    wf1_k = (wf1.T.reshape(64, 16, 16, 128)
             .transpose(1, 2, 0, 3)
             .reshape(16 * 16 * 64, 128))

    # fc2 padded to a lane-dense (128, 128) / (1, 128); logits live in cols 0..1.
    wf2_pad = jnp.pad(wf2.T, ((0, 0), (0, CPAD - wf2.shape[0])))
    bf2_pad = jnp.pad(bf2, (0, CPAD - bf2.shape[0])).reshape(1, CPAD)

    return {
        "w1g": conv_gemm_weight(w1), "b1": pad_bias(b1),
        "w2g": conv_gemm_weight(w2), "b2": pad_bias(b2),
        "wf1g": wf1_k.astype(FC1_WEIGHT_DTYPE),     # bf16: halves the 8 MB read
        "bf1": bf1.reshape(1, 128),
        "wf2g": wf2_pad,                            # (128, 128) f32
        "bf2": bf2_pad,                             # (1, 128)   f32
    }


def simple_cnn_forward(x_nchw, params):
    N = x_nchw.shape[0]
    x = jnp.transpose(x_nchw, (0, 2, 3, 1)).astype(CONV_DTYPE)      # NHWC (N,64,64,3)

    # conv1 + ReLU + 2x2 pool  -> (N*32*32, 128); channels 32..127 are exact zeros.
    p1 = _im2col_pool_layout(x)                                     # (4, N*1024, 27)
    h1 = conv_bias_relu_pool(p1, params["w1g"], params["b1"], tile_rows=512)

    # conv2 + ReLU + 2x2 pool  -> (N*16*16, 128); channels 64..127 are exact zeros.
    h1 = h1.reshape(N, 32, 32, CPAD)[..., :32]                      # drop zero padding
    p2 = _im2col_pool_layout(h1)                                    # (4, N*256, 288)
    h2 = conv_bias_relu_pool(p2, params["w2g"], params["b2"], tile_rows=256)

    # Flatten in (y, x, c) order; fc1 weight was permuted at init accordingly,
    # so this matches PyTorch's x.view(-1, 64*16*16) exactly.
    feats = h2.reshape(N, 16, 16, CPAD)[..., :64].reshape(N, 64 * 16 * 16)

    # fused fc1 (+ReLU) + fc2 (lane-dense, padded to 128 outputs)
    out = fc_fused(feats, params["wf1g"], params["bf1"],
                   params["wf2g"], params["bf2"])
    return out[:, :2]


if __name__ == "__main__":
    params = init_params()
    # fc1 expects 64*16*16 features => input spatial must be 64x64 with 3 channels.
    x = jax.random.normal(jax.random.PRNGKey(0), (2, 3, 64, 64), jnp.float32)
    fwd = jax.jit(simple_cnn_forward)
    out = jax.block_until_ready(fwd(x, params))
    assert out.shape == (2, 2) and out.dtype == jnp.float32
    print("KERNEL_OK")
</pallas_src>

<mosaic_0001>
module attributes {stable_mosaic.version = 11 : i64} {
  func.func @_conv_bias_relu_pool_kernel(%arg0: i32, %arg1: memref<4x512x27xbf16, #tpu.memory_space<vmem>>, %arg2: memref<27x128xbf16, #tpu.memory_space<vmem>>, %arg3: memref<1x128xf32, #tpu.memory_space<vmem>>, %arg4: memref<512x128xbf16, #tpu.memory_space<vmem>>) attributes {dimension_semantics = [#tpu.dimension_semantics<parallel>], iteration_bounds = array<i64: 4>, scalar_prefetch = 0 : i64, scratch_operands = 0 : i64, tpu.core_type = #tpu.core_type<tc>, window_params = [{transform_indices = @transform_0, window_bounds = array<i64: 4, 512, 27>}, {pipeline_mode = #tpu.pipeline_mode<synchronous>, transform_indices = @transform_1, window_bounds = array<i64: 27, 128>}, {pipeline_mode = #tpu.pipeline_mode<synchronous>, transform_indices = @transform_2, window_bounds = array<i64: 1, 128>}, {transform_indices = @transform_3, window_bounds = array<i64: 512, 128>}]} {
    %c0 = arith.constant 0 : index
    %c0_0 = arith.constant 0 : index
    %c0_1 = arith.constant 0 : index
    %0 = vector.load %arg1[%c0, %c0_0, %c0_1] : memref<4x512x27xbf16, #tpu.memory_space<vmem>>, vector<4x512x27xbf16>
    %1 = vector.shape_cast %0 : vector<4x512x27xbf16> to vector<2048x27xbf16>
    %c0_2 = arith.constant 0 : index
    %c0_3 = arith.constant 0 : index
    %2 = vector.load %arg2[%c0_2, %c0_3] : memref<27x128xbf16, #tpu.memory_space<vmem>>, vector<27x128xbf16>
    %cst = arith.constant dense<0.000000e+00> : vector<2048x128xf32>
    %3 = tpu.matmul %1, %2, %cst {dimension_numbers = #tpu.dot_dimension_numbers<[1], [0], [0], [1], [0, 0, 1, 1], [], []>} : vector<2048x27xbf16>, vector<27x128xbf16>, vector<2048x128xf32> -> vector<2048x128xf32>
    %4 = vector.shape_cast %3 : vector<2048x128xf32> to vector<4x512x128xf32>
    %cst_4 = arith.constant dense<0xFF800000> : vector<512x128xf32>
    %5 = vector.multi_reduction <maximumf>, %4, %cst_4 [0] : vector<4x512x128xf32> to vector<512x128xf32>
    %c0_5 = arith.constant 0 : index
    %c0_6 = arith.constant 0 : index
    %6 = vector.load %arg3[%c0_5, %c0_6] : memref<1x128xf32, #tpu.memory_space<vmem>>, vector<1x128xf32>
    %7 = vector.broadcast %6 : vector<1x128xf32> to vector<512x128xf32>
    %8 = arith.addf %5, %7 : vector<512x128xf32>
    %cst_7 = arith.constant 0.000000e+00 : f32
    %9 = vector.broadcast %cst_7 : f32 to vector<512x128xf32>
    %10 = arith.maximumf %8, %9 : vector<512x128xf32>
    %11 = arith.truncf %10 : vector<512x128xf32> to vector<512x128xbf16>
    %c0_8 = arith.constant 0 : index
    %c0_9 = arith.constant 0 : index
    %12 = vector.load %arg4[%c0_8, %c0_9] : memref<512x128xbf16, #tpu.memory_space<vmem>>, vector<512x128xbf16>
    tpu.vector_store %arg4[%c0_8, %c0_9], %11 {strides = array<i32>} : memref<512x128xbf16, #tpu.memory_space<vmem>>, vector<512x128xbf16>,
    return
  }
  func.func @transform_0(%arg0: i32) -> (i32, i32, i32) {
    %c0_i32 = arith.constant 0 : i32
    %c0_i32_0 = arith.constant 0 : i32
    %c0_i32_1 = arith.constant 0 : i32
    return %c0_i32, %arg0, %c0_i32_0 : i32, i32, i32
  }
  func.func @transform_1(%arg0: i32) -> (i32, i32) {
    %c0_i32 = arith.constant 0 : i32
    %c0_i32_0 = arith.constant 0 : i32
    %c0_i32_1 = arith.constant 0 : i32
    return %c0_i32, %c0_i32_0 : i32, i32
  }
  func.func @transform_2(%arg0: i32) -> (i32, i32) {
    %c0_i32 = arith.constant 0 : i32
    %c0_i32_0 = arith.constant 0 : i32
    %c0_i32_1 = arith.constant 0 : i32
    return %c0_i32, %c0_i32_0 : i32, i32
  }
  func.func @transform_3(%arg0: i32) -> (i32, i32) {
    %c0_i32 = arith.constant 0 : i32
    %c0_i32_0 = arith.constant 0 : i32
    return %arg0, %c0_i32 : i32, i32
  }
}

module attributes {stable_mosaic.version = 11 : i64} {
  func.func @_conv_bias_relu_pool_kernel(%arg0: i32, %arg1: memref<4x256x288xbf16, #tpu.memory_space<vmem>>, %arg2: memref<288x128xbf16, #tpu.memory_space<vmem>>, %arg3: memref<1x128xf32, #tpu.memory_space<vmem>>, %arg4: memref<256x128xbf16, #tpu.memory_space<vmem>>) attributes {dimension_semantics = [#tpu.dimension_semantics<parallel>], iteration_bounds = array<i64: 2>, scalar_prefetch = 0 : i64, scratch_operands = 0 : i64, tpu.core_type = #tpu.core_type<tc>, window_params = [{transform_indices = @transform_0, window_bounds = array<i64: 4, 256, 288>}, {pipeline_mode = #tpu.pipeline_mode<synchronous>, transform_indices = @transform_1, window_bounds = array<i64: 288, 128>}, {pipeline_mode = #tpu.pipeline_mode<synchronous>, transform_indices = @transform_2, window_bounds = array<i64: 1, 128>}, {transform_indices = @transform_3, window_bounds = array<i64: 256, 128>}]} {
    %c0 = arith.constant 0 : index
    %c0_0 = arith.constant 0 : index
    %c0_1 = arith.constant 0 : index
    %0 = vector.load %arg1[%c0, %c0_0, %c0_1] : memref<4x256x288xbf16, #tpu.memory_space<vmem>>, vector<4x256x288xbf16>
    %1 = vector.shape_cast %0 : vector<4x256x288xbf16> to vector<1024x288xbf16>
    %c0_2 = arith.constant 0 : index
    %c0_3 = arith.constant 0 : index
    %2 = vector.load %arg2[%c0_2, %c0_3] : memref<288x128xbf16, #tpu.memory_space<vmem>>, vector<288x128xbf16>
    %cst = arith.constant dense<0.000000e+00> : vector<1024x128xf32>
    %3 = tpu.matmul %1, %2, %cst {dimension_numbers = #tpu.dot_dimension_numbers<[1], [0], [0], [1], [0, 0, 1, 1], [], []>} : vector<1024x288xbf16>, vector<288x128xbf16>, vector<1024x128xf32> -> vector<1024x128xf32>
    %4 = vector.shape_cast %3 : vector<1024x128xf32> to vector<4x256x128xf32>
    %cst_4 = arith.constant dense<0xFF800000> : vector<256x128xf32>
    %5 = vector.multi_reduction <maximumf>, %4, %cst_4 [0] : vector<4x256x128xf32> to vector<256x128xf32>
    %c0_5 = arith.constant 0 : index
    %c0_6 = arith.constant 0 : index
    %6 = vector.load %arg3[%c0_5, %c0_6] : memref<1x128xf32, #tpu.memory_space<vmem>>, vector<1x128xf32>
    %7 = vector.broadcast %6 : vector<1x128xf32> to vector<256x128xf32>
    %8 = arith.addf %5, %7 : vector<256x128xf32>
    %cst_7 = arith.constant 0.000000e+00 : f32
    %9 = vector.broadcast %cst_7 : f32 to vector<256x128xf32>
    %10 = arith.maximumf %8, %9 : vector<256x128xf32>
    %11 = arith.truncf %10 : vector<256x128xf32> to vector<256x128xbf16>
    %c0_8 = arith.constant 0 : index
    %c0_9 = arith.constant 0 : index
    %12 = vector.load %arg4[%c0_8, %c0_9] : memref<256x128xbf16, #tpu.memory_space<vmem>>, vector<256x128xbf16>
    tpu.vector_store %arg4[%c0_8, %c0_9], %11 {strides = array<i32>} : memref<256x128xbf16, #tpu.memory_space<vmem>>, vector<256x128xbf16>,
    return
  }
  func.func @transform_0(%arg0: i32) -> (i32, i32, i32) {
    %c0_i32 = arith.constant 0 : i32
    %c0_i32_0 = arith.constant 0 : i32
    %c0_i32_1 = arith.constant 0 : i32
    return %c0_i32, %arg0, %c0_i32_0 : i32, i32, i32
  }
  func.func @transform_1(%arg0: i32) -> (i32, i32) {
    %c0_i32 = arith.constant 0 : i32
    %c0_i32_0 = arith.constant 0 : i32
    %c0_i32_1 = arith.constant 0 : i32
    return %c0_i32, %c0_i32_0 : i32, i32
  }
  func.func @transform_2(%arg0: i32) -> (i32, i32) {
    %c0_i32 = arith.constant 0 : i32
    %c0_i32_0 = arith.constant 0 : i32
    %c0_i32_1 = arith.constant 0 : i32
    return %c0_i32, %c0_i32_0 : i32, i32
  }
  func.func @transform_3(%arg0: i32) -> (i32, i32) {
    %c0_i32 = arith.constant 0 : i32
    %c0_i32_0 = arith.constant 0 : i32
    return %arg0, %c0_i32 : i32, i32
  }
}

module attributes {stable_mosaic.version = 11 : i64} {
  func.func @_fc_fused_kernel(%arg0: i32, %arg1: memref<2x2048xbf16, #tpu.memory_space<vmem>>, %arg2: memref<2048x128xbf16, #tpu.memory_space<vmem>>, %arg3: memref<1x128xf32, #tpu.memory_space<vmem>>, %arg4: memref<128x128xf32, #tpu.memory_space<vmem>>, %arg5: memref<1x128xf32, #tpu.memory_space<vmem>>, %arg6: memref<2x128xf32, #tpu.memory_space<vmem>>, %arg7: memref<2x128xf32, #tpu.memory_space<vmem>>) attributes {dimension_semantics = [#tpu.dimension_semantics<arbitrary>], iteration_bounds = array<i64: 8>, scalar_prefetch = 0 : i64, scratch_operands = 1 : i64, tpu.core_type = #tpu.core_type<tc>, window_params = [{transform_indices = @transform_0, window_bounds = array<i64: 2, 2048>}, {transform_indices = @transform_1, window_bounds = array<i64: 2048, 128>}, {pipeline_mode = #tpu.pipeline_mode<synchronous>, transform_indices = @transform_2, window_bounds = array<i64: 1, 128>}, {pipeline_mode = #tpu.pipeline_mode<synchronous>, transform_indices = @transform_3, window_bounds = array<i64: 128, 128>}, {pipeline_mode = #tpu.pipeline_mode<synchronous>, transform_indices = @transform_4, window_bounds = array<i64: 1, 128>}, {pipeline_mode = #tpu.pipeline_mode<synchronous>, transform_indices = @transform_5, window_bounds = array<i64: 2, 128>}]} {
    %c0_i32 = arith.constant 0 : i32
    %0 = arith.cmpi eq, %arg0, %c0_i32 : i32
    %1 = arith.extui %0 : i1 to i32
    %c0_i32_0 = arith.constant 0 : i32
    %2 = arith.cmpi ne, %1, %c0_i32_0 : i32
    scf.if %2 {
      %cst_9 = arith.constant 0.000000e+00 : f32
      %12 = vector.broadcast %cst_9 : f32 to vector<2x128xf32>
      %c0_10 = arith.constant 0 : index
      %c0_11 = arith.constant 0 : index
      %13 = vector.load %arg7[%c0_10, %c0_11] : memref<2x128xf32, #tpu.memory_space<vmem>>, vector<2x128xf32>
      tpu.vector_store %arg7[%c0_10, %c0_11], %12 {strides = array<i32>} : memref<2x128xf32, #tpu.memory_space<vmem>>, vector<2x128xf32>,
    } else {
    }
    %c0 = arith.constant 0 : index
    %c0_1 = arith.constant 0 : index
    %3 = vector.load %arg7[%c0, %c0_1] : memref<2x128xf32, #tpu.memory_space<vmem>>, vector<2x128xf32>
    %c0_2 = arith.constant 0 : index
    %c0_3 = arith.constant 0 : index
    %4 = vector.load %arg1[%c0_2, %c0_3] : memref<2x2048xbf16, #tpu.memory_space<vmem>>, vector<2x2048xbf16>
    %c0_4 = arith.constant 0 : index
    %c0_5 = arith.constant 0 : index
    %5 = vector.load %arg2[%c0_4, %c0_5] : memref<2048x128xbf16, #tpu.memory_space<vmem>>, vector<2048x128xbf16>
    %cst = arith.constant dense<0.000000e+00> : vector<2x128xf32>
    %6 = tpu.matmul %4, %5, %cst {dimension_numbers = #tpu.dot_dimension_numbers<[1], [0], [0], [1], [0, 0, 1, 1], [], []>} : vector<2x2048xbf16>, vector<2048x128xbf16>, vector<2x128xf32> -> vector<2x128xf32>
    %7 = arith.addf %3, %6 : vector<2x128xf32>
    %c0_6 = arith.constant 0 : index
    %c0_7 = arith.constant 0 : index
    %8 = vector.load %arg7[%c0_6, %c0_7] : memref<2x128xf32, #tpu.memory_space<vmem>>, vector<2x128xf32>
    tpu.vector_store %arg7[%c0_6, %c0_7], %7 {strides = array<i32>} : memref<2x128xf32, #tpu.memory_space<vmem>>, vector<2x128xf32>,
    %c7_i32 = arith.constant 7 : i32
    %9 = arith.cmpi eq, %arg0, %c7_i32 : i32
    %10 = arith.extui %9 : i1 to i32
    %c0_i32_8 = arith.constant 0 : i32
    %11 = arith.cmpi ne, %10, %c0_i32_8 : i32
    scf.if %11 {
      %c0_9 = arith.constant 0 : index
      %c0_10 = arith.constant 0 : index
      %12 = vector.load %arg7[%c0_9, %c0_10] : memref<2x128xf32, #tpu.memory_space<vmem>>, vector<2x128xf32>
      %c0_11 = arith.constant 0 : index
      %c0_12 = arith.constant 0 : index
      %13 = vector.load %arg3[%c0_11, %c0_12] : memref<1x128xf32, #tpu.memory_space<vmem>>, vector<1x128xf32>
      %14 = vector.broadcast %13 : vector<1x128xf32> to vector<2x128xf32>
      %15 = arith.addf %12, %14 : vector<2x128xf32>
      %cst_13 = arith.constant 0.000000e+00 : f32
      %16 = vector.broadcast %cst_13 : f32 to vector<2x128xf32>
      %17 = arith.maximumf %15, %16 : vector<2x128xf32>
      %c0_14 = arith.constant 0 : index
      %c0_15 = arith.constant 0 : index
      %18 = vector.load %arg4[%c0_14, %c0_15] : memref<128x128xf32, #tpu.memory_space<vmem>>, vector<128x128xf32>
      %cst_16 = arith.constant dense<0.000000e+00> : vector<2x128xf32>
      %19 = tpu.matmul %17, %18, %cst_16 {dimension_numbers = #tpu.dot_dimension_numbers<[1], [0], [0], [1], [0, 0, 1, 1], [], []>} : vector<2x128xf32>, vector<128x128xf32>, vector<2x128xf32> -> vector<2x128xf32>
      %c0_17 = arith.constant 0 : index
      %c0_18 = arith.constant 0 : index
      %20 = vector.load %arg5[%c0_17, %c0_18] : memref<1x128xf32, #tpu.memory_space<vmem>>, vector<1x128xf32>
      %21 = vector.broadcast %20 : vector<1x128xf32> to vector<2x128xf32>
      %22 = arith.addf %19, %21 : vector<2x128xf32>
      %c0_19 = arith.constant 0 : index
      %c0_20 = arith.constant 0 : index
      %23 = vector.load %arg6[%c0_19, %c0_20] : memref<2x128xf32, #tpu.memory_space<vmem>>, vector<2x128xf32>
      tpu.vector_store %arg6[%c0_19, %c0_20], %22 {strides = array<i32>} : memref<2x128xf32, #tpu.memory_space<vmem>>, vector<2x128xf32>,
    } else {
    }
    return
  }
  func.func @transform_0(%arg0: i32) -> (i32, i32) {
    %c0_i32 = arith.constant 0 : i32
    %c0_i32_0 = arith.constant 0 : i32
    return %c0_i32, %arg0 : i32, i32
  }
  func.func @transform_1(%arg0: i32) -> (i32, i32) {
    %c0_i32 = arith.constant 0 : i32
    %c0_i32_0 = arith.constant 0 : i32
    return %arg0, %c0_i32 : i32, i32
  }
  func.func @transform_2(%arg0: i32) -> (i32, i32) {
    %c0_i32 = arith.constant 0 : i32
    %c0_i32_0 = arith.constant 0 : i32
    %c0_i32_1 = arith.constant 0 : i32
    return %c0_i32, %c0_i32_0 : i32, i32
  }
  func.func @transform_3(%arg0: i32) -> (i32, i32) {
    %c0_i32 = arith.constant 0 : i32
    %c0_i32_0 = arith.constant 0 : i32
    %c0_i32_1 = arith.constant 0 : i32
    return %c0_i32, %c0_i32_0 : i32, i32
  }
  func.func @transform_4(%arg0: i32) -> (i32, i32) {
    %c0_i32 = arith.constant 0 : i32
    %c0_i32_0 = arith.constant 0 : i32
    %c0_i32_1 = arith.constant 0 : i32
    return %c0_i32, %c0_i32_0 : i32, i32
  }
  func.func @transform_5(%arg0: i32) -> (i32, i32) {
    %c0_i32 = arith.constant 0 : i32
    %c0_i32_0 = arith.constant 0 : i32
    %c0_i32_1 = arith.constant 0 : i32
    return %c0_i32, %c0_i32_0 : i32, i32
  }
}

</mosaic_0001>

<bundles_post_ra>
// kernel: simple_cnn_forward.3
= control target key start
LH: loop header
LB: loop body
LE: loop exit
PB: predicated region body
PF: predicated region fallthrough
CT: control target
= control target key end

     0   :  { %s5493_s12 = smov 0   ;;  %s5495_s13 = smov 0   ;;  %s6556_s0 = inlined_call_operand.vmem [shape: bf16[4,2048,27], index: 0, kind: input, shape index: {}]   ;;  %s6557_s1 = inlined_call_operand.vmem [shape: bf16[27,128], index: 1, kind: input, shape index: {}]   ;;  %s6558_s2 = inlined_call_operand.vmem [shape: f32[1,128], index: 2, kind: input, shape index: {}]   ;;  %s6559_s3 = inlined_call_operand.vmem [shape: bf16[2048,128], index: 3, kind: output, shape index: {}]  }
   0x1   :  { %s5497_s14 = smov 0  }
   0x2 LB: > { %s4307_s15 = sadd.s32 4294967295, %s5470_s14   ;;  %s5510_s16 = sadd.s32 1, %s5470_s14   ;;  %s5470_s14 = sphi %s5497_s14, %s6722_s14   ;;  %s5466_s13 = sphi %s5495_s13, %s6721_s13   ;;  %s5462_s12 = sphi %s5493_s12, %s6720_s12  }
   0x3   : > { %s17_s17 = ssub.s32 %s5470_s14, %s5510_s16  ;;  %s20_s18 = sadd.s32 1, %s5466_s13 }
   0x4   : > { %p18_p0 = scmp.eq.s32.totalorder %s17_s17, 0  ;;  %p27_p1 = scmp.ne.s32.totalorder %s5466_s13, %s5462_s12 }
   0x5   : > { %p28_p2 = scmp.eq.s32.totalorder %s5470_s14, 0  ;;  %p4310_p4 = scmp.ge.s32.totalorder %s5470_s14, 4 }
   0x6   : > { %s5519_s19 = scalar_select %p18_p0, %s5466_s13, %s20_s18  }
   0x7   : > { %p29_p3 = por %p28_p2, %p27_p1  ;;  %127 = sbr.rel (%p4310_p4) target bundleno = 80 (0x50), region = 24 }
   0xc   : > { %130 = sbr.rel (!%p29_p3) target bundleno = 80 (0x50), region = 28  ;;  %s132_s20 = sand.u32 (%p29_p3), 1, %s5466_s13  }
   0xd   : > { %s4643_s21 = sshll.u32 (%p29_p3), %s5470_s14, 8  ;;  %s4311_s22 = sshll.u32 (%p29_p3), %s132_s20, 10 }
   0xe   : > { %s5527_s25 = scalar_lea.vmem (%p29_p3), %s6556_s0, %s4643_s21  ;;  %s5532_s26 = scalar_lea.vmem (%p29_p3), [#allocation2], %s4311_s22 }
   0xf   : > { %v154_v0 = vld [vmem:[%s5527_s25] sm:$0xff] (%p29_p3)   ;;  %v158_v1 = vld [vmem:[%s5527_s25 + $0x8] sm:$0xff] (%p29_p3)   ;;  %v162_v2 = vld [vmem:[%s5527_s25 + $0x10] sm:$0xff] (%p29_p3)  }
  0x10   : > { %155 = vst [vmem:[%s5532_s26] sm:$0xff] (%p29_p3), %v154_v0   ;;  %159 = vst [vmem:[%s5532_s26 + $0x8] sm:$0xff] (%p29_p3), %v158_v1   ;;  %v166_v3 = vld [vmem:[%s5527_s25 + $0x18] sm:$0xff] (%p29_p3)   ;;  %v170_v4 = vld [vmem:[%s5527_s25 + $0x20] sm:$0xff] (%p29_p3)  }
  0x11   : > { %163 = vst [vmem:[%s5532_s26 + $0x10] sm:$0xff] %v162_v2   ;;  %v174_v5 = vld [vmem:[%s5527_s25 + $0x28] sm:$0xff]   ;;  %167 = vst [vmem:[%s5532_s26 + $0x18] sm:$0xff] %v166_v3   ;;  %v178_v6 = vld [vmem:[%s5527_s25 + $0x30] sm:$0xff]  }
  0x12   : > { %171 = vst [vmem:[%s5532_s26 + $0x20] sm:$0xff] %v170_v4   ;;  %175 = vst [vmem:[%s5532_s26 + $0x28] sm:$0xff] %v174_v5   ;;  %v182_v7 = vld [vmem:[%s5527_s25 + $0x38] sm:$0xff]   ;;  %v186_v8 = vld [vmem:[%s5527_s25 + $0x40] sm:$0xff]  }
  0x13   : > { %179 = vst [vmem:[%s5532_s26 + $0x30] sm:$0xff] %v178_v6   ;;  %183 = vst [vmem:[%s5532_s26 + $0x38] sm:$0xff] %v182_v7   ;;  %v190_v9 = vld [vmem:[%s5527_s25 + $0x48] sm:$0xff]   ;;  %v194_v10 = vld [vmem:[%s5527_s25 + $0x50] sm:$0xff]  }
  0x14   : > { %187 = vst [vmem:[%s5532_s26 + $0x40] sm:$0xff] %v186_v8   ;;  %v198_v11 = vld [vmem:[%s5527_s25 + $0x58] sm:$0xff]   ;;  %191 = vst [vmem:[%s5532_s26 + $0x48] sm:$0xff] %v190_v9   ;;  %v202_v12 = vld [vmem:[%s5527_s25 + $0x60] sm:$0xff]  }
  0x15   : > { %195 = vst [vmem:[%s5532_s26 + $0x50] sm:$0xff] %v194_v10   ;;  %199 = vst [vmem:[%s5532_s26 + $0x58] sm:$0xff] %v198_v11   ;;  %v206_v13 = vld [vmem:[%s5527_s25 + $0x68] sm:$0xff]   ;;  %v210_v14 = vld [vmem:[%s5527_s25 + $0x70] sm:$0xff]  }
  0x16   : > { %203 = vst [vmem:[%s5532_s26 + $0x60] sm:$0xff] %v202_v12   ;;  %207 = vst [vmem:[%s5532_s26 + $0x68] sm:$0xff] %v206_v13   ;;  %v214_v15 = vld [vmem:[%s5527_s25 + $0x78] sm:$0xff]   ;;  %v218_v16 = vld [vmem:[%s5527_s25 + $0x80] sm:$0xff]  }
  0x17   : > { %211 = vst [vmem:[%s5532_s26 + $0x70] sm:$0xff] %v210_v14   ;;  %v222_v17 = vld [vmem:[%s5527_s25 + $0x88] sm:$0xff]   ;;  %215 = vst [vmem:[%s5532_s26 + $0x78] sm:$0xff] %v214_v15   ;;  %v226_v18 = vld [vmem:[%s5527_s25 + $0x90] sm:$0xff]  }
  0x18   : > { %219 = vst [vmem:[%s5532_s26 + $0x80] sm:$0xff] %v218_v16   ;;  %223 = vst [vmem:[%s5532_s26 + $0x88] sm:$0xff] %v222_v17   ;;  %v230_v19 = vld [vmem:[%s5527_s25 + $0x98] sm:$0xff]   ;;  %v234_v20 = vld [vmem:[%s5527_s25 + $0xa0] sm:$0xff]  }
  0x19   : > { %227 = vst [vmem:[%s5532_s26 + $0x90] sm:$0xff] %v226_v18   ;;  %231 = vst [vmem:[%s5532_s26 + $0x98] sm:$0xff] %v230_v19   ;;  %v238_v21 = vld [vmem:[%s5527_s25 + $0xa8] sm:$0xff]   ;;  %v242_v22 = vld [vmem:[%s5527_s25 + $0xb0] sm:$0xff]  }
  0x1a   : > { %235 = vst [vmem:[%s5532_s26 + $0xa0] sm:$0xff] %v234_v20   ;;  %v246_v23 = vld [vmem:[%s5527_s25 + $0xb8] sm:$0xff]   ;;  %239 = vst [vmem:[%s5532_s26 + $0xa8] sm:$0xff] %v238_v21   ;;  %v250_v24 = vld [vmem:[%s5527_s25 + $0xc0] sm:$0xff]  }
  0x1b   : > { %243 = vst [vmem:[%s5532_s26 + $0xb0] sm:$0xff] %v242_v22   ;;  %247 = vst [vmem:[%s5532_s26 + $0xb8] sm:$0xff] %v246_v23   ;;  %v254_v25 = vld [vmem:[%s5527_s25 + $0xc8] sm:$0xff]   ;;  %v258_v26 = vld [vmem:[%s5527_s25 + $0xd0] sm:$0xff]  }
  0x1c   : > { %251 = vst [vmem:[%s5532_s26 + $0xc0] sm:$0xff] %v250_v24   ;;  %255 = vst [vmem:[%s5532_s26 + $0xc8] sm:$0xff] %v254_v25   ;;  %v262_v27 = vld [vmem:[%s5527_s25 + $0xd8] sm:$0xff]   ;;  %v266_v28 = vld [vmem:[%s5527_s25 + $0xe0] sm:$0xff]  }
  0x1d   : > { %259 = vst [vmem:[%s5532_s26 + $0xd0] sm:$0xff] %v258_v26   ;;  %v270_v29 = vld [vmem:[%s5527_s25 + $0xe8] sm:$0xff]   ;;  %263 = vst [vmem:[%s5532_s26 + $0xd8] sm:$0xff] %v262_v27   ;;  %v274_v30 = vld [vmem:[%s5527_s25 + $0xf0] sm:$0xff]  }
  0x1e   : > { %267 = vst [vmem:[%s5532_s26 + $0xe0] sm:$0xff] %v266_v28   ;;  %271 = vst [vmem:[%s5532_s26 + $0xe8] sm:$0xff] %v270_v29   ;;  %v278_v31 = vld [vmem:[%s5527_s25 + $0xf8] sm:$0xff]   ;;  %v282_v32 = vld [vmem:[%s5527_s25 + $0x400] sm:$0xff]  }
  0x1f   : > { %275 = vst [vmem:[%s5532_s26 + $0xf0] sm:$0xff] %v274_v30   ;;  %279 = vst [vmem:[%s5532_s26 + $0xf8] sm:$0xff] %v278_v31   ;;  %v286_v33 = vld [vmem:[%s5527_s25 + $0x408] sm:$0xff]   ;;  %v290_v34 = vld [vmem:[%s5527_s25 + $0x410] sm:$0xff]  }
  0x20   : > { %283 = vst [vmem:[%s5532_s26 + $0x100] sm:$0xff] %v282_v32   ;;  %v294_v35 = vld [vmem:[%s5527_s25 + $0x418] sm:$0xff]   ;;  %287 = vst [vmem:[%s5532_s26 + $0x108] sm:$0xff] %v286_v33   ;;  %v298_v36 = vld [vmem:[%s5527_s25 + $0x420] sm:$0xff]  }
  0x21   : > { %291 = vst [vmem:[%s5532_s26 + $0x110] sm:$0xff] %v290_v34   ;;  %295 = vst [vmem:[%s5532_s26 + $0x118] sm:$0xff] %v294_v35   ;;  %v302_v37 = vld [vmem:[%s5527_s25 + $0x428] sm:$0xff]   ;;  %v306_v38 = vld [vmem:[%s5527_s25 + $0x430] sm:$0xff]  }
  0x22   : > { %299 = vst [vmem:[%s5532_s26 + $0x120] sm:$0xff] %v298_v36   ;;  %303 = vst [vmem:[%s5532_s26 + $0x128] sm:$0xff] %v302_v37   ;;  %v310_v39 = vld [vmem:[%s5527_s25 + $0x438] sm:$0xff]   ;;  %v314_v40 = vld [vmem:[%s5527_s25 + $0x440] sm:$0xff]  }
  0x23   : > { %307 = vst [vmem:[%s5532_s26 + $0x130] sm:$0xff] %v306_v38   ;;  %v318_v41 = vld [vmem:[%s5527_s25 + $0x448] sm:$0xff]   ;;  %311 = vst [vmem:[%s5532_s26 + $0x138] sm:$0xff] %v310_v39   ;;  %v322_v42 = vld [vmem:[%s5527_s25 + $0x450] sm:$0xff]  }
  0x24   : > { %315 = vst [vmem:[%s5532_s26 + $0x140] sm:$0xff] %v314_v40   ;;  %319 = vst [vmem:[%s5532_s26 + $0x148] sm:$0xff] %v318_v41   ;;  %v326_v43 = vld [vmem:[%s5527_s25 + $0x458] sm:$0xff]   ;;  %v330_v44 = vld [vmem:[%s5527_s25 + $0x460] sm:$0xff]  }
  0x25   : > { %323 = vst [vmem:[%s5532_s26 + $0x150] sm:$0xff] %v322_v42   ;;  %327 = vst [vmem:[%s5532_s26 + $0x158] sm:$0xff] %v326_v43   ;;  %v334_v45 = vld [vmem:[%s5527_s25 + $0x468] sm:$0xff]   ;;  %v338_v46 = vld [vmem:[%s5527_s25 + $0x470] sm:$0xff]  }
  0x26   : > { %331 = vst [vmem:[%s5532_s26 + $0x160] sm:$0xff] %v330_v44   ;;  %v342_v47 = vld [vmem:[%s5527_s25 + $0x478] sm:$0xff]   ;;  %335 = vst [vmem:[%s5532_s26 + $0x168] sm:$0xff] %v334_v45   ;;  %v346_v48 = vld [vmem:[%s5527_s25 + $0x480] sm:$0xff]  }
  0x27   : > { %339 = vst [vmem:[%s5532_s26 + $0x170] sm:$0xff] %v338_v46   ;;  %343 = vst [vmem:[%s5532_s26 + $0x178] sm:$0xff] %v342_v47   ;;  %v350_v49 = vld [vmem:[%s5527_s25 + $0x488] sm:$0xff]   ;;  %v354_v50 = vld [vmem:[%s5527_s25 + $0x490] sm:$0xff]  }
  0x28   : > { %347 = vst [vmem:[%s5532_s26 + $0x180] sm:$0xff] %v346_v48   ;;  %351 = vst [vmem:[%s5532_s26 + $0x188] sm:$0xff] %v350_v49   ;;  %v358_v51 = vld [vmem:[%s5527_s25 + $0x498] sm:$0xff]   ;;  %v362_v52 = vld [vmem:[%s5527_s25 + $0x4a0] sm:$0xff]  }
  0x29   : > { %355 = vst [vmem:[%s5532_s26 + $0x190] sm:$0xff] %v354_v50   ;;  %v366_v53 = vld [vmem:[%s5527_s25 + $0x4a8] sm:$0xff]   ;;  %359 = vst [vmem:[%s5532_s26 + $0x198] sm:$0xff] %v358_v51   ;;  %v370_v54 = vld [vmem:[%s5527_s25 + $0x4b0] sm:$0xff]  }
  0x2a   : > { %363 = vst [vmem:[%s5532_s26 + $0x1a0] sm:$0xff] %v362_v52   ;;  %367 = vst [vmem:[%s5532_s26 + $0x1a8] sm:$0xff] %v366_v53   ;;  %v374_v55 = vld [vmem:[%s5527_s25 + $0x4b8] sm:$0xff]   ;;  %v378_v56 = vld [vmem:[%s5527_s25 + $0x4c0] sm:$0xff]  }
  0x2b   : > { %371 = vst [vmem:[%s5532_s26 + $0x1b0] sm:$0xff] %v370_v54   ;;  %375 = vst [vmem:[%s5532_s26 + $0x1b8] sm:$0xff] %v374_v55   ;;  %v382_v57 = vld [vmem:[%s5527_s25 + $0x4c8] sm:$0xff]   ;;  %v386_v58 = vld [vmem:[%s5527_s25 + $0x4d0] sm:$0xff]  }
  0x2c   : > { %379 = vst [vmem:[%s5532_s26 + $0x1c0] sm:$0xff] %v378_v56   ;;  %v390_v59 = vld [vmem:[%s5527_s25 + $0x4d8] sm:$0xff]   ;;  %383 = vst [vmem:[%s5532_s26 + $0x1c8] sm:$0xff] %v382_v57   ;;  %v394_v60 = vld [vmem:[%s5527_s25 + $0x4e0] sm:$0xff]  }
  0x2d   : > { %387 = vst [vmem:[%s5532_s26 + $0x1d0] sm:$0xff] %v386_v58   ;;  %391 = vst [vmem:[%s5532_s26 + $0x1d8] sm:$0xff] %v390_v59   ;;  %v398_v61 = vld [vmem:[%s5527_s25 + $0x4e8] sm:$0xff]   ;;  %v402_v62 = vld [vmem:[%s5527_s25 + $0x4f0] sm:$0xff]  }
  0x2e   : > { %395 = vst [vmem:[%s5532_s26 + $0x1e0] sm:$0xff] %v394_v60   ;;  %399 = vst [vmem:[%s5532_s26 + $0x1e8] sm:$0xff] %v398_v61   ;;  %v406_v63 = vld [vmem:[%s5527_s25 + $0x4f8] sm:$0xff]   ;;  %v410_v0 = vld [vmem:[%s5527_s25 + $0x800] sm:$0xff]  }
  0x2f   : > { %403 = vst [vmem:[%s5532_s26 + $0x1f0] sm:$0xff] %v402_v62   ;;  %v414_v1 = vld [vmem:[%s5527_s25 + $0x808] sm:$0xff]   ;;  %407 = vst [vmem:[%s5532_s26 + $0x1f8] sm:$0xff] %v406_v63   ;;  %v418_v2 = vld [vmem:[%s5527_s25 + $0x810] sm:$0xff]  }
  0x30   : > { %411 = vst [vmem:[%s5532_s26 + $0x200] sm:$0xff] %v410_v0   ;;  %415 = vst [vmem:[%s5532_s26 + $0x208] sm:$0xff] %v414_v1   ;;  %v422_v3 = vld [vmem:[%s5527_s25 + $0x818] sm:$0xff]   ;;  %v426_v4 = vld [vmem:[%s5527_s25 + $0x820] sm:$0xff]  }
  0x31   : > { %419 = vst [vmem:[%s5532_s26 + $0x210] sm:$0xff] %v418_v2   ;;  %423 = vst [vmem:[%s5532_s26 + $0x218] sm:$0xff] %v422_v3   ;;  %v430_v5 = vld [vmem:[%s5527_s25 + $0x828] sm:$0xff]   ;;  %v434_v6 = vld [vmem:[%s5527_s25 + $0x830] sm:$0xff]  }
  0x32   : > { %427 = vst [vmem:[%s5532_s26 + $0x220] sm:$0xff] %v426_v4   ;;  %v438_v7 = vld [vmem:[%s5527_s25 + $0x838] sm:$0xff]   ;;  %431 = vst [vmem:[%s5532_s26 + $0x228] sm:$0xff] %v430_v5   ;;  %v442_v8 = vld [vmem:[%s5527_s25 + $0x840] sm:$0xff]  }
  0x33   : > { %435 = vst [vmem:[%s5532_s26 + $0x230] sm:$0xff] %v434_v6   ;;  %439 = vst [vmem:[%s5532_s26 + $0x238] sm:$0xff] %v438_v7   ;;  %v446_v9 = vld [vmem:[%s5527_s25 + $0x848] sm:$0xff]   ;;  %v450_v10 = vld [vmem:[%s5527_s25 + $0x850] sm:$0xff]  }
  0x34   : > { %443 = vst [vmem:[%s5532_s26 + $0x240] sm:$0xff] %v442_v8   ;;  %447 = vst [vmem:[%s5532_s26 + $0x248] sm:$0xff] %v446_v9   ;;  %v454_v11 = vld [vmem:[%s5527_s25 + $0x858] sm:$0xff]   ;;  %v458_v12 = vld [vmem:[%s5527_s25 + $0x860] sm:$0xff]  }
  0x35   : > { %451 = vst [vmem:[%s5532_s26 + $0x250] sm:$0xff] %v450_v10   ;;  %v462_v13 = vld [vmem:[%s5527_s25 + $0x868] sm:$0xff]   ;;  %455 = vst [vmem:[%s5532_s26 + $0x258] sm:$0xff] %v454_v11   ;;  %v466_v14 = vld [vmem:[%s5527_s25 + $0x870] sm:$0xff]  }
  0x36   : > { %459 = vst [vmem:[%s5532_s26 + $0x260] sm:$0xff] %v458_v12   ;;  %463 = vst [vmem:[%s5532_s26 + $0x268] sm:$0xff] %v462_v13   ;;  %v470_v15 = vld [vmem:[%s5527_s25 + $0x878] sm:$0xff]   ;;  %v474_v16 = vld [vmem:[%s5527_s25 + $0x880] sm:$0xff]  }
  0x37   : > { %467 = vst [vmem:[%s5532_s26 + $0x270] sm:$0xff] %v466_v14   ;;  %471 = vst [vmem:[%s5532_s26 + $0x278] sm:$0xff] %v470_v15   ;;  %v478_v17 = vld [vmem:[%s5527_s25 + $0x888] sm:$0xff]   ;;  %v482_v18 = vld [vmem:[%s5527_s25 + $0x890] sm:$0xff]  }
  0x38   : > { %475 = vst [vmem:[%s5532_s26 + $0x280] sm:$0xff] %v474_v16   ;;  %v486_v19 = vld [vmem:[%s5527_s25 + $0x898] sm:$0xff]   ;;  %479 = vst [vmem:[%s5532_s26 + $0x288] sm:$0xff] %v478_v17   ;;  %v490_v20 = vld [vmem:[%s5527_s25 + $0x8a0] sm:$0xff]  }
  0x39   : > { %483 = vst [vmem:[%s5532_s26 + $0x290] sm:$0xff] %v482_v18   ;;  %487 = vst [vmem:[%s5532_s26 + $0x298] sm:$0xff] %v486_v19   ;;  %v494_v21 = vld [vmem:[%s5527_s25 + $0x8a8] sm:$0xff]   ;;  %v498_v22 = vld [vmem:[%s5527_s25 + $0x8b0] sm:$0xff]  }
  0x3a   : > { %491 = vst [vmem:[%s5532_s26 + $0x2a0] sm:$0xff] %v490_v20   ;;  %495 = vst [vmem:[%s5532_s26 + $0x2a8] sm:$0xff] %v494_v21   ;;  %v502_v23 = vld [vmem:[%s5527_s25 + $0x8b8] sm:$0xff]   ;;  %v506_v24 = vld [vmem:[%s5527_s25 + $0x8c0] sm:$0xff]  }
  0x3b   : > { %499 = vst [vmem:[%s5532_s26 + $0x2b0] sm:$0xff] %v498_v22   ;;  %v510_v25 = vld [vmem:[%s5527_s25 + $0x8c8] sm:$0xff]   ;;  %503 = vst [vmem:[%s5532_s26 + $0x2b8] sm:$0xff] %v502_v23   ;;  %v514_v26 = vld [vmem:[%s5527_s25 + $0x8d0] sm:$0xff]  }
  0x3c   : > { %507 = vst [vmem:[%s5532_s26 + $0x2c0] sm:$0xff] %v506_v24   ;;  %511 = vst [vmem:[%s5532_s26 + $0x2c8] sm:$0xff] %v510_v25   ;;  %v518_v27 = vld [vmem:[%s5527_s25 + $0x8d8] sm:$0xff]   ;;  %v522_v28 = vld [vmem:[%s5527_s25 + $0x8e0] sm:$0xff]  }
  0x3d   : > { %515 = vst [vmem:[%s5532_s26 + $0x2d0] sm:$0xff] %v514_v26   ;;  %519 = vst [vmem:[%s5532_s26 + $0x2d8] sm:$0xff] %v518_v27   ;;  %v526_v29 = vld [vmem:[%s5527_s25 + $0x8e8] sm:$0xff]   ;;  %v530_v30 = vld [vmem:[%s5527_s25 + $0x8f0] sm:$0xff]  }
  0x3e   : > { %523 = vst [vmem:[%s5532_s26 + $0x2e0] sm:$0xff] %v522_v28   ;;  %v534_v31 = vld [vmem:[%s5527_s25 + $0x8f8] sm:$0xff]   ;;  %527 = vst [vmem:[%s5532_s26 + $0x2e8] sm:$0xff] %v526_v29   ;;  %v538_v32 = vld [vmem:[%s5527_s25 + $0xc00] sm:$0xff]  }
  0x3f   : > { %531 = vst [vmem:[%s5532_s26 + $0x2f0] sm:$0xff] %v530_v30   ;;  %535 = vst [vmem:[%s5532_s26 + $0x2f8] sm:$0xff] %v534_v31   ;;  %v542_v33 = vld [vmem:[%s5527_s25 + $0xc08] sm:$0xff]   ;;  %v546_v34 = vld [vmem:[%s5527_s25 + $0xc10] sm:$0xff]  }
  0x40   : > { %539 = vst [vmem:[%s5532_s26 + $0x300] sm:$0xff] %v538_v32   ;;  %543 = vst [vmem:[%s5532_s26 + $0x308] sm:$0xff] %v542_v33   ;;  %v550_v35 = vld [vmem:[%s5527_s25 + $0xc18] sm:$0xff]   ;;  %v554_v36 = vld [vmem:[%s5527_s25 + $0xc20] sm:$0xff]  }
  0x41   : > { %547 = vst [vmem:[%s5532_s26 + $0x310] sm:$0xff] %v546_v34   ;;  %v558_v37 = vld [vmem:[%s5527_s25 + $0xc28] sm:$0xff]   ;;  %551 = vst [vmem:[%s5532_s26 + $0x318] sm:$0xff] %v550_v35   ;;  %v562_v38 = vld [vmem:[%s5527_s25 + $0xc30] sm:$0xff]  }
  0x42   : > { %555 = vst [vmem:[%s5532_s26 + $0x320] sm:$0xff] %v554_v36   ;;  %559 = vst [vmem:[%s5532_s26 + $0x328] sm:$0xff] %v558_v37   ;;  %v566_v39 = vld [vmem:[%s5527_s25 + $0xc38] sm:$0xff]   ;;  %v570_v40 = vld [vmem:[%s5527_s25 + $0xc40] sm:$0xff]  }
  0x43   : > { %563 = vst [vmem:[%s5532_s26 + $0x330] sm:$0xff] %v562_v38   ;;  %567 = vst [vmem:[%s5532_s26 + $0x338] sm:$0xff] %v566_v39   ;;  %v574_v41 = vld [vmem:[%s5527_s25 + $0xc48] sm:$0xff]   ;;  %v578_v42 = vld [vmem:[%s5527_s25 + $0xc50] sm:$0xff]  }
  0x44   : > { %571 = vst [vmem:[%s5532_s26 + $0x340] sm:$0xff] %v570_v40   ;;  %v582_v43 = vld [vmem:[%s5527_s25 + $0xc58] sm:$0xff]   ;;  %575 = vst [vmem:[%s5532_s26 + $0x348] sm:$0xff] %v574_v41   ;;  %v586_v44 = vld [vmem:[%s5527_s25 + $0xc60] sm:$0xff]  }
  0x45   : > { %579 = vst [vmem:[%s5532_s26 + $0x350] sm:$0xff] %v578_v42   ;;  %583 = vst [vmem:[%s5532_s26 + $0x358] sm:$0xff] %v582_v43   ;;  %v590_v45 = vld [vmem:[%s5527_s25 + $0xc68] sm:$0xff]   ;;  %v594_v46 = vld [vmem:[%s5527_s25 + $0xc70] sm:$0xff]  }
  0x46   : > { %587 = vst [vmem:[%s5532_s26 + $0x360] sm:$0xff] %v586_v44   ;;  %591 = vst [vmem:[%s5532_s26 + $0x368] sm:$0xff] %v590_v45   ;;  %v598_v47 = vld [vmem:[%s5527_s25 + $0xc78] sm:$0xff]   ;;  %v602_v48 = vld [vmem:[%s5527_s25 + $0xc80] sm:$0xff]  }
  0x47   : > { %595 = vst [vmem:[%s5532_s26 + $0x370] sm:$0xff] %v594_v46   ;;  %v606_v49 = vld [vmem:[%s5527_s25 + $0xc88] sm:$0xff]   ;;  %599 = vst [vmem:[%s5532_s26 + $0x378] sm:$0xff] %v598_v47   ;;  %v610_v50 = vld [vmem:[%s5527_s25 + $0xc90] sm:$0xff]  }
  0x48   : > { %603 = vst [vmem:[%s5532_s26 + $0x380] sm:$0xff] %v602_v48   ;;  %607 = vst [vmem:[%s5532_s26 + $0x388] sm:$0xff] %v606_v49   ;;  %v614_v51 = vld [vmem:[%s5527_s25 + $0xc98] sm:$0xff]   ;;  %v618_v52 = vld [vmem:[%s5527_s25 + $0xca0] sm:$0xff]  }
  0x49   : > { %611 = vst [vmem:[%s5532_s26 + $0x390] sm:$0xff] %v610_v50   ;;  %615 = vst [vmem:[%s5532_s26 + $0x398] sm:$0xff] %v614_v51   ;;  %v622_v53 = vld [vmem:[%s5527_s25 + $0xca8] sm:$0xff]   ;;  %v626_v54 = vld [vmem:[%s5527_s25 + $0xcb0] sm:$0xff]  }
  0x4a   : > { %619 = vst [vmem:[%s5532_s26 + $0x3a0] sm:$0xff] %v618_v52   ;;  %v630_v55 = vld [vmem:[%s5527_s25 + $0xcb8] sm:$0xff]   ;;  %623 = vst [vmem:[%s5532_s26 + $0x3a8] sm:$0xff] %v622_v53   ;;  %v634_v56 = vld [vmem:[%s5527_s25 + $0xcc0] sm:$0xff]  }
  0x4b   : > { %627 = vst [vmem:[%s5532_s26 + $0x3b0] sm:$0xff] %v626_v54   ;;  %631 = vst [vmem:[%s5532_s26 + $0x3b8] sm:$0xff] %v630_v55   ;;  %v638_v57 = vld [vmem:[%s5527_s25 + $0xcc8] sm:$0xff]   ;;  %v642_v58 = vld [vmem:[%s5527_s25 + $0xcd0] sm:$0xff]  }
  0x4c   : > { %635 = vst [vmem:[%s5532_s26 + $0x3c0] sm:$0xff] %v634_v56   ;;  %639 = vst [vmem:[%s5532_s26 + $0x3c8] sm:$0xff] %v638_v57   ;;  %v646_v59 = vld [vmem:[%s5527_s25 + $0xcd8] sm:$0xff]   ;;  %v650_v60 = vld [vmem:[%s5527_s25 + $0xce0] sm:$0xff]  }
  0x4d   : > { %643 = vst [vmem:[%s5532_s26 + $0x3d0] sm:$0xff] %v642_v58   ;;  %v654_v61 = vld [vmem:[%s5527_s25 + $0xce8] sm:$0xff]   ;;  %647 = vst [vmem:[%s5532_s26 + $0x3d8] sm:$0xff] %v646_v59   ;;  %v658_v62 = vld [vmem:[%s5527_s25 + $0xcf0] sm:$0xff]  }
  0x4e   : > { %651 = vst [vmem:[%s5532_s26 + $0x3e0] sm:$0xff] %v650_v60   ;;  %655 = vst [vmem:[%s5532_s26 + $0x3e8] sm:$0xff] %v654_v61   ;;  %v662_v63 = vld [vmem:[%s5527_s25 + $0xcf8] sm:$0xff]  }
  0x4f   : > { %659 = vst [vmem:[%s5532_s26 + $0x3f0] sm:$0xff] %v658_v62   ;;  %663 = vst [vmem:[%s5532_s26 + $0x3f8] sm:$0xff] %v662_v63  }
  0x50 PF: > { %p4314_p5 = scmp.ge.s32.totalorder %s5470_s14, 1  ;;  %p1200_p6 = scmp.lt.s32.totalorder %s5470_s14, 5 }
  0x52   : > { %p1201_p7 = pnand %p4314_p5, %p1200_p6 }
  0x54   : > { %1204 = sbr.rel (%p1201_p7) target bundleno = 562 (0x232), region = 69 }
  0x59   : > { %v5318_v0 = vld [vmem:[%s6557_s1 + $0x8] sm:$0x3f]   ;;  %vm2534_vm0 = vcmask 1044480   ;;  %vm2535_vm1 = vcmask 1045504   ;;  %v5472_v1 = vmov 65535   ;;  %s1207_s29 = sand.u32 1, %s5462_s12  }
  0x5a   : > { %v2536_v2 = vsel %vm2534_vm0, 4294967295, %v5472_v1  ;;  %s4315_s30 = sshll.u32 %s1207_s29, 10  ;;  %v5319_v5 = vld [vmem:[%s6557_s1] sm:$0xff]   ;;  %vm2149_vm2 = vcmask 220160   ;;  %s4316_s7 = sshll.u32 %s4307_s15, 6 }
  0x5b   : > { %v2537_v3 = vsel %vm2535_vm1, %v2536_v2, 0  ;;  %s5796_s6 = scalar_lea.vmem [#allocation2], %s4315_s30  ;;  %p1232_p8 = scmp.lt.s32.totalorder %s4316_s7, 255 }
  0x5c   : > { %v2539_v4 = vand.u32 %v5318_v0, %v2537_v3  ;;  %v5320_v6 = vld [vmem:[%s5796_s6] sm:$0xff]   ;;  %v5322_v8 = vld [vmem:[%s5796_s6 + $0x8] sm:$0xff]   ;;  %v5324_v10 = vld [vmem:[%s5796_s6 + $0x10] sm:$0xff]  }
  0x5d   : > { %v5321_v7 = vld [vmem:[%s5796_s6 + $0x200] sm:$0xff]   ;;  %5033 = vmatprep.mubr.msk.bf16.mxu0 %vm2149_vm2, %v5320_v6  ;;  %v5323_v9 = vld [vmem:[%s5796_s6 + $0x208] sm:$0xff]   ;;  %v5325_v11 = vld [vmem:[%s5796_s6 + $0x210] sm:$0xff]   ;;  %s6724_s7 = smov (!%p1232_p8, %s4316_s7), 255 }
  0x5e   : > { %5029 = vmatprep.subr.bf16.mxu0 %v2539_v4  ;;  %5289 = vmatprep.subr.bf16.mxu1 %v2539_v4  ;;  %v5326_v12 = vld [vmem:[%s5796_s6 + $0x18] sm:$0xff]   ;;  %v5328_v14 = vld [vmem:[%s5796_s6 + $0x20] sm:$0xff]   ;;  %v5330_v16 = vld [vmem:[%s5796_s6 + $0x28] sm:$0xff]   ;;  %s4317_s10 = sshll.u32 %s6724_s7, 2 }
  0x5f   : > { %5030 = vmatpush3.bf16.msra.mxu0 %v2539_v4  ;;  %5291 = vmatpush3.bf16.msra.mxu1 %v2539_v4  ;;  %v5327_v13 = vld [vmem:[%s5796_s6 + $0x218] sm:$0xff]   ;;  %v5329_v15 = vld [vmem:[%s5796_s6 + $0x220] sm:$0xff]   ;;  %v5331_v17 = vld [vmem:[%s5796_s6 + $0x228] sm:$0xff]   ;;  %s6337_s14 = scalar_lea.vmem %s6559_s3, %s4317_s10 }
  0x60   : > { %5031 = vmatprep.subr.bf16.mxu0 %v5319_v5  ;;  %5290 = vmatprep.subr.bf16.mxu1 %v5319_v5  ;;  %v5332_v18 = vld [vmem:[%s5796_s6 + $0x30] sm:$0xff]   ;;  %v5334_v20 = vld [vmem:[%s5796_s6 + $0x38] sm:$0xff]   ;;  %v5336_v22 = vld [vmem:[%s5796_s6 + $0x40] sm:$0xff]  }
  0x61   : > { %5161 = vmatprep.mubr.msk.bf16.mxu1 %vm2149_vm2, %v5321_v7  ;;  %v5333_v19 = vld [vmem:[%s5796_s6 + $0x230] sm:$0xff]   ;;  %v5335_v21 = vld [vmem:[%s5796_s6 + $0x238] sm:$0xff]   ;;  %v5337_v23 = vld [vmem:[%s5796_s6 + $0x240] sm:$0xff]  }
  0x62   : > { %v5338_v24 = vld [vmem:[%s5796_s6 + $0x48] sm:$0xff]   ;;  %v5340_v26 = vld [vmem:[%s5796_s6 + $0x50] sm:$0xff]   ;;  %v5342_v28 = vld [vmem:[%s5796_s6 + $0x58] sm:$0xff]  }
  0x63   : > { %5032 = vmatpush3.bf16.msra.mxu0 %v5319_v5  ;;  %5292 = vmatpush3.bf16.msra.mxu1 %v5319_v5  ;;  %v5339_v25 = vld [vmem:[%s5796_s6 + $0x248] sm:$0xff]   ;;  %v5341_v27 = vld [vmem:[%s5796_s6 + $0x250] sm:$0xff]   ;;  %v5343_v29 = vld [vmem:[%s5796_s6 + $0x258] sm:$0xff]  }
  0x64   : > { %v5344_v30 = vld [vmem:[%s5796_s6 + $0x60] sm:$0xff]   ;;  %v5346_v32 = vld [vmem:[%s5796_s6 + $0x68] sm:$0xff]   ;;  %v5348_v34 = vld [vmem:[%s5796_s6 + $0x70] sm:$0xff]  }
  0x65   : > { %v5345_v31 = vld [vmem:[%s5796_s6 + $0x260] sm:$0xff]   ;;  %v5347_v33 = vld [vmem:[%s5796_s6 + $0x268] sm:$0xff]   ;;  %v5349_v35 = vld [vmem:[%s5796_s6 + $0x270] sm:$0xff]  }
  0x66   : > { %5034 = vmatmul.mubr.msk.bf16.vlgmr.msra.gmra.mxu0 %vm2149_vm2, %v5322_v8  ;;  %5162 = vmatmul.mubr.msk.bf16.vlgmr.msra.gmra.mxu1 %vm2149_vm2, %v5323_v9  ;;  %v5350_v36 = vld [vmem:[%s5796_s6 + $0x78] sm:$0xff]   ;;  %v5352_v38 = vld [vmem:[%s5796_s6 + $0x80] sm:$0xff]   ;;  %v5354_v40 = vld [vmem:[%s5796_s6 + $0x88] sm:$0xff]  }
  0x67   : > { %5037 = vmatprep.mubr.msk.bf16.mxu0 %vm2149_vm2, %v5324_v10  ;;  %5165 = vmatprep.mubr.msk.bf16.mxu1 %vm2149_vm2, %v5325_v11  ;;  %v5351_v37 = vld [vmem:[%s5796_s6 + $0x278] sm:$0xff]   ;;  %v5353_v39 = vld [vmem:[%s5796_s6 + $0x280] sm:$0xff]   ;;  %v5355_v41 = vld [vmem:[%s5796_s6 + $0x288] sm:$0xff]  }
  0x68   : > { %v5356_v42 = vld [vmem:[%s5796_s6 + $0x90] sm:$0xff]   ;;  %v5358_v44 = vld [vmem:[%s5796_s6 + $0x98] sm:$0xff]   ;;  %v5360_v46 = vld [vmem:[%s5796_s6 + $0xa0] sm:$0xff]  }
  0x69   : > { %v5357_v43 = vld [vmem:[%s5796_s6 + $0x290] sm:$0xff]   ;;  %v5359_v45 = vld [vmem:[%s5796_s6 + $0x298] sm:$0xff]   ;;  %v5361_v47 = vld [vmem:[%s5796_s6 + $0x2a0] sm:$0xff]  }
  0x6a   : > { %v5362_v48 = vld [vmem:[%s5796_s6 + $0xa8] sm:$0xff]   ;;  %v5364_v50 = vld [vmem:[%s5796_s6 + $0xb0] sm:$0xff]   ;;  %v5366_v52 = vld [vmem:[%s5796_s6 + $0xb8] sm:$0xff]  }
  0x6b   : > { %v5363_v49 = vld [vmem:[%s5796_s6 + $0x2a8] sm:$0xff]   ;;  %v5365_v51 = vld [vmem:[%s5796_s6 + $0x2b0] sm:$0xff]   ;;  %v5367_v53 = vld [vmem:[%s5796_s6 + $0x2b8] sm:$0xff]  }
  0x6c   : > { %v5368_v54 = vld [vmem:[%s5796_s6 + $0xc0] sm:$0xff]   ;;  %v5370_v56 = vld [vmem:[%s5796_s6 + $0xc8] sm:$0xff]   ;;  %v5372_v58 = vld [vmem:[%s5796_s6 + $0xd0] sm:$0xff]  }
  0x6d   : > { %v5369_v55 = vld [vmem:[%s5796_s6 + $0x2c0] sm:$0xff]   ;;  %v5371_v57 = vld [vmem:[%s5796_s6 + $0x2c8] sm:$0xff]   ;;  %v5373_v59 = vld [vmem:[%s5796_s6 + $0x2d0] sm:$0xff]  }
  0x6e   : > { %5038 = vmatmul.mubr.msk.bf16.gmra.mxu0 %vm2149_vm2, %v5326_v12  ;;  %5166 = vmatmul.mubr.msk.bf16.gmra.mxu1 %vm2149_vm2, %v5327_v13  ;;  %v5374_v60 = vld [vmem:[%s5796_s6 + $0xd8] sm:$0xff]   ;;  %v5376_v62 = vld [vmem:[%s5796_s6 + $0xe0] sm:$0xff]   ;;  %v5378_v0 = vld [vmem:[%s5796_s6 + $0xe8] sm:$0xff]  }
  0x6f   : > { %5041 = vmatprep.mubr.msk.bf16.mxu0 %vm2149_vm2, %v5328_v14  ;;  %5169 = vmatprep.mubr.msk.bf16.mxu1 %vm2149_vm2, %v5329_v15  ;;  %v5375_v61 = vld [vmem:[%s5796_s6 + $0x2d8] sm:$0xff]   ;;  %v5377_v63 = vld [vmem:[%s5796_s6 + $0x2e0] sm:$0xff]   ;;  %v5379_v1 = vld [vmem:[%s5796_s6 + $0x2e8] sm:$0xff]  }
  0x70   : > { %v5380_v2 = vld [vmem:[%s5796_s6 + $0xf0] sm:$0xff]   ;;  %v5382_v4 = vld [vmem:[%s5796_s6 + $0xf8] sm:$0xff]   ;;  %v5384_v6 = vld [vmem:[%s5796_s6 + $0x100] sm:$0xff]  }
  0x71   : > { %v5381_v3 = vld [vmem:[%s5796_s6 + $0x2f0] sm:$0xff]   ;;  %v5383_v5 = vld [vmem:[%s5796_s6 + $0x2f8] sm:$0xff]   ;;  %v5385_v7 = vld [vmem:[%s5796_s6 + $0x300] sm:$0xff]  }
  0x72   : > { %v5386_v8 = vld [vmem:[%s5796_s6 + $0x108] sm:$0xff]   ;;  %v5388_v10 = vld [vmem:[%s5796_s6 + $0x110] sm:$0xff]   ;;  %v5390_v12 = vld [vmem:[%s5796_s6 + $0x118] sm:$0xff]  }
  0x73   : > { %v5387_v9 = vld [vmem:[%s5796_s6 + $0x308] sm:$0xff]   ;;  %v5389_v11 = vld [vmem:[%s5796_s6 + $0x310] sm:$0xff]   ;;  %v5391_v13 = vld [vmem:[%s5796_s6 + $0x318] sm:$0xff]  }
  0x74   : > { %v5392_v14 = vld [vmem:[%s5796_s6 + $0x120] sm:$0xff]  }
  0x75   : > { %v5393_v15 = vld [vmem:[%s5796_s6 + $0x320] sm:$0xff]  }
  0x76   : > { %5042 = vmatmul.mubr.msk.bf16.gmra.mxu0 %vm2149_vm2, %v5330_v16  ;;  %5170 = vmatmul.mubr.msk.bf16.gmra.mxu1 %vm2149_vm2, %v5331_v17  ;;  %v5394_v16 = vld [vmem:[%s5796_s6 + $0x128] sm:$0xff]  }
  0x77   : > { %5045 = vmatprep.mubr.msk.bf16.mxu0 %vm2149_vm2, %v5332_v18  ;;  %5173 = vmatprep.mubr.msk.bf16.mxu1 %vm2149_vm2, %v5333_v19  ;;  %v5395_v17 = vld [vmem:[%s5796_s6 + $0x328] sm:$0xff]   ;;  %v5396_v18 = vld [vmem:[%s5796_s6 + $0x130] sm:$0xff]  }
  0x78   : > { %v5397_v19 = vld [vmem:[%s5796_s6 + $0x330] sm:$0xff]  }
  0x7e   : > { %5046 = vmatmul.mubr.msk.bf16.gmra.mxu0 %vm2149_vm2, %v5334_v20  ;;  %5174 = vmatmul.mubr.msk.bf16.gmra.mxu1 %vm2149_vm2, %v5335_v21  ;;  %v5398_v20 = vld [vmem:[%s5796_s6 + $0x138] sm:$0xff]  }
  0x7f   : > { %5049 = vmatprep.mubr.msk.bf16.mxu0 %vm2149_vm2, %v5336_v22  ;;  %5177 = vmatprep.mubr.msk.bf16.mxu1 %vm2149_vm2, %v5337_v23  ;;  %v5399_v21 = vld [vmem:[%s5796_s6 + $0x338] sm:$0xff]   ;;  %v5400_v22 = vld [vmem:[%s5796_s6 + $0x140] sm:$0xff]  }
  0x80   : > { %v5401_v23 = vld [vmem:[%s5796_s6 + $0x340] sm:$0xff]  }
  0x86   : > { %5050 = vmatmul.mubr.msk.bf16.gmra.mxu0 %vm2149_vm2, %v5338_v24  ;;  %5178 = vmatmul.mubr.msk.bf16.gmra.mxu1 %vm2149_vm2, %v5339_v25  ;;  %v5402_v24 = vld [vmem:[%s5796_s6 + $0x148] sm:$0xff]  }
  0x87   : > { %5053 = vmatprep.mubr.msk.bf16.mxu0 %vm2149_vm2, %v5340_v26  ;;  %5181 = vmatprep.mubr.msk.bf16.mxu1 %vm2149_vm2, %v5341_v27  ;;  %v5403_v25 = vld [vmem:[%s5796_s6 + $0x348] sm:$0xff]   ;;  %v5404_v26 = vld [vmem:[%s5796_s6 + $0x150] sm:$0xff]  }
  0x88   : > { %v5405_v27 = vld [vmem:[%s5796_s6 + $0x350] sm:$0xff]  }
  0x8e   : > { %5054 = vmatmul.mubr.msk.bf16.gmra.mxu0 %vm2149_vm2, %v5342_v28  ;;  %5182 = vmatmul.mubr.msk.bf16.gmra.mxu1 %vm2149_vm2, %v5343_v29  ;;  %v5406_v28 = vld [vmem:[%s5796_s6 + $0x158] sm:$0xff]  }
  0x8f   : > { %5057 = vmatprep.mubr.msk.bf16.mxu0 %vm2149_vm2, %v5344_v30  ;;  %5185 = vmatprep.mubr.msk.bf16.mxu1 %vm2149_vm2, %v5345_v31  ;;  %v5407_v29 = vld [vmem:[%s5796_s6 + $0x358] sm:$0xff]   ;;  %v5408_v30 = vld [vmem:[%s5796_s6 + $0x160] sm:$0xff]  }
  0x90   : > { %v5409_v31 = vld [vmem:[%s5796_s6 + $0x360] sm:$0xff]  }
  0x96   : > { %5058 = vmatmul.mubr.msk.bf16.gmra.mxu0 %vm2149_vm2, %v5346_v32  ;;  %5186 = vmatmul.mubr.msk.bf16.gmra.mxu1 %vm2149_vm2, %v5347_v33  ;;  %v5410_v32 = vld [vmem:[%s5796_s6 + $0x168] sm:$0xff]  }
  0x97   : > { %5061 = vmatprep.mubr.msk.bf16.mxu0 %vm2149_vm2, %v5348_v34  ;;  %5189 = vmatprep.mubr.msk.bf16.mxu1 %vm2149_vm2, %v5349_v35  ;;  %v5411_v33 = vld [vmem:[%s5796_s6 + $0x368] sm:$0xff]   ;;  %v5412_v34 = vld [vmem:[%s5796_s6 + $0x170] sm:$0xff]  }
  0x98   : > { %v5413_v35 = vld [vmem:[%s5796_s6 + $0x370] sm:$0xff]  }
  0x9e   : > { %5062 = vmatmul.mubr.msk.bf16.gmra.mxu0 %vm2149_vm2, %v5350_v36  ;;  %5190 = vmatmul.mubr.msk.bf16.gmra.mxu1 %vm2149_vm2, %v5351_v37  ;;  %v5414_v36 = vld [vmem:[%s5796_s6 + $0x178] sm:$0xff]  }
  0x9f   : > { %5065 = vmatprep.mubr.msk.bf16.mxu0 %vm2149_vm2, %v5352_v38  ;;  %5193 = vmatprep.mubr.msk.bf16.mxu1 %vm2149_vm2, %v5353_v39  ;;  %v5415_v37 = vld [vmem:[%s5796_s6 + $0x378] sm:$0xff]   ;;  %v5416_v38 = vld [vmem:[%s5796_s6 + $0x180] sm:$0xff]  }
  0xa0   : > { %v5417_v39 = vld [vmem:[%s5796_s6 + $0x380] sm:$0xff]  }
  0xa6   : > { %5066 = vmatmul.mubr.msk.bf16.gmra.mxu0 %vm2149_vm2, %v5354_v40  ;;  %5194 = vmatmul.mubr.msk.bf16.gmra.mxu1 %vm2149_vm2, %v5355_v41  ;;  %v5418_v40 = vld [vmem:[%s5796_s6 + $0x188] sm:$0xff]  }
  0xa7   : > { %5069 = vmatprep.mubr.msk.bf16.mxu0 %vm2149_vm2, %v5356_v42  ;;  %5197 = vmatprep.mubr.msk.bf16.mxu1 %vm2149_vm2, %v5357_v43  ;;  %v5419_v41 = vld [vmem:[%s5796_s6 + $0x388] sm:$0xff]   ;;  %v5420_v42 = vld [vmem:[%s5796_s6 + $0x190] sm:$0xff]  }
  0xa8   : > { %v5421_v43 = vld [vmem:[%s5796_s6 + $0x390] sm:$0xff]  }
  0xae   : > { %5070 = vmatmul.mubr.msk.bf16.gmra.mxu0 %vm2149_vm2, %v5358_v44  ;;  %5198 = vmatmul.mubr.msk.bf16.gmra.mxu1 %vm2149_vm2, %v5359_v45 }
  0xaf   : > { %5073 = vmatprep.mubr.msk.bf16.mxu0 %vm2149_vm2, %v5360_v46  ;;  %5201 = vmatprep.mubr.msk.bf16.mxu1 %vm2149_vm2, %v5361_v47 }
  0xb6   : > { %5074 = vmatmul.mubr.msk.bf16.gmra.mxu0 %vm2149_vm2, %v5362_v48  ;;  %5202 = vmatmul.mubr.msk.bf16.gmra.mxu1 %vm2149_vm2, %v5363_v49 }
  0xb7   : > { %5077 = vmatprep.mubr.msk.bf16.mxu0 %vm2149_vm2, %v5364_v50  ;;  %5205 = vmatprep.mubr.msk.bf16.mxu1 %vm2149_vm2, %v5365_v51  ;;  %v5422_v50 = vld [vmem:[%s5796_s6 + $0x198] sm:$0xff]  }
  0xb8   : > { %v5423_v51 = vld [vmem:[%s5796_s6 + $0x398] sm:$0xff]  }
  0xbe   : > { %5078 = vmatmul.mubr.msk.bf16.gmra.mxu0 %vm2149_vm2, %v5366_v52  ;;  %5206 = vmatmul.mubr.msk.bf16.gmra.mxu1 %vm2149_vm2, %v5367_v53  ;;  %v5424_v52 = vld [vmem:[%s5796_s6 + $0x1a0] sm:$0xff]  }
  0xbf   : > { %5081 = vmatprep.mubr.msk.bf16.mxu0 %vm2149_vm2, %v5368_v54  ;;  %5209 = vmatprep.mubr.msk.bf16.mxu1 %vm2149_vm2, %v5369_v55  ;;  %v5425_v53 = vld [vmem:[%s5796_s6 + $0x3a0] sm:$0xff]  }
  0xc6   : > { %5082 = vmatmul.mubr.msk.bf16.gmra.mxu0 %vm2149_vm2, %v5370_v56  ;;  %5210 = vmatmul.mubr.msk.bf16.gmra.mxu1 %vm2149_vm2, %v5371_v57 }
  0xc7   : > { %5085 = vmatprep.mubr.msk.bf16.mxu0 %vm2149_vm2, %v5372_v58  ;;  %5213 = vmatprep.mubr.msk.bf16.mxu1 %vm2149_vm2, %v5373_v59 }
  0xce   : > { %5086 = vmatmul.mubr.msk.bf16.gmra.mxu0 %vm2149_vm2, %v5374_v60  ;;  %5214 = vmatmul.mubr.msk.bf16.gmra.mxu1 %vm2149_vm2, %v5375_v61 }
  0xcf   : > { %5089 = vmatprep.mubr.msk.bf16.mxu0 %vm2149_vm2, %v5376_v62  ;;  %5217 = vmatprep.mubr.msk.bf16.mxu1 %vm2149_vm2, %v5377_v63  ;;  %v5426_v62 = vld [vmem:[%s5796_s6 + $0x1a8] sm:$0xff]  }
  0xd0   : > { %v5427_v63 = vld [vmem:[%s5796_s6 + $0x3a8] sm:$0xff]  }
  0xd6   : > { %5090 = vmatmul.mubr.msk.bf16.gmra.mxu0 %vm2149_vm2, %v5378_v0  ;;  %5218 = vmatmul.mubr.msk.bf16.gmra.mxu1 %vm2149_vm2, %v5379_v1  ;;  %v5428_v0 = vld [vmem:[%s5796_s6 + $0x1b0] sm:$0xff]  }
  0xd7   : > { %5093 = vmatprep.mubr.msk.bf16.mxu0 %vm2149_vm2, %v5380_v2  ;;  %5221 = vmatprep.mubr.msk.bf16.mxu1 %vm2149_vm2, %v5381_v3  ;;  %v5429_v1 = vld [vmem:[%s5796_s6 + $0x3b0] sm:$0xff]  }
  0xde   : > { %5094 = vmatmul.mubr.msk.bf16.gmra.mxu0 %vm2149_vm2, %v5382_v4  ;;  %5222 = vmatmul.mubr.msk.bf16.gmra.mxu1 %vm2149_vm2, %v5383_v5 }
  0xdf   : > { %5097 = vmatprep.mubr.msk.bf16.mxu0 %vm2149_vm2, %v5384_v6  ;;  %5225 = vmatprep.mubr.msk.bf16.mxu1 %vm2149_vm2, %v5385_v7 }
  0xe6   : > { %5098 = vmatmul.mubr.msk.bf16.gmra.mxu0 %vm2149_vm2, %v5386_v8  ;;  %5226 = vmatmul.mubr.msk.bf16.gmra.mxu1 %vm2149_vm2, %v5387_v9 }
  0xe7   : > { %5101 = vmatprep.mubr.msk.bf16.mxu0 %vm2149_vm2, %v5388_v10  ;;  %5229 = vmatprep.mubr.msk.bf16.mxu1 %vm2149_vm2, %v5389_v11  ;;  %v5430_v10 = vld [vmem:[%s5796_s6 + $0x1b8] sm:$0xff]  }
  0xe8   : > { %v5431_v11 = vld [vmem:[%s5796_s6 + $0x3b8] sm:$0xff]  }
  0xee   : > { %5102 = vmatmul.mubr.msk.bf16.gmra.mxu0 %vm2149_vm2, %v5390_v12  ;;  %5230 = vmatmul.mubr.msk.bf16.gmra.mxu1 %vm2149_vm2, %v5391_v13  ;;  %v5432_v12 = vld [vmem:[%s5796_s6 + $0x1c0] sm:$0xff]  }
  0xef   : > { %5105 = vmatprep.mubr.msk.bf16.mxu0 %vm2149_vm2, %v5392_v14  ;;  %5233 = vmatprep.mubr.msk.bf16.mxu1 %vm2149_vm2, %v5393_v15  ;;  %v5433_v13 = vld [vmem:[%s5796_s6 + $0x3c0] sm:$0xff]  }
  0xf6   : > { %5106 = vmatmul.mubr.msk.bf16.gmra.mxu0 %vm2149_vm2, %v5394_v16  ;;  %5234 = vmatmul.mubr.msk.bf16.gmra.mxu1 %vm2149_vm2, %v5395_v17 }
  0xf7   : > { %5109 = vmatprep.mubr.msk.bf16.mxu0 %vm2149_vm2, %v5396_v18  ;;  %5237 = vmatprep.mubr.msk.bf16.mxu1 %vm2149_vm2, %v5397_v19 }
  0xfe   : > { %5110 = vmatmul.mubr.msk.bf16.gmra.mxu0 %vm2149_vm2, %v5398_v20  ;;  %5238 = vmatmul.mubr.msk.bf16.gmra.mxu1 %vm2149_vm2, %v5399_v21 }
  0xff   : > { %5113 = vmatprep.mubr.msk.bf16.mxu0 %vm2149_vm2, %v5400_v22  ;;  %5241 = vmatprep.mubr.msk.bf16.mxu1 %vm2149_vm2, %v5401_v23  ;;  %v5434_v22 = vld [vmem:[%s5796_s6 + $0x1c8] sm:$0xff]  }
 0x100   : > { %v5435_v23 = vld [vmem:[%s5796_s6 + $0x3c8] sm:$0xff]  }
 0x106   : > { %5114 = vmatmul.mubr.msk.bf16.gmra.mxu0 %vm2149_vm2, %v5402_v24  ;;  %5242 = vmatmul.mubr.msk.bf16.gmra.mxu1 %vm2149_vm2, %v5403_v25  ;;  %v5436_v24 = vld [vmem:[%s5796_s6 + $0x1d0] sm:$0xff]  }
 0x107   : > { %5117 = vmatprep.mubr.msk.bf16.mxu0 %vm2149_vm2, %v5404_v26  ;;  %5245 = vmatprep.mubr.msk.bf16.mxu1 %vm2149_vm2, %v5405_v27  ;;  %v5437_v25 = vld [vmem:[%s5796_s6 + $0x3d0] sm:$0xff]  }
 0x10e   : > { %5118 = vmatmul.mubr.msk.bf16.gmra.mxu0 %vm2149_vm2, %v5406_v28  ;;  %5246 = vmatmul.mubr.msk.bf16.gmra.mxu1 %vm2149_vm2, %v5407_v29 }
 0x10f   : > { %5121 = vmatprep.mubr.msk.bf16.mxu0 %vm2149_vm2, %v5408_v30  ;;  %5249 = vmatprep.mubr.msk.bf16.mxu1 %vm2149_vm2, %v5409_v31 }
 0x116   : > { %5122 = vmatmul.mubr.msk.bf16.gmra.mxu0 %vm2149_vm2, %v5410_v32  ;;  %5250 = vmatmul.mubr.msk.bf16.gmra.mxu1 %vm2149_vm2, %v5411_v33 }
 0x117   : > { %5125 = vmatprep.mubr.msk.bf16.mxu0 %vm2149_vm2, %v5412_v34  ;;  %5253 = vmatprep.mubr.msk.bf16.mxu1 %vm2149_vm2, %v5413_v35  ;;  %v5438_v34 = vld [vmem:[%s5796_s6 + $0x1d8] sm:$0xff]  }
 0x118   : > { %v5439_v35 = vld [vmem:[%s5796_s6 + $0x3d8] sm:$0xff]  }
 0x11e   : > { %5126 = vmatmul.mubr.msk.bf16.gmra.mxu0 %vm2149_vm2, %v5414_v36  ;;  %5254 = vmatmul.mubr.msk.bf16.gmra.mxu1 %vm2149_vm2, %v5415_v37  ;;  %v5440_v36 = vld [vmem:[%s5796_s6 + $0x1e0] sm:$0xff]  }
 0x11f   : > { %5129 = vmatprep.mubr.msk.bf16.mxu0 %vm2149_vm2, %v5416_v38  ;;  %5257 = vmatprep.mubr.msk.bf16.mxu1 %vm2149_vm2, %v5417_v39  ;;  %v5441_v37 = vld [vmem:[%s5796_s6 + $0x3e0] sm:$0xff]  }
 0x126   : > { %v5998_v44 = vpop.f32.mrf.mxu0  ;;  %5130 = vmatmul.mubr.msk.bf16.gmra.mxu0 %vm2149_vm2, %v5418_v40  ;;  %v6001_v45 = vpop.f32.mrf.mxu1  ;;  %5258 = vmatmul.mubr.msk.bf16.gmra.mxu1 %vm2149_vm2, %v5419_v41 }
 0x127   : > { %5133 = vmatprep.mubr.msk.bf16.mxu0 %vm2149_vm2, %v5420_v42  ;;  %5261 = vmatprep.mubr.msk.bf16.mxu1 %vm2149_vm2, %v5421_v43 }
 0x128   : > { %v6006_v46 = vpop.f32.mrf.mxu0  ;;  %v6008_v47 = vpop.f32.mrf.mxu1 }
 0x12a   : > { %v6010_v48 = vpop.f32.mrf.mxu0  ;;  %v6012_v49 = vpop.f32.mrf.mxu1 }
 0x12c   : > { %v6018_v54 = vpop.f32.mrf.mxu0  ;;  %v6020_v55 = vpop.f32.mrf.mxu1 }
 0x12e   : > { %v6022_v56 = vpop.f32.mrf.mxu0  ;;  %5134 = vmatmul.mubr.msk.bf16.gmra.mxu0 %vm2149_vm2, %v5422_v50  ;;  %v6025_v57 = vpop.f32.mrf.mxu1  ;;  %5262 = vmatmul.mubr.msk.bf16.gmra.mxu1 %vm2149_vm2, %v5423_v51 }
 0x12f   : > { %5137 = vmatprep.mubr.msk.bf16.mxu0 %vm2149_vm2, %v5424_v52  ;;  %5265 = vmatprep.mubr.msk.bf16.mxu1 %vm2149_vm2, %v5425_v53  ;;  %v5442_v52 = vld [vmem:[%s5796_s6 + $0x1e8] sm:$0xff]  }
 0x130   : > { %v6030_v58 = vpop.f32.mrf.mxu0  ;;  %v6032_v59 = vpop.f32.mrf.mxu1  ;;  %v5443_v53 = vld [vmem:[%s5796_s6 + $0x3e8] sm:$0xff]  }
 0x132   : > { %v6034_v60 = vpop.f32.mrf.mxu0  ;;  %v6036_v61 = vpop.f32.mrf.mxu1 }
 0x134   : > { %v6042_v2 = vpop.f32.mrf.mxu0  ;;  %v6044_v3 = vpop.f32.mrf.mxu1 }
 0x136   : > { %v6046_v4 = vpop.f32.mrf.mxu0  ;;  %5138 = vmatmul.mubr.msk.bf16.gmra.mxu0 %vm2149_vm2, %v5426_v62  ;;  %v6049_v5 = vpop.f32.mrf.mxu1  ;;  %5266 = vmatmul.mubr.msk.bf16.gmra.mxu1 %vm2149_vm2, %v5427_v63  ;;  %v5444_v62 = vld [vmem:[%s5796_s6 + $0x1f0] sm:$0xff]  }
 0x137   : > { %5141 = vmatprep.mubr.msk.bf16.mxu0 %vm2149_vm2, %v5428_v0  ;;  %5269 = vmatprep.mubr.msk.bf16.mxu1 %vm2149_vm2, %v5429_v1  ;;  %v5445_v63 = vld [vmem:[%s5796_s6 + $0x3f0] sm:$0xff]  }
 0x138   : > { %v6054_v6 = vpop.f32.mrf.mxu0  ;;  %v6056_v7 = vpop.f32.mrf.mxu1 }
 0x13a   : > { %v6058_v8 = vpop.f32.mrf.mxu0  ;;  %v6060_v9 = vpop.f32.mrf.mxu1 }
 0x13c   : > { %v6066_v14 = vpop.f32.mrf.mxu0  ;;  %v6068_v15 = vpop.f32.mrf.mxu1 }
 0x13e   : > { %v6070_v16 = vpop.f32.mrf.mxu0  ;;  %5142 = vmatmul.mubr.msk.bf16.gmra.mxu0 %vm2149_vm2, %v5430_v10  ;;  %v6073_v17 = vpop.f32.mrf.mxu1  ;;  %5270 = vmatmul.mubr.msk.bf16.gmra.mxu1 %vm2149_vm2, %v5431_v11 }
 0x13f   : > { %5145 = vmatprep.mubr.msk.bf16.mxu0 %vm2149_vm2, %v5432_v12  ;;  %5273 = vmatprep.mubr.msk.bf16.mxu1 %vm2149_vm2, %v5433_v13 }
 0x140   : > { %v6078_v18 = vpop.f32.mrf.mxu0  ;;  %v6080_v19 = vpop.f32.mrf.mxu1 }
 0x142   : > { %v6082_v20 = vpop.f32.mrf.mxu0  ;;  %v6084_v21 = vpop.f32.mrf.mxu1 }
 0x144   : > { %v6090_v26 = vpop.f32.mrf.mxu0  ;;  %v6092_v27 = vpop.f32.mrf.mxu1 }
 0x146   : > { %v6094_v28 = vpop.f32.mrf.mxu0  ;;  %5146 = vmatmul.mubr.msk.bf16.gmra.mxu0 %vm2149_vm2, %v5434_v22  ;;  %v6097_v29 = vpop.f32.mrf.mxu1  ;;  %5274 = vmatmul.mubr.msk.bf16.gmra.mxu1 %vm2149_vm2, %v5435_v23 }
 0x147   : > { %5149 = vmatprep.mubr.msk.bf16.mxu0 %vm2149_vm2, %v5436_v24  ;;  %5277 = vmatprep.mubr.msk.bf16.mxu1 %vm2149_vm2, %v5437_v25  ;;  %v5446_v24 = vld [vmem:[%s5796_s6 + $0x1f8] sm:$0xff]  }
 0x148   : > { %v6102_v30 = vpop.f32.mrf.mxu0  ;;  %v6104_v31 = vpop.f32.mrf.mxu1  ;;  %v5447_v25 = vld [vmem:[%s5796_s6 + $0x3f8] sm:$0xff]  }
 0x14a   : > { %v6106_v32 = vpop.f32.mrf.mxu0  ;;  %v6108_v33 = vpop.f32.mrf.mxu1 }
 0x14c   : > { %v6114_v38 = vpop.f32.mrf.mxu0  ;;  %v6116_v39 = vpop.f32.mrf.mxu1 }
 0x14e   : > { %v6118_v40 = vpop.f32.mrf.mxu0  ;;  %5150 = vmatmul.mubr.msk.bf16.gmra.mxu0 %vm2149_vm2, %v5438_v34  ;;  %v6121_v41 = vpop.f32.mrf.mxu1  ;;  %5278 = vmatmul.mubr.msk.bf16.gmra.mxu1 %vm2149_vm2, %v5439_v35 }
 0x14f   : > { %5153 = vmatprep.mubr.msk.bf16.mxu0 %vm2149_vm2, %v5440_v36  ;;  %5281 = vmatprep.mubr.msk.bf16.mxu1 %vm2149_vm2, %v5441_v37 }
 0x150   : > { %v6126_v42 = vpop.f32.mrf.mxu0  ;;  %v6128_v43 = vpop.f32.mrf.mxu1 }
 0x152   : > { %v6130_v50 = vpop.f32.mrf.mxu0  ;;  %v6132_v51 = vpop.f32.mrf.mxu1 }
 0x154   : > { %v6138_v0 = vpop.f32.mrf.mxu0  ;;  %v6140_v1 = vpop.f32.mrf.mxu1 }
 0x155   : > { %6560 = vst [vmem:[#allocation3_spill] sm:$0xff] %v6140_v1 }
 0x156   : > { %v6142_v10 = vpop.f32.mrf.mxu0  ;;  %5154 = vmatmul.mubr.msk.bf16.gmra.mxu0 %vm2149_vm2, %v5442_v52  ;;  %v6145_v11 = vpop.f32.mrf.mxu1  ;;  %5282 = vmatmul.mubr.msk.bf16.gmra.mxu1 %vm2149_vm2, %v5443_v53 }
 0x157   : > { %6561 = vst [vmem:[#allocation4_spill] sm:$0xff] %v6145_v11  ;;  %5157 = vmatprep.mubr.msk.bf16.mxu0 %vm2149_vm2, %v5444_v62  ;;  %5285 = vmatprep.mubr.msk.bf16.mxu1 %vm2149_vm2, %v5445_v63 }
 0x158   : > { %v6150_v12 = vpop.f32.mrf.mxu0  ;;  %v6152_v13 = vpop.f32.mrf.mxu1 }
 0x159   : > { %6562 = vst [vmem:[#allocation5_spill] sm:$0xff] %v6150_v12  ;;  %6563 = vst [vmem:[#allocation6_spill] sm:$0xff] %v6152_v13 }
 0x15a   : > { %v6154_v22 = vpop.f32.mrf.mxu0  ;;  %v6156_v23 = vpop.f32.mrf.mxu1 }
 0x15b   : > { %6564 = vst [vmem:[#allocation7_spill] sm:$0xff] %v6154_v22  ;;  %6565 = vst [vmem:[#allocation8_spill] sm:$0xff] %v6156_v23 }
 0x15c   : > { %v6160_v34 = vpop.f32.mrf.mxu0  ;;  %v6162_v35 = vpop.f32.mrf.mxu1 }
 0x15d   : > { %6566 = vst [vmem:[#allocation9_spill] sm:$0xff] %v6160_v34  ;;  %6567 = vst [vmem:[#allocation10_spill] sm:$0xff] %v6162_v35 }
 0x15e   : > { %v6164_v36 = vpop.f32.mrf.mxu0  ;;  %5158 = vmatmul.mubr.msk.bf16.gmra.mxu0 %vm2149_vm2, %v5446_v24  ;;  %v6167_v37 = vpop.f32.mrf.mxu1  ;;  %5286 = vmatmul.mubr.msk.bf16.gmra.mxu1 %vm2149_vm2, %v5447_v25 }
 0x15f   : > { %6568 = vst [vmem:[#allocation11_spill] sm:$0xff] %v6164_v36  ;;  %6569 = vst [vmem:[#allocation12_spill] sm:$0xff] %v6167_v37 }
 0x160   : > { %v6170_v52 = vpop.f32.mrf.mxu0  ;;  %v6172_v53 = vpop.f32.mrf.mxu1 }
 0x161   : > { %6570 = vst [vmem:[#allocation13_spill] sm:$0xff] %v6170_v52  ;;  %6571 = vst [vmem:[#allocation14_spill] sm:$0xff] %v6172_v53 }
 0x162   : > { %v6174_v62 = vpop.f32.mrf.mxu0  ;;  %v6176_v63 = vpop.f32.mrf.mxu1 }
 0x163   : > { %6572 = vst [vmem:[#allocation15_spill] sm:$0xff] %v6174_v62  ;;  %6573 = vst [vmem:[#allocation16_spill] sm:$0xff] %v6176_v63 }
 0x164   : > { %v6178_v23 = vpop.f32.mrf.mxu0  ;;  %v6180_v34 = vpop.f32.mrf.mxu1 }
 0x165   : > { %6574 = vst [vmem:[#allocation17_spill] sm:$0xff] %v6178_v23  ;;  %6575 = vst [vmem:[#allocation18_spill] sm:$0xff] %v6180_v34 }
 0x166   : > { %v6182_v35 = vpop.f32.mrf.mxu0  ;;  %v6184_v36 = vpop.f32.mrf.mxu1 }
 0x167   : > { %6576 = vst [vmem:[#allocation19_spill] sm:$0xff] %v6182_v35  ;;  %6577 = vst [vmem:[#allocation20_spill] sm:$0xff] %v6184_v36 }
 0x168   : > { %v6186_v24 = vpop.f32.mrf.mxu0  ;;  %v6188_v37 = vpop.f32.mrf.mxu1 }
 0x169   : > { %6578 = vst [vmem:[#allocation21_spill] sm:$0xff] %v6186_v24  ;;  %6579 = vst [vmem:[#allocation22_spill] sm:$0xff] %v6188_v37 }
 0x16a   : > { %v6190_v25 = vpop.f32.mrf.mxu0  ;;  %v6192_v52 = vpop.f32.mrf.mxu1 }
 0x16b   : > { %6580 = vst [vmem:[#allocation23_spill] sm:$0xff] %v6190_v25  ;;  %6581 = vst [vmem:[#allocation24_spill] sm:$0xff] %v6192_v52 }
 0x16c   : > { %v6194_v53 = vpop.f32.mrf.mxu0  ;;  %v6196_v62 = vpop.f32.mrf.mxu1 }
 0x16d   : > { %6582 = vst [vmem:[#allocation25_spill] sm:$0xff] %v6194_v53  ;;  %6583 = vst [vmem:[#allocation26_spill] sm:$0xff] %v6196_v62 }
 0x16e   : > { %v6198_v63 = vpop.f32.mrf.mxu0  ;;  %v6200_v23 = vpop.f32.mrf.mxu1 }
 0x16f   : > { %6584 = vst [vmem:[#allocation27_spill] sm:$0xff] %v6198_v63  ;;  %6585 = vst [vmem:[#allocation28_spill] sm:$0xff] %v6200_v23 }
 0x170   : > { %v6202_v34 = vpop.f32.mrf.mxu0  ;;  %v6204_v35 = vpop.f32.mrf.mxu1 }
 0x171   : > { %6586 = vst [vmem:[#allocation29_spill] sm:$0xff] %v6202_v34  ;;  %6587 = vst [vmem:[#allocation30_spill] sm:$0xff] %v6204_v35 }
 0x172   : > { %v6206_v36 = vpop.f32.mrf.mxu0  ;;  %v6208_v24 = vpop.f32.mrf.mxu1 }
 0x173   : > { %6588 = vst [vmem:[#allocation31_spill] sm:$0xff] %v6206_v36  ;;  %6589 = vst [vmem:[#allocation32_spill] sm:$0xff] %v6208_v24 }
 0x174   : > { %v6210_v37 = vpop.f32.mrf.mxu0  ;;  %v6212_v25 = vpop.f32.mrf.mxu1 }
 0x175   : > { %6590 = vst [vmem:[#allocation33_spill] sm:$0xff] %v6210_v37  ;;  %6591 = vst [vmem:[#allocation34_spill] sm:$0xff] %v6212_v25 }
 0x176   : > { %v6214_v52 = vpop.f32.mrf.mxu0  ;;  %v6216_v53 = vpop.f32.mrf.mxu1 }
 0x177   : > { %6592 = vst [vmem:[#allocation35_spill] sm:$0xff] %v6214_v52  ;;  %6593 = vst [vmem:[#allocation36_spill] sm:$0xff] %v6216_v53 }
 0x178   : > { %v6218_v62 = vpop.f32.mrf.mxu0  ;;  %v6220_v63 = vpop.f32.mrf.mxu1 }
 0x179   : > { %6594 = vst [vmem:[#allocation37_spill] sm:$0xff] %v6218_v62  ;;  %6595 = vst [vmem:[#allocation38_spill] sm:$0xff] %v6220_v63 }
 0x17a   : > { %v6222_v23 = vpop.f32.mrf.mxu0  ;;  %v6224_v34 = vpop.f32.mrf.mxu1 }
 0x17b   : > { %6596 = vst [vmem:[#allocation39_spill] sm:$0xff] %v6222_v23  ;;  %6597 = vst [vmem:[#allocation40_spill] sm:$0xff] %v6224_v34 }
 0x17c   : > { %v6226_v35 = vpop.f32.mrf.mxu0  ;;  %v6228_v36 = vpop.f32.mrf.mxu1 }
 0x17d   : > { %6598 = vst [vmem:[#allocation41_spill] sm:$0xff] %v6226_v35  ;;  %6599 = vst [vmem:[#allocation42_spill] sm:$0xff] %v6228_v36 }
 0x17e   : > { %v6230_v24 = vpop.f32.mrf.mxu0  ;;  %v6232_v37 = vpop.f32.mrf.mxu1 }
 0x17f   : > { %6600 = vst [vmem:[#allocation43_spill] sm:$0xff] %v6230_v24  ;;  %6601 = vst [vmem:[#allocation44_spill] sm:$0xff] %v6232_v37 }
 0x180   : > { %v6234_v25 = vpop.f32.mrf.mxu0  ;;  %v6236_v52 = vpop.f32.mrf.mxu1 }
 0x181   : > { %6602 = vst [vmem:[#allocation45_spill] sm:$0xff] %v6234_v25  ;;  %6603 = vst [vmem:[#allocation46_spill] sm:$0xff] %v6236_v52 }
 0x182   : > { %v6238_v53 = vpop.f32.mrf.mxu0  ;;  %v6240_v62 = vpop.f32.mrf.mxu1 }
 0x183   : > { %6604 = vst [vmem:[#allocation47_spill] sm:$0xff] %v6238_v53  ;;  %6605 = vst [vmem:[#allocation48_spill] sm:$0xff] %v6240_v62 }
 0x184   : > { %v6242_v63 = vpop.f32.mrf.mxu0  ;;  %v6244_v23 = vpop.f32.mrf.mxu1 }
 0x185   : > { %6606 = vst [vmem:[#allocation49_spill] sm:$0xff] %v6242_v63  ;;  %6607 = vst [vmem:[#allocation50_spill] sm:$0xff] %v6244_v23 }
 0x186   : > { %v6246_v34 = vpop.f32.mrf.mxu0  ;;  %v6248_v35 = vpop.f32.mrf.mxu1 }
 0x187   : > { %6608 = vst [vmem:[#allocation51_spill] sm:$0xff] %v6246_v34  ;;  %6609 = vst [vmem:[#allocation52_spill] sm:$0xff] %v6248_v35 }
 0x188   : > { %v6250_v36 = vpop.f32.mrf.mxu0  ;;  %v6252_v24 = vpop.f32.mrf.mxu1 }
 0x189   : > { %6610 = vst [vmem:[#allocation53_spill] sm:$0xff] %v6250_v36  ;;  %6611 = vst [vmem:[#allocation54_spill] sm:$0xff] %v6252_v24 }
 0x18a   : > { %v6254_v37 = vpop.f32.mrf.mxu0  ;;  %v6256_v25 = vpop.f32.mrf.mxu1 }
 0x18b   : > { %6612 = vst [vmem:[#allocation55_spill] sm:$0xff] %v6254_v37  ;;  %6613 = vst [vmem:[#allocation56_spill] sm:$0xff] %v6256_v25 }
 0x18c   : > { %v6258_v52 = vpop.f32.mrf.mxu0  ;;  %v6260_v53 = vpop.f32.mrf.mxu1 }
 0x18d   : > { %6614 = vst [vmem:[#allocation57_spill] sm:$0xff] %v6258_v52  ;;  %6615 = vst [vmem:[#allocation58_spill] sm:$0xff] %v6260_v53 }
 0x18e   : > { %v6262_v62 = vpop.f32.mrf.mxu0  ;;  %v6264_v63 = vpop.f32.mrf.mxu1 }
 0x18f   : > { %6616 = vst [vmem:[#allocation59_spill] sm:$0xff] %v6262_v62  ;;  %6617 = vst [vmem:[#allocation60_spill] sm:$0xff] %v6264_v63 }
 0x190   : > { %v6266_v23 = vpop.f32.mrf.mxu0  ;;  %v6268_v34 = vpop.f32.mrf.mxu1 }
 0x191   : > { %6618 = vst [vmem:[#allocation61_spill] sm:$0xff] %v6266_v23  ;;  %6619 = vst [vmem:[#allocation62_spill] sm:$0xff] %v6268_v34 }
 0x192   : > { %v6270_v35 = vpop.f32.mrf.mxu0  ;;  %v6272_v36 = vpop.f32.mrf.mxu1 }
 0x193   : > { %6620 = vst [vmem:[#allocation63_spill] sm:$0xff] %v6270_v35  ;;  %6621 = vst [vmem:[#allocation64_spill] sm:$0xff] %v6272_v36 }
 0x194   : > { %v6274_v24 = vpop.f32.mrf.mxu0  ;;  %v6276_v37 = vpop.f32.mrf.mxu1 }
 0x195   : > { %6622 = vst [vmem:[#allocation65_spill] sm:$0xff] %v6274_v24  ;;  %6623 = vst [vmem:[#allocation66_spill] sm:$0xff] %v6276_v37 }
 0x196   : > { %v6278_v25 = vpop.f32.mrf.mxu0  ;;  %v6280_v52 = vpop.f32.mrf.mxu1 }
 0x197   : > { %6624 = vst [vmem:[#allocation67_spill] sm:$0xff] %v6278_v25  ;;  %6625 = vst [vmem:[#allocation68_spill] sm:$0xff] %v6280_v52 }
 0x198   : > { %v6282_v53 = vpop.f32.mrf.mxu0  ;;  %v6284_v63 = vpop.f32.mrf.mxu1 }
 0x199   : > { %6626 = vst [vmem:[#allocation69_spill] sm:$0xff] %v6282_v53  ;;  %6627 = vst [vmem:[#allocation70_spill] sm:$0xff] %v6284_v63 }
 0x19a   : > { %v6286_v23 = vpop.f32.mrf.mxu0  ;;  %v6288_v34 = vpop.f32.mrf.mxu1 }
 0x19b   : > { %6628 = vst [vmem:[#allocation71_spill] sm:$0xff] %v6286_v23  ;;  %6629 = vst [vmem:[#allocation72_spill] sm:$0xff] %v6288_v34 }
 0x19c   : > { %v6290_v35 = vpop.f32.mrf.mxu0  ;;  %v6292_v36 = vpop.f32.mrf.mxu1 }
 0x19d   : > { %6630 = vst [vmem:[#allocation73_spill] sm:$0xff] %v6290_v35  ;;  %6631 = vst [vmem:[#allocation74_spill] sm:$0xff] %v6292_v36 }
 0x19e   : > { %v6294_v24 = vpop.f32.mrf.mxu0  ;;  %v6296_v37 = vpop.f32.mrf.mxu1 }
 0x19f   : > { %6632 = vst [vmem:[#allocation75_spill] sm:$0xff] %v6294_v24  ;;  %6633 = vst [vmem:[#allocation76_spill] sm:$0xff] %v6296_v37 }
 0x1a0   : > { %v6298_v25 = vpop.f32.mrf.mxu0  ;;  %v6300_v52 = vpop.f32.mrf.mxu1 }
 0x1a1   : > { %6634 = vst [vmem:[#allocation77_spill] sm:$0xff] %v6298_v25  ;;  %6635 = vst [vmem:[#allocation78_spill] sm:$0xff] %v6300_v52 }
 0x1a2   : > { %v6302_v53 = vpop.f32.mrf.mxu0  ;;  %v6304_v62 = vpop.f32.mrf.mxu1 }
 0x1a3   : > { %6636 = vst [vmem:[#allocation79_spill] sm:$0xff] %v6302_v53  ;;  %6637 = vst [vmem:[#allocation80_spill] sm:$0xff] %v6304_v62 }
 0x1a4   : > { %v6306_v63 = vpop.f32.mrf.mxu0  ;;  %v6308_v23 = vpop.f32.mrf.mxu1 }
 0x1a5   : > { %6638 = vst [vmem:[#allocation81_spill] sm:$0xff] %v6306_v63  ;;  %6639 = vst [vmem:[#allocation82_spill] sm:$0xff] %v6308_v23  ;;  %v6318_v23 = vld [vmem:[%s6558_s2] ss:$0 sm:$0xff] }
 0x1a6   : > { %v5099_v34 = vpop.f32.mrf.mxu0  ;;  %v5227_v35 = vpop.f32.mrf.mxu1 }
 0x1a7   : > { %v3604_v36 = vmax.f32 %v5998_v44, %v5099_v34 }
 0x1a8   : > { %v2831_v24 = vpop.f32.mrf.mxu0  ;;  %v3343_v37 = vpop.f32.mrf.mxu1 }
 0x1a9   : > { %v3605_v25 = vmax.f32 %v3604_v36, %v6001_v45  ;;  %v3598_v52 = vmax.f32 %v6006_v46, %v2831_v24 }
 0x1aa   : > { %v5100_v53 = vpop.f32.mrf.mxu0  ;;  %v5228_v22 = vpop.f32.mrf.mxu1 }
 0x1ab   : > { %v3606_v62 = vmax.f32 %v3605_v25, %v5227_v35  ;;  %v3599_v63 = vmax.f32 %v3598_v52, %v6008_v47  ;;  %v3607_v13 = vmax.f32 %v6010_v48, %v5100_v53 }
 0x1ac   : > { %v2834_v44 = vpop.f32.mrf.mxu0  ;;  %v3346_v34 = vpop.f32.mrf.mxu1 }
 0x1ad   : > { %v3600_v12 = vmax.f32 %v3599_v63, %v3343_v37  ;;  %v3608_v45 = vmax.f32 %v3607_v13, %v6012_v49  ;;  %v3601_v46 = vmax.f32 %v6018_v54, %v2834_v44  ;;  %v3799_v36 = vadd.f32 %v6318_v23, %v3606_v62 }
 0x1ae   : > { %v5103_v35 = vpop.f32.mrf.mxu0  ;;  %v5231_v24 = vpop.f32.mrf.mxu1 }
 0x1af   : > { %v3609_v25 = vmax.f32 %v3608_v45, %v5228_v22  ;;  %v3602_v11 = vmax.f32 %v3601_v46, %v6020_v55  ;;  %v3797_v1 = vadd.f32 %v6318_v23, %v3600_v12  ;;  %v3616_v47 = vmax.f32 %v6022_v56, %v5103_v35 }
 0x1b0   : > { %v2847_v48 = vpop.f32.mrf.mxu0  ;;  %v3359_v52 = vpop.f32.mrf.mxu1  ;;  %v3863_v54 = vmax.f32 %v3799_v36, 0.0 }
 0x1b1   : > { %v3800_v37 = vadd.f32 %v6318_v23, %v3609_v25  ;;  %v3603_v53 = vmax.f32 %v3602_v11, %v3346_v34  ;;  %v3610_v49 = vmax.f32 %v6030_v58, %v2847_v48  ;;  %v3617_v13 = vmax.f32 %v3616_v47, %v6025_v57 }
 0x1b2   : > { %v5104_v62 = vpop.f32.mrf.mxu0  ;;  %v5232_v63 = vpop.f32.mrf.mxu1  ;;  %v3861_v44 = vmax.f32 %v3797_v1, 0.0 }
 0x1b3   : > { %v3864_v22 = vmax.f32 %v3800_v37, 0.0  ;;  %v3798_v55 = vadd.f32 %v6318_v23, %v3603_v53  ;;  %v3611_v12 = vmax.f32 %v3610_v49, %v6032_v59  ;;  %v3619_v56 = vmax.f32 %v6034_v60, %v5104_v62 }
 0x1b4   : > { %v3618_v58 = vmax.f32 %v3617_v13, %v5231_v24  ;;  %v2850_v11 = vpop.f32.mrf.mxu0  ;;  %v3362_v34 = vpop.f32.mrf.mxu1 }
 0x1b5   : > { %v4716_v57 = vpack.c.bf16 %v3864_v22, %v3863_v54  ;;  %v3862_v45 = vmax.f32 %v3798_v55, 0.0  ;;  %v3612_v46 = vmax.f32 %v3611_v12, %v3359_v52  ;;  %v3620_v36 = vmax.f32 %v3619_v56, %v6036_v61 }
 0x1b6   : > { %v3803_v59 = vadd.f32 %v6318_v23, %v3618_v58  ;;  %v3613_v60 = vmax.f32 %v6042_v2, %v2850_v11  ;;  %v5107_v1 = vpop.f32.mrf.mxu0  ;;  %v5235_v35 = vpop.f32.mrf.mxu1 }
 0x1b7   : > { %4868 = vst [vmem:[%s6337_s14 + $0x8] sm:$0xff] %v4716_v57   ;;  %v4711_v25 = vpack.c.bf16 %v3862_v45, %v3861_v44  ;;  %v3621_v47 = vmax.f32 %v3620_v36, %v5232_v63  ;;  %v3628_v48 = vmax.f32 %v6046_v4, %v5107_v1  ;;  %v3801_v52 = vadd.f32 %v6318_v23, %v3612_v46 }
 0x1b8   : > { %v3614_v24 = vmax.f32 %v3613_v60, %v6044_v3  ;;  %v2863_v37 = vpop.f32.mrf.mxu0  ;;  %v3375_v53 = vpop.f32.mrf.mxu1  ;;  %v3867_v54 = vmax.f32 %v3803_v59, 0.0 }
 0x1b9   : > { %4712 = vst [vmem:[%s6337_s14] sm:$0xff] %v4711_v25   ;;  %v3804_v61 = vadd.f32 %v6318_v23, %v3621_v47  ;;  %v3629_v49 = vmax.f32 %v3628_v48, %v6049_v5  ;;  %v3622_v2 = vmax.f32 %v6054_v6, %v2863_v37  ;;  %v3865_v58 = vmax.f32 %v3801_v52, 0.0 }
 0x1ba   : > { %v3615_v13 = vmax.f32 %v3614_v24, %v3362_v34  ;;  %v5108_v62 = vpop.f32.mrf.mxu0  ;;  %v5236_v22 = vpop.f32.mrf.mxu1 }
 0x1bb   : > { %v3868_v63 = vmax.f32 %v3804_v61, 0.0  ;;  %v3630_v4 = vmax.f32 %v3629_v49, %v5235_v35  ;;  %v3623_v3 = vmax.f32 %v3622_v2, %v6056_v7  ;;  %v3631_v55 = vmax.f32 %v6058_v8, %v5108_v62 }
 0x1bc   : > { %v3802_v12 = vadd.f32 %v6318_v23, %v3615_v13  ;;  %v2866_v56 = vpop.f32.mrf.mxu0  ;;  %v3378_v44 = vpop.f32.mrf.mxu1 }
 0x1bd   : > { %v4726_v11 = vpack.c.bf16 %v3868_v63, %v3867_v54  ;;  %v3632_v5 = vmax.f32 %v3631_v55, %v6060_v9  ;;  %v3807_v34 = vadd.f32 %v6318_v23, %v3630_v4  ;;  %v3624_v57 = vmax.f32 %v3623_v3, %v3375_v53 }
 0x1be   : > { %v3866_v6 = vmax.f32 %v3802_v12, 0.0  ;;  %v3625_v45 = vmax.f32 %v6066_v14, %v2866_v56  ;;  %v5111_v46 = vpop.f32.mrf.mxu0  ;;  %v5239_v36 = vpop.f32.mrf.mxu1 }
 0x1bf   : > { %4870 = vst [vmem:[%s6337_s14 + $0x18] sm:$0xff] %v4726_v11   ;;  %v3633_v7 = vmax.f32 %v3632_v5, %v5236_v22  ;;  %v3640_v8 = vmax.f32 %v6070_v16, %v5111_v46  ;;  %v3871_v48 = vmax.f32 %v3807_v34, 0.0  ;;  %v3805_v14 = vadd.f32 %v6318_v23, %v3624_v57 }
 0x1c0   : > { %v4721_v59 = vpack.c.bf16 %v3866_v6, %v3865_v58  ;;  %v3626_v60 = vmax.f32 %v3625_v45, %v6068_v15  ;;  %v2879_v1 = vpop.f32.mrf.mxu0  ;;  %v3391_v35 = vpop.f32.mrf.mxu1 }
 0x1c1   : > { %v3808_v9 = vadd.f32 %v6318_v23, %v3633_v7  ;;  %v3641_v25 = vmax.f32 %v3640_v8, %v6073_v17  ;;  %v3634_v47 = vmax.f32 %v6078_v18, %v2879_v1  ;;  %v3869_v62 = vmax.f32 %v3805_v14, 0.0 }
 0x1c2   : > { %4869 = vst [vmem:[%s6337_s14 + $0x10] sm:$0xff] %v4721_v59   ;;  %v3627_v24 = vmax.f32 %v3626_v60, %v3378_v44  ;;  %v5112_v37 = vpop.f32.mrf.mxu0  ;;  %v5240_v53 = vpop.f32.mrf.mxu1 }
 0x1c3   : > { %v3872_v52 = vmax.f32 %v3808_v9, 0.0  ;;  %v3642_v16 = vmax.f32 %v3641_v25, %v5239_v36  ;;  %v3635_v15 = vmax.f32 %v3634_v47, %v6080_v19  ;;  %v3643_v61 = vmax.f32 %v6082_v20, %v5112_v37 }
 0x1c4   : > { %v3806_v49 = vadd.f32 %v6318_v23, %v3627_v24  ;;  %v2882_v2 = vpop.f32.mrf.mxu0  ;;  %v3394_v17 = vpop.f32.mrf.mxu1 }
 0x1c5   : > { %v4736_v54 = vpack.c.bf16 %v3872_v52, %v3871_v48  ;;  %v3636_v18 = vmax.f32 %v3635_v15, %v3391_v35  ;;  %v3644_v13 = vmax.f32 %v3643_v61, %v6084_v21  ;;  %v3811_v63 = vadd.f32 %v6318_v23, %v3642_v16 }
 0x1c6   : > { %v3870_v22 = vmax.f32 %v3806_v49, 0.0  ;;  %v3637_v4 = vmax.f32 %v6090_v26, %v2882_v2  ;;  %v5115_v3 = vpop.f32.mrf.mxu0  ;;  %v5243_v55 = vpop.f32.mrf.mxu1 }
 0x1c7   : > { %4872 = vst [vmem:[%s6337_s14 + $0x28] sm:$0xff] %v4736_v54   ;;  %v3645_v19 = vmax.f32 %v3644_v13, %v5240_v53  ;;  %v3652_v20 = vmax.f32 %v6094_v28, %v5115_v3  ;;  %v3809_v21 = vadd.f32 %v6318_v23, %v3636_v18  ;;  %v3875_v26 = vmax.f32 %v3811_v63, 0.0 }
 0x1c8   : > { %v4731_v12 = vpack.c.bf16 %v3870_v22, %v3869_v62  ;;  %v3638_v56 = vmax.f32 %v3637_v4, %v6092_v27  ;;  %v2895_v44 = vpop.f32.mrf.mxu0  ;;  %v3407_v58 = vpop.f32.mrf.mxu1 }
 0x1c9   : > { %v3812_v11 = vadd.f32 %v6318_v23, %v3645_v19  ;;  %v3653_v5 = vmax.f32 %v3652_v20, %v6097_v29  ;;  %v3646_v6 = vmax.f32 %v6102_v30, %v2895_v44  ;;  %v3873_v60 = vmax.f32 %v3809_v21, 0.0 }
 0x1ca   : > { %4871 = vst [vmem:[%s6337_s14 + $0x20] sm:$0xff] %v4731_v12   ;;  %v3639_v34 = vmax.f32 %v3638_v56, %v3394_v17  ;;  %v5116_v57 = vpop.f32.mrf.mxu0  ;;  %v5244_v45 = vpop.f32.mrf.mxu1  ;;  %v6640_v56 = vld [vmem:[#allocation3_spill] sm:$0xff] }
 0x1cb   : > { %v3876_v46 = vmax.f32 %v3812_v11, 0.0  ;;  %v3654_v28 = vmax.f32 %v3653_v5, %v5243_v55  ;;  %v3647_v27 = vmax.f32 %v3646_v6, %v6104_v31  ;;  %v3655_v36 = vmax.f32 %v6106_v32, %v5116_v57  ;;  %v6641_v5 = vld [vmem:[#allocation4_spill] sm:$0xff] }
 0x1cc   : > { %v3810_v7 = vadd.f32 %v6318_v23, %v3639_v34  ;;  %v2898_v8 = vpop.f32.mrf.mxu0  ;;  %v3410_v59 = vpop.f32.mrf.mxu1 }
 0x1cd   : > { %v4746_v29 = vpack.c.bf16 %v3876_v46, %v3875_v26  ;;  %v3656_v30 = vmax.f32 %v3655_v36, %v6108_v33  ;;  %v3815_v35 = vadd.f32 %v6318_v23, %v3654_v28  ;;  %v3648_v9 = vmax.f32 %v3647_v27, %v3407_v58  ;;  %v6642_v26 = vld [vmem:[#allocation5_spill] sm:$0xff]  ;;  %v6643_v27 = vld [vmem:[#allocation6_spill] sm:$0xff] }
 0x1ce   : > { %v3874_v1 = vmax.f32 %v3810_v7, 0.0  ;;  %v3649_v25 = vmax.f32 %v6114_v38, %v2898_v8  ;;  %v5119_v47 = vpop.f32.mrf.mxu0  ;;  %v5247_v48 = vpop.f32.mrf.mxu1  ;;  %v6644_v7 = vld [vmem:[#allocation7_spill] sm:$0xff] }
 0x1cf   : > { %4874 = vst [vmem:[%s6337_s14 + $0x38] sm:$0xff] %v4746_v29   ;;  %v3657_v31 = vmax.f32 %v3656_v30, %v5244_v45  ;;  %v3664_v32 = vmax.f32 %v6118_v40, %v5119_v47  ;;  %v3879_v15 = vmax.f32 %v3815_v35, 0.0  ;;  %v3813_v38 = vadd.f32 %v6318_v23, %v3648_v9  ;;  %v6645_v35 = vld [vmem:[#allocation8_spill] sm:$0xff] }
 0x1d0   : > { %v4741_v14 = vpack.c.bf16 %v3874_v1, %v3873_v60  ;;  %v3650_v24 = vmax.f32 %v3649_v25, %v6116_v39  ;;  %v2911_v37 = vpop.f32.mrf.mxu0  ;;  %v3423_v53 = vpop.f32.mrf.mxu1 }
 0x1d1   : > { %v3816_v33 = vadd.f32 %v6318_v23, %v3657_v31  ;;  %v3665_v52 = vmax.f32 %v3664_v32, %v6121_v41  ;;  %v3658_v16 = vmax.f32 %v6126_v42, %v2911_v37  ;;  %v3877_v63 = vmax.f32 %v3813_v38, 0.0  ;;  %v6646_v31 = vld [vmem:[#allocation9_spill] sm:$0xff] }
 0x1d2   : > { %4873 = vst [vmem:[%s6337_s14 + $0x30] sm:$0xff] %v4741_v14   ;;  %v3651_v61 = vmax.f32 %v3650_v24, %v3410_v59  ;;  %v5120_v49 = vpop.f32.mrf.mxu0  ;;  %v5248_v2 = vpop.f32.mrf.mxu1 }
 0x1d3   : > { %v3880_v17 = vmax.f32 %v3816_v33, 0.0  ;;  %v3666_v40 = vmax.f32 %v3665_v52, %v5247_v48  ;;  %v3659_v39 = vmax.f32 %v3658_v16, %v6128_v43  ;;  %v3667_v54 = vmax.f32 %v6130_v50, %v5120_v49  ;;  %v6648_v16 = vld [vmem:[#allocation10_spill] sm:$0xff] }
 0x1d4   : > { %v3814_v18 = vadd.f32 %v6318_v23, %v3651_v61  ;;  %v2914_v13 = vpop.f32.mrf.mxu0  ;;  %v3426_v41 = vpop.f32.mrf.mxu1 }
 0x1d5   : > { %v4756_v62 = vpack.c.bf16 %v3880_v17, %v3879_v15  ;;  %v3660_v42 = vmax.f32 %v3659_v39, %v3423_v53  ;;  %v3668_v22 = vmax.f32 %v3667_v54, %v6132_v51  ;;  %v3819_v3 = vadd.f32 %v6318_v23, %v3666_v40  ;;  %v6647_v53 = vld [vmem:[#allocation11_spill] sm:$0xff]  ;;  %v6650_v40 = vld [vmem:[#allocation13_spill] sm:$0xff] }
 0x1d6   : > { %v3878_v4 = vmax.f32 %v3814_v18, 0.0  ;;  %v3661_v55 = vmax.f32 %v6138_v0, %v2914_v13  ;;  %v5123_v19 = vpop.f32.mrf.mxu0  ;;  %v5251_v20 = vpop.f32.mrf.mxu1 }
 0x1d7   : > { %4876 = vst [vmem:[%s6337_s14 + $0x48] sm:$0xff] %v4756_v62   ;;  %v3669_v43 = vmax.f32 %v3668_v22, %v5248_v2  ;;  %v3676_v50 = vmax.f32 %v6142_v10, %v5123_v19  ;;  %v3817_v51 = vadd.f32 %v6318_v23, %v3660_v42  ;;  %v3883_v0 = vmax.f32 %v3819_v3, 0.0  ;;  %v6649_v2 = vld [vmem:[#allocation12_spill] sm:$0xff]  ;;  %v6652_v3 = vld [vmem:[#allocation15_spill] sm:$0xff] }
 0x1d8   : > { %v4751_v12 = vpack.c.bf16 %v3878_v4, %v3877_v63  ;;  %v3662_v44 = vmax.f32 %v3661_v55, %v6640_v56  ;;  %v2927_v58 = vpop.f32.mrf.mxu0  ;;  %v3439_v21 = vpop.f32.mrf.mxu1  ;;  %v6651_v63 = vld [vmem:[#allocation14_spill] sm:$0xff]  ;;  %v6653_v56 = vld [vmem:[#allocation16_spill] sm:$0xff] }
 0x1d9   : > { %v3820_v11 = vadd.f32 %v6318_v23, %v3669_v43  ;;  %v3677_v6 = vmax.f32 %v3676_v50, %v6641_v5  ;;  %v3670_v34 = vmax.f32 %v6642_v26, %v2927_v58  ;;  %v3881_v30 = vmax.f32 %v3817_v51, 0.0 }
 0x1da   : > { %4875 = vst [vmem:[%s6337_s14 + $0x40] sm:$0xff] %v4751_v12   ;;  %v3663_v57 = vmax.f32 %v3662_v44, %v3426_v41  ;;  %v5124_v45 = vpop.f32.mrf.mxu0  ;;  %v5252_v46 = vpop.f32.mrf.mxu1 }
 0x1db   : > { %v3884_v28 = vmax.f32 %v3820_v11, 0.0  ;;  %v3678_v10 = vmax.f32 %v3677_v6, %v5251_v20  ;;  %v3671_v36 = vmax.f32 %v3670_v34, %v6643_v27  ;;  %v3679_v8 = vmax.f32 %v6644_v7, %v5124_v45  ;;  %v6654_v11 = vld [vmem:[#allocation17_spill] sm:$0xff] }
 0x1dc   : > { %v3818_v59 = vadd.f32 %v6318_v23, %v3663_v57  ;;  %v2930_v60 = vpop.f32.mrf.mxu0  ;;  %v3442_v29 = vpop.f32.mrf.mxu1 }
 0x1dd   : > { %v4766_v1 = vpack.c.bf16 %v3884_v28, %v3883_v0  ;;  %v3680_v9 = vmax.f32 %v3679_v8, %v6645_v35  ;;  %v3823_v47 = vadd.f32 %v6318_v23, %v3678_v10  ;;  %v3672_v48 = vmax.f32 %v3671_v36, %v3439_v21  ;;  %v6655_v0 = vld [vmem:[#allocation19_spill] sm:$0xff]  ;;  %v6657_v8 = vld [vmem:[#allocation20_spill] sm:$0xff] }
 0x1de   : > { %v3882_v25 = vmax.f32 %v3818_v59, 0.0  ;;  %v3673_v32 = vmax.f32 %v6646_v31, %v2930_v60  ;;  %v5127_v14 = vpop.f32.mrf.mxu0  ;;  %v5255_v24 = vpop.f32.mrf.mxu1  ;;  %v6658_v60 = vld [vmem:[#allocation21_spill] sm:$0xff] }
 0x1df   : > { %4878 = vst [vmem:[%s6337_s14 + $0x58] sm:$0xff] %v4766_v1   ;;  %v3681_v37 = vmax.f32 %v3680_v9, %v5252_v46  ;;  %v3688_v33 = vmax.f32 %v6647_v53, %v5127_v14  ;;  %v3887_v54 = vmax.f32 %v3823_v47, 0.0  ;;  %v3821_v18 = vadd.f32 %v6318_v23, %v3672_v48  ;;  %v6656_v46 = vld [vmem:[#allocation18_spill] sm:$0xff] }
 0x1e0   : > { %v4761_v52 = vpack.c.bf16 %v3882_v25, %v3881_v30  ;;  %v3674_v15 = vmax.f32 %v3673_v32, %v6648_v16  ;;  %v2943_v38 = vpop.f32.mrf.mxu0  ;;  %v3455_v61 = vpop.f32.mrf.mxu1  ;;  %v6659_v48 = vld [vmem:[#allocation22_spill] sm:$0xff]  ;;  %v6660_v32 = vld [vmem:[#allocation23_spill] sm:$0xff]  ;;  %v6661_v16 = vld [vmem:[#allocation24_spill] sm:$0xff] }
 0x1e1   : > { %v3824_v49 = vadd.f32 %v6318_v23, %v3681_v37  ;;  %v3689_v17 = vmax.f32 %v3688_v33, %v6649_v2  ;;  %v3682_v39 = vmax.f32 %v6650_v40, %v2943_v38  ;;  %v3885_v58 = vmax.f32 %v3821_v18, 0.0  ;;  %v6662_v2 = vld [vmem:[#allocation25_spill] sm:$0xff]  ;;  %v6663_v18 = vld [vmem:[#allocation27_spill] sm:$0xff] }
 0x1e2   : > { %4877 = vst [vmem:[%s6337_s14 + $0x50] sm:$0xff] %v4761_v52   ;;  %v3675_v13 = vmax.f32 %v3674_v15, %v3442_v29  ;;  %v5128_v41 = vpop.f32.mrf.mxu0  ;;  %v5256_v62 = vpop.f32.mrf.mxu1 }
 0x1e3   : > { %v3888_v42 = vmax.f32 %v3824_v49, 0.0  ;;  %v3690_v22 = vmax.f32 %v3689_v17, %v5255_v24  ;;  %v3683_v4 = vmax.f32 %v3682_v39, %v6651_v63  ;;  %v3691_v55 = vmax.f32 %v6652_v3, %v5128_v41  ;;  %v6665_v3 = vld [vmem:[#allocation28_spill] sm:$0xff] }
 0x1e4   : > { %v3822_v19 = vadd.f32 %v6318_v23, %v3675_v13  ;;  %v2946_v20 = vpop.f32.mrf.mxu0  ;;  %v3458_v43 = vpop.f32.mrf.mxu1 }
 0x1e5   : > { %v4776_v50 = vpack.c.bf16 %v3888_v42, %v3887_v54  ;;  %v3684_v12 = vmax.f32 %v3683_v4, %v3455_v61  ;;  %v3692_v44 = vmax.f32 %v3691_v55, %v6653_v56  ;;  %v3827_v51 = vadd.f32 %v6318_v23, %v3690_v22 }
 0x1e6   : > { %v3886_v21 = vmax.f32 %v3822_v19, 0.0  ;;  %v3685_v5 = vmax.f32 %v6654_v11, %v2946_v20  ;;  %v5131_v6 = vpop.f32.mrf.mxu0  ;;  %v5259_v26 = vpop.f32.mrf.mxu1  ;;  %v6666_v19 = vld [vmem:[#allocation29_spill] sm:$0xff] }
 0x1e7   : > { %4880 = vst [vmem:[%s6337_s14 + $0x68] sm:$0xff] %v4776_v50   ;;  %v3693_v34 = vmax.f32 %v3692_v44, %v5256_v62  ;;  %v3700_v57 = vmax.f32 %v6655_v0, %v5131_v6  ;;  %v3825_v36 = vadd.f32 %v6318_v23, %v3684_v12  ;;  %v3891_v30 = vmax.f32 %v3827_v51, 0.0  ;;  %v6664_v62 = vld [vmem:[#allocation26_spill] sm:$0xff] }
 0x1e8   : > { %v4771_v45 = vpack.c.bf16 %v3886_v21, %v3885_v58  ;;  %v3686_v28 = vmax.f32 %v3685_v5, %v6656_v46  ;;  %v2959_v10 = vpop.f32.mrf.mxu0  ;;  %v3471_v27 = vpop.f32.mrf.mxu1  ;;  %v6667_v51 = vld [vmem:[#allocation30_spill] sm:$0xff]  ;;  %v6668_v5 = vld [vmem:[#allocation31_spill] sm:$0xff]  ;;  %v6669_v46 = vld [vmem:[#allocation32_spill] sm:$0xff] }
 0x1e9   : > { %v3828_v7 = vadd.f32 %v6318_v23, %v3693_v34  ;;  %v3701_v59 = vmax.f32 %v3700_v57, %v6657_v8  ;;  %v3694_v29 = vmax.f32 %v6658_v60, %v2959_v10  ;;  %v3889_v33 = vmax.f32 %v3825_v36, 0.0 }
 0x1ea   : > { %4879 = vst [vmem:[%s6337_s14 + $0x60] sm:$0xff] %v4771_v45   ;;  %v3687_v1 = vmax.f32 %v3686_v28, %v3458_v43  ;;  %v5132_v35 = vpop.f32.mrf.mxu0  ;;  %v5260_v9 = vpop.f32.mrf.mxu1 }
 0x1eb   : > { %v3892_v25 = vmax.f32 %v3828_v7, 0.0  ;;  %v3702_v47 = vmax.f32 %v3701_v59, %v5259_v26  ;;  %v3695_v31 = vmax.f32 %v3694_v29, %v6659_v48  ;;  %v3703_v14 = vmax.f32 %v6660_v32, %v5132_v35  ;;  %v6670_v7 = vld [vmem:[#allocation33_spill] sm:$0xff] }
 0x1ec   : > { %v3826_v24 = vadd.f32 %v6318_v23, %v3687_v1  ;;  %v2962_v37 = vpop.f32.mrf.mxu0  ;;  %v3474_v53 = vpop.f32.mrf.mxu1 }
 0x1ed   : > { %v4786_v52 = vpack.c.bf16 %v3892_v25, %v3891_v30  ;;  %v3704_v15 = vmax.f32 %v3703_v14, %v6661_v16  ;;  %v3831_v61 = vadd.f32 %v6318_v23, %v3702_v47  ;;  %v3696_v49 = vmax.f32 %v3695_v31, %v3471_v27  ;;  %v6671_v30 = vld [vmem:[#allocation35_spill] sm:$0xff]  ;;  %v6673_v14 = vld [vmem:[#allocation36_spill] sm:$0xff] }
 0x1ee   : > { %v3890_v38 = vmax.f32 %v3826_v24, 0.0  ;;  %v3697_v17 = vmax.f32 %v6662_v2, %v2962_v37  ;;  %v5135_v40 = vpop.f32.mrf.mxu0  ;;  %v5263_v39 = vpop.f32.mrf.mxu1  ;;  %v6674_v37 = vld [vmem:[#allocation37_spill] sm:$0xff] }
 0x1ef   : > { %4882 = vst [vmem:[%s6337_s14 + $0x78] sm:$0xff] %v4786_v52   ;;  %v3705_v54 = vmax.f32 %v3704_v15, %v5260_v9  ;;  %v3712_v13 = vmax.f32 %v6663_v18, %v5135_v40  ;;  %v3895_v43 = vmax.f32 %v3831_v61, 0.0  ;;  %v3829_v50 = vadd.f32 %v6318_v23, %v3696_v49  ;;  %v6672_v9 = vld [vmem:[#allocation34_spill] sm:$0xff] }
 0x1f0   : > { %v4781_v41 = vpack.c.bf16 %v3890_v38, %v3889_v33  ;;  %v3698_v42 = vmax.f32 %v3697_v17, %v6664_v62  ;;  %v2975_v22 = vpop.f32.mrf.mxu0  ;;  %v3487_v63 = vpop.f32.mrf.mxu1  ;;  %v6675_v49 = vld [vmem:[#allocation38_spill] sm:$0xff]  ;;  %v6676_v17 = vld [vmem:[#allocation39_spill] sm:$0xff]  ;;  %v6677_v62 = vld [vmem:[#allocation40_spill] sm:$0xff] }
 0x1f1   : > { %v3832_v4 = vadd.f32 %v6318_v23, %v3705_v54  ;;  %v3713_v55 = vmax.f32 %v3712_v13, %v6665_v3  ;;  %v3706_v20 = vmax.f32 %v6666_v19, %v2975_v22  ;;  %v3893_v10 = vmax.f32 %v3829_v50, 0.0  ;;  %v6678_v3 = vld [vmem:[#allocation41_spill] sm:$0xff]  ;;  %v6679_v50 = vld [vmem:[#allocation43_spill] sm:$0xff] }
 0x1f2   : > { %4881 = vst [vmem:[%s6337_s14 + $0x70] sm:$0xff] %v4781_v41   ;;  %v3699_v12 = vmax.f32 %v3698_v42, %v3474_v53  ;;  %v5136_v56 = vpop.f32.mrf.mxu0  ;;  %v5264_v44 = vpop.f32.mrf.mxu1 }
 0x1f3   : > { %v3896_v58 = vmax.f32 %v3832_v4, 0.0  ;;  %v3714_v21 = vmax.f32 %v3713_v55, %v5263_v39  ;;  %v3707_v11 = vmax.f32 %v3706_v20, %v6667_v51  ;;  %v3715_v6 = vmax.f32 %v6668_v5, %v5136_v56  ;;  %v6681_v5 = vld [vmem:[#allocation44_spill] sm:$0xff] }
 0x1f4   : > { %v3830_v26 = vadd.f32 %v6318_v23, %v3699_v12  ;;  %v2978_v34 = vpop.f32.mrf.mxu0  ;;  %v3490_v0 = vpop.f32.mrf.mxu1 }
 0x1f5   : > { %v4796_v57 = vpack.c.bf16 %v3896_v58, %v3895_v43  ;;  %v3708_v45 = vmax.f32 %v3707_v11, %v3487_v63  ;;  %v3716_v28 = vmax.f32 %v3715_v6, %v6669_v46  ;;  %v3835_v36 = vadd.f32 %v6318_v23, %v3714_v21 }
 0x1f6   : > { %v3894_v27 = vmax.f32 %v3830_v26, 0.0  ;;  %v3709_v8 = vmax.f32 %v6670_v7, %v2978_v34  ;;  %v5139_v59 = vpop.f32.mrf.mxu0  ;;  %v5267_v60 = vpop.f32.mrf.mxu1  ;;  %v6682_v26 = vld [vmem:[#allocation45_spill] sm:$0xff] }
 0x1f7   : > { %4884 = vst [vmem:[%s6337_s14 + $0x88] sm:$0xff] %v4796_v57   ;;  %v3717_v29 = vmax.f32 %v3716_v28, %v5264_v44  ;;  %v3724_v1 = vmax.f32 %v6671_v30, %v5139_v59  ;;  %v3833_v31 = vadd.f32 %v6318_v23, %v3708_v45  ;;  %v3899_v33 = vmax.f32 %v3835_v36, 0.0  ;;  %v6680_v44 = vld [vmem:[#allocation42_spill] sm:$0xff] }
 0x1f8   : > { %v4791_v35 = vpack.c.bf16 %v3894_v27, %v3893_v10  ;;  %v3710_v25 = vmax.f32 %v3709_v8, %v6672_v9  ;;  %v2991_v47 = vpop.f32.mrf.mxu0  ;;  %v3503_v48 = vpop.f32.mrf.mxu1  ;;  %v6683_v36 = vld [vmem:[#allocation46_spill] sm:$0xff]  ;;  %v6684_v8 = vld [vmem:[#allocation47_spill] sm:$0xff]  ;;  %v6685_v9 = vld [vmem:[#allocation48_spill] sm:$0xff] }
 0x1f9   : > { %v3836_v32 = vadd.f32 %v6318_v23, %v3717_v29  ;;  %v3725_v24 = vmax.f32 %v3724_v1, %v6673_v14  ;;  %v3718_v53 = vmax.f32 %v6674_v37, %v2991_v47  ;;  %v3897_v13 = vmax.f32 %v3833_v31, 0.0 }
 0x1fa   : > { %4883 = vst [vmem:[%s6337_s14 + $0x80] sm:$0xff] %v4791_v35   ;;  %v3711_v52 = vmax.f32 %v3710_v25, %v3490_v0  ;;  %v5140_v16 = vpop.f32.mrf.mxu0  ;;  %v5268_v15 = vpop.f32.mrf.mxu1 }
 0x1fb   : > { %v3900_v38 = vmax.f32 %v3836_v32, 0.0  ;;  %v3726_v61 = vmax.f32 %v3725_v24, %v5267_v60  ;;  %v3719_v2 = vmax.f32 %v3718_v53, %v6675_v49  ;;  %v3727_v40 = vmax.f32 %v6676_v17, %v5140_v16  ;;  %v6686_v32 = vld [vmem:[#allocation49_spill] sm:$0xff] }
 0x1fc   : > { %v3834_v39 = vadd.f32 %v6318_v23, %v3711_v52  ;;  %v2994_v54 = vpop.f32.mrf.mxu0  ;;  %v3506_v18 = vpop.f32.mrf.mxu1 }
 0x1fd   : > { %v4806_v41 = vpack.c.bf16 %v3900_v38, %v3899_v33  ;;  %v3728_v42 = vmax.f32 %v3727_v40, %v6677_v62  ;;  %v3839_v63 = vadd.f32 %v6318_v23, %v3726_v61  ;;  %v3720_v4 = vmax.f32 %v3719_v2, %v3503_v48  ;;  %v6687_v33 = vld [vmem:[#allocation51_spill] sm:$0xff]  ;;  %v6689_v40 = vld [vmem:[#allocation52_spill] sm:$0xff] }
 0x1fe   : > { %v3898_v22 = vmax.f32 %v3834_v39, 0.0  ;;  %v3721_v55 = vmax.f32 %v6678_v3, %v2994_v54  ;;  %v5143_v19 = vpop.f32.mrf.mxu0  ;;  %v5271_v20 = vpop.f32.mrf.mxu1  ;;  %v6690_v54 = vld [vmem:[#allocation53_spill] sm:$0xff] }
 0x1ff   : > { %4886 = vst [vmem:[%s6337_s14 + $0x98] sm:$0xff] %v4806_v41   ;;  %v3729_v43 = vmax.f32 %v3728_v42, %v5268_v15  ;;  %v3736_v12 = vmax.f32 %v6679_v50, %v5143_v19  ;;  %v3903_v0 = vmax.f32 %v3839_v63, 0.0  ;;  %v3837_v57 = vadd.f32 %v6318_v23, %v3720_v4  ;;  %v6688_v15 = vld [vmem:[#allocation50_spill] sm:$0xff] }
 0x200   : > { %v4801_v56 = vpack.c.bf16 %v3898_v22, %v3897_v13  ;;  %v3722_v58 = vmax.f32 %v3721_v55, %v6680_v44  ;;  %v3007_v21 = vpop.f32.mrf.mxu0  ;;  %v3519_v51 = vpop.f32.mrf.mxu1  ;;  %v6691_v4 = vld [vmem:[#allocation54_spill] sm:$0xff]  ;;  %v6692_v55 = vld [vmem:[#allocation55_spill] sm:$0xff]  ;;  %v6693_v44 = vld [vmem:[#allocation56_spill] sm:$0xff] }
 0x201   : > { %v3840_v11 = vadd.f32 %v6318_v23, %v3729_v43  ;;  %v3737_v6 = vmax.f32 %v3736_v12, %v6681_v5  ;;  %v3730_v34 = vmax.f32 %v6682_v26, %v3007_v21  ;;  %v3901_v47 = vmax.f32 %v3837_v57, 0.0  ;;  %v6694_v5 = vld [vmem:[#allocation57_spill] sm:$0xff]  ;;  %v6695_v57 = vld [vmem:[#allocation59_spill] sm:$0xff] }
 0x202   : > { %4885 = vst [vmem:[%s6337_s14 + $0x90] sm:$0xff] %v4801_v56   ;;  %v3723_v45 = vmax.f32 %v3722_v58, %v3506_v18  ;;  %v5144_v46 = vpop.f32.mrf.mxu0  ;;  %v5272_v28 = vpop.f32.mrf.mxu1 }
 0x203   : > { %v3904_v10 = vmax.f32 %v3840_v11, 0.0  ;;  %v3738_v27 = vmax.f32 %v3737_v6, %v5271_v20  ;;  %v3731_v7 = vmax.f32 %v3730_v34, %v6683_v36  ;;  %v3739_v59 = vmax.f32 %v6684_v8, %v5144_v46  ;;  %v6697_v8 = vld [vmem:[#allocation60_spill] sm:$0xff] }
 0x204   : > { %v3838_v60 = vadd.f32 %v6318_v23, %v3723_v45  ;;  %v3010_v29 = vpop.f32.mrf.mxu0  ;;  %v3522_v30 = vpop.f32.mrf.mxu1 }
 0x205   : > { %v4816_v1 = vpack.c.bf16 %v3904_v10, %v3903_v0  ;;  %v3732_v35 = vmax.f32 %v3731_v7, %v3519_v51  ;;  %v3740_v25 = vmax.f32 %v3739_v59, %v6685_v9  ;;  %v3843_v31 = vadd.f32 %v6318_v23, %v3738_v27 }
 0x206   : > { %v3902_v48 = vmax.f32 %v3838_v60, 0.0  ;;  %v3733_v14 = vmax.f32 %v6686_v32, %v3010_v29  ;;  %v5147_v24 = vpop.f32.mrf.mxu0  ;;  %v5275_v37 = vpop.f32.mrf.mxu1  ;;  %v6698_v60 = vld [vmem:[#allocation61_spill] sm:$0xff] }
 0x207   : > { %4888 = vst [vmem:[%s6337_s14 + $0xa8] sm:$0xff] %v4816_v1   ;;  %v3741_v53 = vmax.f32 %v3740_v25, %v5272_v28  ;;  %v3748_v52 = vmax.f32 %v6687_v33, %v5147_v24  ;;  %v3841_v2 = vadd.f32 %v6318_v23, %v3732_v35  ;;  %v3907_v13 = vmax.f32 %v3843_v31, 0.0  ;;  %v6696_v28 = vld [vmem:[#allocation58_spill] sm:$0xff] }
 0x208   : > { %v4811_v16 = vpack.c.bf16 %v3902_v48, %v3901_v47  ;;  %v3734_v38 = vmax.f32 %v3733_v14, %v6688_v15  ;;  %v3023_v61 = vpop.f32.mrf.mxu0  ;;  %v3535_v49 = vpop.f32.mrf.mxu1  ;;  %v6699_v31 = vld [vmem:[#allocation62_spill] sm:$0xff]  ;;  %v6700_v14 = vld [vmem:[#allocation63_spill] sm:$0xff]  ;;  %v6701_v15 = vld [vmem:[#allocation64_spill] sm:$0xff] }
 0x209   : > { %v3844_v17 = vadd.f32 %v6318_v23, %v3741_v53  ;;  %v3749_v39 = vmax.f32 %v3748_v52, %v6689_v40  ;;  %v3742_v18 = vmax.f32 %v6690_v54, %v3023_v61  ;;  %v3905_v12 = vmax.f32 %v3841_v2, 0.0 }
 0x20a   : > { %4887 = vst [vmem:[%s6337_s14 + $0xa0] sm:$0xff] %v4811_v16   ;;  %v3735_v41 = vmax.f32 %v3734_v38, %v3522_v30  ;;  %v5148_v62 = vpop.f32.mrf.mxu0  ;;  %v5276_v42 = vpop.f32.mrf.mxu1 }
 0x20b   : > { %v3908_v22 = vmax.f32 %v3844_v17, 0.0  ;;  %v3750_v63 = vmax.f32 %v3749_v39, %v5275_v37  ;;  %v3743_v3 = vmax.f32 %v3742_v18, %v6691_v4  ;;  %v3751_v19 = vmax.f32 %v6692_v55, %v5148_v62  ;;  %v6702_v17 = vld [vmem:[#allocation65_spill] sm:$0xff] }
 0x20c   : > { %v3842_v20 = vadd.f32 %v6318_v23, %v3735_v41  ;;  %v3026_v43 = vpop.f32.mrf.mxu0  ;;  %v3538_v50 = vpop.f32.mrf.mxu1 }
 0x20d   : > { %v4826_v56 = vpack.c.bf16 %v3908_v22, %v3907_v13  ;;  %v3752_v58 = vmax.f32 %v3751_v19, %v6693_v44  ;;  %v3847_v51 = vadd.f32 %v6318_v23, %v3750_v63  ;;  %v3744_v11 = vmax.f32 %v3743_v3, %v3535_v49  ;;  %v6703_v13 = vld [vmem:[#allocation67_spill] sm:$0xff]  ;;  %v6705_v19 = vld [vmem:[#allocation68_spill] sm:$0xff] }
 0x20e   : > { %v3906_v21 = vmax.f32 %v3842_v20, 0.0  ;;  %v3745_v6 = vmax.f32 %v6694_v5, %v3026_v43  ;;  %v5151_v26 = vpop.f32.mrf.mxu0  ;;  %v5279_v34 = vpop.f32.mrf.mxu1  ;;  %v6706_v43 = vld [vmem:[#allocation69_spill] sm:$0xff] }
 0x20f   : > { %4890 = vst [vmem:[%s6337_s14 + $0xb8] sm:$0xff] %v4826_v56   ;;  %v3753_v0 = vmax.f32 %v3752_v58, %v5276_v42  ;;  %v3760_v45 = vmax.f32 %v6695_v57, %v5151_v26  ;;  %v3911_v30 = vmax.f32 %v3847_v51, 0.0  ;;  %v3845_v1 = vadd.f32 %v6318_v23, %v3744_v11  ;;  %v6704_v42 = vld [vmem:[#allocation66_spill] sm:$0xff] }
 0x210   : > { %v4821_v46 = vpack.c.bf16 %v3906_v21, %v3905_v12  ;;  %v3746_v10 = vmax.f32 %v3745_v6, %v6696_v28  ;;  %v3039_v27 = vpop.f32.mrf.mxu0  ;;  %v3551_v36 = vpop.f32.mrf.mxu1  ;;  %v6707_v11 = vld [vmem:[#allocation70_spill] sm:$0xff]  ;;  %v6708_v6 = vld [vmem:[#allocation71_spill] sm:$0xff]  ;;  %v6709_v28 = vld [vmem:[#allocation72_spill] sm:$0xff] }
 0x211   : > { %v3848_v7 = vadd.f32 %v6318_v23, %v3753_v0  ;;  %v3761_v59 = vmax.f32 %v3760_v45, %v6697_v8  ;;  %v3754_v29 = vmax.f32 %v6698_v60, %v3039_v27  ;;  %v3909_v61 = vmax.f32 %v3845_v1, 0.0  ;;  %v6710_v8 = vld [vmem:[#allocation73_spill] sm:$0xff]  ;;  %v6711_v1 = vld [vmem:[#allocation75_spill] sm:$0xff] }
 0x212   : > { %4889 = vst [vmem:[%s6337_s14 + $0xb0] sm:$0xff] %v4821_v46   ;;  %v3747_v35 = vmax.f32 %v3746_v10, %v3538_v50  ;;  %v5152_v9 = vpop.f32.mrf.mxu0  ;;  %v5280_v25 = vpop.f32.mrf.mxu1 }
 0x213   : > { %v3912_v47 = vmax.f32 %v3848_v7, 0.0  ;;  %v3762_v48 = vmax.f32 %v3761_v59, %v5279_v34  ;;  %v3755_v32 = vmax.f32 %v3754_v29, %v6699_v31  ;;  %v3763_v24 = vmax.f32 %v6700_v14, %v5152_v9 }
 0x214   : > { %v3846_v37 = vadd.f32 %v6318_v23, %v3747_v35  ;;  %v3042_v53 = vpop.f32.mrf.mxu0  ;;  %v3554_v33 = vpop.f32.mrf.mxu1 }
 0x215   : > { %v4836_v52 = vpack.c.bf16 %v3912_v47, %v3911_v30  ;;  %v3756_v16 = vmax.f32 %v3755_v32, %v3551_v36  ;;  %v3764_v38 = vmax.f32 %v3763_v24, %v6701_v15  ;;  %v3851_v2 = vadd.f32 %v6318_v23, %v3762_v48  ;;  %v6713_v32 = vld [vmem:[#allocation76_spill] sm:$0xff]  ;;  %v6714_v24 = vld [vmem:[#allocation77_spill] sm:$0xff] }
 0x216   : > { %v3910_v49 = vmax.f32 %v3846_v37, 0.0  ;;  %v3757_v40 = vmax.f32 %v6702_v17, %v3042_v53  ;;  %v5155_v39 = vpop.f32.mrf.mxu0  ;;  %v5283_v54 = vpop.f32.mrf.mxu1  ;;  %v6716_v17 = vld [vmem:[#allocation79_spill] sm:$0xff] }
 0x217   : > { %4892 = vst [vmem:[%s6337_s14 + $0xc8] sm:$0xff] %v4836_v52   ;;  %v3765_v18 = vmax.f32 %v3764_v38, %v5280_v25  ;;  %v3772_v41 = vmax.f32 %v6703_v13, %v5155_v39  ;;  %v3849_v3 = vadd.f32 %v6318_v23, %v3756_v16  ;;  %v3915_v12 = vmax.f32 %v3851_v2, 0.0  ;;  %v6712_v25 = vld [vmem:[#allocation74_spill] sm:$0xff] }
 0x218   : > { %v4831_v62 = vpack.c.bf16 %v3910_v49, %v3909_v61  ;;  %v3758_v22 = vmax.f32 %v3757_v40, %v6704_v42  ;;  %v3055_v63 = vpop.f32.mrf.mxu0  ;;  %v3567_v4 = vpop.f32.mrf.mxu1  ;;  %v6715_v49 = vld [vmem:[#allocation78_spill] sm:$0xff] }
 0x219   : > { %v3852_v55 = vadd.f32 %v6318_v23, %v3765_v18  ;;  %v3773_v20 = vmax.f32 %v3772_v41, %v6705_v19  ;;  %v3766_v50 = vmax.f32 %v6706_v43, %v3055_v63  ;;  %v3913_v45 = vmax.f32 %v3849_v3, 0.0  ;;  %v6717_v41 = vld [vmem:[#allocation80_spill] sm:$0xff]  ;;  %v6719_v43 = vld [vmem:[#allocation82_spill] sm:$0xff] }
 0x21a   : > { %4891 = vst [vmem:[%s6337_s14 + $0xc0] sm:$0xff] %v4831_v62   ;;  %v3759_v56 = vmax.f32 %v3758_v22, %v3554_v33  ;;  %v5156_v44 = vpop.f32.mrf.mxu0  ;;  %v5284_v58 = vpop.f32.mrf.mxu1 }
 0x21b   : > { %v3916_v21 = vmax.f32 %v3852_v55, 0.0  ;;  %v3774_v51 = vmax.f32 %v3773_v20, %v5283_v54  ;;  %v3767_v5 = vmax.f32 %v3766_v50, %v6707_v11  ;;  %v3775_v26 = vmax.f32 %v6708_v6, %v5156_v44 }
 0x21c   : > { %v3850_v34 = vadd.f32 %v6318_v23, %v3759_v56  ;;  %v3058_v0 = vpop.f32.mrf.mxu0  ;;  %v3570_v57 = vpop.f32.mrf.mxu1 }
 0x21d   : > { %v4846_v46 = vpack.c.bf16 %v3916_v21, %v3915_v12  ;;  %v3776_v10 = vmax.f32 %v3775_v26, %v6709_v28  ;;  %v3855_v36 = vadd.f32 %v6318_v23, %v3774_v51  ;;  %v3768_v7 = vmax.f32 %v3767_v5, %v3567_v4  ;;  %v6718_v4 = vld [vmem:[#allocation81_spill] sm:$0xff] }
 0x21e   : > { %v3914_v27 = vmax.f32 %v3850_v34, 0.0  ;;  %v3769_v59 = vmax.f32 %v6710_v8, %v3058_v0  ;;  %v5159_v60 = vpop.f32.mrf.mxu0  ;;  %v5287_v29 = vpop.f32.mrf.mxu1 }
 0x21f   : > { %4894 = vst [vmem:[%s6337_s14 + $0xd8] sm:$0xff] %v4846_v46   ;;  %v3777_v30 = vmax.f32 %v3776_v10, %v5284_v58  ;;  %v3784_v35 = vmax.f32 %v6711_v1, %v5159_v60  ;;  %v3919_v33 = vmax.f32 %v3855_v36, 0.0  ;;  %v3853_v52 = vadd.f32 %v6318_v23, %v3768_v7 }
 0x220   : > { %v4841_v9 = vpack.c.bf16 %v3914_v27, %v3913_v45  ;;  %v3770_v47 = vmax.f32 %v3769_v59, %v6712_v25  ;;  %v3071_v48 = vpop.f32.mrf.mxu0  ;;  %v3583_v53 = vpop.f32.mrf.mxu1 }
 0x221   : > { %v3856_v31 = vadd.f32 %v6318_v23, %v3777_v30  ;;  %v3785_v14 = vmax.f32 %v3784_v35, %v6713_v32  ;;  %v3778_v37 = vmax.f32 %v6714_v24, %v3071_v48  ;;  %v3917_v42 = vmax.f32 %v3853_v52, 0.0 }
 0x222   : > { %4893 = vst [vmem:[%s6337_s14 + $0xd0] sm:$0xff] %v4841_v9   ;;  %v3771_v16 = vmax.f32 %v3770_v47, %v3570_v57  ;;  %v5160_v15 = vpop.f32.mrf.mxu0  ;;  %v5288_v13 = vpop.f32.mrf.mxu1 }
 0x223   : > { %v3920_v38 = vmax.f32 %v3856_v31, 0.0  ;;  %v3786_v61 = vmax.f32 %v3785_v14, %v5287_v29  ;;  %v3779_v2 = vmax.f32 %v3778_v37, %v6715_v49  ;;  %v3787_v40 = vmax.f32 %v6716_v17, %v5160_v15 }
 0x224   : > { %v3854_v39 = vadd.f32 %v6318_v23, %v3771_v16  ;;  %v3074_v54 = vpop.f32.mrf.mxu0  ;;  %v3586_v56 = vpop.f32.mrf.mxu1 }
 0x225   : > { %v4856_v18 = vpack.c.bf16 %v3920_v38, %v3919_v33  ;;  %v3788_v62 = vmax.f32 %v3787_v40, %v6717_v41  ;;  %v3780_v63 = vmax.f32 %v3779_v2, %v3583_v53  ;;  %v3781_v3 = vmax.f32 %v6718_v4, %v3074_v54 }
 0x226   : > { %v3918_v22 = vmax.f32 %v3854_v39, 0.0  ;;  %v3859_v55 = vadd.f32 %v6318_v23, %v3786_v61 }
 0x227   : > { %4896 = vst [vmem:[%s6337_s14 + $0xe8] sm:$0xff] %v4856_v18   ;;  %v3789_v19 = vmax.f32 %v3788_v62, %v5288_v13  ;;  %v3782_v50 = vmax.f32 %v3781_v3, %v6719_v43  ;;  %v3857_v44 = vadd.f32 %v6318_v23, %v3780_v63 }
 0x228   : > { %v4851_v20 = vpack.c.bf16 %v3918_v22, %v3917_v42  ;;  %v3923_v21 = vmax.f32 %v3859_v55, 0.0 }
 0x229   : > { %v3860_v12 = vadd.f32 %v6318_v23, %v3789_v19  ;;  %v3783_v58 = vmax.f32 %v3782_v50, %v3586_v56  ;;  %v3921_v6 = vmax.f32 %v3857_v44, 0.0 }
 0x22a   : > { %4895 = vst [vmem:[%s6337_s14 + $0xe0] sm:$0xff] %v4851_v20  }
 0x22b   : > { %v3924_v51 = vmax.f32 %v3860_v12, 0.0  ;;  %v3858_v11 = vadd.f32 %v6318_v23, %v3783_v58 }
 0x22d   : > { %v4866_v5 = vpack.c.bf16 %v3924_v51, %v3923_v21  ;;  %v3922_v26 = vmax.f32 %v3858_v11, 0.0 }
 0x22f   : > { %4898 = vst [vmem:[%s6337_s14 + $0xf8] sm:$0xff] %v4866_v5   ;;  %v4861_v34 = vpack.c.bf16 %v3922_v26, %v3921_v6 }
 0x231   : > { %4897 = vst [vmem:[%s6337_s14 + $0xf0] sm:$0xff] %v4861_v34  }
 0x232 PF: > { %p10_p9 = scmp.ge.s32.totalorder %s5510_s16, 6   ;;  %s6720_s12 = smov %s5466_s13 }
 0x233   : > { %s6721_s13 = smov %s5519_s19  ;;  %s6722_s14 = smov %s5510_s16 }
 0x234   :  { %12 = sbr.rel (!%p10_p9) target bundleno = 2 (0x2), region = 108 }

// kernel: simple_cnn_forward.4
= control target key start
LH: loop header
LB: loop body
LE: loop exit
PB: predicated region body
PF: predicated region fallthrough
CT: control target
= control target key end

     0   :  { %s5030_s12 = smov 0   ;;  %s5032_s13 = smov 0   ;;  %s6774_s0 = inlined_call_operand.vmem [shape: bf16[4,512,288], index: 0, kind: input, shape index: {}]   ;;  %s6775_s1 = inlined_call_operand.vmem [shape: bf16[288,128], index: 1, kind: input, shape index: {}]   ;;  %s6776_s2 = inlined_call_operand.vmem [shape: f32[1,128], index: 2, kind: input, shape index: {}]   ;;  %s6777_s3 = inlined_call_operand.vmem [shape: bf16[512,128], index: 3, kind: output, shape index: {}]  }
   0x1   :  { %s5034_s14 = smov 0  }
   0x2 LB: > { %s3751_s15 = sadd.s32 4294967295, %s5007_s14   ;;  %s5047_s16 = sadd.s32 1, %s5007_s14   ;;  %s5007_s14 = sphi %s5034_s14, %s7021_s14   ;;  %s5003_s13 = sphi %s5032_s13, %s7020_s13   ;;  %s4999_s12 = sphi %s5030_s12, %s7019_s12  }
   0x3   : > { %s17_s17 = ssub.s32 %s5007_s14, %s5047_s16  ;;  %s20_s18 = sadd.s32 1, %s5003_s13 }
   0x4   : > { %p18_p0 = scmp.eq.s32.totalorder %s17_s17, 0  ;;  %p27_p1 = scmp.ne.s32.totalorder %s5003_s13, %s4999_s12 }
   0x5   : > { %p28_p2 = scmp.eq.s32.totalorder %s5007_s14, 0  ;;  %p3754_p4 = scmp.ge.s32.totalorder %s5007_s14, 2 }
   0x6   : > { %s5056_s19 = scalar_select %p18_p0, %s5003_s13, %s20_s18  }
   0x7   : > { %p29_p3 = por %p28_p2, %p27_p1  ;;  %127 = sbr.rel (%p3754_p4) target bundleno = 166 (0xa6), region = 24 }
   0xc   : > { %130 = sbr.rel (!%p29_p3) target bundleno = 166 (0xa6), region = 28  ;;  %s132_s20 = sand.u32 (%p29_p3), 1, %s5003_s13  }
   0xd   : > { %s4684_s21 = smul.u32 (%p29_p3), 384, %s5007_s14 }
   0xe   : > { %s4683_s22 = smul.u32 (%p29_p3), 1536, %s132_s20 }
   0xf   : > { %s5064_s25 = scalar_lea.vmem (%p29_p3), %s6774_s0, %s4684_s21 }
  0x10   : > { %v153_v0 = vld [vmem:[%s5064_s25] sm:$0xff] (%p29_p3)  ;;  %v155_v1 = vld [vmem:[%s5064_s25 + $0xc] sm:$0xff] (%p29_p3)  ;;  %v157_v2 = vld [vmem:[%s5064_s25 + $0x18] sm:$0xff] (%p29_p3)  ;;  %s5069_s26 = scalar_lea.vmem (%p29_p3), [#allocation2], %s4683_s22 }
  0x11   : > { %154 = vst [vmem:[%s5069_s26] sm:$0xff] %v153_v0  ;;  %156 = vst [vmem:[%s5069_s26 + $0xc] sm:$0xff] %v155_v1  ;;  %v159_v3 = vld [vmem:[%s5064_s25 + $0x24] sm:$0xff]  ;;  %v161_v4 = vld [vmem:[%s5064_s25 + $0x30] sm:$0xff] }
  0x12   : > { %158 = vst [vmem:[%s5069_s26 + $0x18] sm:$0xff] %v157_v2  ;;  %v163_v5 = vld [vmem:[%s5064_s25 + $0x3c] sm:$0xff]  ;;  %160 = vst [vmem:[%s5069_s26 + $0x24] sm:$0xff] %v159_v3  ;;  %v165_v6 = vld [vmem:[%s5064_s25 + $0x48] sm:$0xff] }
  0x13   : > { %162 = vst [vmem:[%s5069_s26 + $0x30] sm:$0xff] %v161_v4  ;;  %164 = vst [vmem:[%s5069_s26 + $0x3c] sm:$0xff] %v163_v5  ;;  %v167_v7 = vld [vmem:[%s5064_s25 + $0x54] sm:$0xff]  ;;  %v169_v8 = vld [vmem:[%s5064_s25 + $0x60] sm:$0xff] }
  0x14   : > { %166 = vst [vmem:[%s5069_s26 + $0x48] sm:$0xff] %v165_v6  ;;  %168 = vst [vmem:[%s5069_s26 + $0x54] sm:$0xff] %v167_v7  ;;  %v171_v9 = vld [vmem:[%s5064_s25 + $0x6c] sm:$0xff]  ;;  %v173_v10 = vld [vmem:[%s5064_s25 + $0x78] sm:$0xff] }
  0x15   : > { %170 = vst [vmem:[%s5069_s26 + $0x60] sm:$0xff] %v169_v8  ;;  %v175_v11 = vld [vmem:[%s5064_s25 + $0x84] sm:$0xff]  ;;  %172 = vst [vmem:[%s5069_s26 + $0x6c] sm:$0xff] %v171_v9  ;;  %v177_v12 = vld [vmem:[%s5064_s25 + $0x90] sm:$0xff] }
  0x16   : > { %174 = vst [vmem:[%s5069_s26 + $0x78] sm:$0xff] %v173_v10  ;;  %176 = vst [vmem:[%s5069_s26 + $0x84] sm:$0xff] %v175_v11  ;;  %v179_v13 = vld [vmem:[%s5064_s25 + $0x9c] sm:$0xff]  ;;  %v181_v14 = vld [vmem:[%s5064_s25 + $0xa8] sm:$0xff] }
  0x17   : > { %178 = vst [vmem:[%s5069_s26 + $0x90] sm:$0xff] %v177_v12  ;;  %180 = vst [vmem:[%s5069_s26 + $0x9c] sm:$0xff] %v179_v13  ;;  %v183_v15 = vld [vmem:[%s5064_s25 + $0xb4] sm:$0xff]  ;;  %v185_v16 = vld [vmem:[%s5064_s25 + $0xc0] sm:$0xff] }
  0x18   : > { %182 = vst [vmem:[%s5069_s26 + $0xa8] sm:$0xff] %v181_v14  ;;  %v187_v17 = vld [vmem:[%s5064_s25 + $0xcc] sm:$0xff]  ;;  %184 = vst [vmem:[%s5069_s26 + $0xb4] sm:$0xff] %v183_v15  ;;  %v189_v18 = vld [vmem:[%s5064_s25 + $0xd8] sm:$0xff] }
  0x19   : > { %186 = vst [vmem:[%s5069_s26 + $0xc0] sm:$0xff] %v185_v16  ;;  %188 = vst [vmem:[%s5069_s26 + $0xcc] sm:$0xff] %v187_v17  ;;  %v191_v19 = vld [vmem:[%s5064_s25 + $0xe4] sm:$0xff]  ;;  %v193_v20 = vld [vmem:[%s5064_s25 + $0xf0] sm:$0xff] }
  0x1a   : > { %190 = vst [vmem:[%s5069_s26 + $0xd8] sm:$0xff] %v189_v18  ;;  %192 = vst [vmem:[%s5069_s26 + $0xe4] sm:$0xff] %v191_v19  ;;  %v195_v21 = vld [vmem:[%s5064_s25 + $0xfc] sm:$0xff]  ;;  %v197_v22 = vld [vmem:[%s5064_s25 + $0x108] sm:$0xff] }
  0x1b   : > { %194 = vst [vmem:[%s5069_s26 + $0xf0] sm:$0xff] %v193_v20  ;;  %v199_v23 = vld [vmem:[%s5064_s25 + $0x114] sm:$0xff]  ;;  %196 = vst [vmem:[%s5069_s26 + $0xfc] sm:$0xff] %v195_v21  ;;  %v201_v24 = vld [vmem:[%s5064_s25 + $0x120] sm:$0xff] }
  0x1c   : > { %198 = vst [vmem:[%s5069_s26 + $0x108] sm:$0xff] %v197_v22  ;;  %200 = vst [vmem:[%s5069_s26 + $0x114] sm:$0xff] %v199_v23  ;;  %v203_v25 = vld [vmem:[%s5064_s25 + $0x12c] sm:$0xff]  ;;  %v205_v26 = vld [vmem:[%s5064_s25 + $0x138] sm:$0xff] }
  0x1d   : > { %202 = vst [vmem:[%s5069_s26 + $0x120] sm:$0xff] %v201_v24  ;;  %204 = vst [vmem:[%s5069_s26 + $0x12c] sm:$0xff] %v203_v25  ;;  %v207_v27 = vld [vmem:[%s5064_s25 + $0x144] sm:$0xff]  ;;  %v209_v28 = vld [vmem:[%s5064_s25 + $0x150] sm:$0xff] }
  0x1e   : > { %206 = vst [vmem:[%s5069_s26 + $0x138] sm:$0xff] %v205_v26  ;;  %v211_v29 = vld [vmem:[%s5064_s25 + $0x15c] sm:$0xff]  ;;  %208 = vst [vmem:[%s5069_s26 + $0x144] sm:$0xff] %v207_v27  ;;  %v213_v30 = vld [vmem:[%s5064_s25 + $0x168] sm:$0xff] }
  0x1f   : > { %210 = vst [vmem:[%s5069_s26 + $0x150] sm:$0xff] %v209_v28  ;;  %212 = vst [vmem:[%s5069_s26 + $0x15c] sm:$0xff] %v211_v29  ;;  %v215_v31 = vld [vmem:[%s5064_s25 + $0x174] sm:$0xff]  ;;  %v217_v32 = vld [vmem:[%s5064_s25 + $0x300] sm:$0xff] }
  0x20   : > { %214 = vst [vmem:[%s5069_s26 + $0x168] sm:$0xff] %v213_v30  ;;  %216 = vst [vmem:[%s5069_s26 + $0x174] sm:$0xff] %v215_v31  ;;  %v219_v33 = vld [vmem:[%s5064_s25 + $0x30c] sm:$0xff]  ;;  %v221_v34 = vld [vmem:[%s5064_s25 + $0x318] sm:$0xff] }
  0x21   : > { %218 = vst [vmem:[%s5069_s26 + $0x180] sm:$0xff] %v217_v32  ;;  %v223_v35 = vld [vmem:[%s5064_s25 + $0x324] sm:$0xff]  ;;  %220 = vst [vmem:[%s5069_s26 + $0x18c] sm:$0xff] %v219_v33  ;;  %v225_v36 = vld [vmem:[%s5064_s25 + $0x330] sm:$0xff] }
  0x22   : > { %222 = vst [vmem:[%s5069_s26 + $0x198] sm:$0xff] %v221_v34  ;;  %224 = vst [vmem:[%s5069_s26 + $0x1a4] sm:$0xff] %v223_v35  ;;  %v227_v37 = vld [vmem:[%s5064_s25 + $0x33c] sm:$0xff]  ;;  %v229_v38 = vld [vmem:[%s5064_s25 + $0x348] sm:$0xff] }
  0x23   : > { %226 = vst [vmem:[%s5069_s26 + $0x1b0] sm:$0xff] %v225_v36  ;;  %228 = vst [vmem:[%s5069_s26 + $0x1bc] sm:$0xff] %v227_v37  ;;  %v231_v39 = vld [vmem:[%s5064_s25 + $0x354] sm:$0xff]  ;;  %v233_v40 = vld [vmem:[%s5064_s25 + $0x360] sm:$0xff] }
  0x24   : > { %230 = vst [vmem:[%s5069_s26 + $0x1c8] sm:$0xff] %v229_v38  ;;  %v235_v41 = vld [vmem:[%s5064_s25 + $0x36c] sm:$0xff]  ;;  %232 = vst [vmem:[%s5069_s26 + $0x1d4] sm:$0xff] %v231_v39  ;;  %v237_v42 = vld [vmem:[%s5064_s25 + $0x378] sm:$0xff] }
  0x25   : > { %234 = vst [vmem:[%s5069_s26 + $0x1e0] sm:$0xff] %v233_v40  ;;  %236 = vst [vmem:[%s5069_s26 + $0x1ec] sm:$0xff] %v235_v41  ;;  %v239_v43 = vld [vmem:[%s5064_s25 + $0x384] sm:$0xff]  ;;  %v241_v44 = vld [vmem:[%s5064_s25 + $0x390] sm:$0xff] }
  0x26   : > { %238 = vst [vmem:[%s5069_s26 + $0x1f8] sm:$0xff] %v237_v42  ;;  %240 = vst [vmem:[%s5069_s26 + $0x204] sm:$0xff] %v239_v43  ;;  %v243_v45 = vld [vmem:[%s5064_s25 + $0x39c] sm:$0xff]  ;;  %v245_v46 = vld [vmem:[%s5064_s25 + $0x3a8] sm:$0xff] }
  0x27   : > { %242 = vst [vmem:[%s5069_s26 + $0x210] sm:$0xff] %v241_v44  ;;  %v247_v47 = vld [vmem:[%s5064_s25 + $0x3b4] sm:$0xff]  ;;  %244 = vst [vmem:[%s5069_s26 + $0x21c] sm:$0xff] %v243_v45  ;;  %v249_v48 = vld [vmem:[%s5064_s25 + $0x3c0] sm:$0xff] }
  0x28   : > { %246 = vst [vmem:[%s5069_s26 + $0x228] sm:$0xff] %v245_v46  ;;  %248 = vst [vmem:[%s5069_s26 + $0x234] sm:$0xff] %v247_v47  ;;  %v251_v49 = vld [vmem:[%s5064_s25 + $0x3cc] sm:$0xff]  ;;  %v253_v50 = vld [vmem:[%s5064_s25 + $0x3d8] sm:$0xff] }
  0x29   : > { %250 = vst [vmem:[%s5069_s26 + $0x240] sm:$0xff] %v249_v48  ;;  %252 = vst [vmem:[%s5069_s26 + $0x24c] sm:$0xff] %v251_v49  ;;  %v255_v51 = vld [vmem:[%s5064_s25 + $0x3e4] sm:$0xff]  ;;  %v257_v52 = vld [vmem:[%s5064_s25 + $0x3f0] sm:$0xff] }
  0x2a   : > { %254 = vst [vmem:[%s5069_s26 + $0x258] sm:$0xff] %v253_v50  ;;  %v259_v53 = vld [vmem:[%s5064_s25 + $0x3fc] sm:$0xff]  ;;  %256 = vst [vmem:[%s5069_s26 + $0x264] sm:$0xff] %v255_v51  ;;  %v261_v54 = vld [vmem:[%s5064_s25 + $0x408] sm:$0xff] }
  0x2b   : > { %258 = vst [vmem:[%s5069_s26 + $0x270] sm:$0xff] %v257_v52  ;;  %260 = vst [vmem:[%s5069_s26 + $0x27c] sm:$0xff] %v259_v53  ;;  %v263_v55 = vld [vmem:[%s5064_s25 + $0x414] sm:$0xff]  ;;  %v265_v56 = vld [vmem:[%s5064_s25 + $0x420] sm:$0xff] }
  0x2c   : > { %262 = vst [vmem:[%s5069_s26 + $0x288] sm:$0xff] %v261_v54  ;;  %264 = vst [vmem:[%s5069_s26 + $0x294] sm:$0xff] %v263_v55  ;;  %v267_v57 = vld [vmem:[%s5064_s25 + $0x42c] sm:$0xff]  ;;  %v269_v58 = vld [vmem:[%s5064_s25 + $0x438] sm:$0xff] }
  0x2d   : > { %266 = vst [vmem:[%s5069_s26 + $0x2a0] sm:$0xff] %v265_v56  ;;  %v271_v59 = vld [vmem:[%s5064_s25 + $0x444] sm:$0xff]  ;;  %268 = vst [vmem:[%s5069_s26 + $0x2ac] sm:$0xff] %v267_v57  ;;  %v273_v60 = vld [vmem:[%s5064_s25 + $0x450] sm:$0xff] }
  0x2e   : > { %270 = vst [vmem:[%s5069_s26 + $0x2b8] sm:$0xff] %v269_v58  ;;  %272 = vst [vmem:[%s5069_s26 + $0x2c4] sm:$0xff] %v271_v59  ;;  %v275_v61 = vld [vmem:[%s5064_s25 + $0x45c] sm:$0xff]  ;;  %v277_v62 = vld [vmem:[%s5064_s25 + $0x468] sm:$0xff] }
  0x2f   : > { %274 = vst [vmem:[%s5069_s26 + $0x2d0] sm:$0xff] %v273_v60  ;;  %276 = vst [vmem:[%s5069_s26 + $0x2dc] sm:$0xff] %v275_v61  ;;  %v279_v63 = vld [vmem:[%s5064_s25 + $0x474] sm:$0xff]  ;;  %v281_v0 = vld [vmem:[%s5064_s25 + $0x600] sm:$0xff] }
  0x30   : > { %278 = vst [vmem:[%s5069_s26 + $0x2e8] sm:$0xff] %v277_v62  ;;  %v283_v1 = vld [vmem:[%s5064_s25 + $0x60c] sm:$0xff]  ;;  %280 = vst [vmem:[%s5069_s26 + $0x2f4] sm:$0xff] %v279_v63  ;;  %v285_v2 = vld [vmem:[%s5064_s25 + $0x618] sm:$0xff] }
  0x31   : > { %282 = vst [vmem:[%s5069_s26 + $0x300] sm:$0xff] %v281_v0  ;;  %284 = vst [vmem:[%s5069_s26 + $0x30c] sm:$0xff] %v283_v1  ;;  %v287_v3 = vld [vmem:[%s5064_s25 + $0x624] sm:$0xff]  ;;  %v289_v4 = vld [vmem:[%s5064_s25 + $0x630] sm:$0xff] }
  0x32   : > { %286 = vst [vmem:[%s5069_s26 + $0x318] sm:$0xff] %v285_v2  ;;  %288 = vst [vmem:[%s5069_s26 + $0x324] sm:$0xff] %v287_v3  ;;  %v291_v5 = vld [vmem:[%s5064_s25 + $0x63c] sm:$0xff]  ;;  %v293_v6 = vld [vmem:[%s5064_s25 + $0x648] sm:$0xff] }
  0x33   : > { %290 = vst [vmem:[%s5069_s26 + $0x330] sm:$0xff] %v289_v4  ;;  %v295_v7 = vld [vmem:[%s5064_s25 + $0x654] sm:$0xff]  ;;  %292 = vst [vmem:[%s5069_s26 + $0x33c] sm:$0xff] %v291_v5  ;;  %v297_v8 = vld [vmem:[%s5064_s25 + $0x660] sm:$0xff] }
  0x34   : > { %294 = vst [vmem:[%s5069_s26 + $0x348] sm:$0xff] %v293_v6  ;;  %296 = vst [vmem:[%s5069_s26 + $0x354] sm:$0xff] %v295_v7  ;;  %v299_v9 = vld [vmem:[%s5064_s25 + $0x66c] sm:$0xff]  ;;  %v301_v10 = vld [vmem:[%s5064_s25 + $0x678] sm:$0xff] }
  0x35   : > { %298 = vst [vmem:[%s5069_s26 + $0x360] sm:$0xff] %v297_v8  ;;  %300 = vst [vmem:[%s5069_s26 + $0x36c] sm:$0xff] %v299_v9  ;;  %v303_v11 = vld [vmem:[%s5064_s25 + $0x684] sm:$0xff]  ;;  %v305_v12 = vld [vmem:[%s5064_s25 + $0x690] sm:$0xff] }
  0x36   : > { %302 = vst [vmem:[%s5069_s26 + $0x378] sm:$0xff] %v301_v10  ;;  %v307_v13 = vld [vmem:[%s5064_s25 + $0x69c] sm:$0xff]  ;;  %304 = vst [vmem:[%s5069_s26 + $0x384] sm:$0xff] %v303_v11  ;;  %v309_v14 = vld [vmem:[%s5064_s25 + $0x6a8] sm:$0xff] }
  0x37   : > { %306 = vst [vmem:[%s5069_s26 + $0x390] sm:$0xff] %v305_v12  ;;  %308 = vst [vmem:[%s5069_s26 + $0x39c] sm:$0xff] %v307_v13  ;;  %v311_v15 = vld [vmem:[%s5064_s25 + $0x6b4] sm:$0xff]  ;;  %v313_v16 = vld [vmem:[%s5064_s25 + $0x6c0] sm:$0xff] }
  0x38   : > { %310 = vst [vmem:[%s5069_s26 + $0x3a8] sm:$0xff] %v309_v14  ;;  %312 = vst [vmem:[%s5069_s26 + $0x3b4] sm:$0xff] %v311_v15  ;;  %v315_v17 = vld [vmem:[%s5064_s25 + $0x6cc] sm:$0xff]  ;;  %v317_v18 = vld [vmem:[%s5064_s25 + $0x6d8] sm:$0xff] }
  0x39   : > { %314 = vst [vmem:[%s5069_s26 + $0x3c0] sm:$0xff] %v313_v16  ;;  %v319_v19 = vld [vmem:[%s5064_s25 + $0x6e4] sm:$0xff]  ;;  %316 = vst [vmem:[%s5069_s26 + $0x3cc] sm:$0xff] %v315_v17  ;;  %v321_v20 = vld [vmem:[%s5064_s25 + $0x6f0] sm:$0xff] }
  0x3a   : > { %318 = vst [vmem:[%s5069_s26 + $0x3d8] sm:$0xff] %v317_v18  ;;  %320 = vst [vmem:[%s5069_s26 + $0x3e4] sm:$0xff] %v319_v19  ;;  %v323_v21 = vld [vmem:[%s5064_s25 + $0x6fc] sm:$0xff]  ;;  %v325_v22 = vld [vmem:[%s5064_s25 + $0x708] sm:$0xff] }
  0x3b   : > { %322 = vst [vmem:[%s5069_s26 + $0x3f0] sm:$0xff] %v321_v20  ;;  %324 = vst [vmem:[%s5069_s26 + $0x3fc] sm:$0xff] %v323_v21  ;;  %v327_v23 = vld [vmem:[%s5064_s25 + $0x714] sm:$0xff]  ;;  %v329_v24 = vld [vmem:[%s5064_s25 + $0x720] sm:$0xff] }
  0x3c   : > { %326 = vst [vmem:[%s5069_s26 + $0x408] sm:$0xff] %v325_v22  ;;  %v331_v25 = vld [vmem:[%s5064_s25 + $0x72c] sm:$0xff]  ;;  %328 = vst [vmem:[%s5069_s26 + $0x414] sm:$0xff] %v327_v23  ;;  %v333_v26 = vld [vmem:[%s5064_s25 + $0x738] sm:$0xff] }
  0x3d   : > { %330 = vst [vmem:[%s5069_s26 + $0x420] sm:$0xff] %v329_v24  ;;  %332 = vst [vmem:[%s5069_s26 + $0x42c] sm:$0xff] %v331_v25  ;;  %v335_v27 = vld [vmem:[%s5064_s25 + $0x744] sm:$0xff]  ;;  %v337_v28 = vld [vmem:[%s5064_s25 + $0x750] sm:$0xff] }
  0x3e   : > { %334 = vst [vmem:[%s5069_s26 + $0x438] sm:$0xff] %v333_v26  ;;  %336 = vst [vmem:[%s5069_s26 + $0x444] sm:$0xff] %v335_v27  ;;  %v339_v29 = vld [vmem:[%s5064_s25 + $0x75c] sm:$0xff]  ;;  %v341_v30 = vld [vmem:[%s5064_s25 + $0x768] sm:$0xff] }
  0x3f   : > { %338 = vst [vmem:[%s5069_s26 + $0x450] sm:$0xff] %v337_v28  ;;  %v343_v31 = vld [vmem:[%s5064_s25 + $0x774] sm:$0xff]  ;;  %340 = vst [vmem:[%s5069_s26 + $0x45c] sm:$0xff] %v339_v29  ;;  %v345_v32 = vld [vmem:[%s5064_s25 + $0x900] sm:$0xff] }
  0x40   : > { %342 = vst [vmem:[%s5069_s26 + $0x468] sm:$0xff] %v341_v30  ;;  %344 = vst [vmem:[%s5069_s26 + $0x474] sm:$0xff] %v343_v31  ;;  %v347_v33 = vld [vmem:[%s5064_s25 + $0x90c] sm:$0xff]  ;;  %v349_v34 = vld [vmem:[%s5064_s25 + $0x918] sm:$0xff] }
  0x41   : > { %346 = vst [vmem:[%s5069_s26 + $0x480] sm:$0xff] %v345_v32  ;;  %348 = vst [vmem:[%s5069_s26 + $0x48c] sm:$0xff] %v347_v33  ;;  %v351_v35 = vld [vmem:[%s5064_s25 + $0x924] sm:$0xff]  ;;  %v353_v36 = vld [vmem:[%s5064_s25 + $0x930] sm:$0xff] }
  0x42   : > { %350 = vst [vmem:[%s5069_s26 + $0x498] sm:$0xff] %v349_v34  ;;  %v355_v37 = vld [vmem:[%s5064_s25 + $0x93c] sm:$0xff]  ;;  %352 = vst [vmem:[%s5069_s26 + $0x4a4] sm:$0xff] %v351_v35  ;;  %v357_v38 = vld [vmem:[%s5064_s25 + $0x948] sm:$0xff] }
  0x43   : > { %354 = vst [vmem:[%s5069_s26 + $0x4b0] sm:$0xff] %v353_v36  ;;  %356 = vst [vmem:[%s5069_s26 + $0x4bc] sm:$0xff] %v355_v37  ;;  %v359_v39 = vld [vmem:[%s5064_s25 + $0x954] sm:$0xff]  ;;  %v361_v40 = vld [vmem:[%s5064_s25 + $0x960] sm:$0xff] }
  0x44   : > { %358 = vst [vmem:[%s5069_s26 + $0x4c8] sm:$0xff] %v357_v38  ;;  %360 = vst [vmem:[%s5069_s26 + $0x4d4] sm:$0xff] %v359_v39  ;;  %v363_v41 = vld [vmem:[%s5064_s25 + $0x96c] sm:$0xff]  ;;  %v365_v42 = vld [vmem:[%s5064_s25 + $0x978] sm:$0xff] }
  0x45   : > { %362 = vst [vmem:[%s5069_s26 + $0x4e0] sm:$0xff] %v361_v40  ;;  %v367_v43 = vld [vmem:[%s5064_s25 + $0x984] sm:$0xff]  ;;  %364 = vst [vmem:[%s5069_s26 + $0x4ec] sm:$0xff] %v363_v41  ;;  %v369_v44 = vld [vmem:[%s5064_s25 + $0x990] sm:$0xff] }
  0x46   : > { %366 = vst [vmem:[%s5069_s26 + $0x4f8] sm:$0xff] %v365_v42  ;;  %368 = vst [vmem:[%s5069_s26 + $0x504] sm:$0xff] %v367_v43  ;;  %v371_v45 = vld [vmem:[%s5064_s25 + $0x99c] sm:$0xff]  ;;  %v373_v46 = vld [vmem:[%s5064_s25 + $0x9a8] sm:$0xff] }
  0x47   : > { %370 = vst [vmem:[%s5069_s26 + $0x510] sm:$0xff] %v369_v44  ;;  %372 = vst [vmem:[%s5069_s26 + $0x51c] sm:$0xff] %v371_v45  ;;  %v375_v47 = vld [vmem:[%s5064_s25 + $0x9b4] sm:$0xff]  ;;  %v377_v48 = vld [vmem:[%s5064_s25 + $0x9c0] sm:$0xff] }
  0x48   : > { %374 = vst [vmem:[%s5069_s26 + $0x528] sm:$0xff] %v373_v46  ;;  %v379_v49 = vld [vmem:[%s5064_s25 + $0x9cc] sm:$0xff]  ;;  %376 = vst [vmem:[%s5069_s26 + $0x534] sm:$0xff] %v375_v47  ;;  %v381_v50 = vld [vmem:[%s5064_s25 + $0x9d8] sm:$0xff] }
  0x49   : > { %378 = vst [vmem:[%s5069_s26 + $0x540] sm:$0xff] %v377_v48  ;;  %380 = vst [vmem:[%s5069_s26 + $0x54c] sm:$0xff] %v379_v49  ;;  %v383_v51 = vld [vmem:[%s5064_s25 + $0x9e4] sm:$0xff]  ;;  %v385_v52 = vld [vmem:[%s5064_s25 + $0x9f0] sm:$0xff] }
  0x4a   : > { %382 = vst [vmem:[%s5069_s26 + $0x558] sm:$0xff] %v381_v50  ;;  %384 = vst [vmem:[%s5069_s26 + $0x564] sm:$0xff] %v383_v51  ;;  %v387_v53 = vld [vmem:[%s5064_s25 + $0x9fc] sm:$0xff]  ;;  %v389_v54 = vld [vmem:[%s5064_s25 + $0xa08] sm:$0xff] }
  0x4b   : > { %386 = vst [vmem:[%s5069_s26 + $0x570] sm:$0xff] %v385_v52  ;;  %v391_v55 = vld [vmem:[%s5064_s25 + $0xa14] sm:$0xff]  ;;  %388 = vst [vmem:[%s5069_s26 + $0x57c] sm:$0xff] %v387_v53  ;;  %v393_v56 = vld [vmem:[%s5064_s25 + $0xa20] sm:$0xff] }
  0x4c   : > { %390 = vst [vmem:[%s5069_s26 + $0x588] sm:$0xff] %v389_v54  ;;  %392 = vst [vmem:[%s5069_s26 + $0x594] sm:$0xff] %v391_v55  ;;  %v395_v57 = vld [vmem:[%s5064_s25 + $0xa2c] sm:$0xff]  ;;  %v397_v58 = vld [vmem:[%s5064_s25 + $0xa38] sm:$0xff] }
  0x4d   : > { %394 = vst [vmem:[%s5069_s26 + $0x5a0] sm:$0xff] %v393_v56  ;;  %396 = vst [vmem:[%s5069_s26 + $0x5ac] sm:$0xff] %v395_v57  ;;  %v399_v59 = vld [vmem:[%s5064_s25 + $0xa44] sm:$0xff]  ;;  %v401_v60 = vld [vmem:[%s5064_s25 + $0xa50] sm:$0xff] }
  0x4e   : > { %398 = vst [vmem:[%s5069_s26 + $0x5b8] sm:$0xff] %v397_v58  ;;  %v403_v61 = vld [vmem:[%s5064_s25 + $0xa5c] sm:$0xff]  ;;  %400 = vst [vmem:[%s5069_s26 + $0x5c4] sm:$0xff] %v399_v59  ;;  %v405_v62 = vld [vmem:[%s5064_s25 + $0xa68] sm:$0xff] }
  0x4f   : > { %402 = vst [vmem:[%s5069_s26 + $0x5d0] sm:$0xff] %v401_v60  ;;  %404 = vst [vmem:[%s5069_s26 + $0x5dc] sm:$0xff] %v403_v61  ;;  %v407_v63 = vld [vmem:[%s5064_s25 + $0xa74] sm:$0xff]  ;;  %v3758_v0 = vld [vmem:[%s5064_s25 + $0x8] sm:$0xf] }
  0x50   : > { %406 = vst [vmem:[%s5069_s26 + $0x5e8] sm:$0xff] %v405_v62  ;;  %408 = vst [vmem:[%s5069_s26 + $0x5f4] sm:$0xff] %v407_v63  ;;  %v3760_v1 = vld [vmem:[%s5064_s25 + $0x14] sm:$0xf]  ;;  %v3762_v2 = vld [vmem:[%s5064_s25 + $0x20] sm:$0xf] }
  0x51   : > { %3759 = vst [vmem:[%s5069_s26 + $0x8] sm:$0xf] %v3758_v0  ;;  %v3764_v3 = vld [vmem:[%s5064_s25 + $0x2c] sm:$0xf]  ;;  %3761 = vst [vmem:[%s5069_s26 + $0x14] sm:$0xf] %v3760_v1 }
  0x52   : > { %3763 = vst [vmem:[%s5069_s26 + $0x20] sm:$0xf] %v3762_v2  ;;  %3765 = vst [vmem:[%s5069_s26 + $0x2c] sm:$0xf] %v3764_v3  ;;  %v3766_v4 = vld [vmem:[%s5064_s25 + $0x38] sm:$0xf] }
  0x53   : > { %v3768_v5 = vld [vmem:[%s5064_s25 + $0x44] sm:$0xf]  ;;  %v3770_v6 = vld [vmem:[%s5064_s25 + $0x50] sm:$0xf]  ;;  %3767 = vst [vmem:[%s5069_s26 + $0x38] sm:$0xf] %v3766_v4 }
  0x54   : > { %3769 = vst [vmem:[%s5069_s26 + $0x44] sm:$0xf] %v3768_v5  ;;  %3771 = vst [vmem:[%s5069_s26 + $0x50] sm:$0xf] %v3770_v6  ;;  %v3772_v7 = vld [vmem:[%s5064_s25 + $0x5c] sm:$0xf] }
  0x55   : > { %v3774_v8 = vld [vmem:[%s5064_s25 + $0x68] sm:$0xf]  ;;  %v3776_v9 = vld [vmem:[%s5064_s25 + $0x74] sm:$0xf]  ;;  %3773 = vst [vmem:[%s5069_s26 + $0x5c] sm:$0xf] %v3772_v7 }
  0x56   : > { %3775 = vst [vmem:[%s5069_s26 + $0x68] sm:$0xf] %v3774_v8  ;;  %3777 = vst [vmem:[%s5069_s26 + $0x74] sm:$0xf] %v3776_v9  ;;  %v3778_v10 = vld [vmem:[%s5064_s25 + $0x80] sm:$0xf] }
  0x57   : > { %v3780_v11 = vld [vmem:[%s5064_s25 + $0x8c] sm:$0xf]  ;;  %v3782_v12 = vld [vmem:[%s5064_s25 + $0x98] sm:$0xf]  ;;  %3779 = vst [vmem:[%s5069_s26 + $0x80] sm:$0xf] %v3778_v10 }
  0x58   : > { %3781 = vst [vmem:[%s5069_s26 + $0x8c] sm:$0xf] %v3780_v11  ;;  %3783 = vst [vmem:[%s5069_s26 + $0x98] sm:$0xf] %v3782_v12  ;;  %v3784_v13 = vld [vmem:[%s5064_s25 + $0xa4] sm:$0xf] }
  0x59   : > { %v3786_v14 = vld [vmem:[%s5064_s25 + $0xb0] sm:$0xf]  ;;  %v3788_v15 = vld [vmem:[%s5064_s25 + $0xbc] sm:$0xf]  ;;  %3785 = vst [vmem:[%s5069_s26 + $0xa4] sm:$0xf] %v3784_v13 }
  0x5a   : > { %3787 = vst [vmem:[%s5069_s26 + $0xb0] sm:$0xf] %v3786_v14  ;;  %3789 = vst [vmem:[%s5069_s26 + $0xbc] sm:$0xf] %v3788_v15  ;;  %v3790_v16 = vld [vmem:[%s5064_s25 + $0xc8] sm:$0xf] }
  0x5b   : > { %v3792_v17 = vld [vmem:[%s5064_s25 + $0xd4] sm:$0xf]  ;;  %v3794_v18 = vld [vmem:[%s5064_s25 + $0xe0] sm:$0xf]  ;;  %3791 = vst [vmem:[%s5069_s26 + $0xc8] sm:$0xf] %v3790_v16 }
  0x5c   : > { %3793 = vst [vmem:[%s5069_s26 + $0xd4] sm:$0xf] %v3792_v17  ;;  %3795 = vst [vmem:[%s5069_s26 + $0xe0] sm:$0xf] %v3794_v18  ;;  %v3796_v19 = vld [vmem:[%s5064_s25 + $0xec] sm:$0xf] }
  0x5d   : > { %v3798_v20 = vld [vmem:[%s5064_s25 + $0xf8] sm:$0xf]  ;;  %v3800_v21 = vld [vmem:[%s5064_s25 + $0x104] sm:$0xf]  ;;  %3797 = vst [vmem:[%s5069_s26 + $0xec] sm:$0xf] %v3796_v19 }
  0x5e   : > { %3799 = vst [vmem:[%s5069_s26 + $0xf8] sm:$0xf] %v3798_v20  ;;  %3801 = vst [vmem:[%s5069_s26 + $0x104] sm:$0xf] %v3800_v21  ;;  %v3802_v22 = vld [vmem:[%s5064_s25 + $0x110] sm:$0xf] }
  0x5f   : > { %v3804_v23 = vld [vmem:[%s5064_s25 + $0x11c] sm:$0xf]  ;;  %v3806_v24 = vld [vmem:[%s5064_s25 + $0x128] sm:$0xf]  ;;  %3803 = vst [vmem:[%s5069_s26 + $0x110] sm:$0xf] %v3802_v22 }
  0x60   : > { %3805 = vst [vmem:[%s5069_s26 + $0x11c] sm:$0xf] %v3804_v23  ;;  %3807 = vst [vmem:[%s5069_s26 + $0x128] sm:$0xf] %v3806_v24  ;;  %v3808_v25 = vld [vmem:[%s5064_s25 + $0x134] sm:$0xf] }
  0x61   : > { %v3810_v26 = vld [vmem:[%s5064_s25 + $0x140] sm:$0xf]  ;;  %v3812_v27 = vld [vmem:[%s5064_s25 + $0x14c] sm:$0xf]  ;;  %3809 = vst [vmem:[%s5069_s26 + $0x134] sm:$0xf] %v3808_v25 }
  0x62   : > { %3811 = vst [vmem:[%s5069_s26 + $0x140] sm:$0xf] %v3810_v26  ;;  %3813 = vst [vmem:[%s5069_s26 + $0x14c] sm:$0xf] %v3812_v27  ;;  %v3814_v28 = vld [vmem:[%s5064_s25 + $0x158] sm:$0xf] }
  0x63   : > { %v3816_v29 = vld [vmem:[%s5064_s25 + $0x164] sm:$0xf]  ;;  %v3818_v30 = vld [vmem:[%s5064_s25 + $0x170] sm:$0xf]  ;;  %3815 = vst [vmem:[%s5069_s26 + $0x158] sm:$0xf] %v3814_v28 }
  0x64   : > { %3817 = vst [vmem:[%s5069_s26 + $0x164] sm:$0xf] %v3816_v29  ;;  %3819 = vst [vmem:[%s5069_s26 + $0x170] sm:$0xf] %v3818_v30  ;;  %v3820_v31 = vld [vmem:[%s5064_s25 + $0x17c] sm:$0xf] }
  0x65   : > { %v3822_v32 = vld [vmem:[%s5064_s25 + $0x308] sm:$0xf]  ;;  %v3824_v33 = vld [vmem:[%s5064_s25 + $0x314] sm:$0xf]  ;;  %3821 = vst [vmem:[%s5069_s26 + $0x17c] sm:$0xf] %v3820_v31 }
  0x66   : > { %3823 = vst [vmem:[%s5069_s26 + $0x188] sm:$0xf] %v3822_v32  ;;  %3825 = vst [vmem:[%s5069_s26 + $0x194] sm:$0xf] %v3824_v33  ;;  %v3826_v34 = vld [vmem:[%s5064_s25 + $0x320] sm:$0xf] }
  0x67   : > { %v3828_v35 = vld [vmem:[%s5064_s25 + $0x32c] sm:$0xf]  ;;  %v3830_v36 = vld [vmem:[%s5064_s25 + $0x338] sm:$0xf]  ;;  %3827 = vst [vmem:[%s5069_s26 + $0x1a0] sm:$0xf] %v3826_v34 }
  0x68   : > { %3829 = vst [vmem:[%s5069_s26 + $0x1ac] sm:$0xf] %v3828_v35  ;;  %3831 = vst [vmem:[%s5069_s26 + $0x1b8] sm:$0xf] %v3830_v36  ;;  %v3832_v37 = vld [vmem:[%s5064_s25 + $0x344] sm:$0xf] }
  0x69   : > { %v3834_v38 = vld [vmem:[%s5064_s25 + $0x350] sm:$0xf]  ;;  %v3836_v39 = vld [vmem:[%s5064_s25 + $0x35c] sm:$0xf]  ;;  %3833 = vst [vmem:[%s5069_s26 + $0x1c4] sm:$0xf] %v3832_v37 }
  0x6a   : > { %3835 = vst [vmem:[%s5069_s26 + $0x1d0] sm:$0xf] %v3834_v38  ;;  %3837 = vst [vmem:[%s5069_s26 + $0x1dc] sm:$0xf] %v3836_v39  ;;  %v3838_v40 = vld [vmem:[%s5064_s25 + $0x368] sm:$0xf] }
  0x6b   : > { %v3840_v41 = vld [vmem:[%s5064_s25 + $0x374] sm:$0xf]  ;;  %v3842_v42 = vld [vmem:[%s5064_s25 + $0x380] sm:$0xf]  ;;  %3839 = vst [vmem:[%s5069_s26 + $0x1e8] sm:$0xf] %v3838_v40 }
  0x6c   : > { %3841 = vst [vmem:[%s5069_s26 + $0x1f4] sm:$0xf] %v3840_v41  ;;  %3843 = vst [vmem:[%s5069_s26 + $0x200] sm:$0xf] %v3842_v42  ;;  %v3844_v43 = vld [vmem:[%s5064_s25 + $0x38c] sm:$0xf] }
  0x6d   : > { %v3846_v44 = vld [vmem:[%s5064_s25 + $0x398] sm:$0xf]  ;;  %v3848_v45 = vld [vmem:[%s5064_s25 + $0x3a4] sm:$0xf]  ;;  %3845 = vst [vmem:[%s5069_s26 + $0x20c] sm:$0xf] %v3844_v43 }
  0x6e   : > { %3847 = vst [vmem:[%s5069_s26 + $0x218] sm:$0xf] %v3846_v44  ;;  %3849 = vst [vmem:[%s5069_s26 + $0x224] sm:$0xf] %v3848_v45  ;;  %v3850_v46 = vld [vmem:[%s5064_s25 + $0x3b0] sm:$0xf] }
  0x6f   : > { %v3852_v47 = vld [vmem:[%s5064_s25 + $0x3bc] sm:$0xf]  ;;  %v3854_v48 = vld [vmem:[%s5064_s25 + $0x3c8] sm:$0xf]  ;;  %3851 = vst [vmem:[%s5069_s26 + $0x230] sm:$0xf] %v3850_v46 }
  0x70   : > { %3853 = vst [vmem:[%s5069_s26 + $0x23c] sm:$0xf] %v3852_v47  ;;  %3855 = vst [vmem:[%s5069_s26 + $0x248] sm:$0xf] %v3854_v48  ;;  %v3856_v49 = vld [vmem:[%s5064_s25 + $0x3d4] sm:$0xf] }
  0x71   : > { %v3858_v50 = vld [vmem:[%s5064_s25 + $0x3e0] sm:$0xf]  ;;  %v3860_v51 = vld [vmem:[%s5064_s25 + $0x3ec] sm:$0xf]  ;;  %3857 = vst [vmem:[%s5069_s26 + $0x254] sm:$0xf] %v3856_v49 }
  0x72   : > { %3859 = vst [vmem:[%s5069_s26 + $0x260] sm:$0xf] %v3858_v50  ;;  %3861 = vst [vmem:[%s5069_s26 + $0x26c] sm:$0xf] %v3860_v51  ;;  %v3862_v52 = vld [vmem:[%s5064_s25 + $0x3f8] sm:$0xf] }
  0x73   : > { %v3864_v53 = vld [vmem:[%s5064_s25 + $0x404] sm:$0xf]  ;;  %v3866_v54 = vld [vmem:[%s5064_s25 + $0x410] sm:$0xf]  ;;  %3863 = vst [vmem:[%s5069_s26 + $0x278] sm:$0xf] %v3862_v52 }
  0x74   : > { %3865 = vst [vmem:[%s5069_s26 + $0x284] sm:$0xf] %v3864_v53  ;;  %3867 = vst [vmem:[%s5069_s26 + $0x290] sm:$0xf] %v3866_v54  ;;  %v3868_v55 = vld [vmem:[%s5064_s25 + $0x41c] sm:$0xf] }
  0x75   : > { %v3870_v56 = vld [vmem:[%s5064_s25 + $0x428] sm:$0xf]  ;;  %v3872_v57 = vld [vmem:[%s5064_s25 + $0x434] sm:$0xf]  ;;  %3869 = vst [vmem:[%s5069_s26 + $0x29c] sm:$0xf] %v3868_v55 }
  0x76   : > { %3871 = vst [vmem:[%s5069_s26 + $0x2a8] sm:$0xf] %v3870_v56  ;;  %3873 = vst [vmem:[%s5069_s26 + $0x2b4] sm:$0xf] %v3872_v57  ;;  %v3874_v58 = vld [vmem:[%s5064_s25 + $0x440] sm:$0xf] }
  0x77   : > { %v3876_v59 = vld [vmem:[%s5064_s25 + $0x44c] sm:$0xf]  ;;  %v3878_v60 = vld [vmem:[%s5064_s25 + $0x458] sm:$0xf]  ;;  %3875 = vst [vmem:[%s5069_s26 + $0x2c0] sm:$0xf] %v3874_v58 }
  0x78   : > { %3877 = vst [vmem:[%s5069_s26 + $0x2cc] sm:$0xf] %v3876_v59  ;;  %3879 = vst [vmem:[%s5069_s26 + $0x2d8] sm:$0xf] %v3878_v60  ;;  %v3880_v61 = vld [vmem:[%s5064_s25 + $0x464] sm:$0xf] }
  0x79   : > { %v3882_v62 = vld [vmem:[%s5064_s25 + $0x470] sm:$0xf]  ;;  %v3884_v63 = vld [vmem:[%s5064_s25 + $0x47c] sm:$0xf]  ;;  %3881 = vst [vmem:[%s5069_s26 + $0x2e4] sm:$0xf] %v3880_v61 }
  0x7a   : > { %3883 = vst [vmem:[%s5069_s26 + $0x2f0] sm:$0xf] %v3882_v62  ;;  %3885 = vst [vmem:[%s5069_s26 + $0x2fc] sm:$0xf] %v3884_v63  ;;  %v3886_v0 = vld [vmem:[%s5064_s25 + $0x608] sm:$0xf] }
  0x7b   : > { %v3888_v1 = vld [vmem:[%s5064_s25 + $0x614] sm:$0xf]  ;;  %v3890_v2 = vld [vmem:[%s5064_s25 + $0x620] sm:$0xf]  ;;  %3887 = vst [vmem:[%s5069_s26 + $0x308] sm:$0xf] %v3886_v0 }
  0x7c   : > { %3889 = vst [vmem:[%s5069_s26 + $0x314] sm:$0xf] %v3888_v1  ;;  %3891 = vst [vmem:[%s5069_s26 + $0x320] sm:$0xf] %v3890_v2  ;;  %v3892_v3 = vld [vmem:[%s5064_s25 + $0x62c] sm:$0xf] }
  0x7d   : > { %v3894_v4 = vld [vmem:[%s5064_s25 + $0x638] sm:$0xf]  ;;  %v3896_v5 = vld [vmem:[%s5064_s25 + $0x644] sm:$0xf]  ;;  %3893 = vst [vmem:[%s5069_s26 + $0x32c] sm:$0xf] %v3892_v3 }
  0x7e   : > { %3895 = vst [vmem:[%s5069_s26 + $0x338] sm:$0xf] %v3894_v4  ;;  %3897 = vst [vmem:[%s5069_s26 + $0x344] sm:$0xf] %v3896_v5  ;;  %v3898_v6 = vld [vmem:[%s5064_s25 + $0x650] sm:$0xf] }
  0x7f   : > { %v3900_v7 = vld [vmem:[%s5064_s25 + $0x65c] sm:$0xf]  ;;  %v3902_v8 = vld [vmem:[%s5064_s25 + $0x668] sm:$0xf]  ;;  %3899 = vst [vmem:[%s5069_s26 + $0x350] sm:$0xf] %v3898_v6 }
  0x80   : > { %3901 = vst [vmem:[%s5069_s26 + $0x35c] sm:$0xf] %v3900_v7  ;;  %3903 = vst [vmem:[%s5069_s26 + $0x368] sm:$0xf] %v3902_v8  ;;  %v3904_v9 = vld [vmem:[%s5064_s25 + $0x674] sm:$0xf] }
  0x81   : > { %v3906_v10 = vld [vmem:[%s5064_s25 + $0x680] sm:$0xf]  ;;  %v3908_v11 = vld [vmem:[%s5064_s25 + $0x68c] sm:$0xf]  ;;  %3905 = vst [vmem:[%s5069_s26 + $0x374] sm:$0xf] %v3904_v9 }
  0x82   : > { %3907 = vst [vmem:[%s5069_s26 + $0x380] sm:$0xf] %v3906_v10  ;;  %3909 = vst [vmem:[%s5069_s26 + $0x38c] sm:$0xf] %v3908_v11  ;;  %v3910_v12 = vld [vmem:[%s5064_s25 + $0x698] sm:$0xf] }
  0x83   : > { %v3912_v13 = vld [vmem:[%s5064_s25 + $0x6a4] sm:$0xf]  ;;  %v3914_v14 = vld [vmem:[%s5064_s25 + $0x6b0] sm:$0xf]  ;;  %3911 = vst [vmem:[%s5069_s26 + $0x398] sm:$0xf] %v3910_v12 }
  0x84   : > { %3913 = vst [vmem:[%s5069_s26 + $0x3a4] sm:$0xf] %v3912_v13  ;;  %3915 = vst [vmem:[%s5069_s26 + $0x3b0] sm:$0xf] %v3914_v14  ;;  %v3916_v15 = vld [vmem:[%s5064_s25 + $0x6bc] sm:$0xf] }
  0x85   : > { %v3918_v16 = vld [vmem:[%s5064_s25 + $0x6c8] sm:$0xf]  ;;  %v3920_v17 = vld [vmem:[%s5064_s25 + $0x6d4] sm:$0xf]  ;;  %3917 = vst [vmem:[%s5069_s26 + $0x3bc] sm:$0xf] %v3916_v15 }
  0x86   : > { %3919 = vst [vmem:[%s5069_s26 + $0x3c8] sm:$0xf] %v3918_v16  ;;  %3921 = vst [vmem:[%s5069_s26 + $0x3d4] sm:$0xf] %v3920_v17  ;;  %v3922_v18 = vld [vmem:[%s5064_s25 + $0x6e0] sm:$0xf] }
  0x87   : > { %v3924_v19 = vld [vmem:[%s5064_s25 + $0x6ec] sm:$0xf]  ;;  %v3926_v20 = vld [vmem:[%s5064_s25 + $0x6f8] sm:$0xf]  ;;  %3923 = vst [vmem:[%s5069_s26 + $0x3e0] sm:$0xf] %v3922_v18 }
  0x88   : > { %3925 = vst [vmem:[%s5069_s26 + $0x3ec] sm:$0xf] %v3924_v19  ;;  %3927 = vst [vmem:[%s5069_s26 + $0x3f8] sm:$0xf] %v3926_v20  ;;  %v3928_v21 = vld [vmem:[%s5064_s25 + $0x704] sm:$0xf] }
  0x89   : > { %v3930_v22 = vld [vmem:[%s5064_s25 + $0x710] sm:$0xf]  ;;  %v3932_v23 = vld [vmem:[%s5064_s25 + $0x71c] sm:$0xf]  ;;  %3929 = vst [vmem:[%s5069_s26 + $0x404] sm:$0xf] %v3928_v21 }
  0x8a   : > { %3931 = vst [vmem:[%s5069_s26 + $0x410] sm:$0xf] %v3930_v22  ;;  %3933 = vst [vmem:[%s5069_s26 + $0x41c] sm:$0xf] %v3932_v23  ;;  %v3934_v24 = vld [vmem:[%s5064_s25 + $0x728] sm:$0xf] }
  0x8b   : > { %v3936_v25 = vld [vmem:[%s5064_s25 + $0x734] sm:$0xf]  ;;  %v3938_v26 = vld [vmem:[%s5064_s25 + $0x740] sm:$0xf]  ;;  %3935 = vst [vmem:[%s5069_s26 + $0x428] sm:$0xf] %v3934_v24 }
  0x8c   : > { %3937 = vst [vmem:[%s5069_s26 + $0x434] sm:$0xf] %v3936_v25  ;;  %3939 = vst [vmem:[%s5069_s26 + $0x440] sm:$0xf] %v3938_v26  ;;  %v3940_v27 = vld [vmem:[%s5064_s25 + $0x74c] sm:$0xf] }
  0x8d   : > { %v3942_v28 = vld [vmem:[%s5064_s25 + $0x758] sm:$0xf]  ;;  %v3944_v29 = vld [vmem:[%s5064_s25 + $0x764] sm:$0xf]  ;;  %3941 = vst [vmem:[%s5069_s26 + $0x44c] sm:$0xf] %v3940_v27 }
  0x8e   : > { %3943 = vst [vmem:[%s5069_s26 + $0x458] sm:$0xf] %v3942_v28  ;;  %3945 = vst [vmem:[%s5069_s26 + $0x464] sm:$0xf] %v3944_v29  ;;  %v3946_v30 = vld [vmem:[%s5064_s25 + $0x770] sm:$0xf] }
  0x8f   : > { %v3948_v31 = vld [vmem:[%s5064_s25 + $0x77c] sm:$0xf]  ;;  %v3950_v32 = vld [vmem:[%s5064_s25 + $0x908] sm:$0xf]  ;;  %3947 = vst [vmem:[%s5069_s26 + $0x470] sm:$0xf] %v3946_v30 }
  0x90   : > { %3949 = vst [vmem:[%s5069_s26 + $0x47c] sm:$0xf] %v3948_v31  ;;  %3951 = vst [vmem:[%s5069_s26 + $0x488] sm:$0xf] %v3950_v32  ;;  %v3952_v33 = vld [vmem:[%s5064_s25 + $0x914] sm:$0xf] }
  0x91   : > { %v3954_v34 = vld [vmem:[%s5064_s25 + $0x920] sm:$0xf]  ;;  %v3956_v35 = vld [vmem:[%s5064_s25 + $0x92c] sm:$0xf]  ;;  %3953 = vst [vmem:[%s5069_s26 + $0x494] sm:$0xf] %v3952_v33 }
  0x92   : > { %3955 = vst [vmem:[%s5069_s26 + $0x4a0] sm:$0xf] %v3954_v34  ;;  %3957 = vst [vmem:[%s5069_s26 + $0x4ac] sm:$0xf] %v3956_v35  ;;  %v3958_v36 = vld [vmem:[%s5064_s25 + $0x938] sm:$0xf] }
  0x93   : > { %v3960_v37 = vld [vmem:[%s5064_s25 + $0x944] sm:$0xf]  ;;  %v3962_v38 = vld [vmem:[%s5064_s25 + $0x950] sm:$0xf]  ;;  %3959 = vst [vmem:[%s5069_s26 + $0x4b8] sm:$0xf] %v3958_v36 }
  0x94   : > { %3961 = vst [vmem:[%s5069_s26 + $0x4c4] sm:$0xf] %v3960_v37  ;;  %3963 = vst [vmem:[%s5069_s26 + $0x4d0] sm:$0xf] %v3962_v38  ;;  %v3964_v39 = vld [vmem:[%s5064_s25 + $0x95c] sm:$0xf] }
  0x95   : > { %v3966_v40 = vld [vmem:[%s5064_s25 + $0x968] sm:$0xf]  ;;  %v3968_v41 = vld [vmem:[%s5064_s25 + $0x974] sm:$0xf]  ;;  %3965 = vst [vmem:[%s5069_s26 + $0x4dc] sm:$0xf] %v3964_v39 }
  0x96   : > { %3967 = vst [vmem:[%s5069_s26 + $0x4e8] sm:$0xf] %v3966_v40  ;;  %3969 = vst [vmem:[%s5069_s26 + $0x4f4] sm:$0xf] %v3968_v41  ;;  %v3970_v42 = vld [vmem:[%s5064_s25 + $0x980] sm:$0xf] }
  0x97   : > { %v3972_v43 = vld [vmem:[%s5064_s25 + $0x98c] sm:$0xf]  ;;  %v3974_v44 = vld [vmem:[%s5064_s25 + $0x998] sm:$0xf]  ;;  %3971 = vst [vmem:[%s5069_s26 + $0x500] sm:$0xf] %v3970_v42 }
  0x98   : > { %3973 = vst [vmem:[%s5069_s26 + $0x50c] sm:$0xf] %v3972_v43  ;;  %3975 = vst [vmem:[%s5069_s26 + $0x518] sm:$0xf] %v3974_v44  ;;  %v3976_v45 = vld [vmem:[%s5064_s25 + $0x9a4] sm:$0xf] }
  0x99   : > { %v3978_v46 = vld [vmem:[%s5064_s25 + $0x9b0] sm:$0xf]  ;;  %v3980_v47 = vld [vmem:[%s5064_s25 + $0x9bc] sm:$0xf]  ;;  %3977 = vst [vmem:[%s5069_s26 + $0x524] sm:$0xf] %v3976_v45 }
  0x9a   : > { %3979 = vst [vmem:[%s5069_s26 + $0x530] sm:$0xf] %v3978_v46  ;;  %3981 = vst [vmem:[%s5069_s26 + $0x53c] sm:$0xf] %v3980_v47  ;;  %v3982_v48 = vld [vmem:[%s5064_s25 + $0x9c8] sm:$0xf] }
  0x9b   : > { %v3984_v49 = vld [vmem:[%s5064_s25 + $0x9d4] sm:$0xf]  ;;  %v3986_v50 = vld [vmem:[%s5064_s25 + $0x9e0] sm:$0xf]  ;;  %3983 = vst [vmem:[%s5069_s26 + $0x548] sm:$0xf] %v3982_v48 }
  0x9c   : > { %3985 = vst [vmem:[%s5069_s26 + $0x554] sm:$0xf] %v3984_v49  ;;  %3987 = vst [vmem:[%s5069_s26 + $0x560] sm:$0xf] %v3986_v50  ;;  %v3988_v51 = vld [vmem:[%s5064_s25 + $0x9ec] sm:$0xf] }
  0x9d   : > { %v3990_v52 = vld [vmem:[%s5064_s25 + $0x9f8] sm:$0xf]  ;;  %v3992_v53 = vld [vmem:[%s5064_s25 + $0xa04] sm:$0xf]  ;;  %3989 = vst [vmem:[%s5069_s26 + $0x56c] sm:$0xf] %v3988_v51 }
  0x9e   : > { %3991 = vst [vmem:[%s5069_s26 + $0x578] sm:$0xf] %v3990_v52  ;;  %3993 = vst [vmem:[%s5069_s26 + $0x584] sm:$0xf] %v3992_v53  ;;  %v3994_v54 = vld [vmem:[%s5064_s25 + $0xa10] sm:$0xf] }
  0x9f   : > { %v3996_v55 = vld [vmem:[%s5064_s25 + $0xa1c] sm:$0xf]  ;;  %v3998_v56 = vld [vmem:[%s5064_s25 + $0xa28] sm:$0xf]  ;;  %3995 = vst [vmem:[%s5069_s26 + $0x590] sm:$0xf] %v3994_v54 }
  0xa0   : > { %3997 = vst [vmem:[%s5069_s26 + $0x59c] sm:$0xf] %v3996_v55  ;;  %3999 = vst [vmem:[%s5069_s26 + $0x5a8] sm:$0xf] %v3998_v56  ;;  %v4000_v57 = vld [vmem:[%s5064_s25 + $0xa34] sm:$0xf] }
  0xa1   : > { %v4002_v58 = vld [vmem:[%s5064_s25 + $0xa40] sm:$0xf]  ;;  %v4004_v59 = vld [vmem:[%s5064_s25 + $0xa4c] sm:$0xf]  ;;  %4001 = vst [vmem:[%s5069_s26 + $0x5b4] sm:$0xf] %v4000_v57 }
  0xa2   : > { %4003 = vst [vmem:[%s5069_s26 + $0x5c0] sm:$0xf] %v4002_v58  ;;  %4005 = vst [vmem:[%s5069_s26 + $0x5cc] sm:$0xf] %v4004_v59  ;;  %v4006_v60 = vld [vmem:[%s5064_s25 + $0xa58] sm:$0xf] }
  0xa3   : > { %v4008_v61 = vld [vmem:[%s5064_s25 + $0xa64] sm:$0xf]  ;;  %v4010_v62 = vld [vmem:[%s5064_s25 + $0xa70] sm:$0xf]  ;;  %4007 = vst [vmem:[%s5069_s26 + $0x5d8] sm:$0xf] %v4006_v60 }
  0xa4   : > { %4009 = vst [vmem:[%s5069_s26 + $0x5e4] sm:$0xf] %v4008_v61  ;;  %4011 = vst [vmem:[%s5069_s26 + $0x5f0] sm:$0xf] %v4010_v62  ;;  %v4012_v63 = vld [vmem:[%s5064_s25 + $0xa7c] sm:$0xf] }
  0xa5   : > { %4013 = vst [vmem:[%s5069_s26 + $0x5fc] sm:$0xf] %v4012_v63 }
  0xa6 PF: > { %p4014_p5 = scmp.ge.s32.totalorder %s5007_s14, 1  ;;  %p677_p6 = scmp.lt.s32.totalorder %s5007_s14, 3 }
  0xa8   : > { %p678_p7 = pnand %p4014_p5, %p677_p6 }
  0xaa   : > { %681 = sbr.rel (%p678_p7) target bundleno = 826 (0x33a), region = 54 }
  0xaf   : > { %v4711_v0 = vld [vmem:[%s6775_s1 + $0x38] sm:$0xff]   ;;  %v5009_v1 = vmov 0   ;;  %v4712_v2 = vld [vmem:[%s6775_s1 + $0x30] sm:$0xff]   ;;  %v4713_v3 = vld [vmem:[%s6775_s1 + $0x28] sm:$0xff]   ;;  %s684_s6 = sand.u32 1, %s4999_s12   ;;  %vm2075_vm0 = vcmask 261120  }
  0xb0   : > { %2268 = vmatprep.subr.bf16.mxu0 %v5009_v1  ;;  %4651 = vmatprep.subr.bf16.mxu1 %v5009_v1  ;;  %v4714_v4 = vld [vmem:[%s6775_s1 + $0x20] sm:$0xff]   ;;  %s4685_s9 = smul.u32 1536, %s684_s6  ;;  %v4715_v5 = vld [vmem:[%s6775_s1 + $0x18] sm:$0xff]   ;;  %v4716_v7 = vld [vmem:[%s6775_s1 + $0x10] sm:$0xff]  }
  0xb1   : > { %2269 = vmatpush1.bf16.msra.mxu0 %v4711_v0  ;;  %4667 = vmatpush1.bf16.msra.mxu1 %v4711_v0  ;;  %v4717_v9 = vld [vmem:[%s6775_s1 + $0x8] sm:$0xff]   ;;  %v4718_v10 = vld [vmem:[%s6775_s1] sm:$0xff]   ;;  %v4719_v11 = vld [vmem:[%s6775_s1 + $0x78] sm:$0xff]  }
  0xb2   : > { %2270 = vmatprep.subr.bf16.mxu0 %v5009_v1  ;;  %4652 = vmatprep.subr.bf16.mxu1 %v5009_v1  ;;  %s5608_s12 = scalar_lea.vmem [#allocation2], %s4685_s9  ;;  %v4720_v12 = vld [vmem:[%s6775_s1 + $0x70] sm:$0xff]   ;;  %v4721_v13 = vld [vmem:[%s6775_s1 + $0x68] sm:$0xff]   ;;  %v4722_v14 = vld [vmem:[%s6775_s1 + $0x60] sm:$0xff]  }
  0xb3   : > { %v4729_v6 = vld [vmem:[%s5608_s12 + $0x4] ss:$12 sps:$4 sm:$0xff]   ;;  %v4723_v15 = vld [vmem:[%s6775_s1 + $0x58] sm:$0xff]   ;;  %v4725_v17 = vld [vmem:[%s6775_s1 + $0x48] sm:$0xff]  }
  0xb4   : > { %v4732_v8 = vld [vmem:[%s5608_s12 + $0x484] ss:$12 sps:$4 sm:$0xff]   ;;  %2300 = vmatprep.mubr.bf16.mxu0 %v4729_v6  ;;  %v4733_v19 = vld [vmem:[%s6775_s1 + $0x88] sm:$0xff]   ;;  %v4740_v27 = vld [vmem:[%s5608_s12 + $0x34] ss:$12 sps:$4 sm:$0xff]  }
  0xb5   : > { %2271 = vmatpush1.bf16.msra.mxu0 %v4712_v2  ;;  %4668 = vmatpush1.bf16.msra.mxu1 %v4712_v2  ;;  %v4724_v16 = vld [vmem:[%s6775_s1 + $0x50] sm:$0xff]   ;;  %v4726_v18 = vld [vmem:[%s6775_s1 + $0x40] sm:$0xff]   ;;  %v4734_v22 = vld [vmem:[%s5608_s12 + $0x1c] ss:$12 sps:$4 sm:$0xff]  }
  0xb6   : > { %2272 = vmatprep.subr.bf16.mxu0 %v5009_v1  ;;  %4653 = vmatprep.subr.bf16.mxu1 %v5009_v1  ;;  %v4727_v20 = vld [vmem:[%s5608_s12] ss:$12 sps:$4 sm:$0xff]   ;;  %v4736_v23 = vld [vmem:[%s5608_s12 + $0x49c] ss:$12 sps:$4 sm:$0xff]   ;;  %v4738_v25 = vld [vmem:[%s5608_s12 + $0x18] ss:$12 sps:$4 sm:$0xff]  }
  0xb7   : > { %2684 = vmatprep.mubr.bf16.mxu1 %v4732_v8  ;;  %v4730_v21 = vld [vmem:[%s5608_s12 + $0x480] ss:$12 sps:$4 sm:$0xff]   ;;  %v4739_v26 = vld [vmem:[%s5608_s12 + $0x498] ss:$12 sps:$4 sm:$0xff]   ;;  %v4744_v29 = vld [vmem:[%s5608_s12 + $0x30] ss:$12 sps:$4 sm:$0xff]  }
  0xb8   : > { %v4782_v24 = vld [vmem:[%s6775_s1 + $0x80] sm:$0xff]   ;;  %v4745_v30 = vld [vmem:[%s5608_s12 + $0x4b0] ss:$12 sps:$4 sm:$0xff]   ;;  %v4746_v31 = vld [vmem:[%s5608_s12 + $0x4c] ss:$12 sps:$4 sm:$0xff]  }
  0xb9   : > { %2273 = vmatpush1.bf16.msra.mxu0 %v4713_v3  ;;  %4669 = vmatpush1.bf16.msra.mxu1 %v4713_v3  ;;  %v4742_v28 = vld [vmem:[%s5608_s12 + $0x4b4] ss:$12 sps:$4 sm:$0xff]   ;;  %v4748_v32 = vld [vmem:[%s5608_s12 + $0x4cc] ss:$12 sps:$4 sm:$0xff]   ;;  %v4752_v35 = vld [vmem:[%s5608_s12 + $0x64] ss:$12 sps:$4 sm:$0xff]  }
  0xba   : > { %2274 = vmatprep.subr.bf16.mxu0 %v5009_v1  ;;  %4654 = vmatprep.subr.bf16.mxu1 %v5009_v1  ;;  %v4750_v33 = vld [vmem:[%s5608_s12 + $0x48] ss:$12 sps:$4 sm:$0xff]   ;;  %v4754_v36 = vld [vmem:[%s5608_s12 + $0x4e4] ss:$12 sps:$4 sm:$0xff]   ;;  %v4756_v37 = vld [vmem:[%s5608_s12 + $0x60] ss:$12 sps:$4 sm:$0xff]  }
  0xbb   : > { %v4751_v34 = vld [vmem:[%s5608_s12 + $0x4c8] ss:$12 sps:$4 sm:$0xff]   ;;  %v4757_v38 = vld [vmem:[%s5608_s12 + $0x4e0] ss:$12 sps:$4 sm:$0xff]   ;;  %v4762_v41 = vld [vmem:[%s5608_s12 + $0x78] ss:$12 sps:$4 sm:$0xff]  }
  0xbc   : > { %v4758_v39 = vld [vmem:[%s5608_s12 + $0x7c] ss:$12 sps:$4 sm:$0xff]   ;;  %v4763_v42 = vld [vmem:[%s5608_s12 + $0x4f8] ss:$12 sps:$4 sm:$0xff]   ;;  %v4764_v43 = vld [vmem:[%s5608_s12 + $0x94] ss:$12 sps:$4 sm:$0xff]  }
  0xbd   : > { %2275 = vmatpush1.bf16.msra.mxu0 %v4714_v4  ;;  %4670 = vmatpush1.bf16.msra.mxu1 %v4714_v4  ;;  %v4760_v40 = vld [vmem:[%s5608_s12 + $0x4fc] ss:$12 sps:$4 sm:$0xff]   ;;  %v4766_v44 = vld [vmem:[%s5608_s12 + $0x514] ss:$12 sps:$4 sm:$0xff]   ;;  %v4770_v47 = vld [vmem:[%s5608_s12 + $0xac] ss:$12 sps:$4 sm:$0xff]  }
  0xbe   : > { %2276 = vmatprep.subr.bf16.mxu0 %v5009_v1  ;;  %4655 = vmatprep.subr.bf16.mxu1 %v5009_v1  ;;  %v4768_v45 = vld [vmem:[%s5608_s12 + $0x90] ss:$12 sps:$4 sm:$0xff]   ;;  %v4772_v48 = vld [vmem:[%s5608_s12 + $0x52c] ss:$12 sps:$4 sm:$0xff]   ;;  %v4774_v49 = vld [vmem:[%s5608_s12 + $0xa8] ss:$12 sps:$4 sm:$0xff]  }
  0xbf   : > { %v4769_v46 = vld [vmem:[%s5608_s12 + $0x510] ss:$12 sps:$4 sm:$0xff]   ;;  %v4775_v50 = vld [vmem:[%s5608_s12 + $0x528] ss:$12 sps:$4 sm:$0xff]   ;;  %v4780_v53 = vld [vmem:[%s5608_s12 + $0xc0] ss:$12 sps:$4 sm:$0xff]  }
  0xc0   : > { %v4776_v51 = vld [vmem:[%s5608_s12 + $0xc4] ss:$12 sps:$4 sm:$0xff]   ;;  %v4781_v54 = vld [vmem:[%s5608_s12 + $0x540] ss:$12 sps:$4 sm:$0xff]   ;;  %v4783_v55 = vld [vmem:[%s5608_s12 + $0xdc] ss:$12 sps:$4 sm:$0xff]  }
  0xc1   : > { %2277 = vmatpush1.bf16.msra.mxu0 %v4715_v5  ;;  %4671 = vmatpush1.bf16.msra.mxu1 %v4715_v5  ;;  %v4778_v52 = vld [vmem:[%s5608_s12 + $0x544] ss:$12 sps:$4 sm:$0xff]   ;;  %v4785_v56 = vld [vmem:[%s5608_s12 + $0x55c] ss:$12 sps:$4 sm:$0xff]   ;;  %v4789_v59 = vld [vmem:[%s5608_s12 + $0xf4] ss:$12 sps:$4 sm:$0xff]  }
  0xc2   : > { %2278 = vmatprep.subr.bf16.mxu0 %v5009_v1  ;;  %4656 = vmatprep.subr.bf16.mxu1 %v5009_v1  ;;  %v4787_v57 = vld [vmem:[%s5608_s12 + $0xd8] ss:$12 sps:$4 sm:$0xff]   ;;  %v4791_v60 = vld [vmem:[%s5608_s12 + $0x574] ss:$12 sps:$4 sm:$0xff]   ;;  %v4793_v61 = vld [vmem:[%s5608_s12 + $0xf0] ss:$12 sps:$4 sm:$0xff]  }
  0xc3   : > { %v4788_v58 = vld [vmem:[%s5608_s12 + $0x558] ss:$12 sps:$4 sm:$0xff]   ;;  %v4794_v62 = vld [vmem:[%s5608_s12 + $0x570] ss:$12 sps:$4 sm:$0xff]   ;;  %v4800_v2 = vld [vmem:[%s5608_s12 + $0x588] ss:$12 sps:$4 sm:$0xff]  }
  0xc4   : > { %v4795_v63 = vld [vmem:[%s5608_s12 + $0x10c] ss:$12 sps:$4 sm:$0xff]   ;;  %v4801_v3 = vld [vmem:[%s5608_s12 + $0x124] ss:$12 sps:$4 sm:$0xff]   ;;  %v4809_v8 = vld [vmem:[%s5608_s12 + $0x5bc] ss:$12 sps:$4 sm:$0xff]  }
  0xc5   : > { %2279 = vmatpush1.bf16.msra.mxu0 %v4716_v7  ;;  %4672 = vmatpush1.bf16.msra.mxu1 %v4716_v7  ;;  %v4797_v0 = vld [vmem:[%s5608_s12 + $0x58c] ss:$12 sps:$4 sm:$0xff]   ;;  %v4803_v4 = vld [vmem:[%s5608_s12 + $0x5a4] ss:$12 sps:$4 sm:$0xff]   ;;  %v4807_v7 = vld [vmem:[%s5608_s12 + $0x13c] ss:$12 sps:$4 sm:$0xff]  }
  0xc6   : > { %2280 = vmatprep.subr.bf16.mxu0 %v5009_v1  ;;  %4657 = vmatprep.subr.bf16.mxu1 %v5009_v1  ;;  %v4805_v5 = vld [vmem:[%s5608_s12 + $0x120] ss:$12 sps:$4 sm:$0xff]  }
  0xc7   : > { %v4806_v6 = vld [vmem:[%s5608_s12 + $0x5a0] ss:$12 sps:$4 sm:$0xff]  }
  0xc9   : > { %2281 = vmatpush1.bf16.msra.mxu0 %v4717_v9  ;;  %4673 = vmatpush1.bf16.msra.mxu1 %v4717_v9  ;;  %v4811_v9 = vld [vmem:[%s5608_s12 + $0x138] ss:$12 sps:$4 sm:$0xff]  }
  0xca   : > { %2282 = vmatprep.subr.bf16.mxu0 %v5009_v1  ;;  %4658 = vmatprep.subr.bf16.mxu1 %v5009_v1 }
  0xcd   : > { %2283 = vmatpush1.bf16.msra.mxu0 %v4718_v10  ;;  %4674 = vmatpush1.bf16.msra.mxu1 %v4718_v10  ;;  %v4812_v10 = vld [vmem:[%s5608_s12 + $0x5b8] ss:$12 sps:$4 sm:$0xff]  }
  0xce   : > { %2284 = vmatprep.subr.bf16.mxu0 %v5009_v1  ;;  %4659 = vmatprep.subr.bf16.mxu1 %v5009_v1 }
  0xd1   : > { %2285 = vmatpush2.bf16.msra.mxu0 %v4719_v11  ;;  %4675 = vmatpush2.bf16.msra.mxu1 %v4719_v11  ;;  %v4813_v11 = vld [vmem:[%s5608_s12 + $0x154] ss:$12 sps:$4 sm:$0xff]  }
  0xd2   : > { %2286 = vmatprep.subr.bf16.mxu0 %v5009_v1  ;;  %4660 = vmatprep.subr.bf16.mxu1 %v5009_v1 }
  0xd5   : > { %2287 = vmatpush2.bf16.msra.mxu0 %v4720_v12  ;;  %4676 = vmatpush2.bf16.msra.mxu1 %v4720_v12  ;;  %v4815_v12 = vld [vmem:[%s5608_s12 + $0x5d4] ss:$12 sps:$4 sm:$0xff]  }
  0xd6   : > { %2288 = vmatprep.subr.bf16.mxu0 %v5009_v1  ;;  %4661 = vmatprep.subr.bf16.mxu1 %v5009_v1 }
  0xd9   : > { %2289 = vmatpush2.bf16.msra.mxu0 %v4721_v13  ;;  %4677 = vmatpush2.bf16.msra.mxu1 %v4721_v13  ;;  %v4817_v13 = vld [vmem:[%s5608_s12 + $0x150] ss:$12 sps:$4 sm:$0xff]  }
  0xda   : > { %2290 = vmatprep.subr.bf16.mxu0 %v5009_v1  ;;  %4662 = vmatprep.subr.bf16.mxu1 %v5009_v1 }
  0xdd   : > { %2291 = vmatpush2.bf16.msra.mxu0 %v4722_v14  ;;  %4678 = vmatpush2.bf16.msra.mxu1 %v4722_v14  ;;  %v4818_v14 = vld [vmem:[%s5608_s12 + $0x5d0] ss:$12 sps:$4 sm:$0xff]  }
  0xde   : > { %2292 = vmatprep.subr.bf16.mxu0 %v5009_v1  ;;  %4663 = vmatprep.subr.bf16.mxu1 %v5009_v1 }
  0xe1   : > { %2293 = vmatpush2.bf16.msra.mxu0 %v4723_v15  ;;  %4679 = vmatpush2.bf16.msra.mxu1 %v4723_v15  ;;  %v4819_v15 = vld [vmem:[%s5608_s12 + $0x16c] ss:$12 sps:$4 sm:$0xff]  }
  0xe2   : > { %2294 = vmatprep.subr.bf16.mxu0 %v5009_v1  ;;  %4664 = vmatprep.subr.bf16.mxu1 %v5009_v1 }
  0xe5   : > { %2295 = vmatpush2.bf16.msra.mxu0 %v4724_v16  ;;  %4680 = vmatpush2.bf16.msra.mxu1 %v4724_v16  ;;  %v4821_v16 = vld [vmem:[%s5608_s12 + $0x5ec] ss:$12 sps:$4 sm:$0xff]  }
  0xe6   : > { %2296 = vmatprep.subr.bf16.mxu0 %v5009_v1  ;;  %4665 = vmatprep.subr.bf16.mxu1 %v5009_v1 }
  0xe9   : > { %2297 = vmatpush2.bf16.msra.mxu0 %v4725_v17  ;;  %4681 = vmatpush2.bf16.msra.mxu1 %v4725_v17  ;;  %v4823_v17 = vld [vmem:[%s5608_s12 + $0x168] ss:$12 sps:$4 sm:$0xff]  }
  0xea   : > { %2298 = vmatprep.subr.bf16.mxu0 %v5009_v1  ;;  %4666 = vmatprep.subr.bf16.mxu1 %v5009_v1  ;;  %v4799_v1 = vld [vmem:[%s5608_s12 + $0x108] ss:$12 sps:$4 sm:$0xff]  }
  0xed   : > { %2299 = vmatpush2.bf16.msra.mxu0 %v4726_v18  ;;  %4682 = vmatpush2.bf16.msra.mxu1 %v4726_v18  ;;  %v4824_v18 = vld [vmem:[%s5608_s12 + $0x5e8] ss:$12 sps:$4 sm:$0xff]  }
  0xee   : > { %4519 = vmatprep.subr.bf16.mxu1 %v4733_v19 }
  0xf0   : > { %2301 = vmatmul.mubr.bf16.vlgmr.msra.gmra.mxu0 %v4727_v20  ;;  %2685 = vmatmul.mubr.bf16.vlgmr.msra.gmra.mxu1 %v4730_v21  ;;  %v4827_v20 = vld [vmem:[%s5608_s12 + $0x8] ss:$12 sps:$4 sm:$0xff]   ;;  %v4828_v21 = vld [vmem:[%s5608_s12 + $0x180] ss:$12 sps:$4 sm:$0xff]  }
  0xf1   : > { %4520 = vmatpush3.bf16.msra.mxu1 %v4733_v19  ;;  %2308 = vmatprep.mubr.bf16.mxu0 %v4734_v22  ;;  %v4825_v19 = vld [vmem:[%s5608_s12 + $0x184] ss:$12 sps:$4 sm:$0xff]   ;;  %v4829_v22 = vld [vmem:[%s5608_s12 + $0x20] ss:$12 sps:$4 sm:$0xff]  }
  0xf2   : > { %2692 = vmatprep.mubr.bf16.mxu1 %v4736_v23  ;;  %4521 = vmatprep.subr.bf16.mxu1 %v4782_v24  ;;  %v4830_v23 = vld [vmem:[%s5608_s12 + $0x19c] ss:$12 sps:$4 sm:$0xff]  }
  0xf5   : > { %4522 = vmatpush3.bf16.msra.mxu1 %v4782_v24  ;;  %v4832_v24 = vld [vmem:[%s5608_s12 + $0x38] ss:$12 sps:$4 sm:$0xff]  }
  0xf8   : > { %2309 = vmatmul.mubr.bf16.gmra.mxu0 %v4738_v25  ;;  %2693 = vmatmul.mubr.bf16.gmra.mxu1 %v4739_v26  ;;  %v4833_v25 = vld [vmem:[%s5608_s12 + $0x198] ss:$12 sps:$4 sm:$0xff]   ;;  %v4834_v26 = vld [vmem:[%s5608_s12 + $0x50] ss:$12 sps:$4 sm:$0xff]  }
  0xf9   : > { %2316 = vmatprep.mubr.bf16.mxu0 %v4740_v27  ;;  %2700 = vmatprep.mubr.bf16.mxu1 %v4742_v28  ;;  %v4835_v27 = vld [vmem:[%s5608_s12 + $0x1b4] ss:$12 sps:$4 sm:$0xff]  }
  0xfa   : > { %v4837_v28 = vld [vmem:[%s5608_s12 + $0x68] ss:$12 sps:$4 sm:$0xff]  }
 0x100   : > { %2317 = vmatmul.mubr.bf16.gmra.mxu0 %v4744_v29  ;;  %2701 = vmatmul.mubr.bf16.gmra.mxu1 %v4745_v30  ;;  %v4838_v29 = vld [vmem:[%s5608_s12 + $0x1b0] ss:$12 sps:$4 sm:$0xff]   ;;  %v4839_v30 = vld [vmem:[%s5608_s12 + $0x80] ss:$12 sps:$4 sm:$0xff]  }
 0x101   : > { %2324 = vmatprep.mubr.bf16.mxu0 %v4746_v31  ;;  %2708 = vmatprep.mubr.bf16.mxu1 %v4748_v32  ;;  %v4840_v31 = vld [vmem:[%s5608_s12 + $0x1cc] ss:$12 sps:$4 sm:$0xff]  }
 0x102   : > { %v4842_v32 = vld [vmem:[%s5608_s12 + $0x98] ss:$12 sps:$4 sm:$0xff]  }
 0x108   : > { %2325 = vmatmul.mubr.bf16.gmra.mxu0 %v4750_v33  ;;  %2709 = vmatmul.mubr.bf16.gmra.mxu1 %v4751_v34  ;;  %v4843_v33 = vld [vmem:[%s5608_s12 + $0x1c8] ss:$12 sps:$4 sm:$0xff]   ;;  %v4844_v34 = vld [vmem:[%s5608_s12 + $0xb0] ss:$12 sps:$4 sm:$0xff]  }
 0x109   : > { %2332 = vmatprep.mubr.bf16.mxu0 %v4752_v35  ;;  %2716 = vmatprep.mubr.bf16.mxu1 %v4754_v36  ;;  %v4845_v35 = vld [vmem:[%s5608_s12 + $0x1e4] ss:$12 sps:$4 sm:$0xff]   ;;  %v4847_v36 = vld [vmem:[%s5608_s12 + $0xc8] ss:$12 sps:$4 sm:$0xff]  }
 0x110   : > { %2333 = vmatmul.mubr.bf16.gmra.mxu0 %v4756_v37  ;;  %2717 = vmatmul.mubr.bf16.gmra.mxu1 %v4757_v38  ;;  %v4848_v37 = vld [vmem:[%s5608_s12 + $0x1e0] ss:$12 sps:$4 sm:$0xff]  }
 0x111   : > { %2340 = vmatprep.mubr.bf16.mxu0 %v4758_v39  ;;  %2724 = vmatprep.mubr.bf16.mxu1 %v4760_v40  ;;  %v4849_v38 = vld [vmem:[%s5608_s12 + $0xe0] ss:$12 sps:$4 sm:$0xff]   ;;  %v4850_v39 = vld [vmem:[%s5608_s12 + $0x1fc] ss:$12 sps:$4 sm:$0xff]   ;;  %v4852_v40 = vld [vmem:[%s5608_s12 + $0xf8] ss:$12 sps:$4 sm:$0xff]  }
 0x118   : > { %2341 = vmatmul.mubr.bf16.gmra.mxu0 %v4762_v41  ;;  %2725 = vmatmul.mubr.bf16.gmra.mxu1 %v4763_v42  ;;  %v4853_v41 = vld [vmem:[%s5608_s12 + $0x1f8] ss:$12 sps:$4 sm:$0xff]   ;;  %v4854_v42 = vld [vmem:[%s5608_s12 + $0x110] ss:$12 sps:$4 sm:$0xff]  }
 0x119   : > { %2348 = vmatprep.mubr.bf16.mxu0 %v4764_v43  ;;  %2732 = vmatprep.mubr.bf16.mxu1 %v4766_v44  ;;  %v4855_v43 = vld [vmem:[%s5608_s12 + $0x214] ss:$12 sps:$4 sm:$0xff]  }
 0x11a   : > { %v4857_v44 = vld [vmem:[%s5608_s12 + $0x128] ss:$12 sps:$4 sm:$0xff]  }
 0x120   : > { %2349 = vmatmul.mubr.bf16.gmra.mxu0 %v4768_v45  ;;  %2733 = vmatmul.mubr.bf16.gmra.mxu1 %v4769_v46  ;;  %v4858_v45 = vld [vmem:[%s5608_s12 + $0x210] ss:$12 sps:$4 sm:$0xff]   ;;  %v4859_v46 = vld [vmem:[%s5608_s12 + $0x140] ss:$12 sps:$4 sm:$0xff]  }
 0x121   : > { %2356 = vmatprep.mubr.bf16.mxu0 %v4770_v47  ;;  %2740 = vmatprep.mubr.bf16.mxu1 %v4772_v48  ;;  %v4860_v47 = vld [vmem:[%s5608_s12 + $0x22c] ss:$12 sps:$4 sm:$0xff]  }
 0x122   : > { %v4862_v48 = vld [vmem:[%s5608_s12 + $0x158] ss:$12 sps:$4 sm:$0xff]  }
 0x128   : > { %2357 = vmatmul.mubr.bf16.gmra.mxu0 %v4774_v49  ;;  %2741 = vmatmul.mubr.bf16.gmra.mxu1 %v4775_v50  ;;  %v4863_v49 = vld [vmem:[%s5608_s12 + $0x228] ss:$12 sps:$4 sm:$0xff]   ;;  %v4864_v50 = vld [vmem:[%s5608_s12 + $0x170] ss:$12 sps:$4 sm:$0xff]  }
 0x129   : > { %2364 = vmatprep.mubr.bf16.mxu0 %v4776_v51  ;;  %2748 = vmatprep.mubr.bf16.mxu1 %v4778_v52  ;;  %v4865_v51 = vld [vmem:[%s5608_s12 + $0x244] ss:$12 sps:$4 sm:$0xff]   ;;  %v4867_v52 = vld [vmem:[%s5608_s12 + $0x188] ss:$12 sps:$4 sm:$0xff]  }
 0x130   : > { %2365 = vmatmul.mubr.bf16.gmra.mxu0 %v4780_v53  ;;  %2749 = vmatmul.mubr.bf16.gmra.mxu1 %v4781_v54  ;;  %v4868_v53 = vld [vmem:[%s5608_s12 + $0x240] ss:$12 sps:$4 sm:$0xff]  }
 0x131   : > { %2372 = vmatprep.mubr.bf16.mxu0 %v4783_v55  ;;  %2756 = vmatprep.mubr.bf16.mxu1 %v4785_v56  ;;  %v4869_v54 = vld [vmem:[%s5608_s12 + $0x1a0] ss:$12 sps:$4 sm:$0xff]   ;;  %v4870_v55 = vld [vmem:[%s5608_s12 + $0x25c] ss:$12 sps:$4 sm:$0xff]   ;;  %v4872_v56 = vld [vmem:[%s5608_s12 + $0x1b8] ss:$12 sps:$4 sm:$0xff]  }
 0x138   : > { %2373 = vmatmul.mubr.bf16.gmra.mxu0 %v4787_v57  ;;  %2757 = vmatmul.mubr.bf16.gmra.mxu1 %v4788_v58 }
 0x139   : > { %2380 = vmatprep.mubr.bf16.mxu0 %v4789_v59  ;;  %2764 = vmatprep.mubr.bf16.mxu1 %v4791_v60 }
 0x140   : > { %2381 = vmatmul.mubr.bf16.gmra.mxu0 %v4793_v61  ;;  %2765 = vmatmul.mubr.bf16.gmra.mxu1 %v4794_v62 }
 0x141   : > { %2388 = vmatprep.mubr.bf16.mxu0 %v4795_v63  ;;  %2772 = vmatprep.mubr.bf16.mxu1 %v4797_v0  ;;  %v4873_v63 = vld [vmem:[%s5608_s12 + $0x258] ss:$12 sps:$4 sm:$0xff]   ;;  %v4874_v0 = vld [vmem:[%s5608_s12 + $0x1d0] ss:$12 sps:$4 sm:$0xff]  }
 0x148   : > { %2389 = vmatmul.mubr.bf16.gmra.mxu0 %v4799_v1  ;;  %2773 = vmatmul.mubr.bf16.gmra.mxu1 %v4800_v2  ;;  %v4875_v1 = vld [vmem:[%s5608_s12 + $0x274] ss:$12 sps:$4 sm:$0xff]  }
 0x149   : > { %2396 = vmatprep.mubr.bf16.mxu0 %v4801_v3  ;;  %2780 = vmatprep.mubr.bf16.mxu1 %v4803_v4  ;;  %v4877_v2 = vld [vmem:[%s5608_s12 + $0x1e8] ss:$12 sps:$4 sm:$0xff]  }
 0x150   : > { %2397 = vmatmul.mubr.bf16.gmra.mxu0 %v4805_v5  ;;  %2781 = vmatmul.mubr.bf16.gmra.mxu1 %v4806_v6 }
 0x151   : > { %2404 = vmatprep.mubr.bf16.mxu0 %v4807_v7  ;;  %2788 = vmatprep.mubr.bf16.mxu1 %v4809_v8 }
 0x158   : > { %2405 = vmatmul.mubr.bf16.gmra.mxu0 %v4811_v9  ;;  %2789 = vmatmul.mubr.bf16.gmra.mxu1 %v4812_v10 }
 0x159   : > { %2412 = vmatprep.mubr.bf16.mxu0 %v4813_v11  ;;  %2796 = vmatprep.mubr.bf16.mxu1 %v4815_v12  ;;  %v4878_v11 = vld [vmem:[%s5608_s12 + $0x270] ss:$12 sps:$4 sm:$0xff]   ;;  %v4879_v12 = vld [vmem:[%s5608_s12 + $0x200] ss:$12 sps:$4 sm:$0xff]  }
 0x160   : > { %2413 = vmatmul.mubr.bf16.gmra.mxu0 %v4817_v13  ;;  %2797 = vmatmul.mubr.bf16.gmra.mxu1 %v4818_v14  ;;  %v4880_v13 = vld [vmem:[%s5608_s12 + $0x28c] ss:$12 sps:$4 sm:$0xff]  }
 0x161   : > { %2420 = vmatprep.mubr.bf16.mxu0 %v4819_v15  ;;  %2804 = vmatprep.mubr.bf16.mxu1 %v4821_v16  ;;  %v4882_v14 = vld [vmem:[%s5608_s12 + $0x218] ss:$12 sps:$4 sm:$0xff]  }
 0x168   : > { %2421 = vmatmul.mubr.bf16.gmra.mxu0 %v4823_v17  ;;  %2805 = vmatmul.mubr.bf16.gmra.mxu1 %v4824_v18 }
 0x169   : > { %2428 = vmatprep.mubr.bf16.mxu0 %v4825_v19  ;;  %4523 = vmatprep.mubr.msk.bf16.mxu1 %vm2075_vm0, %v4827_v20 }
 0x170   : > { %2429 = vmatmul.mubr.bf16.gmra.mxu0 %v4828_v21  ;;  %4524 = vmatmul.mubr.msk.bf16.vlgmr.msra.gmra.mxu1 %vm2075_vm0, %v4829_v22 }
 0x171   : > { %2436 = vmatprep.mubr.bf16.mxu0 %v4830_v23  ;;  %4527 = vmatprep.mubr.msk.bf16.mxu1 %vm2075_vm0, %v4832_v24  ;;  %v4883_v23 = vld [vmem:[%s5608_s12 + $0x288] ss:$12 sps:$4 sm:$0xff]   ;;  %v4884_v24 = vld [vmem:[%s5608_s12 + $0x230] ss:$12 sps:$4 sm:$0xff]  }
 0x178   : > { %2437 = vmatmul.mubr.bf16.gmra.mxu0 %v4833_v25  ;;  %4528 = vmatmul.mubr.msk.bf16.gmra.mxu1 %vm2075_vm0, %v4834_v26  ;;  %v4887_v25 = vld [vmem:[%s5608_s12 + $0x2a4] ss:$12 sps:$4 sm:$0xff]   ;;  %v4888_v26 = vld [vmem:[%s5608_s12 + $0x248] ss:$12 sps:$4 sm:$0xff]  }
 0x179   : > { %2444 = vmatprep.mubr.bf16.mxu0 %v4835_v27  ;;  %4531 = vmatprep.mubr.msk.bf16.mxu1 %vm2075_vm0, %v4837_v28 }
 0x180   : > { %2445 = vmatmul.mubr.bf16.gmra.mxu0 %v4838_v29  ;;  %4532 = vmatmul.mubr.msk.bf16.gmra.mxu1 %vm2075_vm0, %v4839_v30 }
 0x181   : > { %2452 = vmatprep.mubr.bf16.mxu0 %v4840_v31  ;;  %4535 = vmatprep.mubr.msk.bf16.mxu1 %vm2075_vm0, %v4842_v32 }
 0x188   : > { %2453 = vmatmul.mubr.bf16.gmra.mxu0 %v4843_v33  ;;  %4536 = vmatmul.mubr.msk.bf16.gmra.mxu1 %vm2075_vm0, %v4844_v34 }
 0x189   : > { %2460 = vmatprep.mubr.bf16.mxu0 %v4845_v35  ;;  %4539 = vmatprep.mubr.msk.bf16.mxu1 %vm2075_vm0, %v4847_v36  ;;  %v4885_v35 = vld [vmem:[%s5608_s12 + $0x2a0] ss:$12 sps:$4 sm:$0xff]  }
 0x18a   : > { %v4889_v36 = vld [vmem:[%s5608_s12 + $0x260] ss:$12 sps:$4 sm:$0xff]  }
 0x190   : > { %2461 = vmatmul.mubr.bf16.gmra.mxu0 %v4848_v37  ;;  %4540 = vmatmul.mubr.msk.bf16.gmra.mxu1 %vm2075_vm0, %v4849_v38  ;;  %v4892_v37 = vld [vmem:[%s5608_s12 + $0x2bc] ss:$12 sps:$4 sm:$0xff]   ;;  %v4893_v38 = vld [vmem:[%s5608_s12 + $0x278] ss:$12 sps:$4 sm:$0xff]  }
 0x191   : > { %2468 = vmatprep.mubr.bf16.mxu0 %v4850_v39  ;;  %4543 = vmatprep.mubr.msk.bf16.mxu1 %vm2075_vm0, %v4852_v40 }
 0x198   : > { %2469 = vmatmul.mubr.bf16.gmra.mxu0 %v4853_v41  ;;  %4544 = vmatmul.mubr.msk.bf16.gmra.mxu1 %vm2075_vm0, %v4854_v42 }
 0x199   : > { %2476 = vmatprep.mubr.bf16.mxu0 %v4855_v43  ;;  %4547 = vmatprep.mubr.msk.bf16.mxu1 %vm2075_vm0, %v4857_v44 }
 0x1a0   : > { %2477 = vmatmul.mubr.bf16.gmra.mxu0 %v4858_v45  ;;  %4548 = vmatmul.mubr.msk.bf16.gmra.mxu1 %vm2075_vm0, %v4859_v46 }
 0x1a1   : > { %2484 = vmatprep.mubr.bf16.mxu0 %v4860_v47  ;;  %4551 = vmatprep.mubr.msk.bf16.mxu1 %vm2075_vm0, %v4862_v48  ;;  %v4890_v47 = vld [vmem:[%s5608_s12 + $0x2b8] ss:$12 sps:$4 sm:$0xff]   ;;  %v4894_v48 = vld [vmem:[%s5608_s12 + $0x290] ss:$12 sps:$4 sm:$0xff]  }
 0x1a8   : > { %2485 = vmatmul.mubr.bf16.gmra.mxu0 %v4863_v49  ;;  %4552 = vmatmul.mubr.msk.bf16.gmra.mxu1 %vm2075_vm0, %v4864_v50  ;;  %v4897_v49 = vld [vmem:[%s5608_s12 + $0x2d4] ss:$12 sps:$4 sm:$0xff]  }
 0x1a9   : > { %2492 = vmatprep.mubr.bf16.mxu0 %v4865_v51  ;;  %4555 = vmatprep.mubr.msk.bf16.mxu1 %vm2075_vm0, %v4867_v52  ;;  %v4898_v50 = vld [vmem:[%s5608_s12 + $0x2a8] ss:$12 sps:$4 sm:$0xff]  }
 0x1b0   : > { %v5790_v57 = vpop.f32.mrf.mxu0  ;;  %2493 = vmatmul.mubr.bf16.gmra.mxu0 %v4868_v53  ;;  %v5792_v58 = vpop.f32.mrf.mxu1  ;;  %4556 = vmatmul.mubr.msk.bf16.gmra.mxu1 %vm2075_vm0, %v4869_v54 }
 0x1b1   : > { %6803 = vst [vmem:[#allocation3_spill] sm:$0xff] %v5792_v58  ;;  %2500 = vmatprep.mubr.bf16.mxu0 %v4870_v55  ;;  %4559 = vmatprep.mubr.msk.bf16.mxu1 %vm2075_vm0, %v4872_v56  ;;  %v4972_v58 = vld [vmem:[%s5608_s12 + $0x43c] ss:$12 sps:$4 sm:$0xff]  }
 0x1b2   : > { %v2304_v59 = vpop.f32.mrf.mxu0  ;;  %v2688_v60 = vpop.f32.mrf.mxu1 }
 0x1b4   : > { %v5796_v61 = vpop.f32.mrf.mxu0  ;;  %v5798_v62 = vpop.f32.mrf.mxu1 }
 0x1b5   : > { %6804 = vst [vmem:[#allocation4_spill] sm:$0xff] %v5798_v62 }
 0x1b6   : > { %v2307_v3 = vpop.f32.mrf.mxu0  ;;  %v2691_v4 = vpop.f32.mrf.mxu1 }
 0x1b8   : > { %v5804_v5 = vpop.f32.mrf.mxu0  ;;  %2501 = vmatmul.mubr.bf16.gmra.mxu0 %v4873_v63  ;;  %v5806_v6 = vpop.f32.mrf.mxu1  ;;  %4560 = vmatmul.mubr.msk.bf16.gmra.mxu1 %vm2075_vm0, %v4874_v0  ;;  %v4895_v63 = vld [vmem:[%s5608_s12 + $0x2d0] ss:$12 sps:$4 sm:$0xff]   ;;  %v4899_v0 = vld [vmem:[%s5608_s12 + $0x2c0] ss:$12 sps:$4 sm:$0xff]  }
 0x1b9   : > { %6805 = vst [vmem:[#allocation5_spill] sm:$0xff] %v5806_v6  ;;  %2508 = vmatprep.mubr.bf16.mxu0 %v4875_v1  ;;  %4563 = vmatprep.mubr.msk.bf16.mxu1 %vm2075_vm0, %v4877_v2  ;;  %v4902_v1 = vld [vmem:[%s5608_s12 + $0x2ec] ss:$12 sps:$4 sm:$0xff]  }
 0x1ba   : > { %v2312_v7 = vpop.f32.mrf.mxu0  ;;  %v2696_v8 = vpop.f32.mrf.mxu1  ;;  %v4903_v2 = vld [vmem:[%s5608_s12 + $0x2d8] ss:$12 sps:$4 sm:$0xff]  }
 0x1bc   : > { %v5810_v9 = vpop.f32.mrf.mxu0  ;;  %v5812_v10 = vpop.f32.mrf.mxu1 }
 0x1bd   : > { %6806 = vst [vmem:[#allocation6_spill] sm:$0xff] %v5812_v10  ;;  %v4969_v10 = vld [vmem:[%s5608_s12 + $0x560] ss:$12 sps:$4 sm:$0xff]  }
 0x1be   : > { %v2315_v15 = vpop.f32.mrf.mxu0  ;;  %v2699_v16 = vpop.f32.mrf.mxu1 }
 0x1bf   : > { %v4900_v15 = vld [vmem:[%s5608_s12 + $0x2e8] ss:$12 sps:$4 sm:$0xff]   ;;  %v4904_v16 = vld [vmem:[%s5608_s12 + $0x2f0] ss:$12 sps:$4 sm:$0xff]  }
 0x1c0   : > { %v5818_v17 = vpop.f32.mrf.mxu0  ;;  %2509 = vmatmul.mubr.bf16.gmra.mxu0 %v4878_v11  ;;  %v5820_v18 = vpop.f32.mrf.mxu1  ;;  %4564 = vmatmul.mubr.msk.bf16.gmra.mxu1 %vm2075_vm0, %v4879_v12 }
 0x1c1   : > { %6807 = vst [vmem:[#allocation7_spill] sm:$0xff] %v5820_v18  ;;  %2516 = vmatprep.mubr.bf16.mxu0 %v4880_v13  ;;  %4567 = vmatprep.mubr.msk.bf16.mxu1 %vm2075_vm0, %v4882_v14 }
 0x1c2   : > { %v2320_v19 = vpop.f32.mrf.mxu0  ;;  %v2704_v20 = vpop.f32.mrf.mxu1 }
 0x1c3   : > { %v4907_v19 = vld [vmem:[%s5608_s12 + $0x304] ss:$12 sps:$4 sm:$0xff]   ;;  %v4908_v20 = vld [vmem:[%s5608_s12 + $0x308] ss:$12 sps:$4 sm:$0xff]  }
 0x1c4   : > { %v5824_v21 = vpop.f32.mrf.mxu0  ;;  %v5826_v22 = vpop.f32.mrf.mxu1 }
 0x1c5   : > { %6808 = vst [vmem:[#allocation8_spill] sm:$0xff] %v5826_v22  ;;  %v4967_v22 = vld [vmem:[%s5608_s12 + $0x424] ss:$12 sps:$4 sm:$0xff]  }
 0x1c6   : > { %v2323_v27 = vpop.f32.mrf.mxu0  ;;  %v2707_v28 = vpop.f32.mrf.mxu1 }
 0x1c8   : > { %v5832_v29 = vpop.f32.mrf.mxu0  ;;  %2517 = vmatmul.mubr.bf16.gmra.mxu0 %v4883_v23  ;;  %v5834_v30 = vpop.f32.mrf.mxu1  ;;  %4568 = vmatmul.mubr.msk.bf16.gmra.mxu1 %vm2075_vm0, %v4884_v24 }
 0x1c9   : > { %6809 = vst [vmem:[#allocation9_spill] sm:$0xff] %v5834_v30  ;;  %2524 = vmatprep.mubr.bf16.mxu0 %v4887_v25  ;;  %4571 = vmatprep.mubr.msk.bf16.mxu1 %vm2075_vm0, %v4888_v26 }
 0x1ca   : > { %v2328_v31 = vpop.f32.mrf.mxu0  ;;  %v2712_v32 = vpop.f32.mrf.mxu1 }
 0x1cc   : > { %v5838_v33 = vpop.f32.mrf.mxu0  ;;  %v5840_v34 = vpop.f32.mrf.mxu1 }
 0x1cd   : > { %6810 = vst [vmem:[#allocation10_spill] sm:$0xff] %v5840_v34 }
 0x1ce   : > { %v2331_v39 = vpop.f32.mrf.mxu0  ;;  %v2715_v40 = vpop.f32.mrf.mxu1 }
 0x1d0   : > { %v5846_v41 = vpop.f32.mrf.mxu0  ;;  %2525 = vmatmul.mubr.bf16.gmra.mxu0 %v4885_v35  ;;  %v5848_v42 = vpop.f32.mrf.mxu1  ;;  %4572 = vmatmul.mubr.msk.bf16.gmra.mxu1 %vm2075_vm0, %v4889_v36  ;;  %v4905_v35 = vld [vmem:[%s5608_s12 + $0x300] ss:$12 sps:$4 sm:$0xff]  }
 0x1d1   : > { %6811 = vst [vmem:[#allocation11_spill] sm:$0xff] %v5848_v42  ;;  %2532 = vmatprep.mubr.bf16.mxu0 %v4892_v37  ;;  %4575 = vmatprep.mubr.msk.bf16.mxu1 %vm2075_vm0, %v4893_v38  ;;  %v4909_v36 = vld [vmem:[%s5608_s12 + $0x320] ss:$12 sps:$4 sm:$0xff]   ;;  %v4912_v37 = vld [vmem:[%s5608_s12 + $0x31c] ss:$12 sps:$4 sm:$0xff]  }
 0x1d2   : > { %v2336_v43 = vpop.f32.mrf.mxu0  ;;  %v2720_v44 = vpop.f32.mrf.mxu1  ;;  %v4913_v38 = vld [vmem:[%s5608_s12 + $0x338] ss:$12 sps:$4 sm:$0xff]  }
 0x1d4   : > { %v5852_v45 = vpop.f32.mrf.mxu0  ;;  %v5854_v46 = vpop.f32.mrf.mxu1 }
 0x1d5   : > { %6812 = vst [vmem:[#allocation12_spill] sm:$0xff] %v5854_v46 }
 0x1d6   : > { %v2339_v51 = vpop.f32.mrf.mxu0  ;;  %v2723_v52 = vpop.f32.mrf.mxu1 }
 0x1d7   : > { %v4910_v51 = vld [vmem:[%s5608_s12 + $0x318] ss:$12 sps:$4 sm:$0xff]   ;;  %v4914_v52 = vld [vmem:[%s5608_s12 + $0x350] ss:$12 sps:$4 sm:$0xff]  }
 0x1d8   : > { %v5860_v53 = vpop.f32.mrf.mxu0  ;;  %2533 = vmatmul.mubr.bf16.gmra.mxu0 %v4890_v47  ;;  %v5862_v54 = vpop.f32.mrf.mxu1  ;;  %4576 = vmatmul.mubr.msk.bf16.gmra.mxu1 %vm2075_vm0, %v4894_v48 }
 0x1d9   : > { %6813 = vst [vmem:[#allocation13_spill] sm:$0xff] %v5862_v54  ;;  %2540 = vmatprep.mubr.bf16.mxu0 %v4897_v49  ;;  %4579 = vmatprep.mubr.msk.bf16.mxu1 %vm2075_vm0, %v4898_v50  ;;  %v4964_v54 = vld [vmem:[%s5608_s12 + $0x530] ss:$12 sps:$4 sm:$0xff]  }
 0x1da   : > { %v2344_v55 = vpop.f32.mrf.mxu0  ;;  %v2728_v56 = vpop.f32.mrf.mxu1 }
 0x1db   : > { %v4917_v55 = vld [vmem:[%s5608_s12 + $0x334] ss:$12 sps:$4 sm:$0xff]  }
 0x1dc   : > { %v5866_v59 = vpop.f32.mrf.mxu0  ;;  %v5868_v60 = vpop.f32.mrf.mxu1  ;;  %v4918_v56 = vld [vmem:[%s5608_s12 + $0x368] ss:$12 sps:$4 sm:$0xff]  }
 0x1dd   : > { %6814 = vst [vmem:[#allocation14_spill] sm:$0xff] %v5868_v60 }
 0x1de   : > { %v2347_v3 = vpop.f32.mrf.mxu0  ;;  %v2731_v4 = vpop.f32.mrf.mxu1 }
 0x1e0   : > { %v5874_v7 = vpop.f32.mrf.mxu0  ;;  %2541 = vmatmul.mubr.bf16.gmra.mxu0 %v4895_v63  ;;  %v5876_v8 = vpop.f32.mrf.mxu1  ;;  %4580 = vmatmul.mubr.msk.bf16.gmra.mxu1 %vm2075_vm0, %v4899_v0 }
 0x1e1   : > { %6815 = vst [vmem:[#allocation15_spill] sm:$0xff] %v5876_v8  ;;  %2548 = vmatprep.mubr.bf16.mxu0 %v4902_v1  ;;  %4583 = vmatprep.mubr.msk.bf16.mxu1 %vm2075_vm0, %v4903_v2  ;;  %v4962_v8 = vld [vmem:[%s5608_s12 + $0x40c] ss:$12 sps:$4 sm:$0xff]  }
 0x1e2   : > { %v2352_v11 = vpop.f32.mrf.mxu0  ;;  %v2736_v12 = vpop.f32.mrf.mxu1 }
 0x1e4   : > { %v5880_v13 = vpop.f32.mrf.mxu0  ;;  %v5882_v14 = vpop.f32.mrf.mxu1 }
 0x1e5   : > { %6816 = vst [vmem:[#allocation16_spill] sm:$0xff] %v5882_v14 }
 0x1e6   : > { %v2355_v23 = vpop.f32.mrf.mxu0  ;;  %v2739_v24 = vpop.f32.mrf.mxu1 }
 0x1e8   : > { %v5888_v25 = vpop.f32.mrf.mxu0  ;;  %2549 = vmatmul.mubr.bf16.gmra.mxu0 %v4900_v15  ;;  %v5890_v26 = vpop.f32.mrf.mxu1  ;;  %4584 = vmatmul.mubr.msk.bf16.gmra.mxu1 %vm2075_vm0, %v4904_v16  ;;  %v4915_v15 = vld [vmem:[%s5608_s12 + $0x330] ss:$12 sps:$4 sm:$0xff]   ;;  %v4919_v16 = vld [vmem:[%s5608_s12 + $0x380] ss:$12 sps:$4 sm:$0xff]  }
 0x1e9   : > { %6817 = vst [vmem:[#allocation17_spill] sm:$0xff] %v5890_v26  ;;  %2556 = vmatprep.mubr.bf16.mxu0 %v4907_v19  ;;  %4587 = vmatprep.mubr.msk.bf16.mxu1 %vm2075_vm0, %v4908_v20  ;;  %v4922_v19 = vld [vmem:[%s5608_s12 + $0x34c] ss:$12 sps:$4 sm:$0xff]  }
 0x1ea   : > { %v2360_v27 = vpop.f32.mrf.mxu0  ;;  %v2744_v28 = vpop.f32.mrf.mxu1  ;;  %v4923_v20 = vld [vmem:[%s5608_s12 + $0x398] ss:$12 sps:$4 sm:$0xff]  }
 0x1ec   : > { %v5894_v31 = vpop.f32.mrf.mxu0  ;;  %v5896_v32 = vpop.f32.mrf.mxu1 }
 0x1ed   : > { %6818 = vst [vmem:[#allocation18_spill] sm:$0xff] %v5896_v32  ;;  %v4959_v32 = vld [vmem:[%s5608_s12 + $0x500] ss:$12 sps:$4 sm:$0xff]  }
 0x1ee   : > { %v2363_v39 = vpop.f32.mrf.mxu0  ;;  %v2747_v40 = vpop.f32.mrf.mxu1 }
 0x1ef   : > { %v4920_v39 = vld [vmem:[%s5608_s12 + $0x348] ss:$12 sps:$4 sm:$0xff]   ;;  %v4924_v40 = vld [vmem:[%s5608_s12 + $0x3b0] ss:$12 sps:$4 sm:$0xff]  }
 0x1f0   : > { %v5902_v43 = vpop.f32.mrf.mxu0  ;;  %2557 = vmatmul.mubr.bf16.gmra.mxu0 %v4905_v35  ;;  %v5904_v44 = vpop.f32.mrf.mxu1  ;;  %4588 = vmatmul.mubr.msk.bf16.gmra.mxu1 %vm2075_vm0, %v4909_v36 }
 0x1f1   : > { %6819 = vst [vmem:[#allocation19_spill] sm:$0xff] %v5904_v44  ;;  %2564 = vmatprep.mubr.bf16.mxu0 %v4912_v37  ;;  %4591 = vmatprep.mubr.msk.bf16.mxu1 %vm2075_vm0, %v4913_v38 }
 0x1f2   : > { %v2368_v47 = vpop.f32.mrf.mxu0  ;;  %v2752_v48 = vpop.f32.mrf.mxu1 }
 0x1f3   : > { %v4927_v47 = vld [vmem:[%s5608_s12 + $0x364] ss:$12 sps:$4 sm:$0xff]   ;;  %v4928_v48 = vld [vmem:[%s5608_s12 + $0x3c8] ss:$12 sps:$4 sm:$0xff]  }
 0x1f4   : > { %v5908_v49 = vpop.f32.mrf.mxu0  ;;  %v5910_v50 = vpop.f32.mrf.mxu1 }
 0x1f5   : > { %6820 = vst [vmem:[#allocation20_spill] sm:$0xff] %v5908_v49  ;;  %6821 = vst [vmem:[#allocation21_spill] sm:$0xff] %v5910_v50  ;;  %v4950_v50 = vld [vmem:[%s5608_s12 + $0x3d8] ss:$12 sps:$4 sm:$0xff]  }
 0x1f6   : > { %v2371_v63 = vpop.f32.mrf.mxu0  ;;  %v2755_v0 = vpop.f32.mrf.mxu1 }
 0x1f8   : > { %v5916_v1 = vpop.f32.mrf.mxu0  ;;  %2565 = vmatmul.mubr.bf16.gmra.mxu0 %v4910_v51  ;;  %v5918_v2 = vpop.f32.mrf.mxu1  ;;  %4592 = vmatmul.mubr.msk.bf16.gmra.mxu1 %vm2075_vm0, %v4914_v52 }
 0x1f9   : > { %6822 = vst [vmem:[#allocation22_spill] sm:$0xff] %v5918_v2  ;;  %2572 = vmatprep.mubr.bf16.mxu0 %v4917_v55  ;;  %4595 = vmatprep.mubr.msk.bf16.mxu1 %vm2075_vm0, %v4918_v56 }
 0x1fa   : > { %v2376_v3 = vpop.f32.mrf.mxu0  ;;  %v2760_v4 = vpop.f32.mrf.mxu1 }
 0x1fc   : > { %v5922_v11 = vpop.f32.mrf.mxu0  ;;  %v5924_v12 = vpop.f32.mrf.mxu1 }
 0x1fd   : > { %6823 = vst [vmem:[#allocation23_spill] sm:$0xff] %v5922_v11  ;;  %6824 = vst [vmem:[#allocation24_spill] sm:$0xff] %v5924_v12 }
 0x1fe   : > { %v2379_v23 = vpop.f32.mrf.mxu0  ;;  %v2763_v24 = vpop.f32.mrf.mxu1 }
 0x200   : > { %v5930_v27 = vpop.f32.mrf.mxu0  ;;  %2573 = vmatmul.mubr.bf16.gmra.mxu0 %v4915_v15  ;;  %v5932_v28 = vpop.f32.mrf.mxu1  ;;  %4596 = vmatmul.mubr.msk.bf16.gmra.mxu1 %vm2075_vm0, %v4919_v16  ;;  %v4925_v15 = vld [vmem:[%s5608_s12 + $0x360] ss:$12 sps:$4 sm:$0xff]  }
 0x201   : > { %6825 = vst [vmem:[#allocation25_spill] sm:$0xff] %v5930_v27  ;;  %6826 = vst [vmem:[#allocation26_spill] sm:$0xff] %v5932_v28  ;;  %2580 = vmatprep.mubr.bf16.mxu0 %v4922_v19  ;;  %4599 = vmatprep.mubr.msk.bf16.mxu1 %vm2075_vm0, %v4923_v20  ;;  %v4929_v16 = vld [vmem:[%s5608_s12 + $0x3e0] ss:$12 sps:$4 sm:$0xff]   ;;  %v4932_v19 = vld [vmem:[%s5608_s12 + $0x37c] ss:$12 sps:$4 sm:$0xff]  }
 0x202   : > { %v2384_v35 = vpop.f32.mrf.mxu0  ;;  %v2768_v36 = vpop.f32.mrf.mxu1  ;;  %v4933_v20 = vld [vmem:[%s5608_s12 + $0x3f8] ss:$12 sps:$4 sm:$0xff]   ;;  %v4945_v28 = vld [vmem:[%s5608_s12 + $0x3c0] ss:$12 sps:$4 sm:$0xff]  }
 0x204   : > { %v5936_v37 = vpop.f32.mrf.mxu0  ;;  %v5938_v38 = vpop.f32.mrf.mxu1 }
 0x205   : > { %6827 = vst [vmem:[#allocation27_spill] sm:$0xff] %v5936_v37  ;;  %6828 = vst [vmem:[#allocation28_spill] sm:$0xff] %v5938_v38  ;;  %v4940_v38 = vld [vmem:[%s5608_s12 + $0x3a8] ss:$12 sps:$4 sm:$0xff]  }
 0x206   : > { %v2387_v51 = vpop.f32.mrf.mxu0  ;;  %v2771_v52 = vpop.f32.mrf.mxu1 }
 0x207   : > { %v4930_v51 = vld [vmem:[%s5608_s12 + $0x378] ss:$12 sps:$4 sm:$0xff]   ;;  %v4934_v52 = vld [vmem:[%s5608_s12 + $0x410] ss:$12 sps:$4 sm:$0xff]  }
 0x208   : > { %v5944_v55 = vpop.f32.mrf.mxu0  ;;  %2581 = vmatmul.mubr.bf16.gmra.mxu0 %v4920_v39  ;;  %v5946_v56 = vpop.f32.mrf.mxu1  ;;  %4600 = vmatmul.mubr.msk.bf16.gmra.mxu1 %vm2075_vm0, %v4924_v40 }
 0x209   : > { %6829 = vst [vmem:[#allocation29_spill] sm:$0xff] %v5944_v55  ;;  %6830 = vst [vmem:[#allocation30_spill] sm:$0xff] %v5946_v56  ;;  %2588 = vmatprep.mubr.bf16.mxu0 %v4927_v47  ;;  %4603 = vmatprep.mubr.msk.bf16.mxu1 %vm2075_vm0, %v4928_v48  ;;  %v4979_v55 = vld [vmem:[%s5608_s12 + $0x5c0] ss:$12 sps:$4 sm:$0xff]  }
 0x20a   : > { %v2392_v63 = vpop.f32.mrf.mxu0  ;;  %v2776_v0 = vpop.f32.mrf.mxu1 }
 0x20b   : > { %v4937_v63 = vld [vmem:[%s5608_s12 + $0x394] ss:$12 sps:$4 sm:$0xff]  }
 0x20c   : > { %v5950_v3 = vpop.f32.mrf.mxu0  ;;  %v5952_v4 = vpop.f32.mrf.mxu1  ;;  %v4938_v0 = vld [vmem:[%s5608_s12 + $0x428] ss:$12 sps:$4 sm:$0xff]  }
 0x20d   : > { %6831 = vst [vmem:[#allocation31_spill] sm:$0xff] %v5950_v3  ;;  %6832 = vst [vmem:[#allocation32_spill] sm:$0xff] %v5952_v4 }
 0x20e   : > { %v2395_v23 = vpop.f32.mrf.mxu0  ;;  %v2779_v24 = vpop.f32.mrf.mxu1 }
 0x210   : > { %v5958_v35 = vpop.f32.mrf.mxu0  ;;  %2589 = vmatmul.mubr.bf16.gmra.mxu0 %v4925_v15  ;;  %v5960_v36 = vpop.f32.mrf.mxu1  ;;  %4604 = vmatmul.mubr.msk.bf16.gmra.mxu1 %vm2075_vm0, %v4929_v16 }
 0x211   : > { %6833 = vst [vmem:[#allocation33_spill] sm:$0xff] %v5958_v35  ;;  %6834 = vst [vmem:[#allocation34_spill] sm:$0xff] %v5960_v36  ;;  %2596 = vmatprep.mubr.bf16.mxu0 %v4932_v19  ;;  %4607 = vmatprep.mubr.msk.bf16.mxu1 %vm2075_vm0, %v4933_v20  ;;  %v4977_v35 = vld [vmem:[%s5608_s12 + $0x454] ss:$12 sps:$4 sm:$0xff]  }
 0x212   : > { %v2400_v39 = vpop.f32.mrf.mxu0  ;;  %v2784_v40 = vpop.f32.mrf.mxu1 }
 0x214   : > { %v5964_v47 = vpop.f32.mrf.mxu0  ;;  %v5966_v48 = vpop.f32.mrf.mxu1 }
 0x215   : > { %6835 = vst [vmem:[#allocation35_spill] sm:$0xff] %v5964_v47  ;;  %6836 = vst [vmem:[#allocation36_spill] sm:$0xff] %v5966_v48  ;;  %v4935_v48 = vld [vmem:[%s5608_s12 + $0x390] ss:$12 sps:$4 sm:$0xff]  }
 0x216   : > { %v2403_v15 = vpop.f32.mrf.mxu0  ;;  %v2787_v23 = vpop.f32.mrf.mxu1 }
 0x217   : > { %v4939_v15 = vld [vmem:[%s5608_s12 + $0x440] ss:$12 sps:$4 sm:$0xff]  }
 0x218   : > { %v5972_v16 = vpop.f32.mrf.mxu0  ;;  %2597 = vmatmul.mubr.bf16.gmra.mxu0 %v4930_v51  ;;  %v5974_v19 = vpop.f32.mrf.mxu1  ;;  %4608 = vmatmul.mubr.msk.bf16.gmra.mxu1 %vm2075_vm0, %v4934_v52  ;;  %v4942_v23 = vld [vmem:[%s5608_s12 + $0x3ac] ss:$12 sps:$4 sm:$0xff]  }
 0x219   : > { %6837 = vst [vmem:[#allocation37_spill] sm:$0xff] %v5972_v16  ;;  %6838 = vst [vmem:[#allocation38_spill] sm:$0xff] %v5974_v19  ;;  %2604 = vmatprep.mubr.bf16.mxu0 %v4937_v63  ;;  %4611 = vmatprep.mubr.msk.bf16.mxu1 %vm2075_vm0, %v4938_v0  ;;  %v4943_v51 = vld [vmem:[%s5608_s12 + $0x458] ss:$12 sps:$4 sm:$0xff]  }
 0x21a   : > { %v2408_v20 = vpop.f32.mrf.mxu0  ;;  %v2792_v24 = vpop.f32.mrf.mxu1 }
 0x21c   : > { %v5978_v39 = vpop.f32.mrf.mxu0  ;;  %v5980_v40 = vpop.f32.mrf.mxu1 }
 0x21d   : > { %6839 = vst [vmem:[#allocation39_spill] sm:$0xff] %v5978_v39  ;;  %6840 = vst [vmem:[#allocation40_spill] sm:$0xff] %v5980_v40  ;;  %v4974_v39 = vld [vmem:[%s5608_s12 + $0x590] ss:$12 sps:$4 sm:$0xff]  }
 0x21e   : > { %v2411_v36 = vpop.f32.mrf.mxu0  ;;  %v2795_v19 = vpop.f32.mrf.mxu1 }
 0x21f   : > { %v4944_v36 = vld [vmem:[%s5608_s12 + $0x470] ss:$12 sps:$4 sm:$0xff]  }
 0x220   : > { %v5986_v52 = vpop.f32.mrf.mxu0  ;;  %2605 = vmatmul.mubr.bf16.gmra.mxu0 %v4935_v48  ;;  %v5988_v63 = vpop.f32.mrf.mxu1  ;;  %4612 = vmatmul.mubr.msk.bf16.gmra.mxu1 %vm2075_vm0, %v4939_v15  ;;  %v4947_v19 = vld [vmem:[%s5608_s12 + $0x3c4] ss:$12 sps:$4 sm:$0xff]   ;;  %v4948_v48 = vld [vmem:[%s5608_s12 + $0x488] ss:$12 sps:$4 sm:$0xff]  }
 0x221   : > { %6841 = vst [vmem:[#allocation41_spill] sm:$0xff] %v5986_v52  ;;  %6842 = vst [vmem:[#allocation42_spill] sm:$0xff] %v5988_v63  ;;  %2612 = vmatprep.mubr.bf16.mxu0 %v4942_v23  ;;  %4615 = vmatprep.mubr.msk.bf16.mxu1 %vm2075_vm0, %v4943_v51 }
 0x222   : > { %v2416_v0 = vpop.f32.mrf.mxu0  ;;  %v2800_v20 = vpop.f32.mrf.mxu1 }
 0x224   : > { %v5992_v24 = vpop.f32.mrf.mxu0  ;;  %v5994_v40 = vpop.f32.mrf.mxu1 }
 0x225   : > { %6843 = vst [vmem:[#allocation43_spill] sm:$0xff] %v5992_v24  ;;  %6844 = vst [vmem:[#allocation44_spill] sm:$0xff] %v5994_v40 }
 0x226   : > { %v2419_v63 = vpop.f32.mrf.mxu0  ;;  %v2803_v4 = vpop.f32.mrf.mxu1 }
 0x227   : > { %v4949_v63 = vld [vmem:[%s5608_s12 + $0x4a0] ss:$12 sps:$4 sm:$0xff]   ;;  %v4952_v4 = vld [vmem:[%s5608_s12 + $0x3dc] ss:$12 sps:$4 sm:$0xff]  }
 0x228   : > { %v6000_v15 = vpop.f32.mrf.mxu0  ;;  %2613 = vmatmul.mubr.bf16.gmra.mxu0 %v4940_v38  ;;  %v6002_v23 = vpop.f32.mrf.mxu1  ;;  %4616 = vmatmul.mubr.msk.bf16.gmra.mxu1 %vm2075_vm0, %v4944_v36  ;;  %v4953_v38 = vld [vmem:[%s5608_s12 + $0x4b8] ss:$12 sps:$4 sm:$0xff]  }
 0x229   : > { %6845 = vst [vmem:[#allocation45_spill] sm:$0xff] %v6002_v23  ;;  %2620 = vmatprep.mubr.bf16.mxu0 %v4947_v19  ;;  %4619 = vmatprep.mubr.msk.bf16.mxu1 %vm2075_vm0, %v4948_v48 }
 0x22a   : > { %v2424_v51 = vpop.f32.mrf.mxu0  ;;  %v2808_v0 = vpop.f32.mrf.mxu1 }
 0x22c   : > { %v6006_v20 = vpop.f32.mrf.mxu0  ;;  %v6008_v40 = vpop.f32.mrf.mxu1 }
 0x22d   : > { %6846 = vst [vmem:[#allocation46_spill] sm:$0xff] %v6008_v40 }
 0x22e   : > { %v2427_v23 = vpop.f32.mrf.mxu0  ;;  %v2811_v56 = vpop.f32.mrf.mxu1 }
 0x22f   : > { %v4954_v56 = vld [vmem:[%s5608_s12 + $0x4d0] ss:$12 sps:$4 sm:$0xff]   ;;  %v4957_v23 = vld [vmem:[%s5608_s12 + $0x3f4] ss:$12 sps:$4 sm:$0xff]  }
 0x230   : > { %v6014_v36 = vpop.f32.mrf.mxu0  ;;  %2621 = vmatmul.mubr.bf16.gmra.mxu0 %v4945_v28  ;;  %v6016_v19 = vpop.f32.mrf.mxu1  ;;  %4620 = vmatmul.mubr.msk.bf16.gmra.mxu1 %vm2075_vm0, %v4949_v63  ;;  %v4958_v28 = vld [vmem:[%s5608_s12 + $0x4e8] ss:$12 sps:$4 sm:$0xff]  }
 0x231   : > { %2628 = vmatprep.mubr.bf16.mxu0 %v4952_v4  ;;  %4623 = vmatprep.mubr.msk.bf16.mxu1 %vm2075_vm0, %v4953_v38 }
 0x232   : > { %v2432_v48 = vpop.f32.mrf.mxu0  ;;  %v6020_v51 = vpop.f32.mrf.mxu1 }
 0x234   : > { %v6022_v0 = vpop.f32.mrf.mxu0  ;;  %v6024_v40 = vpop.f32.mrf.mxu1 }
 0x236   : > { %v2435_v12 = vpop.f32.mrf.mxu0  ;;  %v6030_v63 = vpop.f32.mrf.mxu1 }
 0x237   : > { %v4955_v12 = vld [vmem:[%s5608_s12 + $0x3f0] ss:$12 sps:$4 sm:$0xff]  }
 0x238   : > { %v6032_v4 = vpop.f32.mrf.mxu0  ;;  %2629 = vmatmul.mubr.bf16.gmra.mxu0 %v4950_v50  ;;  %v6034_v38 = vpop.f32.mrf.mxu1  ;;  %4624 = vmatmul.mubr.msk.bf16.gmra.mxu1 %vm2075_vm0, %v4954_v56  ;;  %v4963_v50 = vld [vmem:[%s5608_s12 + $0x518] ss:$12 sps:$4 sm:$0xff]  }
 0x239   : > { %2636 = vmatprep.mubr.bf16.mxu0 %v4957_v23  ;;  %4627 = vmatprep.mubr.msk.bf16.mxu1 %vm2075_vm0, %v4958_v28 }
 0x23a   : > { %v2440_v48 = vpop.f32.mrf.mxu0  ;;  %v6038_v44 = vpop.f32.mrf.mxu1 }
 0x23c   : > { %v6040_v2 = vpop.f32.mrf.mxu0  ;;  %v6042_v14 = vpop.f32.mrf.mxu1 }
 0x23e   : > { %v2443_v26 = vpop.f32.mrf.mxu0  ;;  %v6048_v56 = vpop.f32.mrf.mxu1 }
 0x23f   : > { %v4960_v26 = vld [vmem:[%s5608_s12 + $0x408] ss:$12 sps:$4 sm:$0xff]  }
 0x240   : > { %v6050_v23 = vpop.f32.mrf.mxu0  ;;  %2637 = vmatmul.mubr.bf16.gmra.mxu0 %v4955_v12  ;;  %v6052_v28 = vpop.f32.mrf.mxu1  ;;  %4628 = vmatmul.mubr.msk.bf16.gmra.mxu1 %vm2075_vm0, %v4959_v32  ;;  %v4968_v12 = vld [vmem:[%s5608_s12 + $0x548] ss:$12 sps:$4 sm:$0xff]  }
 0x241   : > { %2644 = vmatprep.mubr.bf16.mxu0 %v4962_v8  ;;  %4631 = vmatprep.mubr.msk.bf16.mxu1 %vm2075_vm0, %v4963_v50 }
 0x242   : > { %v2448_v48 = vpop.f32.mrf.mxu0  ;;  %v6056_v46 = vpop.f32.mrf.mxu1 }
 0x244   : > { %v6058_v60 = vpop.f32.mrf.mxu0  ;;  %v6060_v42 = vpop.f32.mrf.mxu1 }
 0x246   : > { %v2451_v34 = vpop.f32.mrf.mxu0  ;;  %v6066_v32 = vpop.f32.mrf.mxu1 }
 0x247   : > { %v4965_v34 = vld [vmem:[%s5608_s12 + $0x420] ss:$12 sps:$4 sm:$0xff]  }
 0x248   : > { %v6068_v8 = vpop.f32.mrf.mxu0  ;;  %2645 = vmatmul.mubr.bf16.gmra.mxu0 %v4960_v26  ;;  %v6070_v50 = vpop.f32.mrf.mxu1  ;;  %4632 = vmatmul.mubr.msk.bf16.gmra.mxu1 %vm2075_vm0, %v4964_v54  ;;  %v4973_v26 = vld [vmem:[%s5608_s12 + $0x578] ss:$12 sps:$4 sm:$0xff]  }
 0x249   : > { %2652 = vmatprep.mubr.bf16.mxu0 %v4967_v22  ;;  %4635 = vmatprep.mubr.msk.bf16.mxu1 %vm2075_vm0, %v4968_v12 }
 0x24a   : > { %v2456_v48 = vpop.f32.mrf.mxu0  ;;  %v6074_v18 = vpop.f32.mrf.mxu1 }
 0x24c   : > { %v6076_v30 = vpop.f32.mrf.mxu0  ;;  %v6078_v62 = vpop.f32.mrf.mxu1 }
 0x24e   : > { %v2459_v6 = vpop.f32.mrf.mxu0  ;;  %v6084_v54 = vpop.f32.mrf.mxu1 }
 0x24f   : > { %v4970_v6 = vld [vmem:[%s5608_s12 + $0x438] ss:$12 sps:$4 sm:$0xff]  }
 0x250   : > { %v6086_v22 = vpop.f32.mrf.mxu0  ;;  %2653 = vmatmul.mubr.bf16.gmra.mxu0 %v4965_v34  ;;  %v6088_v12 = vpop.f32.mrf.mxu1  ;;  %4636 = vmatmul.mubr.msk.bf16.gmra.mxu1 %vm2075_vm0, %v4969_v10  ;;  %v4978_v34 = vld [vmem:[%s5608_s12 + $0x5a8] ss:$12 sps:$4 sm:$0xff]  }
 0x251   : > { %2660 = vmatprep.mubr.bf16.mxu0 %v4972_v58  ;;  %4639 = vmatprep.mubr.msk.bf16.mxu1 %vm2075_vm0, %v4973_v26 }
 0x252   : > { %v2464_v48 = vpop.f32.mrf.mxu0  ;;  %v6092_v24 = vpop.f32.mrf.mxu1 }
 0x253   : > { %6847 = vst [vmem:[#allocation47_spill] sm:$0xff] %v6092_v24 }
 0x254   : > { %v6094_v52 = vpop.f32.mrf.mxu0  ;;  %v6096_v47 = vpop.f32.mrf.mxu1 }
 0x255   : > { %6848 = vst [vmem:[#allocation48_spill] sm:$0xff] %v6096_v47  ;;  %v4984_v47 = vld [vmem:[%s5608_s12 + $0x5f0] ss:$12 sps:$4 sm:$0xff]  }
 0x256   : > { %v2467_v16 = vpop.f32.mrf.mxu0  ;;  %v6102_v10 = vpop.f32.mrf.mxu1 }
 0x257   : > { %6849 = vst [vmem:[#allocation49_spill] sm:$0xff] %v6102_v10  ;;  %v4975_v16 = vld [vmem:[%s5608_s12 + $0x450] ss:$12 sps:$4 sm:$0xff]   ;;  %v4982_v10 = vld [vmem:[%s5608_s12 + $0x46c] ss:$12 sps:$4 sm:$0xff]  }
 0x258   : > { %v6104_v58 = vpop.f32.mrf.mxu0  ;;  %2661 = vmatmul.mubr.bf16.gmra.mxu0 %v4970_v6  ;;  %v6106_v26 = vpop.f32.mrf.mxu1  ;;  %4640 = vmatmul.mubr.msk.bf16.gmra.mxu1 %vm2075_vm0, %v4974_v39  ;;  %v4983_v6 = vld [vmem:[%s5608_s12 + $0x5d8] ss:$12 sps:$4 sm:$0xff]  }
 0x259   : > { %6850 = vst [vmem:[#allocation50_spill] sm:$0xff] %v6106_v26  ;;  %2668 = vmatprep.mubr.bf16.mxu0 %v4977_v35  ;;  %4643 = vmatprep.mubr.msk.bf16.mxu1 %vm2075_vm0, %v4978_v34 }
 0x25a   : > { %v2472_v48 = vpop.f32.mrf.mxu0  ;;  %v6110_v37 = vpop.f32.mrf.mxu1 }
 0x25b   : > { %6851 = vst [vmem:[#allocation51_spill] sm:$0xff] %v6110_v37 }
 0x25c   : > { %v6112_v3 = vpop.f32.mrf.mxu0  ;;  %v6114_v27 = vpop.f32.mrf.mxu1 }
 0x25d   : > { %6852 = vst [vmem:[#allocation52_spill] sm:$0xff] %v6114_v27 }
 0x25e   : > { %v2475_v49 = vpop.f32.mrf.mxu0  ;;  %v6120_v26 = vpop.f32.mrf.mxu1 }
 0x25f   : > { %6853 = vst [vmem:[#allocation53_spill] sm:$0xff] %v6120_v26  ;;  %v4980_v49 = vld [vmem:[%s5608_s12 + $0x468] ss:$12 sps:$4 sm:$0xff]   ;;  %s4015_s12 = sshll.u32 %s3751_s15, 5 }
 0x260   : > { %v6122_v39 = vpop.f32.mrf.mxu0  ;;  %2669 = vmatmul.mubr.bf16.gmra.mxu0 %v4975_v16  ;;  %v6124_v35 = vpop.f32.mrf.mxu1  ;;  %4644 = vmatmul.mubr.msk.bf16.gmra.mxu1 %vm2075_vm0, %v4979_v55  ;;  %p709_p8 = scmp.lt.s32.totalorder %s4015_s12, 63 }
 0x261   : > { %6854 = vst [vmem:[#allocation54_spill] sm:$0xff] %v6124_v35  ;;  %2676 = vmatprep.mubr.bf16.mxu0 %v4982_v10  ;;  %4647 = vmatprep.mubr.msk.bf16.mxu1 %vm2075_vm0, %v4983_v6 }
 0x262   : > { %v2480_v34 = vpop.f32.mrf.mxu0  ;;  %v6128_v48 = vpop.f32.mrf.mxu1  ;;  %s7023_s12 = smov (!%p709_p8, %s4015_s12), 63 }
 0x263   : > { %6855 = vst [vmem:[#allocation55_spill] sm:$0xff] %v6128_v48  ;;  %s4016_s23 = sshll.u32 %s7023_s12, 2 }
 0x264   : > { %v6130_v27 = vpop.f32.mrf.mxu0  ;;  %v6132_v37 = vpop.f32.mrf.mxu1  ;;  %s6582_s26 = scalar_lea.vmem %s6777_s3, %s4016_s23 }
 0x265   : > { %6856 = vst [vmem:[#allocation56_spill] sm:$0xff] %v6132_v37 }
 0x266   : > { %v2483_v26 = vpop.f32.mrf.mxu0  ;;  %v6136_v11 = vpop.f32.mrf.mxu1 }
 0x267   : > { %6857 = vst [vmem:[#allocation57_spill] sm:$0xff] %v6136_v11 }
 0x268   : > { %v6138_v16 = vpop.f32.mrf.mxu0  ;;  %2677 = vmatmul.mubr.bf16.gmra.mxu0 %v4980_v49  ;;  %v4553_v35 = vpop.f32.mrf.mxu1  ;;  %4648 = vmatmul.mubr.msk.bf16.gmra.mxu1 %vm2075_vm0, %v4984_v47  ;;  %v6157_v47 = vadd.f32 %v6016_v19, %v5804_v5  ;;  %v6175_v5 = vadd.f32 %v6024_v40, %v5810_v9  ;;  %v6875_v19 = vld [vmem:[#allocation52_spill] sm:$0xff] }
 0x269   : > { %v6142_v55 = vadd.f32 %v4553_v35, %v6000_v15 }
 0x26a   : > { %v2488_v10 = vpop.f32.mrf.mxu0  ;;  %v6144_v6 = vpop.f32.mrf.mxu1 }
 0x26b   : > { %6858 = vst [vmem:[#allocation58_spill] sm:$0xff] %v6142_v55  ;;  %v6164_v55 = vadd.f32 %v6020_v51, %v5790_v57 }
 0x26c   : > { %v6146_v34 = vpop.f32.mrf.mxu0  ;;  %v4554_v37 = vpop.f32.mrf.mxu1 }
 0x26d   : > { %v6149_v48 = vadd.f32 %v4554_v37, %v6006_v20  ;;  %v6873_v37 = vld [vmem:[#allocation51_spill] sm:$0xff] }
 0x26e   : > { %v2491_v26 = vpop.f32.mrf.mxu0  ;;  %v6151_v11 = vpop.f32.mrf.mxu1 }
 0x26f   : > { %6859 = vst [vmem:[#allocation59_spill] sm:$0xff] %v6149_v48 }
 0x270   : > { %v6153_v24 = vpop.f32.mrf.mxu0  ;;  %v4557_v49 = vpop.f32.mrf.mxu1 }
 0x271   : > { %v6160_v15 = vadd.f32 %v4557_v49, %v6032_v4  ;;  %v6184_v49 = vadd.f32 %v6030_v63, %v5796_v61 }
 0x272   : > { %v2496_v35 = vpop.f32.mrf.mxu0  ;;  %v2975_v10 = vpop.f32.mrf.mxu1 }
 0x273   : > { %v6169_v20 = vadd.f32 %v2975_v10, %v6014_v36  ;;  %v6195_v10 = vadd.f32 %v6034_v38, %v5832_v29  ;;  %v6215_v36 = vadd.f32 %v6042_v14, %v5838_v33 }
 0x274   : > { %v6171_v26 = vpop.f32.mrf.mxu0  ;;  %v4558_v48 = vpop.f32.mrf.mxu1 }
 0x275   : > { %v6180_v4 = vadd.f32 %v4558_v48, %v6040_v2 }
 0x276   : > { %v2499_v57 = vpop.f32.mrf.mxu0  ;;  %v2978_v51 = vpop.f32.mrf.mxu1 }
 0x277   : > { %v6189_v35 = vadd.f32 %v2978_v51, %v6022_v0  ;;  %v6204_v57 = vadd.f32 %v6038_v44, %v5818_v17  ;;  %v6235_v0 = vadd.f32 %v6052_v28, %v5860_v53 }
 0x278   : > { %v6191_v9 = vpop.f32.mrf.mxu0  ;;  %v4561_v40 = vpop.f32.mrf.mxu1 }
 0x279   : > { %v6200_v48 = vadd.f32 %v4561_v40, %v6068_v8  ;;  %v6871_v8 = vld [vmem:[#allocation50_spill] sm:$0xff] }
 0x27a   : > { %v2504_v61 = vpop.f32.mrf.mxu0  ;;  %v2991_v63 = vpop.f32.mrf.mxu1 }
 0x27b   : > { %v6209_v51 = vadd.f32 %v2991_v63, %v6050_v23  ;;  %v6224_v61 = vadd.f32 %v6048_v56, %v5824_v21  ;;  %v6273_v23 = vadd.f32 %v6070_v50, %v5888_v25 }
 0x27c   : > { %v6211_v29 = vpop.f32.mrf.mxu0  ;;  %v4562_v38 = vpop.f32.mrf.mxu1 }
 0x27d   : > { %v6220_v40 = vadd.f32 %v4562_v38, %v6076_v30  ;;  %v6255_v30 = vadd.f32 %v6060_v42, %v5866_v59 }
 0x27e   : > { %v2507_v17 = vpop.f32.mrf.mxu0  ;;  %v2994_v44 = vpop.f32.mrf.mxu1 }
 0x27f   : > { %v6229_v63 = vadd.f32 %v2994_v44, %v6058_v60  ;;  %v6244_v17 = vadd.f32 %v6056_v46, %v5846_v41  ;;  %v6867_v60 = vld [vmem:[#allocation49_spill] sm:$0xff] }
 0x280   : > { %v6231_v33 = vpop.f32.mrf.mxu0  ;;  %v4565_v14 = vpop.f32.mrf.mxu1 }
 0x281   : > { %v6240_v38 = vadd.f32 %v4565_v14, %v6104_v58  ;;  %v6870_v58 = vld [vmem:[#allocation29_spill] sm:$0xff] }
 0x282   : > { %v2512_v21 = vpop.f32.mrf.mxu0  ;;  %v3007_v56 = vpop.f32.mrf.mxu1 }
 0x283   : > { %v6249_v44 = vadd.f32 %v3007_v56, %v6086_v22  ;;  %v6264_v21 = vadd.f32 %v6066_v32, %v5852_v45  ;;  %v6309_v22 = vadd.f32 %v6088_v12, %v5916_v1 }
 0x284   : > { %v6251_v53 = vpop.f32.mrf.mxu0  ;;  %v4566_v28 = vpop.f32.mrf.mxu1 }
 0x285   : > { %v6260_v14 = vadd.f32 %v4566_v28, %v6112_v3  ;;  %v6291_v3 = vadd.f32 %v6078_v62, %v5894_v31 }
 0x286   : > { %v2515_v41 = vpop.f32.mrf.mxu0  ;;  %v3010_v46 = vpop.f32.mrf.mxu1 }
 0x287   : > { %v6269_v56 = vadd.f32 %v3010_v46, %v6094_v52  ;;  %v6282_v41 = vadd.f32 %v6074_v18, %v5874_v7  ;;  %v6862_v52 = vld [vmem:[#allocation23_spill] sm:$0xff] }
 0x288   : > { %v2518_v42 = vpop.f32.mrf.mxu0  ;;  %v4569_v59 = vpop.f32.mrf.mxu1 }
 0x289   : > { %v6278_v28 = vadd.f32 %v4569_v59, %v6138_v16  ;;  %v6863_v16 = vld [vmem:[#allocation48_spill] sm:$0xff] }
 0x28a   : > { %v2520_v45 = vpop.f32.mrf.mxu0  ;;  %v3023_v32 = vpop.f32.mrf.mxu1 }
 0x28b   : > { %v6287_v46 = vadd.f32 %v3023_v32, %v6122_v39  ;;  %v6300_v45 = vadd.f32 %v6084_v54, %v5880_v13 }
 0x28c   : > { %v2521_v25 = vpop.f32.mrf.mxu0  ;;  %v4570_v50 = vpop.f32.mrf.mxu1 }
 0x28d   : > { %v6296_v59 = vadd.f32 %v4570_v50, %v6146_v34  ;;  %v6327_v34 = vadd.f32 %v6863_v16, %v6862_v52 }
 0x28e   : > { %v2523_v18 = vpop.f32.mrf.mxu0  ;;  %v3026_v7 = vpop.f32.mrf.mxu1 }
 0x28f   : > { %v6305_v32 = vadd.f32 %v3026_v7, %v6130_v27  ;;  %v6861_v18 = vld [vmem:[#allocation47_spill] sm:$0xff] }
 0x290   : > { %v2526_v62 = vpop.f32.mrf.mxu0  ;;  %v4573_v31 = vpop.f32.mrf.mxu1  ;;  %v6318_v39 = vadd.f32 %v6861_v18, %v5902_v43  ;;  %6864 = vst [vmem:[#allocation47_spill] sm:$0xff] %v6327_v34  ;;  %v6866_v18 = vld [vmem:[#allocation20_spill] sm:$0xff] }
 0x291   : > { %6860 = vst [vmem:[#allocation60_spill] sm:$0xff] %v6305_v32  ;;  %v6314_v50 = vadd.f32 %v4573_v31, %v6191_v9  ;;  %v6336_v27 = vadd.f32 %v6867_v60, %v6866_v18  ;;  %v6345_v9 = vadd.f32 %v6871_v8, %v6870_v58  ;;  %v6872_v18 = vld [vmem:[#allocation25_spill] sm:$0xff]  ;;  %v6874_v58 = vld [vmem:[#allocation31_spill] sm:$0xff] }
 0x292   : > { %v2528_v13 = vpop.f32.mrf.mxu0  ;;  %v3039_v54 = vpop.f32.mrf.mxu1  ;;  %v6353_v2 = vadd.f32 %v6873_v37, %v6872_v18  ;;  %v6878_v18 = vld [vmem:[#allocation27_spill] sm:$0xff] }
 0x293   : > { %v6323_v7 = vadd.f32 %v3039_v54, %v6153_v24  ;;  %6868 = vst [vmem:[#allocation48_spill] sm:$0xff] %v6336_v27  ;;  %v6883_v27 = vld [vmem:[#allocation54_spill] sm:$0xff] }
 0x294   : > { %v2529_v1 = vpop.f32.mrf.mxu0  ;;  %v4574_v12 = vpop.f32.mrf.mxu1 }
 0x295   : > { %v6332_v31 = vadd.f32 %v4574_v12, %v6211_v29  ;;  %v6879_v29 = vld [vmem:[#allocation53_spill] sm:$0xff] }
 0x296   : > { %v2531_v43 = vpop.f32.mrf.mxu0  ;;  %v3042_v13 = vpop.f32.mrf.mxu1 }
 0x297   : > { %6865 = vst [vmem:[#allocation23_spill] sm:$0xff] %v6332_v31  ;;  %v6341_v54 = vadd.f32 %v3042_v13, %v6171_v26  ;;  %v6362_v31 = vadd.f32 %v6875_v19, %v6874_v58  ;;  %v6882_v58 = vld [vmem:[#allocation37_spill] sm:$0xff] }
 0x298   : > { %v2534_v52 = vpop.f32.mrf.mxu0  ;;  %v4577_v16 = vpop.f32.mrf.mxu1  ;;  %v6379_v34 = vadd.f32 %v6883_v27, %v6882_v58  ;;  %v6890_v27 = vld [vmem:[#allocation39_spill] sm:$0xff]  ;;  %v6891_v58 = vld [vmem:[#allocation56_spill] sm:$0xff] }
 0x299   : > { %6869 = vst [vmem:[#allocation20_spill] sm:$0xff] %v6341_v54  ;;  %v6349_v12 = vadd.f32 %v4577_v16, %v2518_v42  ;;  %6876 = vst [vmem:[#allocation49_spill] sm:$0xff] %v6362_v31  ;;  %v6370_v54 = vadd.f32 %v6879_v29, %v6878_v18  ;;  %v6886_v18 = vld [vmem:[#allocation33_spill] sm:$0xff]  ;;  %v6887_v42 = vld [vmem:[#allocation55_spill] sm:$0xff]  ;;  %v6395_v31 = vadd.f32 %v6891_v58, %v6890_v27 }
 0x29a   : > { %v2536_v43 = vpop.f32.mrf.mxu0  ;;  %v3055_v60 = vpop.f32.mrf.mxu1  ;;  %6884 = vst [vmem:[#allocation51_spill] sm:$0xff] %v6379_v34  ;;  %v6387_v32 = vadd.f32 %v6887_v42, %v6886_v18  ;;  %v6894_v42 = vld [vmem:[#allocation35_spill] sm:$0xff]  ;;  %v6895_v18 = vld [vmem:[#allocation57_spill] sm:$0xff] }
 0x29b   : > { %v6358_v13 = vadd.f32 %v3055_v60, %v6231_v33  ;;  %6880 = vst [vmem:[#allocation50_spill] sm:$0xff] %v6370_v54  ;;  %6892 = vst [vmem:[#allocation53_spill] sm:$0xff] %v6395_v31 }
 0x29c   : > { %v2537_v24 = vpop.f32.mrf.mxu0  ;;  %v4578_v8 = vpop.f32.mrf.mxu1  ;;  %6888 = vst [vmem:[#allocation52_spill] sm:$0xff] %v6387_v32 }
 0x29d   : > { %v6366_v16 = vadd.f32 %v4578_v8, %v2521_v25 }
 0x29e   : > { %v2539_v43 = vpop.f32.mrf.mxu0  ;;  %v3058_v37 = vpop.f32.mrf.mxu1 }
 0x29f   : > { %6877 = vst [vmem:[#allocation29_spill] sm:$0xff] %v6366_v16  ;;  %v6375_v60 = vadd.f32 %v3058_v37, %v6251_v53 }
 0x2a0   : > { %v2542_v26 = vpop.f32.mrf.mxu0  ;;  %v4581_v19 = vpop.f32.mrf.mxu1 }
 0x2a1   : > { %6881 = vst [vmem:[#allocation25_spill] sm:$0xff] %v6375_v60  ;;  %v6383_v8 = vadd.f32 %v4581_v19, %v2534_v52  ;;  %v6403_v60 = vadd.f32 %v6895_v18, %v6894_v42 }
 0x2a2   : > { %v2544_v43 = vpop.f32.mrf.mxu0  ;;  %v3071_v29 = vpop.f32.mrf.mxu1 }
 0x2a3   : > { %6885 = vst [vmem:[#allocation31_spill] sm:$0xff] %v6383_v8  ;;  %v6391_v37 = vadd.f32 %v3071_v29, %v2526_v62  ;;  %6896 = vst [vmem:[#allocation54_spill] sm:$0xff] %v6403_v60 }
 0x2a4   : > { %v2545_v33 = vpop.f32.mrf.mxu0  ;;  %v4582_v16 = vpop.f32.mrf.mxu1 }
 0x2a5   : > { %6889 = vst [vmem:[#allocation27_spill] sm:$0xff] %v6391_v37  ;;  %v6399_v19 = vadd.f32 %v4582_v16, %v2537_v24 }
 0x2a6   : > { %v2547_v43 = vpop.f32.mrf.mxu0  ;;  %v3074_v25 = vpop.f32.mrf.mxu1 }
 0x2a7   : > { %6893 = vst [vmem:[#allocation37_spill] sm:$0xff] %v6399_v19  ;;  %v6407_v29 = vadd.f32 %v3074_v25, %v2529_v1  ;;  %v6899_v43 = vld [vmem:[#allocation41_spill] sm:$0xff] }
 0x2a8   : > { %v2550_v53 = vpop.f32.mrf.mxu0  ;;  %v4585_v54 = vpop.f32.mrf.mxu1  ;;  %v6415_v52 = vadd.f32 %v6144_v6, %v6899_v43  ;;  %v6909_v6 = vmax.f32 %v6184_v49, %v6189_v35 }
 0x2a9   : > { %6897 = vst [vmem:[#allocation33_spill] sm:$0xff] %v6407_v29  ;;  %v6411_v58 = vadd.f32 %v4585_v54, %v2550_v53 }
 0x2aa   : > { %v2552_v24 = vpop.f32.mrf.mxu0  ;;  %v3087_v16 = vpop.f32.mrf.mxu1  ;;  %6900 = vst [vmem:[#allocation39_spill] sm:$0xff] %v6415_v52 }
 0x2ab   : > { %6898 = vst [vmem:[#allocation55_spill] sm:$0xff] %v6411_v58  ;;  %v6419_v8 = vadd.f32 %v3087_v16, %v2542_v26  ;;  %v6904_v24 = vld [vmem:[#allocation43_spill] sm:$0xff] }
 0x2ac   : > { %v2553_v1 = vpop.f32.mrf.mxu0  ;;  %v4586_v25 = vpop.f32.mrf.mxu1  ;;  %v6427_v27 = vadd.f32 %v6151_v11, %v6904_v24  ;;  %v6908_v11 = vmax.f32 %v6164_v55, %v6169_v20 }
 0x2ad   : > { %6902 = vst [vmem:[#allocation56_spill] sm:$0xff] %v6419_v8  ;;  %v6423_v19 = vadd.f32 %v4586_v25, %v2553_v1 }
 0x2ae   : > { %v2555_v54 = vpop.f32.mrf.mxu0  ;;  %v3090_v53 = vpop.f32.mrf.mxu1  ;;  %6905 = vst [vmem:[#allocation57_spill] sm:$0xff] %v6427_v27 }
 0x2af   : > { %6903 = vst [vmem:[#allocation35_spill] sm:$0xff] %v6423_v19  ;;  %v6431_v29 = vadd.f32 %v3090_v53, %v2545_v33 }
 0x2b0   : > { %v2558_v26 = vpop.f32.mrf.mxu0  ;;  %v4589_v16 = vpop.f32.mrf.mxu1 }
 0x2b1   : > { %6907 = vst [vmem:[#allocation41_spill] sm:$0xff] %v6431_v29  ;;  %v6910_v29 = vmax.f32 %v6157_v47, %v6160_v15 }
 0x2b2   : > { %v2560_v58 = vpop.f32.mrf.mxu0  ;;  %v3103_v62 = vpop.f32.mrf.mxu1 }
 0x2b3   : > { %v3104_v1 = vadd.f32 %v3103_v62, %v2558_v26 }
 0x2b4   : > { %v2561_v25 = vpop.f32.mrf.mxu0  ;;  %v6435_v54 = vpop.f32.mrf.mxu1 }
 0x2b5   : > { %v6440_v24 = vmax.f32 %v6908_v11, %v3104_v1 }
 0x2b6   : > { %v2563_v42 = vpop.f32.mrf.mxu0  ;;  %v3106_v43 = vpop.f32.mrf.mxu1 }
 0x2b7   : > { %v3107_v33 = vadd.f32 %v3106_v43, %v2561_v25 }
 0x2b8   : > { %v2566_v53 = vpop.f32.mrf.mxu0  ;;  %v4593_v19 = vpop.f32.mrf.mxu1 }
 0x2b9   : > { %v6445_v18 = vmax.f32 %v6909_v6, %v3107_v33  ;;  %v3112_v58 = vadd.f32 %v4589_v16, %v2566_v53  ;;  %v6911_v16 = vmax.f32 %v6204_v57, %v6209_v51 }
 0x2ba   : > { %v2568_v62 = vpop.f32.mrf.mxu0  ;;  %v3119_v26 = vpop.f32.mrf.mxu1 }
 0x2bb   : > { %v6450_v27 = vmax.f32 %v6910_v29, %v3112_v58 }
 0x2bc   : > { %v6452_v55 = vpop.f32.mrf.mxu0  ;;  %v6454_v20 = vpop.f32.mrf.mxu1 }
 0x2be   : > { %v2571_v42 = vpop.f32.mrf.mxu0  ;;  %v6456_v43 = vpop.f32.mrf.mxu1 }
 0x2c0   : > { %v2574_v1 = vpop.f32.mrf.mxu0  ;;  %v4597_v25 = vpop.f32.mrf.mxu1 }
 0x2c1   : > { %v3120_v49 = vadd.f32 %v3119_v26, %v2574_v1  ;;  %v6912_v26 = vmax.f32 %v6195_v10, %v6200_v48 }
 0x2c2   : > { %v2576_v35 = vpop.f32.mrf.mxu0  ;;  %v3135_v6 = vpop.f32.mrf.mxu1 }
 0x2c3   : > { %v6461_v11 = vmax.f32 %v6911_v16, %v3120_v49 }
 0x2c4   : > { %v6463_v47 = vpop.f32.mrf.mxu0  ;;  %v6465_v15 = vpop.f32.mrf.mxu1 }
 0x2c6   : > { %v2579_v29 = vpop.f32.mrf.mxu0  ;;  %v6467_v33 = vpop.f32.mrf.mxu1 }
 0x2c8   : > { %v2582_v53 = vpop.f32.mrf.mxu0  ;;  %v4601_v58 = vpop.f32.mrf.mxu1 }
 0x2c9   : > { %v3128_v62 = vadd.f32 %v4593_v19, %v2582_v53  ;;  %v6913_v53 = vmax.f32 %v6244_v17, %v6249_v44 }
 0x2ca   : > { %v2584_v42 = vpop.f32.mrf.mxu0  ;;  %v3151_v60 = vpop.f32.mrf.mxu1 }
 0x2cb   : > { %v6472_v1 = vmax.f32 %v6912_v26, %v3128_v62 }
 0x2cc   : > { %v6474_v57 = vpop.f32.mrf.mxu0  ;;  %v6476_v51 = vpop.f32.mrf.mxu1 }
 0x2ce   : > { %v2587_v49 = vpop.f32.mrf.mxu0  ;;  %v6478_v35 = vpop.f32.mrf.mxu1 }
 0x2d0   : > { %v2590_v16 = vpop.f32.mrf.mxu0  ;;  %v6480_v29 = vpop.f32.mrf.mxu1 }
 0x2d1   : > { %v3136_v31 = vadd.f32 %v3135_v6, %v2590_v16 }
 0x2d2   : > { %v2592_v8 = vpop.f32.mrf.mxu0  ;;  %v3167_v19 = vpop.f32.mrf.mxu1 }
 0x2d3   : > { %v6485_v42 = vmax.f32 %v6913_v53, %v3136_v31  ;;  %v6915_v8 = vmax.f32 %v6235_v0, %v6240_v38 }
 0x2d4   : > { %v6487_v10 = vpop.f32.mrf.mxu0  ;;  %v6489_v48 = vpop.f32.mrf.mxu1 }
 0x2d5   : > { %6914 = vst [vmem:[#allocation43_spill] sm:$0xff] %v6489_v48 }
 0x2d6   : > { %v2595_v62 = vpop.f32.mrf.mxu0  ;;  %v6491_v26 = vpop.f32.mrf.mxu1 }
 0x2d8   : > { %v2598_v49 = vpop.f32.mrf.mxu0  ;;  %v6493_v52 = vpop.f32.mrf.mxu1 }
 0x2d9   : > { %v3144_v34 = vadd.f32 %v4597_v25, %v2598_v49  ;;  %v6919_v49 = vmax.f32 %v6282_v41, %v6287_v46  ;;  %v6924_v41 = vmax.f32 %v6273_v23, %v6278_v28 }
 0x2da   : > { %v2600_v37 = vpop.f32.mrf.mxu0  ;;  %v6495_v6 = vpop.f32.mrf.mxu1 }
 0x2db   : > { %v6500_v17 = vmax.f32 %v6915_v8, %v3144_v34 }
 0x2dc   : > { %v6502_v44 = vpop.f32.mrf.mxu0  ;;  %v6504_v31 = vpop.f32.mrf.mxu1 }
 0x2dd   : > { %6916 = vst [vmem:[#allocation61_spill] sm:$0xff] %v6504_v31 }
 0x2de   : > { %v2603_v16 = vpop.f32.mrf.mxu0  ;;  %v6506_v53 = vpop.f32.mrf.mxu1 }
 0x2df   : > { %6917 = vst [vmem:[#allocation62_spill] sm:$0xff] %v6506_v53 }
 0x2e0   : > { %v2606_v62 = vpop.f32.mrf.mxu0  ;;  %v6508_v32 = vpop.f32.mrf.mxu1 }
 0x2e1   : > { %6918 = vst [vmem:[#allocation63_spill] sm:$0xff] %v6508_v32  ;;  %v3152_v48 = vadd.f32 %v3151_v60, %v2606_v62  ;;  %v6553_v32 = vld [vmem:[%s6776_s2] ss:$0 sm:$0xff] }
 0x2e2   : > { %v2608_v25 = vpop.f32.mrf.mxu0  ;;  %v6510_v37 = vpop.f32.mrf.mxu1 }
 0x2e3   : > { %v6515_v0 = vmax.f32 %v6919_v49, %v3152_v48 }
 0x2e4   : > { %v6517_v38 = vpop.f32.mrf.mxu0  ;;  %v6519_v34 = vpop.f32.mrf.mxu1 }
 0x2e5   : > { %6920 = vst [vmem:[#allocation64_spill] sm:$0xff] %v6519_v34 }
 0x2e6   : > { %v2611_v8 = vpop.f32.mrf.mxu0  ;;  %v6521_v16 = vpop.f32.mrf.mxu1 }
 0x2e7   : > { %6921 = vst [vmem:[#allocation65_spill] sm:$0xff] %v6521_v16 }
 0x2e8   : > { %v2614_v53 = vpop.f32.mrf.mxu0  ;;  %v6523_v31 = vpop.f32.mrf.mxu1 }
 0x2e9   : > { %6922 = vst [vmem:[#allocation66_spill] sm:$0xff] %v6523_v31  ;;  %v3160_v60 = vadd.f32 %v4601_v58, %v2614_v53  ;;  %v3115_v58 = vadd.f32 %v6435_v54, %v6452_v55 }
 0x2ea   : > { %v2616_v62 = vpop.f32.mrf.mxu0  ;;  %v6525_v25 = vpop.f32.mrf.mxu1 }
 0x2eb   : > { %6923 = vst [vmem:[#allocation67_spill] sm:$0xff] %v6525_v25  ;;  %v6530_v46 = vmax.f32 %v6924_v41, %v3160_v60  ;;  %v6927_v62 = vld [vmem:[#allocation5_spill] sm:$0xff]  ;;  %v6928_v60 = vmax.f32 %v6318_v39, %v6323_v7  ;;  %v6932_v39 = vld [vmem:[#allocation6_spill] sm:$0xff] }
 0x2ec   : > { %v6532_v48 = vpop.f32.mrf.mxu0  ;;  %v6534_v49 = vpop.f32.mrf.mxu1 }
 0x2ed   : > { %6925 = vst [vmem:[#allocation68_spill] sm:$0xff] %v6534_v49  ;;  %v6930_v49 = vld [vmem:[#allocation3_spill] sm:$0xff] }
 0x2ee   : > { %v2619_v34 = vpop.f32.mrf.mxu0  ;;  %v6536_v8 = vpop.f32.mrf.mxu1 }
 0x2ef   : > { %6926 = vst [vmem:[#allocation69_spill] sm:$0xff] %v6536_v8 }
 0x2f0   : > { %v2622_v16 = vpop.f32.mrf.mxu0  ;;  %v4621_v31 = vpop.f32.mrf.mxu1 }
 0x2f1   : > { %v3168_v53 = vadd.f32 %v3167_v19, %v2622_v16  ;;  %v3240_v25 = vadd.f32 %v4621_v31, %v6927_v62  ;;  %v6931_v19 = vmax.f32 %v6175_v5, %v6180_v4  ;;  %v6933_v62 = vld [vmem:[#allocation4_spill] sm:$0xff]  ;;  %v6934_v4 = vld [vmem:[#allocation9_spill] sm:$0xff] }
 0x2f2   : > { %v2624_v23 = vpop.f32.mrf.mxu0  ;;  %v3231_v28 = vpop.f32.mrf.mxu1 }
 0x2f3   : > { %v6546_v41 = vmax.f32 %v6928_v60, %v3168_v53  ;;  %v3366_v34 = vmax.f32 %v6450_v27, %v3240_v25  ;;  %v3232_v8 = vadd.f32 %v3231_v28, %v6930_v49  ;;  %v3368_v31 = vmax.f32 %v6931_v19, %v3115_v58 }
 0x2f4   : > { %v6555_v54 = vpop.f32.mrf.mxu0  ;;  %v4622_v55 = vpop.f32.mrf.mxu1 }
 0x2f5   : > { %6929 = vst [vmem:[#allocation5_spill] sm:$0xff] %v6546_v41  ;;  %v3243_v7 = vadd.f32 %v4622_v55, %v6932_v39  ;;  %v3360_v16 = vmax.f32 %v6440_v24, %v3232_v8  ;;  %v3463_v49 = vadd.f32 %v6553_v32, %v3366_v34  ;;  %v3123_v55 = vadd.f32 %v6456_v43, %v6463_v47 }
 0x2f6   : > { %v2627_v27 = vpop.f32.mrf.mxu0  ;;  %v3234_v25 = vpop.f32.mrf.mxu1  ;;  %v3131_v24 = vadd.f32 %v6454_v20, %v6474_v57 }
 0x2f7   : > { %v3369_v53 = vmax.f32 %v3368_v31, %v3243_v7  ;;  %v3235_v23 = vadd.f32 %v3234_v25, %v6933_v62  ;;  %v3461_v8 = vadd.f32 %v6553_v32, %v3360_v16  ;;  %v3495_v39 = vmax.f32 %v3463_v49, 0.0  ;;  %v6936_v25 = vld [vmem:[#allocation7_spill] sm:$0xff]  ;;  %v6938_v62 = vld [vmem:[#allocation10_spill] sm:$0xff] }
 0x2f8   : > { %v2630_v28 = vpop.f32.mrf.mxu0  ;;  %v4625_v60 = vpop.f32.mrf.mxu1  ;;  %v6935_v27 = vmax.f32 %v6309_v22, %v6314_v50  ;;  %v6937_v50 = vmax.f32 %v6215_v36, %v6220_v40 }
 0x2f9   : > { %v3464_v41 = vadd.f32 %v6553_v32, %v3369_v53  ;;  %v3176_v5 = vadd.f32 %v6480_v29, %v2630_v28  ;;  %v3256_v58 = vadd.f32 %v4625_v60, %v6934_v4  ;;  %v3363_v34 = vmax.f32 %v6445_v18, %v3235_v23  ;;  %v6940_v4 = vld [vmem:[#allocation8_spill] sm:$0xff] }
 0x2fa   : > { %v2632_v19 = vpop.f32.mrf.mxu0  ;;  %v3247_v31 = vpop.f32.mrf.mxu1  ;;  %v3493_v16 = vmax.f32 %v3461_v8, 0.0 }
 0x2fb   : > { %v3496_v7 = vmax.f32 %v3464_v41, 0.0  ;;  %v6576_v29 = vmax.f32 %v6935_v27, %v3176_v5  ;;  %v3248_v53 = vadd.f32 %v3247_v31, %v6936_v25  ;;  %v3462_v20 = vadd.f32 %v6553_v32, %v3363_v34 }
 0x2fc   : > { %v3378_v18 = vmax.f32 %v6472_v1, %v3256_v58  ;;  %v6586_v43 = vpop.f32.mrf.mxu0  ;;  %v4626_v47 = vpop.f32.mrf.mxu1  ;;  %v3380_v41 = vmax.f32 %v6937_v50, %v3131_v24  ;;  %v6939_v1 = vmax.f32 %v6224_v61, %v6229_v63  ;;  %v3147_v61 = vadd.f32 %v6465_v15, %v6502_v44 }
 0x2fd   : > { %v4366_v57 = vpack.c.bf16 %v3496_v7, %v3495_v39  ;;  %v3372_v22 = vmax.f32 %v6461_v11, %v3248_v53  ;;  %v3494_v49 = vmax.f32 %v3462_v20, 0.0  ;;  %v3259_v23 = vadd.f32 %v4626_v47, %v6938_v62  ;;  %v6941_v39 = vld [vmem:[#allocation13_spill] sm:$0xff] }
 0x2fe   : > { %v2635_v28 = vpop.f32.mrf.mxu0  ;;  %v3250_v60 = vpop.f32.mrf.mxu1  ;;  %v3374_v5 = vmax.f32 %v6939_v1, %v3123_v55  ;;  %v3467_v11 = vadd.f32 %v6553_v32, %v3378_v18  ;;  %v6942_v53 = vmax.f32 %v6353_v2, %v6358_v13  ;;  %v6943_v18 = vld [vmem:[#allocation11_spill] sm:$0xff]  ;;  %v6944_v2 = vmax.f32 %v6255_v30, %v6260_v14 }
 0x2ff   : > { %4438 = vst [vmem:[%s6582_s26 + $0x8] sm:$0xff] %v4366_v57   ;;  %v3251_v58 = vadd.f32 %v3250_v60, %v6940_v4  ;;  %v4361_v34 = vpack.c.bf16 %v3494_v49, %v3493_v16  ;;  %v3381_v19 = vmax.f32 %v3380_v41, %v3259_v23  ;;  %v3465_v24 = vadd.f32 %v6553_v32, %v3372_v22  ;;  %v6945_v23 = vld [vmem:[#allocation14_spill] sm:$0xff] }
 0x300   : > { %v2638_v36 = vpop.f32.mrf.mxu0  ;;  %v4629_v40 = vpop.f32.mrf.mxu1  ;;  %v3499_v57 = vmax.f32 %v3467_v11, 0.0  ;;  %v3392_v13 = vmax.f32 %v6944_v2, %v3147_v61 }
 0x301   : > { %v3375_v8 = vmax.f32 %v3374_v5, %v3251_v58  ;;  %v3184_v31 = vadd.f32 %v6495_v6, %v2638_v36  ;;  %v3272_v7 = vadd.f32 %v4629_v40, %v6941_v39  ;;  %4362 = vst [vmem:[%s6582_s26] sm:$0xff] %v4361_v34   ;;  %v3468_v63 = vadd.f32 %v6553_v32, %v3381_v19  ;;  %v6947_v58 = vld [vmem:[#allocation12_spill] sm:$0xff]  ;;  %v6948_v19 = vld [vmem:[#allocation17_spill] sm:$0xff] }
 0x302   : > { %v2640_v55 = vpop.f32.mrf.mxu0  ;;  %v3263_v27 = vpop.f32.mrf.mxu1  ;;  %v3139_v6 = vadd.f32 %v6467_v33, %v6487_v10  ;;  %v3497_v41 = vmax.f32 %v3465_v24, 0.0 }
 0x303   : > { %v3466_v25 = vadd.f32 %v6553_v32, %v3375_v8  ;;  %v6610_v20 = vmax.f32 %v6942_v53, %v3184_v31  ;;  %v3264_v47 = vadd.f32 %v3263_v27, %v6943_v18  ;;  %v3500_v15 = vmax.f32 %v3468_v63, 0.0 }
 0x304   : > { %v3390_v44 = vmax.f32 %v6500_v17, %v3272_v7  ;;  %v6616_v22 = vpop.f32.mrf.mxu0  ;;  %v4630_v50 = vpop.f32.mrf.mxu1  ;;  %v6946_v17 = vmax.f32 %v6264_v21, %v6269_v56  ;;  %v6949_v31 = vmax.f32 %v6345_v9, %v6349_v12  ;;  %v6951_v53 = vmax.f32 %v6291_v3, %v6296_v59  ;;  %v6952_v12 = vld [vmem:[#allocation18_spill] sm:$0xff]  ;;  %v6955_v59 = vld [vmem:[#allocation16_spill] sm:$0xff] }
 0x305   : > { %v3498_v16 = vmax.f32 %v3466_v25, 0.0  ;;  %v4376_v49 = vpack.c.bf16 %v3500_v15, %v3499_v57  ;;  %v3384_v62 = vmax.f32 %v6485_v42, %v3264_v47  ;;  %v3275_v33 = vadd.f32 %v4630_v50, %v6945_v23  ;;  %v6953_v50 = vld [vmem:[#allocation60_spill] sm:$0xff]  ;;  %v6956_v23 = vld [vmem:[#allocation22_spill] sm:$0xff] }
 0x306   : > { %v2643_v10 = vpop.f32.mrf.mxu0  ;;  %v3266_v28 = vpop.f32.mrf.mxu1  ;;  %v3386_v1 = vmax.f32 %v6946_v17, %v3139_v6  ;;  %v3471_v5 = vadd.f32 %v6553_v32, %v3390_v44  ;;  %v3163_v42 = vadd.f32 %v6476_v51, %v6532_v48  ;;  %v6950_v51 = vld [vmem:[#allocation15_spill] sm:$0xff] }
 0x307   : > { %v4371_v60 = vpack.c.bf16 %v3498_v16, %v3497_v41  ;;  %4440 = vst [vmem:[%s6582_s26 + $0x18] sm:$0xff] %v4376_v49   ;;  %v3393_v4 = vmax.f32 %v3392_v13, %v3275_v33  ;;  %v3267_v30 = vadd.f32 %v3266_v28, %v6947_v58  ;;  %v3469_v40 = vadd.f32 %v6553_v32, %v3384_v62  ;;  %v6957_v28 = vld [vmem:[#allocation43_spill] sm:$0xff] }
 0x308   : > { %v2646_v14 = vpop.f32.mrf.mxu0  ;;  %v4633_v34 = vpop.f32.mrf.mxu1  ;;  %v3503_v61 = vmax.f32 %v3471_v5, 0.0  ;;  %v3404_v9 = vmax.f32 %v6951_v53, %v3163_v42  ;;  %v6954_v41 = vmax.f32 %v6300_v45, %v6953_v50  ;;  %v3171_v10 = vadd.f32 %v6491_v26, %v6555_v54  ;;  %v6961_v42 = vld [vmem:[#allocation19_spill] sm:$0xff]  ;;  %v6972_v50 = vld [vmem:[#allocation30_spill] sm:$0xff] }
 0x309   : > { %4439 = vst [vmem:[%s6582_s26 + $0x10] sm:$0xff] %v4371_v60   ;;  %v3192_v11 = vadd.f32 %v6493_v52, %v2646_v14  ;;  %v3288_v36 = vadd.f32 %v4633_v34, %v6948_v19  ;;  %v3472_v21 = vadd.f32 %v6553_v32, %v3393_v4  ;;  %v3387_v56 = vmax.f32 %v3386_v1, %v3267_v30  ;;  %v6958_v30 = vld [vmem:[#allocation52_spill] sm:$0xff]  ;;  %v6959_v14 = vld [vmem:[#allocation27_spill] sm:$0xff] }
 0x30a   : > { %v2648_v24 = vpop.f32.mrf.mxu0  ;;  %v3279_v8 = vpop.f32.mrf.mxu1  ;;  %v3155_v52 = vadd.f32 %v6478_v35, %v6517_v38  ;;  %v3501_v47 = vmax.f32 %v3469_v40, 0.0  ;;  %v3179_v60 = vadd.f32 %v6957_v28, %v6586_v43  ;;  %v6960_v34 = vmax.f32 %v6958_v30, %v6959_v14  ;;  %v6962_v40 = vld [vmem:[#allocation5_spill] sm:$0xff] }
 0x30b   : > { %v6639_v39 = vmax.f32 %v6949_v31, %v3192_v11  ;;  %v3402_v7 = vmax.f32 %v6530_v46, %v3288_v36  ;;  %v3280_v48 = vadd.f32 %v3279_v8, %v6950_v51  ;;  %v3504_v63 = vmax.f32 %v3472_v21, 0.0  ;;  %v6964_v24 = vld [vmem:[#allocation23_spill] sm:$0xff] }
 0x30c   : > { %v3470_v55 = vadd.f32 %v6553_v32, %v3387_v56  ;;  %v2649_v27 = vpop.f32.mrf.mxu0  ;;  %v4634_v25 = vpop.f32.mrf.mxu1  ;;  %v3398_v16 = vmax.f32 %v6954_v41, %v3155_v52  ;;  %v6963_v56 = vld [vmem:[#allocation47_spill] sm:$0xff] }
 0x30d   : > { %v3291_v18 = vadd.f32 %v4634_v25, %v6952_v12  ;;  %v4386_v46 = vpack.c.bf16 %v3504_v63, %v3503_v61  ;;  %v3396_v57 = vmax.f32 %v6515_v0, %v3280_v48  ;;  %v3475_v15 = vadd.f32 %v6553_v32, %v3402_v7  ;;  %v6966_v48 = vld [vmem:[#allocation24_spill] sm:$0xff] }
 0x30e   : > { %v3502_v6 = vmax.f32 %v3470_v55, 0.0  ;;  %v2651_v35 = vpop.f32.mrf.mxu0  ;;  %v3282_v38 = vpop.f32.mrf.mxu1  ;;  %v6965_v8 = vmax.f32 %v6963_v56, %v6964_v24  ;;  %v6967_v55 = vld [vmem:[#allocation48_spill] sm:$0xff]  ;;  %v6983_v56 = vld [vmem:[#allocation50_spill] sm:$0xff]  ;;  %v6984_v24 = vld [vmem:[#allocation25_spill] sm:$0xff] }
 0x30f   : > { %v3405_v44 = vmax.f32 %v3404_v9, %v3291_v18  ;;  %4442 = vst [vmem:[%s6582_s26 + $0x28] sm:$0xff] %v4386_v46   ;;  %v3283_v2 = vadd.f32 %v3282_v38, %v6955_v59  ;;  %v3473_v45 = vadd.f32 %v6553_v32, %v3396_v57  ;;  %v3507_v4 = vmax.f32 %v3475_v15, 0.0  ;;  %v6968_v25 = vld [vmem:[#allocation20_spill] sm:$0xff]  ;;  %v6970_v9 = vld [vmem:[#allocation21_spill] sm:$0xff]  ;;  %v6971_v15 = vld [vmem:[#allocation63_spill] sm:$0xff] }
 0x310   : > { %v4381_v3 = vpack.c.bf16 %v3502_v6, %v3501_v47  ;;  %v2654_v13 = vpop.f32.mrf.mxu0  ;;  %v4637_v49 = vpop.f32.mrf.mxu1  ;;  %v3416_v31 = vmax.f32 %v6965_v8, %v3179_v60  ;;  %v6978_v60 = vld [vmem:[#allocation62_spill] sm:$0xff] }
 0x311   : > { %v3476_v62 = vadd.f32 %v6553_v32, %v3405_v44  ;;  %v3200_v0 = vadd.f32 %v6510_v37, %v2654_v13  ;;  %v3304_v33 = vadd.f32 %v4637_v49, %v6956_v23  ;;  %v3399_v17 = vmax.f32 %v3398_v16, %v3283_v2  ;;  %v6973_v16 = vld [vmem:[#allocation61_spill] sm:$0xff] }
 0x312   : > { %4441 = vst [vmem:[%s6582_s26 + $0x20] sm:$0xff] %v4381_v3   ;;  %v2656_v1 = vpop.f32.mrf.mxu0  ;;  %v3295_v5 = vpop.f32.mrf.mxu1  ;;  %v3505_v7 = vmax.f32 %v3473_v45, 0.0  ;;  %v3195_v3 = vadd.f32 %v6973_v16, %v2649_v27  ;;  %v3187_v45 = vadd.f32 %v6978_v60, %v6616_v22  ;;  %v6998_v60 = vld [vmem:[#allocation40_spill] sm:$0xff] }
 0x313   : > { %v3508_v58 = vmax.f32 %v3476_v62, 0.0  ;;  %v6669_v37 = vmax.f32 %v6960_v34, %v3200_v0  ;;  %v3296_v11 = vadd.f32 %v3295_v5, %v6961_v42  ;;  %v3474_v26 = vadd.f32 %v6553_v32, %v3399_v17  ;;  %v6974_v62 = vld [vmem:[#allocation51_spill] sm:$0xff]  ;;  %v6979_v34 = vld [vmem:[#allocation49_spill] sm:$0xff] }
 0x314   : > { %v3414_v54 = vmax.f32 %v6576_v29, %v3304_v33  ;;  %v6674_v43 = vpop.f32.mrf.mxu0  ;;  %v4638_v19 = vpop.f32.mrf.mxu1  ;;  %v6969_v29 = vmax.f32 %v6967_v55, %v6968_v25  ;;  %v6975_v0 = vld [vmem:[#allocation31_spill] sm:$0xff]  ;;  %v6980_v42 = vld [vmem:[#allocation29_spill] sm:$0xff] }
 0x315   : > { %v4396_v36 = vpack.c.bf16 %v3508_v58, %v3507_v4  ;;  %v3408_v21 = vmax.f32 %v6962_v40, %v3296_v11  ;;  %v3506_v51 = vmax.f32 %v3474_v26, 0.0  ;;  %v3307_v52 = vadd.f32 %v4638_v19, %v6966_v48  ;;  %v6982_v19 = vld [vmem:[#allocation32_spill] sm:$0xff]  ;;  %v6988_v25 = vld [vmem:[#allocation67_spill] sm:$0xff] }
 0x316   : > { %v2659_v61 = vpop.f32.mrf.mxu0  ;;  %v3298_v63 = vpop.f32.mrf.mxu1  ;;  %v3410_v53 = vmax.f32 %v6969_v29, %v3171_v10  ;;  %v3479_v47 = vadd.f32 %v6553_v32, %v3414_v54  ;;  %v6976_v23 = vmax.f32 %v6974_v62, %v6975_v0  ;;  %v6977_v10 = vld [vmem:[#allocation26_spill] sm:$0xff]  ;;  %v6981_v11 = vmax.f32 %v6979_v34, %v6980_v42  ;;  %v6995_v0 = vld [vmem:[#allocation53_spill] sm:$0xff] }
 0x317   : > { %4444 = vst [vmem:[%s6582_s26 + $0x38] sm:$0xff] %v4396_v36   ;;  %v3299_v12 = vadd.f32 %v3298_v63, %v6970_v9  ;;  %v4391_v18 = vpack.c.bf16 %v3506_v51, %v3505_v7  ;;  %v3417_v46 = vmax.f32 %v3416_v31, %v3307_v52  ;;  %v3477_v35 = vadd.f32 %v6553_v32, %v3408_v21  ;;  %v6986_v51 = vld [vmem:[#allocation28_spill] sm:$0xff] }
 0x318   : > { %v2662_v6 = vpop.f32.mrf.mxu0  ;;  %v4641_v57 = vpop.f32.mrf.mxu1  ;;  %v3511_v17 = vmax.f32 %v3479_v47, 0.0  ;;  %v3428_v26 = vmax.f32 %v6981_v11, %v3195_v3  ;;  %v6987_v63 = vld [vmem:[#allocation64_spill] sm:$0xff] }
 0x319   : > { %v3411_v38 = vmax.f32 %v3410_v53, %v3299_v12  ;;  %v3208_v44 = vadd.f32 %v6971_v15, %v2662_v6  ;;  %v3320_v41 = vadd.f32 %v4641_v57, %v6972_v50  ;;  %4443 = vst [vmem:[%s6582_s26 + $0x30] sm:$0xff] %v4391_v18   ;;  %v3480_v59 = vadd.f32 %v6553_v32, %v3417_v46  ;;  %v6989_v53 = vld [vmem:[#allocation38_spill] sm:$0xff]  ;;  %v6990_v6 = vld [vmem:[#allocation39_spill] sm:$0xff]  ;;  %v6991_v57 = vld [vmem:[#allocation56_spill] sm:$0xff] }
 0x31a   : > { %v2664_v2 = vpop.f32.mrf.mxu0  ;;  %v3311_v13 = vpop.f32.mrf.mxu1  ;;  %v3509_v58 = vmax.f32 %v3477_v35, 0.0  ;;  %v6992_v35 = vmax.f32 %v6990_v6, %v6991_v57  ;;  %v7002_v11 = vld [vmem:[#allocation36_spill] sm:$0xff] }
 0x31b   : > { %v3478_v49 = vadd.f32 %v6553_v32, %v3411_v38  ;;  %v3437_v33 = vmax.f32 %v6976_v23, %v3208_v44  ;;  %v3312_v28 = vadd.f32 %v3311_v13, %v6977_v10  ;;  %v3512_v1 = vmax.f32 %v3480_v59, 0.0  ;;  %v6993_v44 = vld [vmem:[#allocation34_spill] sm:$0xff]  ;;  %v6996_v23 = vld [vmem:[#allocation37_spill] sm:$0xff] }
 0x31c   : > { %v3426_v27 = vmax.f32 %v6639_v39, %v3320_v41  ;;  %v2665_v5 = vpop.f32.mrf.mxu0  ;;  %v4642_v4 = vpop.f32.mrf.mxu1  ;;  %v6985_v39 = vmax.f32 %v6983_v56, %v6984_v24  ;;  %v6994_v41 = vld [vmem:[#allocation65_spill] sm:$0xff]  ;;  %v6997_v10 = vmax.f32 %v6995_v0, %v6996_v23  ;;  %v7018_v23 = vld [vmem:[#allocation44_spill] sm:$0xff] }
 0x31d   : > { %v3510_v30 = vmax.f32 %v3478_v49, 0.0  ;;  %v3420_v14 = vmax.f32 %v6610_v20, %v3312_v28  ;;  %v4406_v54 = vpack.c.bf16 %v3512_v1, %v3511_v17  ;;  %v3323_v36 = vadd.f32 %v4642_v4, %v6982_v19  ;;  %v7004_v56 = vld [vmem:[#allocation69_spill] sm:$0xff] }
 0x31e   : > { %v2667_v22 = vpop.f32.mrf.mxu0  ;;  %v3314_v40 = vpop.f32.mrf.mxu1  ;;  %v3422_v8 = vmax.f32 %v6985_v39, %v3187_v45  ;;  %v3483_v31 = vadd.f32 %v6553_v32, %v3426_v27  ;;  %v3211_v55 = vadd.f32 %v6987_v63, %v2665_v5  ;;  %v3203_v16 = vadd.f32 %v6994_v41, %v6674_v43  ;;  %v7012_v41 = vld [vmem:[#allocation41_spill] sm:$0xff] }
 0x31f   : > { %v4401_v21 = vpack.c.bf16 %v3510_v30, %v3509_v58  ;;  %4446 = vst [vmem:[%s6582_s26 + $0x48] sm:$0xff] %v4406_v54   ;;  %v3429_v7 = vmax.f32 %v3428_v26, %v3323_v36  ;;  %v3315_v20 = vadd.f32 %v3314_v40, %v6986_v51  ;;  %v3481_v61 = vadd.f32 %v6553_v32, %v3420_v14  ;;  %v6999_v58 = vld [vmem:[#allocation54_spill] sm:$0xff]  ;;  %v7000_v30 = vld [vmem:[#allocation33_spill] sm:$0xff] }
 0x320   : > { %v2670_v48 = vpop.f32.mrf.mxu0  ;;  %v4645_v52 = vpop.f32.mrf.mxu1  ;;  %v3515_v3 = vmax.f32 %v3483_v31, 0.0  ;;  %v3440_v28 = vmax.f32 %v6997_v10, %v3211_v55  ;;  %v7001_v14 = vmax.f32 %v6999_v58, %v7000_v30  ;;  %v7003_v22 = vld [vmem:[#allocation66_spill] sm:$0xff] }
 0x321   : > { %4445 = vst [vmem:[%s6582_s26 + $0x40] sm:$0xff] %v4401_v21   ;;  %v3216_v29 = vadd.f32 %v6988_v25, %v2670_v48  ;;  %v3336_v9 = vadd.f32 %v4645_v52, %v6989_v53  ;;  %v3484_v12 = vadd.f32 %v6553_v32, %v3429_v7  ;;  %v3423_v18 = vmax.f32 %v3422_v8, %v3315_v20  ;;  %v7005_v51 = vld [vmem:[#allocation58_spill] sm:$0xff]  ;;  %v7006_v20 = vld [vmem:[#allocation55_spill] sm:$0xff] }
 0x322   : > { %v2672_v47 = vpop.f32.mrf.mxu0  ;;  %v3327_v46 = vpop.f32.mrf.mxu1  ;;  %v3513_v62 = vmax.f32 %v3481_v61, 0.0  ;;  %v3434_v34 = vmax.f32 %v7001_v14, %v3203_v16  ;;  %v7007_v48 = vmax.f32 %v7005_v51, %v7006_v20  ;;  %v7008_v61 = vld [vmem:[#allocation45_spill] sm:$0xff]  ;;  %v7009_v55 = vld [vmem:[#allocation42_spill] sm:$0xff] }
 0x323   : > { %v3443_v38 = vmax.f32 %v6992_v35, %v3216_v29  ;;  %v3438_v15 = vmax.f32 %v3437_v33, %v3336_v9  ;;  %v3328_v50 = vadd.f32 %v3327_v46, %v6993_v44  ;;  %v3516_v59 = vmax.f32 %v3484_v12, 0.0  ;;  %v7010_v46 = vld [vmem:[#allocation68_spill] sm:$0xff] }
 0x324   : > { %v3482_v2 = vadd.f32 %v6553_v32, %v3423_v18  ;;  %v2673_v13 = vpop.f32.mrf.mxu0  ;;  %v4646_v49 = vpop.f32.mrf.mxu1 }
 0x325   : > { %v3339_v45 = vadd.f32 %v4646_v49, %v6998_v60  ;;  %v4416_v33 = vpack.c.bf16 %v3516_v59, %v3515_v3  ;;  %v3487_v1 = vadd.f32 %v6553_v32, %v3438_v15  ;;  %v3432_v43 = vmax.f32 %v6669_v37, %v3328_v50  ;;  %v7011_v50 = vld [vmem:[#allocation57_spill] sm:$0xff]  ;;  %v7014_v59 = vld [vmem:[#allocation59_spill] sm:$0xff] }
 0x326   : > { %v3514_v17 = vmax.f32 %v3482_v2, 0.0  ;;  %v2675_v27 = vpop.f32.mrf.mxu0  ;;  %v3330_v5 = vpop.f32.mrf.mxu1  ;;  %v3219_v24 = vadd.f32 %v7004_v56, %v2673_v13  ;;  %v7013_v16 = vmax.f32 %v7011_v50, %v7012_v41  ;;  %v7015_v2 = vld [vmem:[#allocation35_spill] sm:$0xff] }
 0x327   : > { %v3441_v4 = vmax.f32 %v3440_v28, %v3339_v45  ;;  %4448 = vst [vmem:[%s6582_s26 + $0x58] sm:$0xff] %v4416_v33   ;;  %v3331_v26 = vadd.f32 %v3330_v5, %v7002_v11  ;;  %v3519_v21 = vmax.f32 %v3487_v1, 0.0  ;;  %v3485_v37 = vadd.f32 %v6553_v32, %v3432_v43 }
 0x328   : > { %v4411_v42 = vpack.c.bf16 %v3514_v17, %v3513_v62  ;;  %v2678_v54 = vpop.f32.mrf.mxu0  ;;  %v4649_v19 = vpop.f32.mrf.mxu1  ;;  %v3446_v3 = vmax.f32 %v7013_v16, %v3219_v24  ;;  %v7016_v13 = vmax.f32 %v7014_v59, %v7015_v2  ;;  %v7017_v62 = vld [vmem:[#allocation46_spill] sm:$0xff] }
 0x329   : > { %v3488_v36 = vadd.f32 %v6553_v32, %v3441_v4  ;;  %v3224_v40 = vadd.f32 %v7003_v22, %v2678_v54  ;;  %v3435_v39 = vmax.f32 %v3434_v34, %v3331_v26  ;;  %v3352_v63 = vadd.f32 %v4649_v19, %v7008_v61 }
 0x32a   : > { %4447 = vst [vmem:[%s6582_s26 + $0x50] sm:$0xff] %v4411_v42   ;;  %v2680_v8 = vpop.f32.mrf.mxu0  ;;  %v3343_v31 = vpop.f32.mrf.mxu1  ;;  %v3517_v57 = vmax.f32 %v3485_v37, 0.0 }
 0x32b   : > { %v3520_v7 = vmax.f32 %v3488_v36, 0.0  ;;  %v3449_v52 = vmax.f32 %v7007_v48, %v3224_v40  ;;  %v3344_v25 = vadd.f32 %v3343_v31, %v7009_v55  ;;  %v3486_v29 = vadd.f32 %v6553_v32, %v3435_v39 }
 0x32c   : > { %v2681_v53 = vpop.f32.mrf.mxu0  ;;  %v4650_v9 = vpop.f32.mrf.mxu1 }
 0x32d   : > { %v4426_v12 = vpack.c.bf16 %v3520_v7, %v3519_v21  ;;  %v3450_v18 = vmax.f32 %v3449_v52, %v3352_v63  ;;  %v3444_v47 = vmax.f32 %v3443_v38, %v3344_v25  ;;  %v3227_v6 = vadd.f32 %v7010_v46, %v2681_v53 }
 0x32e   : > { %v3518_v35 = vmax.f32 %v3486_v29, 0.0  ;;  %v2683_v15 = vpop.f32.mrf.mxu0  ;;  %v3346_v44 = vpop.f32.mrf.mxu1  ;;  %v3355_v0 = vadd.f32 %v4650_v9, %v7017_v62 }
 0x32f   : > { %4450 = vst [vmem:[%s6582_s26 + $0x68] sm:$0xff] %v4426_v12   ;;  %v3452_v49 = vmax.f32 %v7016_v13, %v3227_v6  ;;  %v3347_v38 = vadd.f32 %v3346_v44, %v7018_v23  ;;  %v3491_v28 = vadd.f32 %v6553_v32, %v3450_v18  ;;  %v3489_v60 = vadd.f32 %v6553_v32, %v3444_v47 }
 0x330   : > { %v4421_v10 = vpack.c.bf16 %v3518_v35, %v3517_v57 }
 0x331   : > { %v3453_v45 = vmax.f32 %v3452_v49, %v3355_v0  ;;  %v3447_v33 = vmax.f32 %v3446_v3, %v3347_v38  ;;  %v3523_v43 = vmax.f32 %v3491_v28, 0.0  ;;  %v3521_v27 = vmax.f32 %v3489_v60, 0.0 }
 0x332   : > { %4449 = vst [vmem:[%s6582_s26 + $0x60] sm:$0xff] %v4421_v10  }
 0x333   : > { %v3492_v17 = vadd.f32 %v6553_v32, %v3453_v45  ;;  %v3490_v1 = vadd.f32 %v6553_v32, %v3447_v33 }
 0x335   : > { %v3524_v5 = vmax.f32 %v3492_v17, 0.0  ;;  %v3522_v4 = vmax.f32 %v3490_v1, 0.0 }
 0x337   : > { %v4436_v58 = vpack.c.bf16 %v3524_v5, %v3523_v43  ;;  %v4431_v30 = vpack.c.bf16 %v3522_v4, %v3521_v27 }
 0x339   : > { %4452 = vst [vmem:[%s6582_s26 + $0x78] sm:$0xff] %v4436_v58   ;;  %4451 = vst [vmem:[%s6582_s26 + $0x70] sm:$0xff] %v4431_v30  }
 0x33a PF: > { %p10_p9 = scmp.ge.s32.totalorder %s5047_s16, 4   ;;  %s7019_s12 = smov %s5003_s13 }
 0x33b   : > { %s7020_s13 = smov %s5056_s19  ;;  %s7021_s14 = smov %s5047_s16 }
 0x33c   :  { %12 = sbr.rel (!%p10_p9) target bundleno = 2 (0x2), region = 99 }

// kernel: simple_cnn_forward.5
= control target key start
LH: loop header
LB: loop body
LE: loop exit
PB: predicated region body
PF: predicated region fallthrough
CT: control target
= control target key end

     0   :  { %10 = vsyncpa [#allocation4], 0  ;;  %s2457_s18 = smov 0   ;;  %s2704_s0 = inlined_call_operand.vmem [shape: bf16[2,16384], index: 0, kind: input, shape index: {}]   ;;  %s2705_s1 = inlined_call_operand.vmem [shape: bf16[16384,128], index: 1, kind: input, shape index: {}]   ;;  %s2706_s2 = inlined_call_operand.vmem [shape: f32[1,128], index: 2, kind: input, shape index: {}]   ;;  %s2707_s3 = inlined_call_operand.vmem [shape: f32[128,128], index: 3, kind: input, shape index: {}]   ;;  %s2708_s4 = inlined_call_operand.vmem [shape: f32[1,128], index: 4, kind: input, shape index: {}]   ;;  %s2709_s5 = inlined_call_operand.hbm [shape: f32[2,128], index: 5, kind: output, shape index: {}]  }
   0x1 LB: > { %s2463_s19 = sadd.s32 4294967295, %s2420_s18   ;;  %p1869_p0 = scmp.ge.s32.totalorder %s2420_s18, 1  ;;  %s2420_s18 = sphi %s2457_s18, %s16_s18  }
   0x2   : > { %p194_p1 = scmp.lt.s32.totalorder %s2420_s18, 9 }
   0x4   : > { %p195_p2 = pnand %p1869_p0, %p194_p1 }
   0x5   : > { %s1870_s20 = sshll.u32 (!%p195_p2), %s2463_s19, 4  ;;  %s1871_s21 = sshll.u32 (!%p195_p2), %s2463_s19, 8 }
   0x6   : > { %198 = sbr.rel (%p195_p2) target bundleno = 598 (0x256), region = 40  ;;  %p222_p3 = scmp.lt.s32.totalorder (!%p195_p2), %s1870_s20, 127 }
   0x7   : > { %p227_p4 = scmp.lt.s32.totalorder (!%p195_p2), %s1871_s21, 2047  ;;  %p1873_p5 = scmp.ne.s32.totalorder (!%p195_p2), %s2463_s19, 0 }
   0xb   : > { %s2711_s20 = smov (!%p222_p3, %s1870_s20), 127  ;;  %s2713_s21 = smov (!%p227_p4, %s1871_s21), 2047 }
   0xc   : > { %s2472_s24 = scalar_lea.vmem %s2704_s0, %s2711_s20  ;;  %s1872_s25 = sshll.u32 %s2713_s21, 2 }
   0xd   : > { %s2477_s28 = scalar_lea.vmem %s2705_s1, %s1872_s25  ;;  %236 = sbr.rel (%p1873_p5) target bundleno = 20 (0x14), region = 44 }
  0x12   : > { %v2422_v0 = vmov 0.0  }
  0x13   : > { %237 = vst [vmem:[#allocation2] sm:$0x3] %v2422_v0 }
  0x14 PF: > { %v2256_v1 = vld [vmem:[%s2477_s28 + $0x78] sm:$0xff]   ;;  %v2260_v5 = vld [vmem:[%s2477_s28 + $0x70] sm:$0xff]   ;;  %v2264_v9 = vld [vmem:[%s2477_s28 + $0x68] sm:$0xff]   ;;  %v503_v29 = vlaneseq  ;;  %v2423_v37 = vmov 1966171168   ;;  %p2002_p6 = scmp.ne.s32.totalorder %s2463_s19, 7 }
  0x15   : > { %v2257_v2 = vld [vmem:[%s2477_s28 + $0xf8] sm:$0xff]   ;;  %2009 = vmatprep.subr.bf16.mxu0 %v2256_v1  ;;  %v2261_v6 = vld [vmem:[%s2477_s28 + $0xf0] sm:$0xff]   ;;  %v2265_v10 = vld [vmem:[%s2477_s28 + $0xe8] sm:$0xff]   ;;  %v501_v38 = vunpack.c.l.s4 %v2423_v37 }
  0x16   : > { %v2258_v3 = vld [vmem:[%s2477_s28 + $0x38] sm:$0xff]   ;;  %2031 = vmatprep.subr.bf16.mxu1 %v2257_v2  ;;  %v2262_v7 = vld [vmem:[%s2477_s28 + $0x30] sm:$0xff]   ;;  %v2266_v11 = vld [vmem:[%s2477_s28 + $0x28] sm:$0xff]   ;;  %v504_v34 = vshrl.u32 %v503_v29, 7 }
  0x17   : > { %v2259_v4 = vld [vmem:[%s2477_s28 + $0xb8] sm:$0xff]   ;;  %2010 = vmatpush3.bf16.msra.mxu0 %v2258_v3  ;;  %v2263_v8 = vld [vmem:[%s2477_s28 + $0xb0] sm:$0xff]   ;;  %v2267_v12 = vld [vmem:[%s2477_s28 + $0xa8] sm:$0xff]   ;;  %v502_v41 = vunpack.c.0.s8 %v501_v38 }
  0x18   : > { %2032 = vmatpush3.bf16.msra.mxu1 %v2259_v4  ;;  %2011 = vmatprep.subr.bf16.mxu0 %v2260_v5  ;;  %v2268_v13 = vld [vmem:[%s2477_s28 + $0x60] sm:$0xff]   ;;  %v2272_v17 = vld [vmem:[%s2477_s28 + $0x58] sm:$0xff]   ;;  %v2276_v21 = vld [vmem:[%s2477_s28 + $0x50] sm:$0xff]  }
  0x19   : > { %2033 = vmatprep.subr.bf16.mxu1 %v2261_v6  ;;  %v2269_v14 = vld [vmem:[%s2477_s28 + $0xe0] sm:$0xff]   ;;  %v2273_v18 = vld [vmem:[%s2477_s28 + $0xd8] sm:$0xff]   ;;  %v2277_v22 = vld [vmem:[%s2477_s28 + $0xd0] sm:$0xff]   ;;  %v2515_v42 = vsub.s32 %v502_v41, %v504_v34 }
  0x1a   : > { %v2270_v15 = vld [vmem:[%s2477_s28 + $0x20] sm:$0xff]   ;;  %v2274_v19 = vld [vmem:[%s2477_s28 + $0x18] sm:$0xff]   ;;  %v2278_v23 = vld [vmem:[%s2477_s28 + $0x10] sm:$0xff]  }
  0x1b   : > { %2012 = vmatpush3.bf16.msra.mxu0 %v2262_v7  ;;  %v2271_v16 = vld [vmem:[%s2477_s28 + $0xa0] sm:$0xff]   ;;  %v2275_v20 = vld [vmem:[%s2477_s28 + $0x98] sm:$0xff]   ;;  %v2279_v24 = vld [vmem:[%s2477_s28 + $0x90] sm:$0xff]  }
  0x1c   : > { %2034 = vmatpush3.bf16.msra.mxu1 %v2263_v8  ;;  %2013 = vmatprep.subr.bf16.mxu0 %v2264_v9  ;;  %v2280_v25 = vld [vmem:[%s2477_s28 + $0x48] sm:$0xff]   ;;  %v2284_v30 = vld [vmem:[%s2477_s28 + $0x40] sm:$0xff]   ;;  %v2289_v36 = vld [vmem:[%s2477_s28 + $0x178] sm:$0xff]  }
  0x1d   : > { %2035 = vmatprep.subr.bf16.mxu1 %v2265_v10  ;;  %v2281_v26 = vld [vmem:[%s2477_s28 + $0xc8] sm:$0xff]   ;;  %v2285_v31 = vld [vmem:[%s2477_s28 + $0xc0] sm:$0xff]   ;;  %v2290_v39 = vld [vmem:[%s2477_s28 + $0x1f8] sm:$0xff]  }
  0x1e   : > { %v2282_v27 = vld [vmem:[%s2477_s28 + $0x8] sm:$0xff]   ;;  %v2286_v32 = vld [vmem:[%s2477_s28] sm:$0xff]   ;;  %v2291_v49 = vld [vmem:[%s2477_s28 + $0x138] sm:$0xff]  }
  0x1f   : > { %2014 = vmatpush3.bf16.msra.mxu0 %v2266_v11  ;;  %v2283_v28 = vld [vmem:[%s2477_s28 + $0x88] sm:$0xff]   ;;  %v2287_v33 = vld [vmem:[%s2477_s28 + $0x80] sm:$0xff]   ;;  %v2293_v52 = vld [vmem:[%s2477_s28 + $0x170] sm:$0xff]  }
  0x20   : > { %2036 = vmatpush3.bf16.msra.mxu1 %v2267_v12  ;;  %2015 = vmatprep.subr.bf16.mxu0 %v2268_v13  ;;  %v239_v35 = vld [vmem:[%s2472_s24] sm:$0xff]  ;;  %v2292_v54 = vld [vmem:[%s2477_s28 + $0x1b8] sm:$0xff]   ;;  %v2294_v55 = vld [vmem:[%s2477_s28 + $0x1f0] sm:$0xff]  }
  0x21   : > { %2037 = vmatprep.subr.bf16.mxu1 %v2269_v14  ;;  %v499_v40 = vcombine.high %v239_v35, %v239_v35  ;;  %v506_v43 = vrot.slane %v239_v35, %v2515_v42  ;;  %v2295_v57 = vld [vmem:[%s2477_s28 + $0x130] sm:$0xff]   ;;  %v2297_v58 = vld [vmem:[%s2477_s28 + $0x168] sm:$0xff]   ;;  %v2301_v62 = vld [vmem:[%s2477_s28 + $0x160] sm:$0xff]  }
  0x22   : > { %v2296_v59 = vld [vmem:[%s2477_s28 + $0x1b0] sm:$0xff]   ;;  %v2298_v60 = vld [vmem:[%s2477_s28 + $0x1e8] sm:$0xff]   ;;  %v2302_v0 = vld [vmem:[%s2477_s28 + $0x1e0] sm:$0xff]  }
  0x23   : > { %2016 = vmatpush3.bf16.msra.mxu0 %v2270_v15  ;;  %v2519_v44 = vrot.slane %v499_v40, %v2515_v42  ;;  %v514_v45 = vcombine.high %v506_v43, %v506_v43  ;;  %v522_v46 = vrot.slane %v506_v43, %v2515_v42  ;;  %v2299_v61 = vld [vmem:[%s2477_s28 + $0x128] sm:$0xff]   ;;  %v2303_v1 = vld [vmem:[%s2477_s28 + $0x120] sm:$0xff]   ;;  %v2305_v2 = vld [vmem:[%s2477_s28 + $0x158] sm:$0xff]  }
  0x24   : > { %2038 = vmatpush3.bf16.msra.mxu1 %v2271_v16  ;;  %2017 = vmatprep.subr.bf16.mxu0 %v2272_v17  ;;  %v2300_v63 = vld [vmem:[%s2477_s28 + $0x1a8] sm:$0xff]   ;;  %v2304_v3 = vld [vmem:[%s2477_s28 + $0x1a0] sm:$0xff]   ;;  %v2306_v4 = vld [vmem:[%s2477_s28 + $0x1d8] sm:$0xff]  }
  0x25   : > { %2039 = vmatprep.subr.bf16.mxu1 %v2273_v18  ;;  %v515_v47 = vcombine.high %v2519_v44, %v2519_v44  ;;  %v536_v48 = vrot.slane %v514_v45, %v2515_v42  ;;  %v544_v51 = vcombine.high %v522_v46, %v522_v46  ;;  %v2307_v5 = vld [vmem:[%s2477_s28 + $0x118] sm:$0xff]   ;;  %v2309_v6 = vld [vmem:[%s2477_s28 + $0x150] sm:$0xff]   ;;  %v2313_v10 = vld [vmem:[%s2477_s28 + $0x148] sm:$0xff]   ;;  %v529_v18 = vrot.slane %v2519_v44, %v2515_v42 }
  0x26   : > { %v2308_v7 = vld [vmem:[%s2477_s28 + $0x198] sm:$0xff]   ;;  %v2310_v8 = vld [vmem:[%s2477_s28 + $0x1d0] sm:$0xff]   ;;  %v2314_v12 = vld [vmem:[%s2477_s28 + $0x1c8] sm:$0xff]  }
  0x27   : > { %2018 = vmatpush3.bf16.msra.mxu0 %v2274_v19  ;;  %v543_v50 = vrot.slane %v515_v47, %v2515_v42  ;;  %1413 = vmatprep.mubr.bf16.mxu0 %v536_v48  ;;  %v546_v53 = vcombine.high %v536_v48, %v536_v48  ;;  %v2311_v9 = vld [vmem:[%s2477_s28 + $0x110] sm:$0xff]   ;;  %v2315_v13 = vld [vmem:[%s2477_s28 + $0x108] sm:$0xff]   ;;  %v2317_v14 = vld [vmem:[%s2477_s28 + $0x140] sm:$0xff]  }
  0x28   : > { %2040 = vmatpush3.bf16.msra.mxu1 %v2275_v20  ;;  %2019 = vmatprep.subr.bf16.mxu0 %v2276_v21  ;;  %v2312_v11 = vld [vmem:[%s2477_s28 + $0x190] sm:$0xff]   ;;  %v2316_v15 = vld [vmem:[%s2477_s28 + $0x188] sm:$0xff]   ;;  %v2318_v16 = vld [vmem:[%s2477_s28 + $0x1c0] sm:$0xff]  }
  0x29   : > { %2041 = vmatprep.subr.bf16.mxu1 %v2277_v22  ;;  %v547_v56 = vcombine.high %v543_v50, %v543_v50  ;;  %1453 = vmatprep.mubr.bf16.mxu1 %v546_v53  ;;  %v2319_v17 = vld [vmem:[%s2477_s28 + $0x100] sm:$0xff]   ;;  %v2321_v19 = vld [vmem:[%s2477_s28 + $0x278] sm:$0xff]   ;;  %v2328_v29 = vld [vmem:[%s2477_s28 + $0x2b0] sm:$0xff]  }
  0x2a   : > { %v2320_v20 = vld [vmem:[%s2477_s28 + $0x180] sm:$0xff]   ;;  %v2322_v21 = vld [vmem:[%s2477_s28 + $0x2f8] sm:$0xff]   ;;  %v2341_v40 = vld [vmem:[%s2477_s28 + $0x250] sm:$0xff]  }
  0x2b   : > { %2020 = vmatpush3.bf16.msra.mxu0 %v2278_v23  ;;  %v2323_v22 = vld [vmem:[%s2477_s28 + $0x238] sm:$0xff]   ;;  %v545_v23 = vcombine.high %v529_v18, %v529_v18  ;;  %v2334_v34 = vld [vmem:[%s2477_s28 + $0x2e0] sm:$0xff]   ;;  %v2342_v43 = vld [vmem:[%s2477_s28 + $0x2d0] sm:$0xff]  }
  0x2c   : > { %2042 = vmatpush3.bf16.msra.mxu1 %v2279_v24  ;;  %2021 = vmatprep.subr.bf16.mxu0 %v2280_v25  ;;  %v2325_v24 = vld [vmem:[%s2477_s28 + $0x270] sm:$0xff]   ;;  %v2324_v25 = vld [vmem:[%s2477_s28 + $0x2b8] sm:$0xff]   ;;  %v2335_v35 = vld [vmem:[%s2477_s28 + $0x220] sm:$0xff]  }
  0x2d   : > { %2043 = vmatprep.subr.bf16.mxu1 %v2281_v26  ;;  %v2326_v26 = vld [vmem:[%s2477_s28 + $0x2f0] sm:$0xff]   ;;  %v2336_v37 = vld [vmem:[%s2477_s28 + $0x2a0] sm:$0xff]   ;;  %v2338_v38 = vld [vmem:[%s2477_s28 + $0x2d8] sm:$0xff]  }
  0x2e   : > { %v2340_v41 = vld [vmem:[%s2477_s28 + $0x298] sm:$0xff]   ;;  %v2343_v44 = vld [vmem:[%s2477_s28 + $0x210] sm:$0xff]   ;;  %v2345_v45 = vld [vmem:[%s2477_s28 + $0x248] sm:$0xff]  }
  0x2f   : > { %2022 = vmatpush3.bf16.msra.mxu0 %v2282_v27  ;;  %v2327_v27 = vld [vmem:[%s2477_s28 + $0x230] sm:$0xff]  }
  0x30   : > { %2044 = vmatpush3.bf16.msra.mxu1 %v2283_v28  ;;  %2023 = vmatprep.subr.bf16.mxu0 %v2284_v30  ;;  %v2329_v28 = vld [vmem:[%s2477_s28 + $0x268] sm:$0xff]   ;;  %v2344_v47 = vld [vmem:[%s2477_s28 + $0x290] sm:$0xff]  }
  0x31   : > { %2045 = vmatprep.subr.bf16.mxu1 %v2285_v31  ;;  %v2330_v30 = vld [vmem:[%s2477_s28 + $0x2e8] sm:$0xff]  }
  0x32   : > { %v2331_v31 = vld [vmem:[%s2477_s28 + $0x228] sm:$0xff]  }
  0x33   : > { %2024 = vmatpush3.bf16.msra.mxu0 %v2286_v32  ;;  %v2333_v32 = vld [vmem:[%s2477_s28 + $0x260] sm:$0xff]  }
  0x34   : > { %2046 = vmatpush3.bf16.msra.mxu1 %v2287_v33  ;;  %2053 = vmatprep.subr.bf16.mxu0 %v2289_v36  ;;  %v2332_v33 = vld [vmem:[%s2477_s28 + $0x2a8] sm:$0xff]   ;;  %v2337_v36 = vld [vmem:[%s2477_s28 + $0x258] sm:$0xff]  }
  0x35   : > { %2075 = vmatprep.subr.bf16.mxu1 %v2290_v39  ;;  %v2339_v39 = vld [vmem:[%s2477_s28 + $0x218] sm:$0xff]  }
  0x36   : > { %1414 = vmatmul.mubr.bf16.vlgmr.msra.gmra.mxu0 %v522_v46  ;;  %v240_v46 = vld [vmem:[%s2472_s24 + $0x8] sm:$0xff] }
  0x37   : > { %2054 = vmatpush3.bf16.msra.mxu0 %v2291_v49  ;;  %1454 = vmatmul.mubr.bf16.vlgmr.msra.gmra.mxu1 %v544_v51  ;;  %v555_v48 = vrot.slane %v240_v46, %v2515_v42  ;;  %v548_v49 = vcombine.high %v240_v46, %v240_v46  ;;  %v2347_v51 = vld [vmem:[%s2477_s28 + $0x208] sm:$0xff]  }
  0x38   : > { %2055 = vmatprep.subr.bf16.mxu0 %v2293_v52  ;;  %2076 = vmatpush3.bf16.msra.mxu1 %v2292_v54  ;;  %v2349_v54 = vld [vmem:[%s2477_s28 + $0x240] sm:$0xff]  }
  0x39   : > { %1493 = vmatprep.mubr.bf16.mxu0 %v543_v50  ;;  %2077 = vmatprep.subr.bf16.mxu1 %v2294_v55  ;;  %v2346_v50 = vld [vmem:[%s2477_s28 + $0x2c8] sm:$0xff]   ;;  %v563_v52 = vcombine.high %v555_v48, %v555_v48  ;;  %v2588_v53 = vrot.slane %v548_v49, %v2515_v42 }
  0x3a   : > { %1533 = vmatprep.mubr.bf16.mxu1 %v547_v56  ;;  %v2348_v55 = vld [vmem:[%s2477_s28 + $0x288] sm:$0xff]  }
  0x3b   : > { %2056 = vmatpush3.bf16.msra.mxu0 %v2295_v57  ;;  %v585_v56 = vrot.slane %v563_v52, %v2515_v42  ;;  %v564_v57 = vcombine.high %v2588_v53, %v2588_v53 }
  0x3c   : > { %2057 = vmatprep.subr.bf16.mxu0 %v2297_v58  ;;  %2078 = vmatpush3.bf16.msra.mxu1 %v2296_v59  ;;  %v2350_v58 = vld [vmem:[%s2477_s28 + $0x2c0] sm:$0xff]  }
  0x3d   : > { %2079 = vmatprep.subr.bf16.mxu1 %v2298_v60  ;;  %v2351_v59 = vld [vmem:[%s2477_s28 + $0x200] sm:$0xff]   ;;  %v595_v60 = vcombine.high %v585_v56, %v585_v56 }
  0x3f   : > { %2058 = vmatpush3.bf16.msra.mxu0 %v2299_v61  ;;  %v571_v61 = vrot.slane %v555_v48, %v2515_v42 }
  0x40   : > { %2059 = vmatprep.subr.bf16.mxu0 %v2301_v62  ;;  %2080 = vmatpush3.bf16.msra.mxu1 %v2300_v63  ;;  %v2353_v62 = vld [vmem:[%s2477_s28 + $0x378] sm:$0xff]   ;;  %v2352_v63 = vld [vmem:[%s2477_s28 + $0x280] sm:$0xff]  }
  0x41   : > { %2081 = vmatprep.subr.bf16.mxu1 %v2302_v0  ;;  %v592_v0 = vrot.slane %v564_v57, %v2515_v42 }
  0x43   : > { %2060 = vmatpush3.bf16.msra.mxu0 %v2303_v1  ;;  %v2354_v1 = vld [vmem:[%s2477_s28 + $0x3f8] sm:$0xff]  }
  0x44   : > { %2061 = vmatprep.subr.bf16.mxu0 %v2305_v2  ;;  %2082 = vmatpush3.bf16.msra.mxu1 %v2304_v3  ;;  %v2355_v2 = vld [vmem:[%s2477_s28 + $0x338] sm:$0xff]   ;;  %v593_v3 = vcombine.high %v571_v61, %v571_v61 }
  0x45   : > { %2083 = vmatprep.subr.bf16.mxu1 %v2306_v4  ;;  %v2357_v4 = vld [vmem:[%s2477_s28 + $0x370] sm:$0xff]  }
  0x47   : > { %2062 = vmatpush3.bf16.msra.mxu0 %v2307_v5  ;;  %v2356_v5 = vld [vmem:[%s2477_s28 + $0x3b8] sm:$0xff]  }
  0x48   : > { %2063 = vmatprep.subr.bf16.mxu0 %v2309_v6  ;;  %2084 = vmatpush3.bf16.msra.mxu1 %v2308_v7  ;;  %v596_v6 = vcombine.high %v592_v0, %v592_v0  ;;  %v2358_v7 = vld [vmem:[%s2477_s28 + $0x3f0] sm:$0xff]  }
  0x49   : > { %2085 = vmatprep.subr.bf16.mxu1 %v2310_v8  ;;  %v2359_v8 = vld [vmem:[%s2477_s28 + $0x330] sm:$0xff]  }
  0x4b   : > { %2064 = vmatpush3.bf16.msra.mxu0 %v2311_v9  ;;  %v2361_v9 = vld [vmem:[%s2477_s28 + $0x368] sm:$0xff]  }
  0x4c   : > { %2065 = vmatprep.subr.bf16.mxu0 %v2313_v10  ;;  %2086 = vmatpush3.bf16.msra.mxu1 %v2312_v11  ;;  %v2360_v10 = vld [vmem:[%s2477_s28 + $0x3b0] sm:$0xff]   ;;  %v2362_v11 = vld [vmem:[%s2477_s28 + $0x3e8] sm:$0xff]  }
  0x4d   : > { %2087 = vmatprep.subr.bf16.mxu1 %v2314_v12  ;;  %v2363_v12 = vld [vmem:[%s2477_s28 + $0x328] sm:$0xff]  }
  0x4f   : > { %2066 = vmatpush3.bf16.msra.mxu0 %v2315_v13  ;;  %v2365_v13 = vld [vmem:[%s2477_s28 + $0x360] sm:$0xff]  }
  0x50   : > { %2067 = vmatprep.subr.bf16.mxu0 %v2317_v14  ;;  %2088 = vmatpush3.bf16.msra.mxu1 %v2316_v15  ;;  %v2364_v14 = vld [vmem:[%s2477_s28 + $0x3a8] sm:$0xff]   ;;  %v2366_v15 = vld [vmem:[%s2477_s28 + $0x3e0] sm:$0xff]  }
  0x51   : > { %2089 = vmatprep.subr.bf16.mxu1 %v2318_v16  ;;  %v2367_v16 = vld [vmem:[%s2477_s28 + $0x320] sm:$0xff]  }
  0x53   : > { %2068 = vmatpush3.bf16.msra.mxu0 %v2319_v17  ;;  %v2369_v17 = vld [vmem:[%s2477_s28 + $0x358] sm:$0xff]  }
  0x54   : > { %2097 = vmatprep.subr.bf16.mxu0 %v2321_v19  ;;  %2090 = vmatpush3.bf16.msra.mxu1 %v2320_v20  ;;  %v2370_v19 = vld [vmem:[%s2477_s28 + $0x3d8] sm:$0xff]  }
  0x55   : > { %2119 = vmatprep.subr.bf16.mxu1 %v2322_v21  ;;  %v2371_v20 = vld [vmem:[%s2477_s28 + $0x318] sm:$0xff]   ;;  %v2373_v21 = vld [vmem:[%s2477_s28 + $0x350] sm:$0xff]  }
  0x56   : > { %1494 = vmatmul.mubr.bf16.vlgmr.msra.gmra.mxu0 %v529_v18  ;;  %v2368_v18 = vld [vmem:[%s2477_s28 + $0x3a0] sm:$0xff]  }
  0x57   : > { %2098 = vmatpush3.bf16.msra.mxu0 %v2323_v22  ;;  %1534 = vmatmul.mubr.bf16.vlgmr.msra.gmra.mxu1 %v545_v23  ;;  %v2372_v22 = vld [vmem:[%s2477_s28 + $0x398] sm:$0xff]   ;;  %v2374_v23 = vld [vmem:[%s2477_s28 + $0x3d0] sm:$0xff]  }
  0x58   : > { %2099 = vmatprep.subr.bf16.mxu0 %v2325_v24  ;;  %2120 = vmatpush3.bf16.msra.mxu1 %v2324_v25  ;;  %v2375_v24 = vld [vmem:[%s2477_s28 + $0x310] sm:$0xff]   ;;  %v2377_v25 = vld [vmem:[%s2477_s28 + $0x348] sm:$0xff]  }
  0x59   : > { %2121 = vmatprep.subr.bf16.mxu1 %v2326_v26  ;;  %1573 = vmatprep.mubr.bf16.mxu0 %v585_v56  ;;  %v2376_v26 = vld [vmem:[%s2477_s28 + $0x390] sm:$0xff]  }
  0x5a   : > { %1613 = vmatprep.mubr.bf16.mxu1 %v595_v60 }
  0x5b   : > { %2100 = vmatpush3.bf16.msra.mxu0 %v2327_v27  ;;  %v2378_v27 = vld [vmem:[%s2477_s28 + $0x3c8] sm:$0xff]  }
  0x5c   : > { %2101 = vmatprep.subr.bf16.mxu0 %v2329_v28  ;;  %2122 = vmatpush3.bf16.msra.mxu1 %v2328_v29  ;;  %v2379_v28 = vld [vmem:[%s2477_s28 + $0x308] sm:$0xff]   ;;  %v2381_v29 = vld [vmem:[%s2477_s28 + $0x340] sm:$0xff]  }
  0x5d   : > { %2123 = vmatprep.subr.bf16.mxu1 %v2330_v30  ;;  %v2380_v30 = vld [vmem:[%s2477_s28 + $0x388] sm:$0xff]  }
  0x5f   : > { %2102 = vmatpush3.bf16.msra.mxu0 %v2331_v31  ;;  %v2382_v31 = vld [vmem:[%s2477_s28 + $0x3c0] sm:$0xff]  }
  0x60   : > { %2103 = vmatprep.subr.bf16.mxu0 %v2333_v32  ;;  %2124 = vmatpush3.bf16.msra.mxu1 %v2332_v33  ;;  %v2383_v32 = vld [vmem:[%s2477_s28 + $0x300] sm:$0xff]   ;;  %v578_v33 = vrot.slane %v2588_v53, %v2515_v42 }
  0x61   : > { %2125 = vmatprep.subr.bf16.mxu1 %v2334_v34  ;;  %v2384_v34 = vld [vmem:[%s2477_s28 + $0x380] sm:$0xff]  }
  0x63   : > { %2104 = vmatpush3.bf16.msra.mxu0 %v2335_v35  ;;  %v594_v35 = vcombine.high %v578_v33, %v578_v33 }
  0x64   : > { %2105 = vmatprep.subr.bf16.mxu0 %v2337_v36  ;;  %2126 = vmatpush3.bf16.msra.mxu1 %v2336_v37 }
  0x65   : > { %2127 = vmatprep.subr.bf16.mxu1 %v2338_v38 }
  0x67   : > { %2106 = vmatpush3.bf16.msra.mxu0 %v2339_v39 }
  0x68   : > { %2107 = vmatprep.subr.bf16.mxu0 %v2341_v40  ;;  %2128 = vmatpush3.bf16.msra.mxu1 %v2340_v41 }
  0x69   : > { %2129 = vmatprep.subr.bf16.mxu1 %v2342_v43 }
  0x6b   : > { %2108 = vmatpush3.bf16.msra.mxu0 %v2343_v44 }
  0x6c   : > { %2109 = vmatprep.subr.bf16.mxu0 %v2345_v45  ;;  %2130 = vmatpush3.bf16.msra.mxu1 %v2344_v47 }
  0x6d   : > { %2131 = vmatprep.subr.bf16.mxu1 %v2346_v50 }
  0x6f   : > { %2110 = vmatpush3.bf16.msra.mxu0 %v2347_v51 }
  0x70   : > { %2111 = vmatprep.subr.bf16.mxu0 %v2349_v54  ;;  %2132 = vmatpush3.bf16.msra.mxu1 %v2348_v55 }
  0x71   : > { %2133 = vmatprep.subr.bf16.mxu1 %v2350_v58 }
  0x73   : > { %2112 = vmatpush3.bf16.msra.mxu0 %v2351_v59 }
  0x74   : > { %2141 = vmatprep.subr.bf16.mxu0 %v2353_v62  ;;  %2134 = vmatpush3.bf16.msra.mxu1 %v2352_v63 }
  0x75   : > { %2163 = vmatprep.subr.bf16.mxu1 %v2354_v1 }
  0x76   : > { %1574 = vmatmul.mubr.bf16.vlgmr.msra.gmra.mxu0 %v571_v61 }
  0x77   : > { %2142 = vmatpush3.bf16.msra.mxu0 %v2355_v2  ;;  %1653 = vmatprep.mubr.bf16.mxu0 %v592_v0 }
  0x78   : > { %1614 = vmatmul.mubr.bf16.vlgmr.msra.gmra.mxu1 %v593_v3  ;;  %2143 = vmatprep.subr.bf16.mxu0 %v2357_v4 }
  0x79   : > { %2164 = vmatpush3.bf16.msra.mxu1 %v2356_v5  ;;  %1693 = vmatprep.mubr.bf16.mxu1 %v596_v6 }
  0x7a   : > { %2165 = vmatprep.subr.bf16.mxu1 %v2358_v7 }
  0x7b   : > { %2144 = vmatpush3.bf16.msra.mxu0 %v2359_v8 }
  0x7c   : > { %2145 = vmatprep.subr.bf16.mxu0 %v2361_v9 }
  0x7d   : > { %2166 = vmatpush3.bf16.msra.mxu1 %v2360_v10 }
  0x7e   : > { %2167 = vmatprep.subr.bf16.mxu1 %v2362_v11 }
  0x7f   : > { %2146 = vmatpush3.bf16.msra.mxu0 %v2363_v12 }
  0x80   : > { %2147 = vmatprep.subr.bf16.mxu0 %v2365_v13 }
  0x81   : > { %2168 = vmatpush3.bf16.msra.mxu1 %v2364_v14 }
  0x82   : > { %2169 = vmatprep.subr.bf16.mxu1 %v2366_v15  ;;  %v238_v15 = vld [vmem:[#allocation2] sm:$0x3] }
  0x83   : > { %2148 = vmatpush3.bf16.msra.mxu0 %v2367_v16 }
  0x84   : > { %2149 = vmatprep.subr.bf16.mxu0 %v2369_v17 }
  0x85   : > { %2170 = vmatpush3.bf16.msra.mxu1 %v2368_v18 }
  0x86   : > { %2171 = vmatprep.subr.bf16.mxu1 %v2370_v19 }
  0x87   : > { %2150 = vmatpush3.bf16.msra.mxu0 %v2371_v20 }
  0x88   : > { %2151 = vmatprep.subr.bf16.mxu0 %v2373_v21 }
  0x89   : > { %2172 = vmatpush3.bf16.msra.mxu1 %v2372_v22 }
  0x8a   : > { %2173 = vmatprep.subr.bf16.mxu1 %v2374_v23 }
  0x8b   : > { %2152 = vmatpush3.bf16.msra.mxu0 %v2375_v24 }
  0x8c   : > { %2153 = vmatprep.subr.bf16.mxu0 %v2377_v25 }
  0x8d   : > { %2174 = vmatpush3.bf16.msra.mxu1 %v2376_v26 }
  0x8e   : > { %2175 = vmatprep.subr.bf16.mxu1 %v2378_v27 }
  0x8f   : > { %2154 = vmatpush3.bf16.msra.mxu0 %v2379_v28 }
  0x90   : > { %2155 = vmatprep.subr.bf16.mxu0 %v2381_v29 }
  0x91   : > { %2176 = vmatpush3.bf16.msra.mxu1 %v2380_v30 }
  0x92   : > { %2177 = vmatprep.subr.bf16.mxu1 %v2382_v31 }
  0x93   : > { %2156 = vmatpush3.bf16.msra.mxu0 %v2383_v32 }
  0x95   : > { %2178 = vmatpush3.bf16.msra.mxu1 %v2384_v34 }
  0x96   : > { %1654 = vmatmul.mubr.bf16.vlgmr.msra.gmra.mxu0 %v578_v33 }
  0x98   : > { %1694 = vmatmul.mubr.bf16.vlgmr.msra.gmra.mxu1 %v594_v35 }
  0xf6   : > { %v2025_v36 = vpop.f32.mrf.mxu0 }
  0xf7   : > { %v2047_v37 = vpop.f32.mrf.mxu1 }
  0xf8   : > { %v2026_v38 = vpop.f32.mrf.mxu0 }
  0xf9   : > { %v2027_v39 = vadd.f32 %v2026_v38, %v2025_v36  ;;  %v2048_v40 = vpop.f32.mrf.mxu1 }
  0xfa   : > { %v2028_v41 = vpop.f32.mrf.mxu0  ;;  %v2049_v43 = vadd.f32 %v2048_v40, %v2047_v37 }
  0xfb   : > { %v2050_v44 = vpop.f32.mrf.mxu1 }
  0xfc   : > { %v2029_v45 = vpop.f32.mrf.mxu0  ;;  %v1456_v46 = vadd.f32 %v2049_v43, %v2027_v39 }
  0xfd   : > { %v2051_v47 = vpop.f32.mrf.mxu1 }
 0x116   : > { %v2069_v42 = vpop.f32.mrf.mxu0 }
 0x117   : > { %v2091_v48 = vpop.f32.mrf.mxu1 }
 0x118   : > { %v2070_v49 = vpop.f32.mrf.mxu0 }
 0x119   : > { %v2092_v50 = vpop.f32.mrf.mxu1  ;;  %v2071_v63 = vadd.f32 %v2070_v49, %v2069_v42 }
 0x11a   : > { %v2072_v51 = vpop.f32.mrf.mxu0  ;;  %v2093_v1 = vadd.f32 %v2092_v50, %v2091_v48 }
 0x11b   : > { %v2094_v52 = vpop.f32.mrf.mxu1  ;;  %v1496_v0 = vadd.f32 %v2071_v63, %v1456_v46 }
 0x11c   : > { %v2073_v53 = vpop.f32.mrf.mxu0 }
 0x11d   : > { %v2095_v54 = vpop.f32.mrf.mxu1  ;;  %v1536_v3 = vadd.f32 %v2093_v1, %v1496_v0 }
 0x136   : > { %v2113_v55 = vpop.f32.mrf.mxu0 }
 0x138   : > { %v2135_v56 = vpop.f32.mrf.mxu1  ;;  %v2114_v57 = vpop.f32.mrf.mxu0 }
 0x139   : > { %v2115_v2 = vadd.f32 %v2114_v57, %v2113_v55 }
 0x13a   : > { %v2136_v58 = vpop.f32.mrf.mxu1  ;;  %v2116_v59 = vpop.f32.mrf.mxu0 }
 0x13b   : > { %v1576_v4 = vadd.f32 %v2115_v2, %v1536_v3  ;;  %v2137_v5 = vadd.f32 %v2136_v58, %v2135_v56 }
 0x13c   : > { %v2138_v60 = vpop.f32.mrf.mxu1  ;;  %v2117_v61 = vpop.f32.mrf.mxu0 }
 0x13d   : > { %v1616_v9 = vadd.f32 %v2137_v5, %v1576_v4 }
 0x13e   : > { %v2139_v62 = vpop.f32.mrf.mxu1 }
 0x156   : > { %v2157_v6 = vpop.f32.mrf.mxu0 }
 0x158   : > { %v2179_v7 = vpop.f32.mrf.mxu1  ;;  %v2158_v8 = vpop.f32.mrf.mxu0 }
 0x159   : > { %v2159_v10 = vadd.f32 %v2158_v8, %v2157_v6 }
 0x15a   : > { %v2180_v11 = vpop.f32.mrf.mxu1  ;;  %v2160_v12 = vpop.f32.mrf.mxu0 }
 0x15b   : > { %v1656_v13 = vadd.f32 %v2159_v10, %v1616_v9  ;;  %v2181_v14 = vadd.f32 %v2180_v11, %v2179_v7 }
 0x15c   : > { %v2182_v16 = vpop.f32.mrf.mxu1  ;;  %v2161_v17 = vpop.f32.mrf.mxu0 }
 0x15d   : > { %v1696_v18 = vadd.f32 %v2181_v14, %v1656_v13  ;;  %1706 = sbr.rel (%p2002_p6) target bundleno = 583 (0x247), region = 48 }
 0x15e   : > { %v2183_v19 = vpop.f32.mrf.mxu1 }
 0x15f   : > { %v1701_v20 = vadd.f32 %v1696_v18, %v238_v15 }
 0x161   : > { %1702 = vst [vmem:[#allocation2] sm:$0x3] %v1701_v20 }
 0x162   : > { %v1732_v21 = vld [vmem:[%s2707_s3 + $0x78] sm:$0xff]  ;;  %v2424_v22 = vmov 0.0   ;;  %v1731_v23 = vld [vmem:[%s2707_s3 + $0x70] sm:$0xff]  ;;  %vm2425_vm0 = vmmov 0   ;;  %v1730_v24 = vld [vmem:[%s2707_s3 + $0x68] sm:$0xff] }
 0x163   : > { %2202 = vmatprep.subr.mxu0 %v2424_v22  ;;  %2234 = vmatprep.mubr.msk.f32.mxu0 %vm2425_vm0, %v2424_v22  ;;  %v1729_v25 = vld [vmem:[%s2707_s3 + $0x60] sm:$0xff]  ;;  %v1728_v26 = vld [vmem:[%s2707_s3 + $0x58] sm:$0xff]  ;;  %v1727_v27 = vld [vmem:[%s2707_s3 + $0x50] sm:$0xff] }
 0x164   : > { %2203 = vmatpush3.msra.mxu0 %v1732_v21  ;;  %v1726_v28 = vld [vmem:[%s2707_s3 + $0x48] sm:$0xff]  ;;  %v1725_v29 = vld [vmem:[%s2707_s3 + $0x40] sm:$0xff]  ;;  %v1724_v30 = vld [vmem:[%s2707_s3 + $0x38] sm:$0xff] }
 0x165   : > { %2204 = vmatprep.subr.mxu0 %v2424_v22  ;;  %v1723_v31 = vld [vmem:[%s2707_s3 + $0x30] sm:$0xff]  ;;  %v1722_v32 = vld [vmem:[%s2707_s3 + $0x28] sm:$0xff]  ;;  %v1721_v33 = vld [vmem:[%s2707_s3 + $0x20] sm:$0xff] }
 0x166   : > { %2205 = vmatpush3.msra.mxu0 %v1731_v23  ;;  %v2003_v35 = vld [vmem:[%s2706_s2] ss:$0 sm:$0xff]  ;;  %v1720_v36 = vld [vmem:[%s2707_s3 + $0x18] sm:$0xff]  ;;  %v1719_v37 = vld [vmem:[%s2707_s3 + $0x10] sm:$0xff] }
 0x167   : > { %2206 = vmatprep.subr.mxu0 %v2424_v22  ;;  %v1718_v39 = vld [vmem:[%s2707_s3 + $0x8] sm:$0xff]  ;;  %v1717_v40 = vld [vmem:[%s2707_s3] sm:$0xff] }
 0x168   : > { %2207 = vmatpush3.msra.mxu0 %v1730_v24  ;;  %v1707_v34 = vld [vmem:[#allocation2] sm:$0x3] }
 0x169   : > { %2208 = vmatprep.subr.mxu0 %v2424_v22  ;;  %v1715_v38 = vadd.f32 %v2003_v35, %v1707_v34  ;;  %v2004_v43 = vld [vmem:[%s2708_s4] ss:$0 sm:$0xff] }
 0x16a   : > { %2209 = vmatpush3.msra.mxu0 %v1729_v25 }
 0x16b   : > { %2210 = vmatprep.subr.mxu0 %v2424_v22  ;;  %v1716_v41 = vmax.f32 %v1715_v38, 0.0 }
 0x16c   : > { %2211 = vmatpush3.msra.mxu0 %v1728_v26 }
 0x16d   : > { %2212 = vmatprep.subr.mxu0 %v2424_v22 }
 0x16e   : > { %2213 = vmatpush3.msra.mxu0 %v1727_v27 }
 0x16f   : > { %2214 = vmatprep.subr.mxu0 %v2424_v22 }
 0x170   : > { %2215 = vmatpush3.msra.mxu0 %v1726_v28 }
 0x171   : > { %2216 = vmatprep.subr.mxu0 %v2424_v22 }
 0x172   : > { %2217 = vmatpush3.msra.mxu0 %v1725_v29 }
 0x173   : > { %2218 = vmatprep.subr.mxu0 %v2424_v22 }
 0x174   : > { %2219 = vmatpush3.msra.mxu0 %v1724_v30 }
 0x175   : > { %2220 = vmatprep.subr.mxu0 %v2424_v22 }
 0x176   : > { %2221 = vmatpush3.msra.mxu0 %v1723_v31 }
 0x177   : > { %2222 = vmatprep.subr.mxu0 %v2424_v22 }
 0x178   : > { %2223 = vmatpush3.msra.mxu0 %v1722_v32 }
 0x179   : > { %2224 = vmatprep.subr.mxu0 %v2424_v22 }
 0x17a   : > { %2225 = vmatpush3.msra.mxu0 %v1721_v33 }
 0x17b   : > { %2226 = vmatprep.subr.mxu0 %v2424_v22 }
 0x17c   : > { %2227 = vmatpush3.msra.mxu0 %v1720_v36 }
 0x17d   : > { %2228 = vmatprep.subr.mxu0 %v2424_v22 }
 0x17e   : > { %2229 = vmatpush3.msra.mxu0 %v1719_v37 }
 0x17f   : > { %2230 = vmatprep.subr.mxu0 %v2424_v22 }
 0x180   : > { %2231 = vmatpush3.msra.mxu0 %v1718_v39 }
 0x181   : > { %2232 = vmatprep.subr.mxu0 %v2424_v22 }
 0x182   : > { %2233 = vmatpush3.msra.mxu0 %v1717_v40 }
 0x183   : > { %2235 = vmatmul.mubr.f32.vlgmr.msra.gmra.mxu0 %v1716_v41 }
 0x243   : > { %v1806_v44 = vpop.f32.mrf.mxu0 }
 0x244   : > { %v1807_v45 = vadd.f32 %v2004_v43, %v1806_v44 }
 0x245   : > { %v2236_v46 = vpop.f32.mrf.mxu0 }
 0x246   : > { %1810 = vst [vmem:[#allocation3] sm:$0x3] %v1807_v45 }
 0x247 PF: > { %p2241_p7 = scmp.eq.s32.totalorder %s2463_s19, 7  ;;  %s2426_s17 = smov [#allocation3]  }
 0x248   : > { %s1818_s20 = sshll.u32 %s2426_s17, 4  ;;  %s1819_s20 = int_to_ptr.vmem [resolvable:$true] %s1818_s20 }
 0x249   : > { %s2386_s21 = scalar_lea.vmem %s1819_s20, 32  ;;  %p2393_p11 = scmp.lt.s32.totalorder %s1819_s20, %s1819_s20 }
 0x24a   : > { %p2387_p8 = scmp.ne.s32.totalorder %s1819_s20, %s2386_s21  ;;  %p2394_p12 = scmp.lt.s32.totalorder %s2386_s21, %s2386_s21 }
 0x24c   : > { %p2388_p9 = pnand %p2387_p8, %p2241_p7  ;;  %p2395_p13 = por %p2394_p12, %p2393_p11 }
 0x24e   : > { %p2389_p10 = pneg %p2388_p9 }
 0x250   : > { %p2396_p0 = pnand %p2395_p13, %p2389_p10 }
 0x252   : > { %2399 = shalt.err (!%p2396_p0)
}
 0x253   : > { %2238 = dma.vmem_to_hbm [thread:$0]  (%p2241_p7), %s1819_s20, 32, %s2709_s5, [#allocation4]  }
 0x254   : > { %2415 = dma.done.wait (%p2241_p7), [#allocation4], 32  }
 0x255   : > { %2417 = vsyncadd (%p2241_p7), [#allocation4], 4294967264 }
 0x256 PF: > { %s16_s18 = sadd.s32 1, %s2420_s18  }
 0x257   : > { %p13_p1 = scmp.ge.s32.totalorder %s16_s18, 10  }
 0x259   :  { %15 = sbr.rel (!%p13_p1) target bundleno = 1 (0x1), region = 78 }
 0x25e   :  { %1831 = vsyncpa [#allocation4], 1 }
 0x25f   :  { %1833 = vsyncpa [#allocation4 + $0x1], 1 }

</bundles_post_ra>
